<compile_context>
chip_gen: v5e
topology: v5e:2x2
jax: 0.10.0
libtpu: 0.0.40
codegen_flags: <defaults>
</compile_context>

<pallas_src>
import jax
import jax.numpy as jnp
from jax.experimental import pallas as pl
from jax.experimental.pallas import tpu as pltpu


# Layer dimensions of the PyTorch AmazonMLP.
DIMS = [(5000, 1000), (1000, 500), (500, 100), (100, 2)]
OUT_FEATURES = DIMS[-1][1]

# Layer-1 reduction tile: Kp = 5120 -> 4 grid steps; double-buffered W1 tile is
# 2 * 1280*1024*4 B = 10 MiB.
TK1 = 1280


def _round_up(v, m):
    return (v + m - 1) // m * m


def _fused_mlp_kernel(x_ref, w1_ref, b1_ref, w2_ref, b2_ref, w3_ref, b3_ref,
                      w4_ref, b4_ref, o_ref, acc_ref):
    """Fused 4-layer MLP. Grid axis 0 iterates over layer-1 K tiles only."""
    k = pl.program_id(0)

    @pl.when(k == 0)
    def _():
        # Initialize the layer-1 accumulator with its bias (drops epilogue add).
        acc_ref[...] = jnp.broadcast_to(b1_ref[...], acc_ref.shape)

    # Layer 1 partial matmul on this K tile (f32 MXU accumulation).
    acc_ref[...] += jnp.dot(
        x_ref[...], w1_ref[...], preferred_element_type=jnp.float32
    )

    @pl.when(k == pl.num_programs(0) - 1)
    def _():
        # Layers 2-4 run entirely in VMEM on the finished layer-1 activation.
        h = jnp.maximum(acc_ref[...], 0.0)
        h = jnp.maximum(
            jnp.dot(h, w2_ref[...], preferred_element_type=jnp.float32)
            + b2_ref[...], 0.0)
        h = jnp.maximum(
            jnp.dot(h, w3_ref[...], preferred_element_type=jnp.float32)
            + b3_ref[...], 0.0)
        o_ref[...] = (
            jnp.dot(h, w4_ref[...], preferred_element_type=jnp.float32)
            + b4_ref[...]
        ).astype(o_ref.dtype)


def init_params(key):
    """Deterministic init mimicking torch.nn.Linear U[-1/sqrt(fan_in), +1/sqrt(fan_in)]."""
    params = []
    for fan_in, fan_out in DIMS:
        key, kw, kb = jax.random.split(key, 3)
        bound = 1.0 / jnp.sqrt(fan_in)
        w = jax.random.uniform(kw, (fan_in, fan_out), jnp.float32, -bound, bound)
        b = jax.random.uniform(kb, (fan_out,), jnp.float32, -bound, bound)
        params.append((w, b))
    return params


def prepare_params(params):
    """Zero-pad weights/biases to (multiple-of-128) shapes ONCE, at init time."""
    padded = []
    for w, b in params:
        K, N = w.shape
        Kp, Np = _round_up(K, 128), _round_up(N, 128)
        wp = jnp.zeros((Kp, Np), jnp.float32).at[:K, :N].set(w)
        bp = jnp.zeros((1, Np), jnp.float32).at[0, :N].set(b)
        padded.append((wp, bp))
    return tuple(padded)


@jax.jit
def amazon_mlp_forward(x, padded_params):
    """Forward pass: x (B, 5000) -> logits (B, 2). padded_params from prepare_params()."""
    (w1, b1), (w2, b2), (w3, b3), (w4, b4) = padded_params
    B, K = x.shape
    Kp, N1 = w1.shape
    K2, N2 = w2.shape
    K3, N3 = w3.shape
    K4, N4 = w4.shape

    Bp = _round_up(max(B, 8), 8)

    # Input pad is cheap (B x 5000 f32); weights are pre-padded.
    xp = jnp.zeros((Bp, Kp), jnp.float32).at[:B, :K].set(x)

    assert Kp % TK1 == 0, (Kp, TK1)
    grid = (Kp // TK1,)

    flops = 2 * Bp * (Kp * N1 + K2 * N2 + K3 * N3 + K4 * N4)
    bytes_accessed = 4 * (
        Bp * Kp + Kp * N1 + K2 * N2 + K3 * N3 + K4 * N4
        + N1 + N2 + N3 + N4 + Bp * N4)

    out = pl.pallas_call(
        _fused_mlp_kernel,
        out_shape=jax.ShapeDtypeStruct((Bp, N4), jnp.float32),
        grid_spec=pltpu.PrefetchScalarGridSpec(
            num_scalar_prefetch=0,
            grid=grid,
            in_specs=[
                # Pipelined over the layer-1 reduction:
                pl.BlockSpec((Bp, TK1), lambda k: (0, k)),   # x tile
                pl.BlockSpec((TK1, N1), lambda k: (k, 0)),   # W1 tile
                # VMEM-resident (constant block index -> DMA'd once):
                pl.BlockSpec((1, N1), lambda k: (0, 0)),     # b1
                pl.BlockSpec((K2, N2), lambda k: (0, 0)),    # W2
                pl.BlockSpec((1, N2), lambda k: (0, 0)),     # b2
                pl.BlockSpec((K3, N3), lambda k: (0, 0)),    # W3
                pl.BlockSpec((1, N3), lambda k: (0, 0)),     # b3
                pl.BlockSpec((K4, N4), lambda k: (0, 0)),    # W4
                pl.BlockSpec((1, N4), lambda k: (0, 0)),     # b4
            ],
            out_specs=pl.BlockSpec((Bp, N4), lambda k: (0, 0)),
            scratch_shapes=[pltpu.VMEM((Bp, N1), jnp.float32)],  # layer-1 acc
        ),
        compiler_params=pltpu.CompilerParams(
            dimension_semantics=("arbitrary",),      # reduction axis
            vmem_limit_bytes=40 * 1024 * 1024,       # ~15 MiB used; safe on v5e/v6e/v7x
        ),
        cost_estimate=pl.CostEstimate(
            flops=flops, transcendentals=0, bytes_accessed=bytes_accessed),
    )(xp, w1, b1, w2, b2, w3, b3, w4, b4)

    return out[:B, :OUT_FEATURES]


def reference_forward(x, params):
    h = x
    for i, (w, b) in enumerate(params):
        h = h @ w + b
        if i < 3:
            h = jnp.maximum(h, 0.0)
    return h


if __name__ == "__main__":
    key = jax.random.PRNGKey(0)
    kx, kp = jax.random.split(key)

    batch = 2
    x = jax.random.normal(kx, (batch, 5000), jnp.float32)
    params = init_params(kp)
    padded_params = prepare_params(params)   # one-time pad, reused every call

    out = amazon_mlp_forward(x, padded_params)
    out = jax.block_until_ready(out)

    ref = reference_forward(x, params)
    assert out.shape == (batch, 2), out.shape
    assert jnp.allclose(out, ref, atol=1e-3, rtol=1e-3), (out, ref)

    print("KERNEL_OK")
</pallas_src>

<mosaic_0001>
module attributes {stable_mosaic.version = 11 : i64} {
  func.func @_fused_mlp_kernel(%arg0: i32, %arg1: memref<8x1280xf32, #tpu.memory_space<vmem>>, %arg2: memref<1280x1024xf32, #tpu.memory_space<vmem>>, %arg3: memref<1x1024xf32, #tpu.memory_space<vmem>>, %arg4: memref<1024x512xf32, #tpu.memory_space<vmem>>, %arg5: memref<1x512xf32, #tpu.memory_space<vmem>>, %arg6: memref<512x128xf32, #tpu.memory_space<vmem>>, %arg7: memref<1x128xf32, #tpu.memory_space<vmem>>, %arg8: memref<128x128xf32, #tpu.memory_space<vmem>>, %arg9: memref<1x128xf32, #tpu.memory_space<vmem>>, %arg10: memref<8x128xf32, #tpu.memory_space<vmem>>, %arg11: memref<8x1024xf32, #tpu.memory_space<vmem>>) attributes {dimension_semantics = [#tpu.dimension_semantics<arbitrary>], iteration_bounds = array<i64: 4>, scalar_prefetch = 0 : i64, scratch_operands = 1 : i64, tpu.core_type = #tpu.core_type<tc>, window_params = [{transform_indices = @transform_0, window_bounds = array<i64: 8, 1280>}, {transform_indices = @transform_1, window_bounds = array<i64: 1280, 1024>}, {pipeline_mode = #tpu.pipeline_mode<synchronous>, transform_indices = @transform_2, window_bounds = array<i64: 1, 1024>}, {pipeline_mode = #tpu.pipeline_mode<synchronous>, transform_indices = @transform_3, window_bounds = array<i64: 1024, 512>}, {pipeline_mode = #tpu.pipeline_mode<synchronous>, transform_indices = @transform_4, window_bounds = array<i64: 1, 512>}, {pipeline_mode = #tpu.pipeline_mode<synchronous>, transform_indices = @transform_5, window_bounds = array<i64: 512, 128>}, {pipeline_mode = #tpu.pipeline_mode<synchronous>, transform_indices = @transform_6, window_bounds = array<i64: 1, 128>}, {pipeline_mode = #tpu.pipeline_mode<synchronous>, transform_indices = @transform_7, window_bounds = array<i64: 128, 128>}, {pipeline_mode = #tpu.pipeline_mode<synchronous>, transform_indices = @transform_8, window_bounds = array<i64: 1, 128>}, {pipeline_mode = #tpu.pipeline_mode<synchronous>, transform_indices = @transform_9, window_bounds = array<i64: 8, 128>}]} {
    %c0_i32 = arith.constant 0 : i32
    %0 = arith.cmpi eq, %arg0, %c0_i32 : i32
    %1 = arith.extui %0 : i1 to i32
    %c0_i32_0 = arith.constant 0 : i32
    %2 = arith.cmpi ne, %1, %c0_i32_0 : i32
    scf.if %2 {
      %c0_9 = arith.constant 0 : index
      %c0_10 = arith.constant 0 : index
      %12 = vector.load %arg3[%c0_9, %c0_10] : memref<1x1024xf32, #tpu.memory_space<vmem>>, vector<1x1024xf32>
      %13 = vector.shape_cast %12 : vector<1x1024xf32> to vector<1x1024xf32>
      %14 = vector.broadcast %13 : vector<1x1024xf32> to vector<8x1024xf32>
      %c0_11 = arith.constant 0 : index
      %c0_12 = arith.constant 0 : index
      %15 = vector.load %arg11[%c0_11, %c0_12] : memref<8x1024xf32, #tpu.memory_space<vmem>>, vector<8x1024xf32>
      tpu.vector_store %arg11[%c0_11, %c0_12], %14 {strides = array<i32>} : memref<8x1024xf32, #tpu.memory_space<vmem>>, vector<8x1024xf32>,
    } else {
    }
    %c0 = arith.constant 0 : index
    %c0_1 = arith.constant 0 : index
    %3 = vector.load %arg11[%c0, %c0_1] : memref<8x1024xf32, #tpu.memory_space<vmem>>, vector<8x1024xf32>
    %c0_2 = arith.constant 0 : index
    %c0_3 = arith.constant 0 : index
    %4 = vector.load %arg1[%c0_2, %c0_3] : memref<8x1280xf32, #tpu.memory_space<vmem>>, vector<8x1280xf32>
    %c0_4 = arith.constant 0 : index
    %c0_5 = arith.constant 0 : index
    %5 = vector.load %arg2[%c0_4, %c0_5] : memref<1280x1024xf32, #tpu.memory_space<vmem>>, vector<1280x1024xf32>
    %cst = arith.constant dense<0.000000e+00> : vector<8x1024xf32>
    %6 = tpu.matmul %4, %5, %cst {dimension_numbers = #tpu.dot_dimension_numbers<[1], [0], [0], [1], [0, 0, 1, 1], [], []>} : vector<8x1280xf32>, vector<1280x1024xf32>, vector<8x1024xf32> -> vector<8x1024xf32>
    %7 = arith.addf %3, %6 : vector<8x1024xf32>
    %c0_6 = arith.constant 0 : index
    %c0_7 = arith.constant 0 : index
    %8 = vector.load %arg11[%c0_6, %c0_7] : memref<8x1024xf32, #tpu.memory_space<vmem>>, vector<8x1024xf32>
    tpu.vector_store %arg11[%c0_6, %c0_7], %7 {strides = array<i32>} : memref<8x1024xf32, #tpu.memory_space<vmem>>, vector<8x1024xf32>,
    %c3_i32 = arith.constant 3 : i32
    %9 = arith.cmpi eq, %arg0, %c3_i32 : i32
    %10 = arith.extui %9 : i1 to i32
    %c0_i32_8 = arith.constant 0 : i32
    %11 = arith.cmpi ne, %10, %c0_i32_8 : i32
    scf.if %11 {
      %c0_9 = arith.constant 0 : index
      %c0_10 = arith.constant 0 : index
      %12 = vector.load %arg11[%c0_9, %c0_10] : memref<8x1024xf32, #tpu.memory_space<vmem>>, vector<8x1024xf32>
      %cst_11 = arith.constant 0.000000e+00 : f32
      %13 = vector.broadcast %cst_11 : f32 to vector<8x1024xf32>
      %14 = arith.maximumf %12, %13 : vector<8x1024xf32>
      %c0_12 = arith.constant 0 : index
      %c0_13 = arith.constant 0 : index
      %15 = vector.load %arg4[%c0_12, %c0_13] : memref<1024x512xf32, #tpu.memory_space<vmem>>, vector<1024x512xf32>
      %cst_14 = arith.constant dense<0.000000e+00> : vector<8x512xf32>
      %16 = tpu.matmul %14, %15, %cst_14 {dimension_numbers = #tpu.dot_dimension_numbers<[1], [0], [0], [1], [0, 0, 1, 1], [], []>} : vector<8x1024xf32>, vector<1024x512xf32>, vector<8x512xf32> -> vector<8x512xf32>
      %c0_15 = arith.constant 0 : index
      %c0_16 = arith.constant 0 : index
      %17 = vector.load %arg5[%c0_15, %c0_16] : memref<1x512xf32, #tpu.memory_space<vmem>>, vector<1x512xf32>
      %18 = vector.broadcast %17 : vector<1x512xf32> to vector<8x512xf32>
      %19 = arith.addf %16, %18 : vector<8x512xf32>
      %cst_17 = arith.constant 0.000000e+00 : f32
      %20 = vector.broadcast %cst_17 : f32 to vector<8x512xf32>
      %21 = arith.maximumf %19, %20 : vector<8x512xf32>
      %c0_18 = arith.constant 0 : index
      %c0_19 = arith.constant 0 : index
      %22 = vector.load %arg6[%c0_18, %c0_19] : memref<512x128xf32, #tpu.memory_space<vmem>>, vector<512x128xf32>
      %cst_20 = arith.constant dense<0.000000e+00> : vector<8x128xf32>
      %23 = tpu.matmul %21, %22, %cst_20 {dimension_numbers = #tpu.dot_dimension_numbers<[1], [0], [0], [1], [0, 0, 1, 1], [], []>} : vector<8x512xf32>, vector<512x128xf32>, vector<8x128xf32> -> vector<8x128xf32>
      %c0_21 = arith.constant 0 : index
      %c0_22 = arith.constant 0 : index
      %24 = vector.load %arg7[%c0_21, %c0_22] : memref<1x128xf32, #tpu.memory_space<vmem>>, vector<1x128xf32>
      %25 = vector.broadcast %24 : vector<1x128xf32> to vector<8x128xf32>
      %26 = arith.addf %23, %25 : vector<8x128xf32>
      %cst_23 = arith.constant 0.000000e+00 : f32
      %27 = vector.broadcast %cst_23 : f32 to vector<8x128xf32>
      %28 = arith.maximumf %26, %27 : vector<8x128xf32>
      %c0_24 = arith.constant 0 : index
      %c0_25 = arith.constant 0 : index
      %29 = vector.load %arg8[%c0_24, %c0_25] : memref<128x128xf32, #tpu.memory_space<vmem>>, vector<128x128xf32>
      %cst_26 = arith.constant dense<0.000000e+00> : vector<8x128xf32>
      %30 = tpu.matmul %28, %29, %cst_26 {dimension_numbers = #tpu.dot_dimension_numbers<[1], [0], [0], [1], [0, 0, 1, 1], [], []>} : vector<8x128xf32>, vector<128x128xf32>, vector<8x128xf32> -> vector<8x128xf32>
      %c0_27 = arith.constant 0 : index
      %c0_28 = arith.constant 0 : index
      %31 = vector.load %arg9[%c0_27, %c0_28] : memref<1x128xf32, #tpu.memory_space<vmem>>, vector<1x128xf32>
      %32 = vector.broadcast %31 : vector<1x128xf32> to vector<8x128xf32>
      %33 = arith.addf %30, %32 : vector<8x128xf32>
      %c0_29 = arith.constant 0 : index
      %c0_30 = arith.constant 0 : index
      %34 = vector.load %arg10[%c0_29, %c0_30] : memref<8x128xf32, #tpu.memory_space<vmem>>, vector<8x128xf32>
      tpu.vector_store %arg10[%c0_29, %c0_30], %33 {strides = array<i32>} : memref<8x128xf32, #tpu.memory_space<vmem>>, vector<8x128xf32>,
    } else {
    }
    return
  }
  func.func @transform_0(%arg0: i32) -> (i32, i32) {
    %c0_i32 = arith.constant 0 : i32
    %c0_i32_0 = arith.constant 0 : i32
    return %c0_i32, %arg0 : i32, i32
  }
  func.func @transform_1(%arg0: i32) -> (i32, i32) {
    %c0_i32 = arith.constant 0 : i32
    %c0_i32_0 = arith.constant 0 : i32
    return %arg0, %c0_i32 : i32, i32
  }
  func.func @transform_2(%arg0: i32) -> (i32, i32) {
    %c0_i32 = arith.constant 0 : i32
    %c0_i32_0 = arith.constant 0 : i32
    %c0_i32_1 = arith.constant 0 : i32
    return %c0_i32, %c0_i32_0 : i32, i32
  }
  func.func @transform_3(%arg0: i32) -> (i32, i32) {
    %c0_i32 = arith.constant 0 : i32
    %c0_i32_0 = arith.constant 0 : i32
    %c0_i32_1 = arith.constant 0 : i32
    return %c0_i32, %c0_i32_0 : i32, i32
  }
  func.func @transform_4(%arg0: i32) -> (i32, i32) {
    %c0_i32 = arith.constant 0 : i32
    %c0_i32_0 = arith.constant 0 : i32
    %c0_i32_1 = arith.constant 0 : i32
    return %c0_i32, %c0_i32_0 : i32, i32
  }
  func.func @transform_5(%arg0: i32) -> (i32, i32) {
    %c0_i32 = arith.constant 0 : i32
    %c0_i32_0 = arith.constant 0 : i32
    %c0_i32_1 = arith.constant 0 : i32
    return %c0_i32, %c0_i32_0 : i32, i32
  }
  func.func @transform_6(%arg0: i32) -> (i32, i32) {
    %c0_i32 = arith.constant 0 : i32
    %c0_i32_0 = arith.constant 0 : i32
    %c0_i32_1 = arith.constant 0 : i32
    return %c0_i32, %c0_i32_0 : i32, i32
  }
  func.func @transform_7(%arg0: i32) -> (i32, i32) {
    %c0_i32 = arith.constant 0 : i32
    %c0_i32_0 = arith.constant 0 : i32
    %c0_i32_1 = arith.constant 0 : i32
    return %c0_i32, %c0_i32_0 : i32, i32
  }
  func.func @transform_8(%arg0: i32) -> (i32, i32) {
    %c0_i32 = arith.constant 0 : i32
    %c0_i32_0 = arith.constant 0 : i32
    %c0_i32_1 = arith.constant 0 : i32
    return %c0_i32, %c0_i32_0 : i32, i32
  }
  func.func @transform_9(%arg0: i32) -> (i32, i32) {
    %c0_i32 = arith.constant 0 : i32
    %c0_i32_0 = arith.constant 0 : i32
    %c0_i32_1 = arith.constant 0 : i32
    return %c0_i32, %c0_i32_0 : i32, i32
  }
}

</mosaic_0001>

<bundles_post_ra>
// kernel: amazon_mlp_forward.1
= control target key start
LH: loop header
LB: loop body
LE: loop exit
PB: predicated region body
PF: predicated region fallthrough
CT: control target
= control target key end

     0   :  { %s7165_s0 = inlined_call_operand.vmem [shape: f32[8,5120], index: 0, kind: input, shape index: {}]   ;;  %s7166_s1 = inlined_call_operand.hbm [shape: f32[5120,1024], index: 1, kind: input, shape index: {}]   ;;  %s7167_s2 = inlined_call_operand.hbm [shape: f32[1,1024], index: 2, kind: input, shape index: {}]   ;;  %s7168_s3 = inlined_call_operand.hbm [shape: f32[1024,512], index: 3, kind: input, shape index: {}]   ;;  %s7169_s4 = inlined_call_operand.hbm [shape: f32[1,512], index: 4, kind: input, shape index: {}]   ;;  %s7170_s5 = inlined_call_operand.hbm [shape: f32[512,128], index: 5, kind: input, shape index: {}]   ;;  %s7171_s6 = inlined_call_operand.hbm [shape: f32[1,128], index: 6, kind: input, shape index: {}]   ;;  %s7172_s7 = inlined_call_operand.hbm [shape: f32[128,128], index: 7, kind: input, shape index: {}]   ;;  %s7173_s8 = inlined_call_operand.hbm [shape: f32[1,128], index: 8, kind: input, shape index: {}]   ;;  %s7174_s9 = inlined_call_operand.vmem [shape: f32[8,128], index: 9, kind: output, shape index: {}]  }
   0x1   :  { %7175 = sst [smem:[#allocation21_spill]] %s7167_s2 }
   0x2   :  { %14 = vsyncpa [#allocation4], 0 }
   0x3   :  { %16 = vsyncpa [#allocation4 + $0x1], 0 }
   0x4   :  { %17 = vsyncpa [#allocation6], 0 }
   0x5   :  { %18 = vsyncpa [#allocation9], 0 }
   0x6   :  { %19 = vsyncpa [#allocation12], 0 }
   0x7   :  { %20 = vsyncpa [#allocation15], 0  ;;  %s5443_s30 = smov 0   ;;  %s5445_s10 = smov 0  }
   0x8   :  { %s5447_s11 = smov 0   ;;  %s5449_s12 = smov 0  }
   0x9 LB: > { %s7176_s2 = sld [smem:[#allocation21_spill]]  ;;  %s5467_s16 = sadd.s32 4294967295, %s5378_s12   ;;  %s5378_s12 = sphi %s5449_s12, %s7184_s12   ;;  %s5374_s11 = sphi %s5447_s11, %s7183_s11   ;;  %s5370_s10 = sphi %s5445_s10, %s7182_s10   ;;  %s5366_s30 = sphi %s5443_s30, %s7181_s30  }
   0xa   : > { %p4911_p0 = scmp.ge.s32.totalorder %s5378_s12, 1  ;;  %p73_p1 = scmp.eq.s32.totalorder %s5467_s16, 0 }
   0xb   : > { %p251_p2 = scmp.lt.s32.totalorder %s5378_s12, 5  ;;  %p4912_p3 = scmp.ne.s32.totalorder %s5467_s16, 0 }
   0xc   : > { %s5380_s18 = smov [#allocation5]   ;;  %s289_s22 = sshll.u32 %s7169_s4, 4  ;;  %s290_s22 = int_to_ptr.hbm [resolvable:$true] %s289_s22 }
   0xd   : > { %p5473_p4 = pnand %p4911_p0, %p251_p2  ;;  %s265_s19 = sshll.u32 %s5380_s18, 4  ;;  %s266_s19 = int_to_ptr.vmem [resolvable:$true] %s265_s19 }
   0xe   : > { %s5381_s24 = smov [#allocation8]   ;;  %s315_s28 = sshll.u32 %s7171_s6, 4  ;;  %s316_s28 = int_to_ptr.hbm [resolvable:$true] %s315_s28 }
   0xf   : > { %s263_s15 = sshll.u32 %s7176_s2, 4  ;;  %p4970_p5 = pneg %p5473_p4  ;;  %s264_s15 = int_to_ptr.hbm [resolvable:$true] %s263_s15 }
  0x10   : > { %s291_s25 = sshll.u32 %s5381_s24, 4  ;;  %s274_s14 = sshll.u32 %s7168_s3, 4  ;;  %s292_s25 = int_to_ptr.vmem [resolvable:$true] %s291_s25  ;;  %s275_s14 = int_to_ptr.hbm [resolvable:$true] %s274_s14 }
  0x11   : > { %p5484_p6 = pnand %p4970_p5, %p73_p1  ;;  %s5382_s18 = smov [#allocation11]  }
  0x12   : > { %s317_s20 = sshll.u32 %s5382_s18, 4  ;;  %s5383_s21 = smov [#allocation7]   ;;  %s318_s20 = int_to_ptr.vmem [resolvable:$true] %s317_s20 }
  0x13   : > { %4973 = dma.hbm_to_vmem [thread:$0]  (!%p5484_p6), %s264_s15, 128, %s266_s19, [#allocation6]  }
  0x14   : > { %4979 = dma.hbm_to_vmem [thread:$0]  (!%p5484_p6), %s290_s22, 64, %s292_s25, [#allocation9]  }
  0x15   : > { %4985 = dma.hbm_to_vmem [thread:$0]  (!%p5484_p6), %s316_s28, 16, %s318_s20, [#allocation12]  }
  0x16   : > { %s276_s24 = sshll.u32 %s5383_s21, 4  ;;  %s5384_s26 = smov 512   ;;  %s277_s24 = int_to_ptr.vmem [resolvable:$true] %s276_s24 }
  0x17   : > { %s5385_s27 = smov 32   ;;  %s300_s22 = sshll.u32 %s7170_s5, 4  ;;  %s301_s22 = int_to_ptr.hbm [resolvable:$true] %s300_s22 }
  0x18   : > { %4976 = dma.hbm_to_vmem [thread:$0]  (!%p5484_p6), %s275_s14, 65536, %s277_s24, [#allocation6], %s5384_s26, %s5384_s26, %s5385_s27  }
  0x19   : > { %s5386_s25 = smov [#allocation10]   ;;  %s326_s28 = sshll.u32 %s7172_s7, 4  ;;  %s327_s28 = int_to_ptr.hbm [resolvable:$true] %s326_s28 }
  0x1a   : > { %s302_s29 = sshll.u32 %s5386_s25, 4  ;;  %s5387_s20 = smov 128   ;;  %s303_s29 = int_to_ptr.vmem [resolvable:$true] %s302_s29 }
  0x1b   : > { %s5388_s21 = smov 8   ;;  %s5389_s14 = smov [#allocation13]  }
  0x1c   : > { %4982 = dma.hbm_to_vmem [thread:$0]  (!%p5484_p6), %s301_s22, 8192, %s303_s29, [#allocation9], %s5387_s20, %s5387_s20, %s5388_s21  }
  0x1d   : > { %s328_s24 = sshll.u32 %s5389_s14, 4  ;;  %s341_s15 = sshll.u32 %s7173_s8, 4  ;;  %s329_s24 = int_to_ptr.vmem [resolvable:$true] %s328_s24  ;;  %s342_s15 = int_to_ptr.hbm [resolvable:$true] %s341_s15 }
  0x1e   : > { %4988 = dma.hbm_to_vmem [thread:$0]  (!%p5484_p6), %s327_s28, 2048, %s329_s24, [#allocation12], %s5387_s20, %s5387_s20, %s5388_s21  }
  0x1f   : > { %s5390_s19 = smov [#allocation14]   ;;  %s5518_s25 = sadd.s32 1, %s5378_s12  }
  0x20   : > { %s343_s22 = sshll.u32 %s5390_s19, 4  ;;  %s56_s29 = ssub.s32 %s5378_s12, %s5518_s25  ;;  %s344_s22 = int_to_ptr.vmem [resolvable:$true] %s343_s22 }
  0x21   : > { %4991 = dma.hbm_to_vmem [thread:$0]  (!%p5484_p6), %s342_s15, 16, %s344_s22, [#allocation15]  }
  0x22   : > { %s59_s13 = sadd.s32 1, %s5374_s11  ;;  %p57_p7 = scmp.eq.s32.totalorder %s56_s29, 0 }
  0x23   : > { %p66_p8 = scmp.ne.s32.totalorder %s5374_s11, %s5370_s10  ;;  %p67_p9 = scmp.eq.s32.totalorder %s5378_s12, 0 }
  0x24   : > { %p72_p10 = scmp.ne.s32.totalorder %s5370_s10, %s5366_s30  ;;  %p5003_p13 = scmp.lt.s32.totalorder %s5378_s12, 4 }
  0x25   : > { %s5529_s18 = scalar_select %p57_p7, %s5374_s11, %s59_s13  }
  0x26   : > { %p68_p11 = por %p67_p9, %p66_p8  ;;  %p5533_p12 = por %p73_p1, %p72_p10 }
  0x27   : > { %s363_s23 = sand.u32 1, %s5374_s11   ;;  %s4937_s21 = smul.u32 10240, %s5378_s12 }
  0x28   : > { %s4938_s20 = smul.u32 10240, %s363_s23  ;;  %p5540_p0 = pnand %p5003_p13, %p68_p11 }
  0x29   : > { %s373_s30 = scalar_lea.hbm %s7166_s1, %s4937_s21  ;;  %s364_s22 = scalar_lea.sflag [#allocation4], %s363_s23 }
  0x2a   : > { %s367_s27 = scalar_lea.vmem [#allocation3], %s4938_s20  ;;  %s374_s19 = sshll.u32 %s373_s30, 4  ;;  %s375_s19 = int_to_ptr.hbm [resolvable:$true] %s374_s19 }
  0x2b   : > { %s376_s15 = sshll.u32 %s367_s27, 4  ;;  %s5298_s29 = sshra.s32 %s375_s19, 4  ;;  %s377_s15 = int_to_ptr.vmem [resolvable:$true] %s376_s15  ;;  %s5299_s29 = int_to_ptr.hbm [resolvable:$true] %s5298_s29 }
  0x2c   : > { %s5300_s13 = scalar_lea.hbm %s5299_s29, 10240  ;;  %p5302_p5 = pneg %p5540_p0 }
  0x2d   : > { %p5301_p2 = scmp.ne.s32.totalorder %s5299_s29, %s5300_s13  ;;  %s5305_s24 = scalar_lea.hbm %s7166_s1, 40960 }
  0x2e   : > { %p5306_p8 = scmp.lt.s32.totalorder %s5299_s29, %s7166_s1  ;;  %p5307_p9 = scmp.lt.s32.totalorder %s5305_s24, %s5300_s13 }
  0x2f   : > { %p5303_p6 = pnand %p5302_p5, %p5301_p2 }
  0x30   : > { %p5308_p10 = por %p5307_p9, %p5306_p8 }
  0x31   : > { %p5304_p7 = pneg %p5303_p6 }
  0x33   : > { %p5309_p11 = pnand %p5308_p10, %p5304_p7 }
  0x35   : > { %5312 = shalt.err (!%p5309_p11)
}
  0x36   : > { %s5391_s23 = smov 1024   ;;  %s5392_s20 = smov 64  }
  0x37   : > { %4995 = dma.hbm_to_vmem [thread:$0]  (!%p5540_p0), %s375_s19, 163840, %s377_s15, %s364_s22, %s5391_s23, %s5391_s23, %s5392_s20  }
  0x38   : > { %388 = sbr.rel (%p5473_p4) target bundleno = 1872 (0x750), region = 56  ;;  %s390_s2 = sand.u32 (!%p5473_p4), 1, %s5370_s10  }
  0x39   : > { %s4939_s30 = smul.u32 (!%p5473_p4), 10240, %s390_s2  ;;  %s391_s27 = scalar_lea.sflag (!%p5473_p4), [#allocation4], %s390_s2 }
  0x3b   : > { %s5560_s12 = scalar_lea.vmem (!%p5473_p4), [#allocation3], %s4939_s30 }
  0x3d   : > { %5345 = dma.done.wait (%p5533_p12), %s391_s27, 163840  }
  0x3e   : > { %5347 = vsyncadd (%p5533_p12), %s391_s27, 4294803456 }
  0x3f   : > { %5349 = dma.done.wait (%p73_p1), [#allocation6], 65664  }
  0x40   : > { %5351 = vsyncadd (%p73_p1), [#allocation6], 4294901632 }
  0x41   : > { %5353 = dma.done.wait (%p73_p1), [#allocation9], 8256  }
  0x42   : > { %5355 = vsyncadd (%p73_p1), [#allocation9], 4294959040 }
  0x43   : > { %5357 = dma.done.wait (%p73_p1), [#allocation12], 2064  }
  0x44   : > { %5359 = vsyncadd (%p73_p1), [#allocation12], 4294965232 }
  0x45   : > { %5361 = dma.done.wait (%p73_p1), [#allocation15], 16  }
  0x46   : > { %5363 = vsyncadd (%p73_p1), [#allocation15], 4294967280  ;;  %s465_s17 = smul.u32 10, %s5467_s16 }
  0x48   : > { %p466_p4 = scmp.lt.s32.totalorder %s465_s17, 39  ;;  %475 = sbr.rel (%p4912_p3) target bundleno = 88 (0x58), region = 92 }
  0x4a   : > { %s7186_s17 = smov (!%p466_p4, %s465_s17), 39 }
  0x4b   : > { %s4930_s28 = sshll.u32 %s7186_s17, 3 }
  0x4c   : > { %s5586_s19 = scalar_lea.vmem %s7165_s0, %s4930_s28 }
  0x4d   : > { %v476_v0 = vld [vmem:[#allocation5] sm:$0xff] }
  0x4e   : > { %v478_v1 = vperm.slane %v476_v0, 0  ;;  %v479_v2 = vperm.slane %v476_v0, 1  ;;  %v480_v3 = vperm.slane %v476_v0, 2  ;;  %v481_v4 = vperm.slane %v476_v0, 3 }
  0x4f   : > { %v482_v5 = vperm.slane %v476_v0, 4  ;;  %v483_v6 = vperm.slane %v476_v0, 5  ;;  %v484_v7 = vperm.slane %v476_v0, 6  ;;  %v485_v8 = vperm.slane %v476_v0, 7 }
  0x50   : > { %494 = vst [vmem:[#allocation2 + $0x30] sm:$0xff] %v478_v1 }
  0x51   : > { %495 = vst [vmem:[#allocation2] sm:$0xff] %v479_v2 }
  0x52   : > { %496 = vst [vmem:[#allocation2 + $0x18] sm:$0xff] %v480_v3 }
  0x53   : > { %497 = vst [vmem:[#allocation2 + $0x10] sm:$0xff] %v481_v4 }
  0x54   : > { %498 = vst [vmem:[#allocation2 + $0x8] sm:$0xff] %v482_v5 }
  0x55   : > { %499 = vst [vmem:[#allocation2 + $0x20] sm:$0xff] %v483_v6 }
  0x56   : > { %500 = vst [vmem:[#allocation2 + $0x28] sm:$0xff] %v484_v7 }
  0x57   : > { %501 = vst [vmem:[#allocation2 + $0x38] sm:$0xff] %v485_v8 }
  0x58 PF: > { %v640_v9 = vld [vmem:[%s5560_s12 + $0x3c0] sm:$0xff]  ;;  %p4932_p1 = scmp.ne.s32.totalorder %s5467_s16, 3 }
  0x59   : > { %v896_v10 = vld [vmem:[%s5560_s12 + $0xbc0] sm:$0xff]  ;;  %1800 = vmatpush.msra.mxu0 %v640_v9 }
  0x5a   : > { %v632_v11 = vld [vmem:[%s5560_s12 + $0x380] sm:$0xff]  ;;  %1840 = vmatpush.msra.mxu2 %v896_v10 }
  0x5b   : > { %v768_v12 = vld [vmem:[%s5560_s12 + $0x7c0] sm:$0xff]  ;;  %1801 = vmatpush.msra.mxu0 %v632_v11 }
  0x5c   : > { %v888_v13 = vld [vmem:[%s5560_s12 + $0xb80] sm:$0xff]  ;;  %1820 = vmatpush.msra.mxu1 %v768_v12 }
  0x5d   : > { %v1024_v14 = vld [vmem:[%s5560_s12 + $0xfc0] sm:$0xff]  ;;  %1841 = vmatpush.msra.mxu2 %v888_v13 }
  0x5e   : > { %1860 = vmatpush.msra.mxu3 %v1024_v14  ;;  %v624_v15 = vld [vmem:[%s5560_s12 + $0x340] sm:$0xff] }
  0x5f   : > { %v760_v16 = vld [vmem:[%s5560_s12 + $0x780] sm:$0xff]  ;;  %1802 = vmatpush.msra.mxu0 %v624_v15 }
  0x60   : > { %v880_v17 = vld [vmem:[%s5560_s12 + $0xb40] sm:$0xff]  ;;  %1821 = vmatpush.msra.mxu1 %v760_v16 }
  0x61   : > { %v1016_v18 = vld [vmem:[%s5560_s12 + $0xf80] sm:$0xff]  ;;  %1842 = vmatpush.msra.mxu2 %v880_v17 }
  0x62   : > { %v752_v19 = vld [vmem:[%s5560_s12 + $0x740] sm:$0xff]  ;;  %1861 = vmatpush.msra.mxu3 %v1016_v18 }
  0x63   : > { %v616_v20 = vld [vmem:[%s5560_s12 + $0x300] sm:$0xff]  ;;  %1822 = vmatpush.msra.mxu1 %v752_v19 }
  0x64   : > { %v872_v21 = vld [vmem:[%s5560_s12 + $0xb00] sm:$0xff]  ;;  %1803 = vmatpush.msra.mxu0 %v616_v20 }
  0x65   : > { %v1008_v22 = vld [vmem:[%s5560_s12 + $0xf40] sm:$0xff]  ;;  %1843 = vmatpush.msra.mxu2 %v872_v21 }
  0x66   : > { %v744_v23 = vld [vmem:[%s5560_s12 + $0x700] sm:$0xff]  ;;  %1862 = vmatpush.msra.mxu3 %v1008_v22 }
  0x67   : > { %v1000_v24 = vld [vmem:[%s5560_s12 + $0xf00] sm:$0xff]  ;;  %1823 = vmatpush.msra.mxu1 %v744_v23 }
  0x68   : > { %v608_v25 = vld [vmem:[%s5560_s12 + $0x2c0] sm:$0xff]  ;;  %1863 = vmatpush.msra.mxu3 %v1000_v24 }
  0x69   : > { %v864_v26 = vld [vmem:[%s5560_s12 + $0xac0] sm:$0xff]  ;;  %1804 = vmatpush.msra.mxu0 %v608_v25 }
  0x6a   : > { %v736_v27 = vld [vmem:[%s5560_s12 + $0x6c0] sm:$0xff]  ;;  %1844 = vmatpush.msra.mxu2 %v864_v26 }
  0x6b   : > { %v992_v28 = vld [vmem:[%s5560_s12 + $0xec0] sm:$0xff]  ;;  %1824 = vmatpush.msra.mxu1 %v736_v27 }
  0x6c   : > { %v600_v29 = vld [vmem:[%s5560_s12 + $0x280] sm:$0xff]  ;;  %1864 = vmatpush.msra.mxu3 %v992_v28 }
  0x6d   : > { %v856_v30 = vld [vmem:[%s5560_s12 + $0xa80] sm:$0xff]  ;;  %1805 = vmatpush.msra.mxu0 %v600_v29 }
  0x6e   : > { %v728_v31 = vld [vmem:[%s5560_s12 + $0x680] sm:$0xff]  ;;  %1845 = vmatpush.msra.mxu2 %v856_v30 }
  0x6f   : > { %v984_v32 = vld [vmem:[%s5560_s12 + $0xe80] sm:$0xff]  ;;  %1825 = vmatpush.msra.mxu1 %v728_v31 }
  0x70   : > { %v592_v33 = vld [vmem:[%s5560_s12 + $0x240] sm:$0xff]  ;;  %1865 = vmatpush.msra.mxu3 %v984_v32 }
  0x71   : > { %v848_v34 = vld [vmem:[%s5560_s12 + $0xa40] sm:$0xff]  ;;  %1806 = vmatpush.msra.mxu0 %v592_v33 }
  0x72   : > { %v720_v35 = vld [vmem:[%s5560_s12 + $0x640] sm:$0xff]  ;;  %1846 = vmatpush.msra.mxu2 %v848_v34 }
  0x73   : > { %v976_v36 = vld [vmem:[%s5560_s12 + $0xe40] sm:$0xff]  ;;  %1826 = vmatpush.msra.mxu1 %v720_v35 }
  0x74   : > { %v584_v37 = vld [vmem:[%s5560_s12 + $0x200] sm:$0xff]  ;;  %1866 = vmatpush.msra.mxu3 %v976_v36 }
  0x75   : > { %v840_v38 = vld [vmem:[%s5560_s12 + $0xa00] sm:$0xff]  ;;  %1807 = vmatpush.msra.mxu0 %v584_v37 }
  0x76   : > { %v712_v39 = vld [vmem:[%s5560_s12 + $0x600] sm:$0xff]  ;;  %1847 = vmatpush.msra.mxu2 %v840_v38 }
  0x77   : > { %v968_v40 = vld [vmem:[%s5560_s12 + $0xe00] sm:$0xff]  ;;  %1827 = vmatpush.msra.mxu1 %v712_v39 }
  0x78   : > { %v576_v41 = vld [vmem:[%s5560_s12 + $0x1c0] sm:$0xff]  ;;  %1867 = vmatpush.msra.mxu3 %v968_v40 }
  0x79   : > { %v832_v42 = vld [vmem:[%s5560_s12 + $0x9c0] sm:$0xff]  ;;  %1808 = vmatpush.msra.mxu0 %v576_v41 }
  0x7a   : > { %v704_v43 = vld [vmem:[%s5560_s12 + $0x5c0] sm:$0xff]  ;;  %1848 = vmatpush.msra.mxu2 %v832_v42 }
  0x7b   : > { %v960_v44 = vld [vmem:[%s5560_s12 + $0xdc0] sm:$0xff]  ;;  %1828 = vmatpush.msra.mxu1 %v704_v43 }
  0x7c   : > { %v568_v45 = vld [vmem:[%s5560_s12 + $0x180] sm:$0xff]  ;;  %1868 = vmatpush.msra.mxu3 %v960_v44 }
  0x7d   : > { %v824_v46 = vld [vmem:[%s5560_s12 + $0x980] sm:$0xff]  ;;  %1809 = vmatpush.msra.mxu0 %v568_v45 }
  0x7e   : > { %v696_v47 = vld [vmem:[%s5560_s12 + $0x580] sm:$0xff]  ;;  %1849 = vmatpush.msra.mxu2 %v824_v46 }
  0x7f   : > { %v952_v48 = vld [vmem:[%s5560_s12 + $0xd80] sm:$0xff]  ;;  %1829 = vmatpush.msra.mxu1 %v696_v47 }
  0x80   : > { %v560_v49 = vld [vmem:[%s5560_s12 + $0x140] sm:$0xff]  ;;  %1869 = vmatpush.msra.mxu3 %v952_v48 }
  0x81   : > { %v816_v50 = vld [vmem:[%s5560_s12 + $0x940] sm:$0xff]  ;;  %1810 = vmatpush.msra.mxu0 %v560_v49 }
  0x82   : > { %v688_v51 = vld [vmem:[%s5560_s12 + $0x540] sm:$0xff]  ;;  %1850 = vmatpush.msra.mxu2 %v816_v50 }
  0x83   : > { %v944_v52 = vld [vmem:[%s5560_s12 + $0xd40] sm:$0xff]  ;;  %1830 = vmatpush.msra.mxu1 %v688_v51 }
  0x84   : > { %v552_v53 = vld [vmem:[%s5560_s12 + $0x100] sm:$0xff]  ;;  %1870 = vmatpush.msra.mxu3 %v944_v52 }
  0x85   : > { %v808_v54 = vld [vmem:[%s5560_s12 + $0x900] sm:$0xff]  ;;  %1811 = vmatpush.msra.mxu0 %v552_v53 }
  0x86   : > { %v680_v55 = vld [vmem:[%s5560_s12 + $0x500] sm:$0xff]  ;;  %1851 = vmatpush.msra.mxu2 %v808_v54 }
  0x87   : > { %v936_v56 = vld [vmem:[%s5560_s12 + $0xd00] sm:$0xff]  ;;  %1831 = vmatpush.msra.mxu1 %v680_v55 }
  0x88   : > { %v544_v57 = vld [vmem:[%s5560_s12 + $0xc0] sm:$0xff]  ;;  %1871 = vmatpush.msra.mxu3 %v936_v56 }
  0x89   : > { %v800_v58 = vld [vmem:[%s5560_s12 + $0x8c0] sm:$0xff]  ;;  %1812 = vmatpush.msra.mxu0 %v544_v57 }
  0x8a   : > { %v672_v59 = vld [vmem:[%s5560_s12 + $0x4c0] sm:$0xff]  ;;  %1852 = vmatpush.msra.mxu2 %v800_v58 }
  0x8b   : > { %v928_v60 = vld [vmem:[%s5560_s12 + $0xcc0] sm:$0xff]  ;;  %1832 = vmatpush.msra.mxu1 %v672_v59 }
  0x8c   : > { %v536_v61 = vld [vmem:[%s5560_s12 + $0x80] sm:$0xff]  ;;  %1872 = vmatpush.msra.mxu3 %v928_v60 }
  0x8d   : > { %v792_v62 = vld [vmem:[%s5560_s12 + $0x880] sm:$0xff]  ;;  %1813 = vmatpush.msra.mxu0 %v536_v61 }
  0x8e   : > { %v664_v63 = vld [vmem:[%s5560_s12 + $0x480] sm:$0xff]  ;;  %1853 = vmatpush.msra.mxu2 %v792_v62 }
  0x8f   : > { %v920_v0 = vld [vmem:[%s5560_s12 + $0xc80] sm:$0xff]  ;;  %1833 = vmatpush.msra.mxu1 %v664_v63 }
  0x90   : > { %v528_v1 = vld [vmem:[%s5560_s12 + $0x40] sm:$0xff]  ;;  %1873 = vmatpush.msra.mxu3 %v920_v0 }
  0x91   : > { %v784_v2 = vld [vmem:[%s5560_s12 + $0x840] sm:$0xff]  ;;  %1814 = vmatpush.msra.mxu0 %v528_v1 }
  0x92   : > { %v656_v3 = vld [vmem:[%s5560_s12 + $0x440] sm:$0xff]  ;;  %1854 = vmatpush.msra.mxu2 %v784_v2 }
  0x93   : > { %v912_v4 = vld [vmem:[%s5560_s12 + $0xc40] sm:$0xff]  ;;  %1834 = vmatpush.msra.mxu1 %v656_v3  ;;  %v5713_v3 = vld [vmem:[%s5586_s19 + $0x10] sm:$0xff] }
  0x94   : > { %v520_v5 = vld [vmem:[%s5560_s12] sm:$0xff]  ;;  %1874 = vmatpush.msra.mxu3 %v912_v4 }
  0x95   : > { %v776_v6 = vld [vmem:[%s5560_s12 + $0x800] sm:$0xff]  ;;  %1815 = vmatpush.msra.mxu0 %v520_v5 }
  0x96   : > { %v1152_v7 = vld [vmem:[%s5560_s12 + $0x13c0] sm:$0xff]  ;;  %1855 = vmatpush.msra.mxu2 %v776_v6 }
  0x97   : > { %v1408_v8 = vld [vmem:[%s5560_s12 + $0x1bc0] sm:$0xff]  ;;  %1880 = vmatpush.msrb.mxu0 %v1152_v7  ;;  %1856 = vmatmul.f32.vlgmr.msra.gmra.mxu2 %v5713_v3 }
  0x98   : > { %v648_v9 = vld [vmem:[%s5560_s12 + $0x400] sm:$0xff]  ;;  %1920 = vmatpush.msrb.mxu2 %v1408_v8 }
  0x99   : > { %v904_v10 = vld [vmem:[%s5560_s12 + $0xc00] sm:$0xff]  ;;  %1835 = vmatpush.msra.mxu1 %v648_v9  ;;  %v5724_v9 = vld [vmem:[%s5586_s19 + $0x18] sm:$0xff] }
  0x9a   : > { %v1144_v11 = vld [vmem:[%s5560_s12 + $0x1380] sm:$0xff]  ;;  %1875 = vmatpush.msra.mxu3 %v904_v10 }
  0x9b   : > { %v1280_v12 = vld [vmem:[%s5560_s12 + $0x17c0] sm:$0xff]  ;;  %1881 = vmatpush.msrb.mxu0 %v1144_v11  ;;  %v641_v11 = vld [vmem:[%s5560_s12 + $0x3c8] sm:$0xff]  ;;  %1876 = vmatmul.f32.vlgmr.msra.gmra.mxu3 %v5724_v9 }
  0x9c   : > { %v1400_v13 = vld [vmem:[%s5560_s12 + $0x1b80] sm:$0xff]  ;;  %1900 = vmatpush.msrb.mxu1 %v1280_v12 }
  0x9d   : > { %v1536_v14 = vld [vmem:[%s5560_s12 + $0x1fc0] sm:$0xff]  ;;  %1921 = vmatpush.msrb.mxu2 %v1400_v13 }
  0x9e   : > { %v1136_v15 = vld [vmem:[%s5560_s12 + $0x1340] sm:$0xff]  ;;  %1940 = vmatpush.msrb.mxu3 %v1536_v14  ;;  %v5732_v14 = vld [vmem:[%s5586_s19 + $0x8] sm:$0xff] }
  0x9f   : > { %v1272_v16 = vld [vmem:[%s5560_s12 + $0x1780] sm:$0xff]  ;;  %1882 = vmatpush.msrb.mxu0 %v1136_v15  ;;  %1836 = vmatmul.f32.vlgmr.msra.gmra.mxu1 %v5732_v14 }
  0xa0   : > { %v1392_v17 = vld [vmem:[%s5560_s12 + $0x1b40] sm:$0xff]  ;;  %1901 = vmatpush.msrb.mxu1 %v1272_v16 }
  0xa1   : > { %v1528_v18 = vld [vmem:[%s5560_s12 + $0x1f80] sm:$0xff]  ;;  %1922 = vmatpush.msrb.mxu2 %v1392_v17  ;;  %v633_v17 = vld [vmem:[%s5560_s12 + $0x388] sm:$0xff] }
  0xa2   : > { %v1128_v19 = vld [vmem:[%s5560_s12 + $0x1300] sm:$0xff]  ;;  %1941 = vmatpush.msrb.mxu3 %v1528_v18  ;;  %v769_v18 = vld [vmem:[%s5560_s12 + $0x7c8] sm:$0xff] }
  0xa3   : > { %v1264_v20 = vld [vmem:[%s5560_s12 + $0x1740] sm:$0xff]  ;;  %1883 = vmatpush.msrb.mxu0 %v1128_v19 }
  0xa4   : > { %v1384_v21 = vld [vmem:[%s5560_s12 + $0x1b00] sm:$0xff]  ;;  %1902 = vmatpush.msrb.mxu1 %v1264_v20 }
  0xa5   : > { %v1520_v22 = vld [vmem:[%s5560_s12 + $0x1f40] sm:$0xff]  ;;  %1923 = vmatpush.msrb.mxu2 %v1384_v21  ;;  %v625_v21 = vld [vmem:[%s5560_s12 + $0x348] sm:$0xff] }
  0xa6   : > { %v1120_v23 = vld [vmem:[%s5560_s12 + $0x12c0] sm:$0xff]  ;;  %1942 = vmatpush.msrb.mxu3 %v1520_v22  ;;  %v761_v22 = vld [vmem:[%s5560_s12 + $0x788] sm:$0xff] }
  0xa7   : > { %v1256_v24 = vld [vmem:[%s5560_s12 + $0x1700] sm:$0xff]  ;;  %1884 = vmatpush.msrb.mxu0 %v1120_v23  ;;  %v5745_v23 = vld [vmem:[%s5586_s19 + $0x30] sm:$0xff] }
  0xa8   : > { %v1376_v25 = vld [vmem:[%s5560_s12 + $0x1ac0] sm:$0xff]  ;;  %1903 = vmatpush.msrb.mxu1 %v1256_v24 }
  0xa9   : > { %v1512_v26 = vld [vmem:[%s5560_s12 + $0x1f00] sm:$0xff]  ;;  %1924 = vmatpush.msrb.mxu2 %v1376_v25 }
  0xaa   : > { %v1112_v27 = vld [vmem:[%s5560_s12 + $0x1280] sm:$0xff]  ;;  %1943 = vmatpush.msrb.mxu3 %v1512_v26  ;;  %v617_v26 = vld [vmem:[%s5560_s12 + $0x308] sm:$0xff] }
  0xab   : > { %v1248_v28 = vld [vmem:[%s5560_s12 + $0x16c0] sm:$0xff]  ;;  %1885 = vmatpush.msrb.mxu0 %v1112_v27  ;;  %v753_v27 = vld [vmem:[%s5560_s12 + $0x748] sm:$0xff] }
  0xac   : > { %v1368_v29 = vld [vmem:[%s5560_s12 + $0x1a80] sm:$0xff]  ;;  %1904 = vmatpush.msrb.mxu1 %v1248_v28 }
  0xad   : > { %v1504_v30 = vld [vmem:[%s5560_s12 + $0x1ec0] sm:$0xff]  ;;  %1925 = vmatpush.msrb.mxu2 %v1368_v29  ;;  %v5756_v29 = vld [vmem:[%s5586_s19 + $0x38] sm:$0xff] }
  0xae   : > { %v1104_v31 = vld [vmem:[%s5560_s12 + $0x1240] sm:$0xff]  ;;  %1944 = vmatpush.msrb.mxu3 %v1504_v30 }
  0xaf   : > { %v1240_v32 = vld [vmem:[%s5560_s12 + $0x1680] sm:$0xff]  ;;  %1886 = vmatpush.msrb.mxu0 %v1104_v31 }
  0xb0   : > { %v1360_v33 = vld [vmem:[%s5560_s12 + $0x1a40] sm:$0xff]  ;;  %1905 = vmatpush.msrb.mxu1 %v1240_v32  ;;  %v609_v32 = vld [vmem:[%s5560_s12 + $0x2c8] sm:$0xff] }
  0xb1   : > { %v1496_v34 = vld [vmem:[%s5560_s12 + $0x1e80] sm:$0xff]  ;;  %1926 = vmatpush.msrb.mxu2 %v1360_v33  ;;  %v745_v33 = vld [vmem:[%s5560_s12 + $0x708] sm:$0xff] }
  0xb2   : > { %v1096_v35 = vld [vmem:[%s5560_s12 + $0x1200] sm:$0xff]  ;;  %1945 = vmatpush.msrb.mxu3 %v1496_v34  ;;  %v5764_v34 = vld [vmem:[%s5586_s19 + $0x28] sm:$0xff] }
  0xb3   : > { %v1232_v36 = vld [vmem:[%s5560_s12 + $0x1640] sm:$0xff]  ;;  %1887 = vmatpush.msrb.mxu0 %v1096_v35 }
  0xb4   : > { %v1352_v37 = vld [vmem:[%s5560_s12 + $0x1a00] sm:$0xff]  ;;  %1906 = vmatpush.msrb.mxu1 %v1232_v36 }
  0xb5   : > { %v1488_v38 = vld [vmem:[%s5560_s12 + $0x1e40] sm:$0xff]  ;;  %1927 = vmatpush.msrb.mxu2 %v1352_v37  ;;  %v601_v37 = vld [vmem:[%s5560_s12 + $0x288] sm:$0xff] }
  0xb6   : > { %v1088_v39 = vld [vmem:[%s5560_s12 + $0x11c0] sm:$0xff]  ;;  %1946 = vmatpush.msrb.mxu3 %v1488_v38  ;;  %v737_v38 = vld [vmem:[%s5560_s12 + $0x6c8] sm:$0xff] }
  0xb7   : > { %v1224_v40 = vld [vmem:[%s5560_s12 + $0x1600] sm:$0xff]  ;;  %1888 = vmatpush.msrb.mxu0 %v1088_v39 }
  0xb8   : > { %v1344_v41 = vld [vmem:[%s5560_s12 + $0x19c0] sm:$0xff]  ;;  %1907 = vmatpush.msrb.mxu1 %v1224_v40 }
  0xb9   : > { %v1480_v42 = vld [vmem:[%s5560_s12 + $0x1e00] sm:$0xff]  ;;  %1928 = vmatpush.msrb.mxu2 %v1344_v41  ;;  %v593_v41 = vld [vmem:[%s5560_s12 + $0x248] sm:$0xff] }
  0xba   : > { %v1080_v43 = vld [vmem:[%s5560_s12 + $0x1180] sm:$0xff]  ;;  %1947 = vmatpush.msrb.mxu3 %v1480_v42  ;;  %v729_v42 = vld [vmem:[%s5560_s12 + $0x688] sm:$0xff] }
  0xbb   : > { %v1216_v44 = vld [vmem:[%s5560_s12 + $0x15c0] sm:$0xff]  ;;  %1889 = vmatpush.msrb.mxu0 %v1080_v43 }
  0xbc   : > { %v1336_v45 = vld [vmem:[%s5560_s12 + $0x1980] sm:$0xff]  ;;  %1908 = vmatpush.msrb.mxu1 %v1216_v44 }
  0xbd   : > { %v1472_v46 = vld [vmem:[%s5560_s12 + $0x1dc0] sm:$0xff]  ;;  %1929 = vmatpush.msrb.mxu2 %v1336_v45  ;;  %v585_v45 = vld [vmem:[%s5560_s12 + $0x208] sm:$0xff] }
  0xbe   : > { %v1072_v47 = vld [vmem:[%s5560_s12 + $0x1140] sm:$0xff]  ;;  %1948 = vmatpush.msrb.mxu3 %v1472_v46  ;;  %v721_v46 = vld [vmem:[%s5560_s12 + $0x648] sm:$0xff] }
  0xbf   : > { %v1208_v48 = vld [vmem:[%s5560_s12 + $0x1580] sm:$0xff]  ;;  %1890 = vmatpush.msrb.mxu0 %v1072_v47 }
  0xc0   : > { %v1328_v49 = vld [vmem:[%s5560_s12 + $0x1940] sm:$0xff]  ;;  %1909 = vmatpush.msrb.mxu1 %v1208_v48 }
  0xc1   : > { %v1464_v50 = vld [vmem:[%s5560_s12 + $0x1d80] sm:$0xff]  ;;  %1930 = vmatpush.msrb.mxu2 %v1328_v49  ;;  %v577_v49 = vld [vmem:[%s5560_s12 + $0x1c8] sm:$0xff] }
  0xc2   : > { %v1064_v51 = vld [vmem:[%s5560_s12 + $0x1100] sm:$0xff]  ;;  %1949 = vmatpush.msrb.mxu3 %v1464_v50  ;;  %v713_v50 = vld [vmem:[%s5560_s12 + $0x608] sm:$0xff] }
  0xc3   : > { %v1200_v52 = vld [vmem:[%s5560_s12 + $0x1540] sm:$0xff]  ;;  %1891 = vmatpush.msrb.mxu0 %v1064_v51 }
  0xc4   : > { %v1320_v53 = vld [vmem:[%s5560_s12 + $0x1900] sm:$0xff]  ;;  %1910 = vmatpush.msrb.mxu1 %v1200_v52 }
  0xc5   : > { %v1456_v54 = vld [vmem:[%s5560_s12 + $0x1d40] sm:$0xff]  ;;  %1931 = vmatpush.msrb.mxu2 %v1320_v53  ;;  %v569_v53 = vld [vmem:[%s5560_s12 + $0x188] sm:$0xff] }
  0xc6   : > { %v1056_v55 = vld [vmem:[%s5560_s12 + $0x10c0] sm:$0xff]  ;;  %1950 = vmatpush.msrb.mxu3 %v1456_v54  ;;  %v705_v54 = vld [vmem:[%s5560_s12 + $0x5c8] sm:$0xff] }
  0xc7   : > { %v1192_v56 = vld [vmem:[%s5560_s12 + $0x1500] sm:$0xff]  ;;  %1892 = vmatpush.msrb.mxu0 %v1056_v55 }
  0xc8   : > { %v1312_v57 = vld [vmem:[%s5560_s12 + $0x18c0] sm:$0xff]  ;;  %1911 = vmatpush.msrb.mxu1 %v1192_v56 }
  0xc9   : > { %v1448_v58 = vld [vmem:[%s5560_s12 + $0x1d00] sm:$0xff]  ;;  %1932 = vmatpush.msrb.mxu2 %v1312_v57  ;;  %v561_v57 = vld [vmem:[%s5560_s12 + $0x148] sm:$0xff] }
  0xca   : > { %v1048_v59 = vld [vmem:[%s5560_s12 + $0x1080] sm:$0xff]  ;;  %1951 = vmatpush.msrb.mxu3 %v1448_v58  ;;  %v697_v58 = vld [vmem:[%s5560_s12 + $0x588] sm:$0xff] }
  0xcb   : > { %v1184_v60 = vld [vmem:[%s5560_s12 + $0x14c0] sm:$0xff]  ;;  %1893 = vmatpush.msrb.mxu0 %v1048_v59 }
  0xcc   : > { %v1304_v61 = vld [vmem:[%s5560_s12 + $0x1880] sm:$0xff]  ;;  %1912 = vmatpush.msrb.mxu1 %v1184_v60 }
  0xcd   : > { %v1440_v62 = vld [vmem:[%s5560_s12 + $0x1cc0] sm:$0xff]  ;;  %1933 = vmatpush.msrb.mxu2 %v1304_v61  ;;  %v553_v61 = vld [vmem:[%s5560_s12 + $0x108] sm:$0xff] }
  0xce   : > { %v1040_v63 = vld [vmem:[%s5560_s12 + $0x1040] sm:$0xff]  ;;  %1952 = vmatpush.msrb.mxu3 %v1440_v62  ;;  %v689_v62 = vld [vmem:[%s5560_s12 + $0x548] sm:$0xff] }
  0xcf   : > { %v1176_v0 = vld [vmem:[%s5560_s12 + $0x1480] sm:$0xff]  ;;  %1894 = vmatpush.msrb.mxu0 %v1040_v63 }
  0xd0   : > { %v1296_v1 = vld [vmem:[%s5560_s12 + $0x1840] sm:$0xff]  ;;  %1913 = vmatpush.msrb.mxu1 %v1176_v0 }
  0xd1   : > { %v1432_v2 = vld [vmem:[%s5560_s12 + $0x1c80] sm:$0xff]  ;;  %1934 = vmatpush.msrb.mxu2 %v1296_v1  ;;  %v545_v1 = vld [vmem:[%s5560_s12 + $0xc8] sm:$0xff] }
  0xd2   : > { %v1032_v4 = vld [vmem:[%s5560_s12 + $0x1000] sm:$0xff]  ;;  %1953 = vmatpush.msrb.mxu3 %v1432_v2  ;;  %v681_v2 = vld [vmem:[%s5560_s12 + $0x508] sm:$0xff] }
  0xd3   : > { %v1168_v5 = vld [vmem:[%s5560_s12 + $0x1440] sm:$0xff]  ;;  %1895 = vmatpush.msrb.mxu0 %v1032_v4 }
  0xd4   : > { %v1288_v6 = vld [vmem:[%s5560_s12 + $0x1800] sm:$0xff]  ;;  %1914 = vmatpush.msrb.mxu1 %v1168_v5 }
  0xd5   : > { %v1424_v7 = vld [vmem:[%s5560_s12 + $0x1c40] sm:$0xff]  ;;  %1935 = vmatpush.msrb.mxu2 %v1288_v6  ;;  %v537_v6 = vld [vmem:[%s5560_s12 + $0x88] sm:$0xff] }
  0xd6   : > { %v5720_v8 = vld [vmem:[%s5586_s19] sm:$0xff]  ;;  %1954 = vmatpush.msrb.mxu3 %v1424_v7  ;;  %1936 = vmatmul.f32.vlgmr.msrb.gmra.mxu2 %v5745_v23  ;;  %v673_v7 = vld [vmem:[%s5560_s12 + $0x4c8] sm:$0xff] }
  0xd7   : > { %v1664_v10 = vld [vmem:[%s5560_s12 + $0x23c0] sm:$0xff]  ;;  %1816 = vmatmul.f32.vlgmr.msra.gmra.mxu0 %v5720_v8  ;;  %2000 = vmatpush.msra.mxu2 %v641_v11 }
  0xd8   : > { %v1160_v12 = vld [vmem:[%s5560_s12 + $0x1400] sm:$0xff]  ;;  %1960 = vmatpush.msra.mxu0 %v1664_v10 }
  0xd9   : > { %v1416_v13 = vld [vmem:[%s5560_s12 + $0x1c00] sm:$0xff]  ;;  %1915 = vmatpush.msrb.mxu1 %v1160_v12  ;;  %2001 = vmatpush.msra.mxu2 %v633_v17  ;;  %v529_v12 = vld [vmem:[%s5560_s12 + $0x48] sm:$0xff] }
  0xda   : > { %v1656_v15 = vld [vmem:[%s5560_s12 + $0x2380] sm:$0xff]  ;;  %1955 = vmatpush.msrb.mxu3 %v1416_v13  ;;  %1916 = vmatmul.f32.vlgmr.msrb.gmra.mxu1 %v5764_v34  ;;  %v665_v13 = vld [vmem:[%s5560_s12 + $0x488] sm:$0xff] }
  0xdb   : > { %v1792_v16 = vld [vmem:[%s5560_s12 + $0x27c0] sm:$0xff]  ;;  %1961 = vmatpush.msra.mxu0 %v1656_v15  ;;  %2002 = vmatpush.msra.mxu2 %v625_v21  ;;  %v521_v17 = vld [vmem:[%s5560_s12 + $0x8] sm:$0xff] }
  0xdc   : > { %v1648_v19 = vld [vmem:[%s5560_s12 + $0x2340] sm:$0xff]  ;;  %1980 = vmatpush.msra.mxu1 %v1792_v16  ;;  %2020 = vmatpush.msra.mxu3 %v769_v18  ;;  %v657_v18 = vld [vmem:[%s5560_s12 + $0x448] sm:$0xff] }
  0xdd   : > { %v1784_v20 = vld [vmem:[%s5560_s12 + $0x2780] sm:$0xff]  ;;  %1962 = vmatpush.msra.mxu0 %v1648_v19  ;;  %2003 = vmatpush.msra.mxu2 %v617_v26  ;;  %v897_v21 = vld [vmem:[%s5560_s12 + $0xbc8] sm:$0xff] }
  0xde   : > { %v1640_v24 = vld [vmem:[%s5560_s12 + $0x2300] sm:$0xff]  ;;  %1981 = vmatpush.msra.mxu1 %v1784_v20  ;;  %2021 = vmatpush.msra.mxu3 %v761_v22  ;;  %v1153_v20 = vld [vmem:[%s5560_s12 + $0x13c8] sm:$0xff] }
  0xdf   : > { %v1776_v25 = vld [vmem:[%s5560_s12 + $0x2740] sm:$0xff]  ;;  %1963 = vmatpush.msra.mxu0 %v1640_v24  ;;  %1956 = vmatmul.f32.vlgmr.msrb.gmra.mxu3 %v5756_v29  ;;  %v649_v24 = vld [vmem:[%s5560_s12 + $0x408] sm:$0xff] }
  0xe0   : > { %v5752_v28 = vld [vmem:[%s5586_s19 + $0x20] sm:$0xff]  ;;  %1982 = vmatpush.msra.mxu1 %v1776_v25  ;;  %2022 = vmatpush.msra.mxu3 %v753_v27  ;;  %v5820_v25 = vld [vmem:[%s5586_s19 + $0x48] sm:$0xff] }
  0xe1   : > { %v1632_v30 = vld [vmem:[%s5560_s12 + $0x22c0] sm:$0xff]  ;;  %1896 = vmatmul.f32.vlgmr.msrb.gmra.mxu0 %v5752_v28  ;;  %2004 = vmatpush.msra.mxu2 %v609_v32  ;;  %v889_v26 = vld [vmem:[%s5560_s12 + $0xb88] sm:$0xff] }
  0xe2   : > { %v1768_v31 = vld [vmem:[%s5560_s12 + $0x2700] sm:$0xff]  ;;  %1964 = vmatpush.msra.mxu0 %v1632_v30  ;;  %2023 = vmatpush.msra.mxu3 %v745_v33  ;;  %v1025_v27 = vld [vmem:[%s5560_s12 + $0xfc8] sm:$0xff] }
  0xe3   : > { %v1624_v35 = vld [vmem:[%s5560_s12 + $0x2280] sm:$0xff]  ;;  %1983 = vmatpush.msra.mxu1 %v1768_v31  ;;  %2005 = vmatpush.msra.mxu2 %v601_v37  ;;  %v1145_v30 = vld [vmem:[%s5560_s12 + $0x1388] sm:$0xff] }
  0xe4   : > { %v1760_v36 = vld [vmem:[%s5560_s12 + $0x26c0] sm:$0xff]  ;;  %1965 = vmatpush.msra.mxu0 %v1624_v35  ;;  %2024 = vmatpush.msra.mxu3 %v737_v38  ;;  %v1281_v31 = vld [vmem:[%s5560_s12 + $0x17c8] sm:$0xff] }
  0xe5   : > { %v1616_v39 = vld [vmem:[%s5560_s12 + $0x2240] sm:$0xff]  ;;  %1984 = vmatpush.msra.mxu1 %v1760_v36  ;;  %2006 = vmatpush.msra.mxu2 %v593_v41  ;;  %v881_v32 = vld [vmem:[%s5560_s12 + $0xb48] sm:$0xff] }
  0xe6   : > { %v1752_v40 = vld [vmem:[%s5560_s12 + $0x2680] sm:$0xff]  ;;  %1966 = vmatpush.msra.mxu0 %v1616_v39  ;;  %2025 = vmatpush.msra.mxu3 %v729_v42  ;;  %v1017_v33 = vld [vmem:[%s5560_s12 + $0xf88] sm:$0xff] }
  0xe7   : > { %v1608_v43 = vld [vmem:[%s5560_s12 + $0x2200] sm:$0xff]  ;;  %1985 = vmatpush.msra.mxu1 %v1752_v40  ;;  %2007 = vmatpush.msra.mxu2 %v585_v45  ;;  %v1137_v35 = vld [vmem:[%s5560_s12 + $0x1348] sm:$0xff] }
  0xe8   : > { %v1744_v44 = vld [vmem:[%s5560_s12 + $0x2640] sm:$0xff]  ;;  %1967 = vmatpush.msra.mxu0 %v1608_v43  ;;  %2026 = vmatpush.msra.mxu3 %v721_v46  ;;  %v1273_v36 = vld [vmem:[%s5560_s12 + $0x1788] sm:$0xff] }
  0xe9   : > { %v1600_v47 = vld [vmem:[%s5560_s12 + $0x21c0] sm:$0xff]  ;;  %1986 = vmatpush.msra.mxu1 %v1744_v44  ;;  %2008 = vmatpush.msra.mxu2 %v577_v49  ;;  %v873_v37 = vld [vmem:[%s5560_s12 + $0xb08] sm:$0xff] }
  0xea   : > { %v1736_v48 = vld [vmem:[%s5560_s12 + $0x2600] sm:$0xff]  ;;  %1968 = vmatpush.msra.mxu0 %v1600_v47  ;;  %2027 = vmatpush.msra.mxu3 %v713_v50  ;;  %v1009_v38 = vld [vmem:[%s5560_s12 + $0xf48] sm:$0xff] }
  0xeb   : > { %v1592_v51 = vld [vmem:[%s5560_s12 + $0x2180] sm:$0xff]  ;;  %1987 = vmatpush.msra.mxu1 %v1736_v48  ;;  %2009 = vmatpush.msra.mxu2 %v569_v53  ;;  %v1129_v39 = vld [vmem:[%s5560_s12 + $0x1308] sm:$0xff] }
  0xec   : > { %v1728_v52 = vld [vmem:[%s5560_s12 + $0x25c0] sm:$0xff]  ;;  %1969 = vmatpush.msra.mxu0 %v1592_v51  ;;  %2028 = vmatpush.msra.mxu3 %v705_v54  ;;  %v1265_v40 = vld [vmem:[%s5560_s12 + $0x1748] sm:$0xff] }
  0xed   : > { %v1584_v55 = vld [vmem:[%s5560_s12 + $0x2140] sm:$0xff]  ;;  %1988 = vmatpush.msra.mxu1 %v1728_v52  ;;  %2010 = vmatpush.msra.mxu2 %v561_v57  ;;  %v865_v41 = vld [vmem:[%s5560_s12 + $0xac8] sm:$0xff] }
  0xee   : > { %v1720_v56 = vld [vmem:[%s5560_s12 + $0x2580] sm:$0xff]  ;;  %1970 = vmatpush.msra.mxu0 %v1584_v55  ;;  %2029 = vmatpush.msra.mxu3 %v697_v58  ;;  %v1001_v42 = vld [vmem:[%s5560_s12 + $0xf08] sm:$0xff] }
  0xef   : > { %v1576_v59 = vld [vmem:[%s5560_s12 + $0x2100] sm:$0xff]  ;;  %1989 = vmatpush.msra.mxu1 %v1720_v56  ;;  %2011 = vmatpush.msra.mxu2 %v553_v61  ;;  %v1121_v43 = vld [vmem:[%s5560_s12 + $0x12c8] sm:$0xff] }
  0xf0   : > { %v1712_v60 = vld [vmem:[%s5560_s12 + $0x2540] sm:$0xff]  ;;  %1971 = vmatpush.msra.mxu0 %v1576_v59  ;;  %2030 = vmatpush.msra.mxu3 %v689_v62  ;;  %v1257_v44 = vld [vmem:[%s5560_s12 + $0x1708] sm:$0xff] }
  0xf1   : > { %v1568_v63 = vld [vmem:[%s5560_s12 + $0x20c0] sm:$0xff]  ;;  %1990 = vmatpush.msra.mxu1 %v1712_v60  ;;  %2012 = vmatpush.msra.mxu2 %v545_v1  ;;  %v857_v45 = vld [vmem:[%s5560_s12 + $0xa88] sm:$0xff] }
  0xf2   : > { %v1704_v0 = vld [vmem:[%s5560_s12 + $0x2500] sm:$0xff]  ;;  %1972 = vmatpush.msra.mxu0 %v1568_v63  ;;  %2031 = vmatpush.msra.mxu3 %v681_v2  ;;  %v993_v46 = vld [vmem:[%s5560_s12 + $0xec8] sm:$0xff] }
  0xf3   : > { %v1560_v4 = vld [vmem:[%s5560_s12 + $0x2080] sm:$0xff]  ;;  %1991 = vmatpush.msra.mxu1 %v1704_v0  ;;  %2013 = vmatpush.msra.mxu2 %v537_v6  ;;  %v1113_v47 = vld [vmem:[%s5560_s12 + $0x1288] sm:$0xff] }
  0xf4   : > { %v1696_v5 = vld [vmem:[%s5560_s12 + $0x24c0] sm:$0xff]  ;;  %1973 = vmatpush.msra.mxu0 %v1560_v4  ;;  %2032 = vmatpush.msra.mxu3 %v673_v7  ;;  %v1249_v48 = vld [vmem:[%s5560_s12 + $0x16c8] sm:$0xff] }
  0xf5   : > { %v1552_v10 = vld [vmem:[%s5560_s12 + $0x2040] sm:$0xff]  ;;  %1992 = vmatpush.msra.mxu1 %v1696_v5  ;;  %2014 = vmatpush.msra.mxu2 %v529_v12  ;;  %v849_v49 = vld [vmem:[%s5560_s12 + $0xa48] sm:$0xff] }
  0xf6   : > { %v1688_v11 = vld [vmem:[%s5560_s12 + $0x2480] sm:$0xff]  ;;  %1974 = vmatpush.msra.mxu0 %v1552_v10  ;;  %2033 = vmatpush.msra.mxu3 %v665_v13  ;;  %v985_v50 = vld [vmem:[%s5560_s12 + $0xe88] sm:$0xff] }
  0xf7   : > { %v1544_v15 = vld [vmem:[%s5560_s12 + $0x2000] sm:$0xff]  ;;  %1993 = vmatpush.msra.mxu1 %v1688_v11  ;;  %2015 = vmatpush.msra.mxu2 %v521_v17  ;;  %v1105_v51 = vld [vmem:[%s5560_s12 + $0x1248] sm:$0xff] }
  0xf8   : > { %v1680_v16 = vld [vmem:[%s5560_s12 + $0x2440] sm:$0xff]  ;;  %1975 = vmatpush.msra.mxu0 %v1544_v15  ;;  %2034 = vmatpush.msra.mxu3 %v657_v18  ;;  %v1241_v52 = vld [vmem:[%s5560_s12 + $0x1688] sm:$0xff] }
  0xf9   : > { %v5813_v19 = vld [vmem:[%s5586_s19 + $0x40] sm:$0xff]  ;;  %1994 = vmatpush.msra.mxu1 %v1680_v16  ;;  %2080 = vmatpush.msrb.mxu2 %v1153_v20  ;;  %v841_v53 = vld [vmem:[%s5560_s12 + $0xa08] sm:$0xff] }
  0xfa   : > { %v1672_v22 = vld [vmem:[%s5560_s12 + $0x2400] sm:$0xff]  ;;  %1976 = vmatmul.f32.vlgmr.msra.gmra.mxu0 %v5813_v19  ;;  %2035 = vmatpush.msra.mxu3 %v649_v24  ;;  %v977_v54 = vld [vmem:[%s5560_s12 + $0xe48] sm:$0xff] }
  0xfb   : > { %2040 = vmatpush.msrb.mxu0 %v897_v21  ;;  %1995 = vmatpush.msra.mxu1 %v1672_v22  ;;  %v1097_v55 = vld [vmem:[%s5560_s12 + $0x1208] sm:$0xff] }
  0xfc   : > { %1996 = vmatmul.f32.vlgmr.msra.gmra.mxu1 %v5820_v25  ;;  %2081 = vmatpush.msrb.mxu2 %v1145_v30  ;;  %v1233_v56 = vld [vmem:[%s5560_s12 + $0x1648] sm:$0xff] }
  0xfd   : > { %2041 = vmatpush.msrb.mxu0 %v889_v26  ;;  %2060 = vmatpush.msrb.mxu1 %v1025_v27  ;;  %v833_v57 = vld [vmem:[%s5560_s12 + $0x9c8] sm:$0xff] }
  0xfe   : > { %2100 = vmatpush.msrb.mxu3 %v1281_v31  ;;  %2082 = vmatpush.msrb.mxu2 %v1137_v35  ;;  %v969_v58 = vld [vmem:[%s5560_s12 + $0xe08] sm:$0xff] }
  0xff   : > { %2042 = vmatpush.msrb.mxu0 %v881_v32  ;;  %2061 = vmatpush.msrb.mxu1 %v1017_v33  ;;  %v1089_v59 = vld [vmem:[%s5560_s12 + $0x11c8] sm:$0xff] }
 0x100   : > { %2101 = vmatpush.msrb.mxu3 %v1273_v36  ;;  %2083 = vmatpush.msrb.mxu2 %v1129_v39  ;;  %v1225_v60 = vld [vmem:[%s5560_s12 + $0x1608] sm:$0xff] }
 0x101   : > { %2043 = vmatpush.msrb.mxu0 %v873_v37  ;;  %2062 = vmatpush.msrb.mxu1 %v1009_v38  ;;  %v825_v61 = vld [vmem:[%s5560_s12 + $0x988] sm:$0xff] }
 0x102   : > { %2102 = vmatpush.msrb.mxu3 %v1265_v40  ;;  %2084 = vmatpush.msrb.mxu2 %v1121_v43  ;;  %v961_v62 = vld [vmem:[%s5560_s12 + $0xdc8] sm:$0xff] }
 0x103   : > { %2044 = vmatpush.msrb.mxu0 %v865_v41  ;;  %2063 = vmatpush.msrb.mxu1 %v1001_v42  ;;  %v1081_v63 = vld [vmem:[%s5560_s12 + $0x1188] sm:$0xff] }
 0x104   : > { %2103 = vmatpush.msrb.mxu3 %v1257_v44  ;;  %2085 = vmatpush.msrb.mxu2 %v1113_v47  ;;  %v1217_v0 = vld [vmem:[%s5560_s12 + $0x15c8] sm:$0xff] }
 0x105   : > { %2045 = vmatpush.msrb.mxu0 %v857_v45  ;;  %2064 = vmatpush.msrb.mxu1 %v993_v46  ;;  %v817_v1 = vld [vmem:[%s5560_s12 + $0x948] sm:$0xff] }
 0x106   : > { %2104 = vmatpush.msrb.mxu3 %v1249_v48  ;;  %2086 = vmatpush.msrb.mxu2 %v1105_v51  ;;  %v953_v2 = vld [vmem:[%s5560_s12 + $0xd88] sm:$0xff] }
 0x107   : > { %2046 = vmatpush.msrb.mxu0 %v849_v49  ;;  %2065 = vmatpush.msrb.mxu1 %v985_v50  ;;  %v1073_v4 = vld [vmem:[%s5560_s12 + $0x1148] sm:$0xff] }
 0x108   : > { %2105 = vmatpush.msrb.mxu3 %v1241_v52  ;;  %2087 = vmatpush.msrb.mxu2 %v1097_v55  ;;  %v1209_v5 = vld [vmem:[%s5560_s12 + $0x1588] sm:$0xff] }
 0x109   : > { %2047 = vmatpush.msrb.mxu0 %v841_v53  ;;  %2066 = vmatpush.msrb.mxu1 %v977_v54  ;;  %v809_v6 = vld [vmem:[%s5560_s12 + $0x908] sm:$0xff] }
 0x10a   : > { %2106 = vmatpush.msrb.mxu3 %v1233_v56  ;;  %2088 = vmatpush.msrb.mxu2 %v1089_v59  ;;  %v945_v7 = vld [vmem:[%s5560_s12 + $0xd48] sm:$0xff] }
 0x10b   : > { %2048 = vmatpush.msrb.mxu0 %v833_v57  ;;  %2067 = vmatpush.msrb.mxu1 %v969_v58  ;;  %v1065_v10 = vld [vmem:[%s5560_s12 + $0x1108] sm:$0xff] }
 0x10c   : > { %2107 = vmatpush.msrb.mxu3 %v1225_v60  ;;  %2089 = vmatpush.msrb.mxu2 %v1081_v63  ;;  %v1201_v11 = vld [vmem:[%s5560_s12 + $0x1548] sm:$0xff] }
 0x10d   : > { %2049 = vmatpush.msrb.mxu0 %v825_v61  ;;  %2068 = vmatpush.msrb.mxu1 %v961_v62  ;;  %v801_v12 = vld [vmem:[%s5560_s12 + $0x8c8] sm:$0xff] }
 0x10e   : > { %2108 = vmatpush.msrb.mxu3 %v1217_v0  ;;  %2090 = vmatpush.msrb.mxu2 %v1073_v4  ;;  %v937_v13 = vld [vmem:[%s5560_s12 + $0xd08] sm:$0xff] }
 0x10f   : > { %2050 = vmatpush.msrb.mxu0 %v817_v1  ;;  %2069 = vmatpush.msrb.mxu1 %v953_v2  ;;  %v1057_v15 = vld [vmem:[%s5560_s12 + $0x10c8] sm:$0xff] }
 0x110   : > { %2109 = vmatpush.msrb.mxu3 %v1209_v5  ;;  %v1193_v16 = vld [vmem:[%s5560_s12 + $0x1508] sm:$0xff]  ;;  %2091 = vmatpush.msrb.mxu2 %v1065_v10 }
 0x111   : > { %2051 = vmatpush.msrb.mxu0 %v809_v6  ;;  %2070 = vmatpush.msrb.mxu1 %v945_v7  ;;  %v793_v17 = vld [vmem:[%s5560_s12 + $0x888] sm:$0xff] }
 0x112   : > { %2110 = vmatpush.msrb.mxu3 %v1201_v11  ;;  %v929_v18 = vld [vmem:[%s5560_s12 + $0xcc8] sm:$0xff]  ;;  %2092 = vmatpush.msrb.mxu2 %v1057_v15 }
 0x113   : > { %2052 = vmatpush.msrb.mxu0 %v801_v12  ;;  %2071 = vmatpush.msrb.mxu1 %v937_v13  ;;  %v1049_v20 = vld [vmem:[%s5560_s12 + $0x1088] sm:$0xff] }
 0x114   : > { %v1185_v21 = vld [vmem:[%s5560_s12 + $0x14c8] sm:$0xff]  ;;  %2111 = vmatpush.msrb.mxu3 %v1193_v16  ;;  %2093 = vmatpush.msrb.mxu2 %v1049_v20 }
 0x115   : > { %v785_v22 = vld [vmem:[%s5560_s12 + $0x848] sm:$0xff]  ;;  %2053 = vmatpush.msrb.mxu0 %v793_v17  ;;  %2072 = vmatpush.msrb.mxu1 %v929_v18 }
 0x116   : > { %v921_v24 = vld [vmem:[%s5560_s12 + $0xc88] sm:$0xff]  ;;  %2112 = vmatpush.msrb.mxu3 %v1185_v21  ;;  %2016 = vmatmul.f32.vlgmr.msra.gmra.mxu2 %v5720_v8 }
 0x117   : > { %v1041_v26 = vld [vmem:[%s5560_s12 + $0x1048] sm:$0xff]  ;;  %2054 = vmatpush.msrb.mxu0 %v785_v22  ;;  %2073 = vmatpush.msrb.mxu1 %v921_v24 }
 0x118   : > { %v1177_v27 = vld [vmem:[%s5560_s12 + $0x1488] sm:$0xff]  ;;  %2094 = vmatpush.msrb.mxu2 %v1041_v26  ;;  %2036 = vmatmul.f32.vlgmr.msra.gmra.mxu3 %v5732_v14 }
 0x119   : > { %v777_v30 = vld [vmem:[%s5560_s12 + $0x808] sm:$0xff]  ;;  %2113 = vmatpush.msrb.mxu3 %v1177_v27 }
 0x11a   : > { %v913_v31 = vld [vmem:[%s5560_s12 + $0xc48] sm:$0xff]  ;;  %2055 = vmatpush.msrb.mxu0 %v777_v30 }
 0x11b   : > { %v1033_v32 = vld [vmem:[%s5560_s12 + $0x1008] sm:$0xff]  ;;  %2074 = vmatpush.msrb.mxu1 %v913_v31  ;;  %2056 = vmatmul.f32.vlgmr.msrb.gmra.mxu0 %v5713_v3 }
 0x11c   : > { %v1169_v33 = vld [vmem:[%s5560_s12 + $0x1448] sm:$0xff]  ;;  %2095 = vmatpush.msrb.mxu2 %v1033_v32 }
 0x11d   : > { %v1409_v35 = vld [vmem:[%s5560_s12 + $0x1bc8] sm:$0xff]  ;;  %2114 = vmatpush.msrb.mxu3 %v1169_v33 }
 0x11e   : > { %v1665_v36 = vld [vmem:[%s5560_s12 + $0x23c8] sm:$0xff]  ;;  %2120 = vmatpush.msra.mxu0 %v1409_v35  ;;  %2096 = vmatmul.f32.vlgmr.msrb.gmra.mxu2 %v5752_v28 }
 0x11f   : > { %v905_v37 = vld [vmem:[%s5560_s12 + $0xc08] sm:$0xff]  ;;  %2160 = vmatpush.msra.mxu2 %v1665_v36 }
 0x120   : > { %v1161_v38 = vld [vmem:[%s5560_s12 + $0x1408] sm:$0xff]  ;;  %2075 = vmatpush.msrb.mxu1 %v905_v37 }
 0x121   : > { %v1401_v39 = vld [vmem:[%s5560_s12 + $0x1b88] sm:$0xff]  ;;  %2115 = vmatpush.msrb.mxu3 %v1161_v38  ;;  %2076 = vmatmul.f32.vlgmr.msrb.gmra.mxu1 %v5724_v9 }
 0x122   : > { %v1537_v40 = vld [vmem:[%s5560_s12 + $0x1fc8] sm:$0xff]  ;;  %2121 = vmatpush.msra.mxu0 %v1401_v39  ;;  %2116 = vmatmul.f32.vlgmr.msrb.gmra.mxu3 %v5764_v34  ;;  %v642_v39 = vld [vmem:[%s5560_s12 + $0x3d0] sm:$0xff] }
 0x123   : > { %v1657_v8 = vld [vmem:[%s5560_s12 + $0x2388] sm:$0xff]  ;;  %2140 = vmatpush.msra.mxu1 %v1537_v40  ;;  %v898_v40 = vld [vmem:[%s5560_s12 + $0xbd0] sm:$0xff] }
 0x124   : > { %v1793_v41 = vld [vmem:[%s5560_s12 + $0x27c8] sm:$0xff]  ;;  %2161 = vmatpush.msra.mxu2 %v1657_v8 }
 0x125   : > { %v1393_v42 = vld [vmem:[%s5560_s12 + $0x1b48] sm:$0xff]  ;;  %2180 = vmatpush.msra.mxu3 %v1793_v41 }
 0x126   : > { %v1529_v43 = vld [vmem:[%s5560_s12 + $0x1f88] sm:$0xff]  ;;  %2122 = vmatpush.msra.mxu0 %v1393_v42  ;;  %v634_v42 = vld [vmem:[%s5560_s12 + $0x390] sm:$0xff] }
 0x127   : > { %v1649_v44 = vld [vmem:[%s5560_s12 + $0x2348] sm:$0xff]  ;;  %2141 = vmatpush.msra.mxu1 %v1529_v43  ;;  %v770_v43 = vld [vmem:[%s5560_s12 + $0x7d0] sm:$0xff] }
 0x128   : > { %v1785_v45 = vld [vmem:[%s5560_s12 + $0x2788] sm:$0xff]  ;;  %2162 = vmatpush.msra.mxu2 %v1649_v44  ;;  %v890_v44 = vld [vmem:[%s5560_s12 + $0xb90] sm:$0xff] }
 0x129   : > { %v1385_v14 = vld [vmem:[%s5560_s12 + $0x1b08] sm:$0xff]  ;;  %2181 = vmatpush.msra.mxu3 %v1785_v45  ;;  %v1026_v45 = vld [vmem:[%s5560_s12 + $0xfd0] sm:$0xff] }
 0x12a   : > { %v1521_v46 = vld [vmem:[%s5560_s12 + $0x1f48] sm:$0xff]  ;;  %2123 = vmatpush.msra.mxu0 %v1385_v14  ;;  %v882_v14 = vld [vmem:[%s5560_s12 + $0xb50] sm:$0xff] }
 0x12b   : > { %v1641_v47 = vld [vmem:[%s5560_s12 + $0x2308] sm:$0xff]  ;;  %2142 = vmatpush.msra.mxu1 %v1521_v46  ;;  %v1018_v46 = vld [vmem:[%s5560_s12 + $0xf90] sm:$0xff] }
 0x12c   : > { %v1777_v48 = vld [vmem:[%s5560_s12 + $0x2748] sm:$0xff]  ;;  %2163 = vmatpush.msra.mxu2 %v1641_v47  ;;  %v618_v47 = vld [vmem:[%s5560_s12 + $0x310] sm:$0xff] }
 0x12d   : > { %v1377_v49 = vld [vmem:[%s5560_s12 + $0x1ac8] sm:$0xff]  ;;  %2182 = vmatpush.msra.mxu3 %v1777_v48  ;;  %v754_v48 = vld [vmem:[%s5560_s12 + $0x750] sm:$0xff] }
 0x12e   : > { %v1513_v50 = vld [vmem:[%s5560_s12 + $0x1f08] sm:$0xff]  ;;  %2124 = vmatpush.msra.mxu0 %v1377_v49  ;;  %v610_v49 = vld [vmem:[%s5560_s12 + $0x2d0] sm:$0xff] }
 0x12f   : > { %v1633_v51 = vld [vmem:[%s5560_s12 + $0x22c8] sm:$0xff]  ;;  %2143 = vmatpush.msra.mxu1 %v1513_v50  ;;  %v746_v50 = vld [vmem:[%s5560_s12 + $0x710] sm:$0xff] }
 0x130   : > { %v1769_v52 = vld [vmem:[%s5560_s12 + $0x2708] sm:$0xff]  ;;  %2164 = vmatpush.msra.mxu2 %v1633_v51  ;;  %v866_v51 = vld [vmem:[%s5560_s12 + $0xad0] sm:$0xff] }
 0x131   : > { %v1369_v28 = vld [vmem:[%s5560_s12 + $0x1a88] sm:$0xff]  ;;  %2183 = vmatpush.msra.mxu3 %v1769_v52  ;;  %v1002_v52 = vld [vmem:[%s5560_s12 + $0xf10] sm:$0xff] }
 0x132   : > { %v1505_v53 = vld [vmem:[%s5560_s12 + $0x1ec8] sm:$0xff]  ;;  %2125 = vmatpush.msra.mxu0 %v1369_v28  ;;  %v602_v28 = vld [vmem:[%s5560_s12 + $0x290] sm:$0xff] }
 0x133   : > { %v1625_v54 = vld [vmem:[%s5560_s12 + $0x2288] sm:$0xff]  ;;  %2144 = vmatpush.msra.mxu1 %v1505_v53  ;;  %v738_v53 = vld [vmem:[%s5560_s12 + $0x6d0] sm:$0xff] }
 0x134   : > { %v1761_v55 = vld [vmem:[%s5560_s12 + $0x26c8] sm:$0xff]  ;;  %2165 = vmatpush.msra.mxu2 %v1625_v54  ;;  %v858_v54 = vld [vmem:[%s5560_s12 + $0xa90] sm:$0xff] }
 0x135   : > { %v1361_v3 = vld [vmem:[%s5560_s12 + $0x1a48] sm:$0xff]  ;;  %2184 = vmatpush.msra.mxu3 %v1761_v55  ;;  %v994_v55 = vld [vmem:[%s5560_s12 + $0xed0] sm:$0xff] }
 0x136   : > { %v1497_v56 = vld [vmem:[%s5560_s12 + $0x1e88] sm:$0xff]  ;;  %2126 = vmatpush.msra.mxu0 %v1361_v3  ;;  %v594_v3 = vld [vmem:[%s5560_s12 + $0x250] sm:$0xff] }
 0x137   : > { %v1617_v34 = vld [vmem:[%s5560_s12 + $0x2248] sm:$0xff]  ;;  %2145 = vmatpush.msra.mxu1 %v1497_v56  ;;  %v730_v56 = vld [vmem:[%s5560_s12 + $0x690] sm:$0xff] }
 0x138   : > { %v1753_v57 = vld [vmem:[%s5560_s12 + $0x2688] sm:$0xff]  ;;  %2166 = vmatpush.msra.mxu2 %v1617_v34  ;;  %v850_v34 = vld [vmem:[%s5560_s12 + $0xa50] sm:$0xff] }
 0x139   : > { %v1353_v58 = vld [vmem:[%s5560_s12 + $0x1a08] sm:$0xff]  ;;  %2185 = vmatpush.msra.mxu3 %v1753_v57  ;;  %v986_v57 = vld [vmem:[%s5560_s12 + $0xe90] sm:$0xff] }
 0x13a   : > { %v1489_v59 = vld [vmem:[%s5560_s12 + $0x1e48] sm:$0xff]  ;;  %2127 = vmatpush.msra.mxu0 %v1353_v58  ;;  %v586_v58 = vld [vmem:[%s5560_s12 + $0x210] sm:$0xff] }
 0x13b   : > { %v1609_v60 = vld [vmem:[%s5560_s12 + $0x2208] sm:$0xff]  ;;  %2146 = vmatpush.msra.mxu1 %v1489_v59  ;;  %v722_v59 = vld [vmem:[%s5560_s12 + $0x650] sm:$0xff] }
 0x13c   : > { %v1745_v9 = vld [vmem:[%s5560_s12 + $0x2648] sm:$0xff]  ;;  %2167 = vmatpush.msra.mxu2 %v1609_v60  ;;  %v842_v60 = vld [vmem:[%s5560_s12 + $0xa10] sm:$0xff] }
 0x13d   : > { %v1345_v61 = vld [vmem:[%s5560_s12 + $0x19c8] sm:$0xff]  ;;  %2186 = vmatpush.msra.mxu3 %v1745_v9  ;;  %v978_v9 = vld [vmem:[%s5560_s12 + $0xe50] sm:$0xff] }
 0x13e   : > { %v1481_v62 = vld [vmem:[%s5560_s12 + $0x1e08] sm:$0xff]  ;;  %2128 = vmatpush.msra.mxu0 %v1345_v61  ;;  %v578_v61 = vld [vmem:[%s5560_s12 + $0x1d0] sm:$0xff] }
 0x13f   : > { %v1601_v63 = vld [vmem:[%s5560_s12 + $0x21c8] sm:$0xff]  ;;  %2147 = vmatpush.msra.mxu1 %v1481_v62  ;;  %v714_v62 = vld [vmem:[%s5560_s12 + $0x610] sm:$0xff] }
 0x140   : > { %v1737_v0 = vld [vmem:[%s5560_s12 + $0x2608] sm:$0xff]  ;;  %2168 = vmatpush.msra.mxu2 %v1601_v63  ;;  %v834_v63 = vld [vmem:[%s5560_s12 + $0x9d0] sm:$0xff] }
 0x141   : > { %v1337_v1 = vld [vmem:[%s5560_s12 + $0x1988] sm:$0xff]  ;;  %2187 = vmatpush.msra.mxu3 %v1737_v0  ;;  %v970_v0 = vld [vmem:[%s5560_s12 + $0xe10] sm:$0xff] }
 0x142   : > { %v1473_v2 = vld [vmem:[%s5560_s12 + $0x1dc8] sm:$0xff]  ;;  %2129 = vmatpush.msra.mxu0 %v1337_v1  ;;  %v570_v1 = vld [vmem:[%s5560_s12 + $0x190] sm:$0xff] }
 0x143   : > { %v1593_v4 = vld [vmem:[%s5560_s12 + $0x2188] sm:$0xff]  ;;  %2148 = vmatpush.msra.mxu1 %v1473_v2  ;;  %v706_v2 = vld [vmem:[%s5560_s12 + $0x5d0] sm:$0xff] }
 0x144   : > { %v1729_v5 = vld [vmem:[%s5560_s12 + $0x25c8] sm:$0xff]  ;;  %2169 = vmatpush.msra.mxu2 %v1593_v4  ;;  %v826_v4 = vld [vmem:[%s5560_s12 + $0x990] sm:$0xff] }
 0x145   : > { %v1329_v6 = vld [vmem:[%s5560_s12 + $0x1948] sm:$0xff]  ;;  %2188 = vmatpush.msra.mxu3 %v1729_v5  ;;  %v962_v5 = vld [vmem:[%s5560_s12 + $0xdd0] sm:$0xff] }
 0x146   : > { %v1465_v7 = vld [vmem:[%s5560_s12 + $0x1d88] sm:$0xff]  ;;  %2130 = vmatpush.msra.mxu0 %v1329_v6  ;;  %v562_v6 = vld [vmem:[%s5560_s12 + $0x150] sm:$0xff] }
 0x147   : > { %v1585_v10 = vld [vmem:[%s5560_s12 + $0x2148] sm:$0xff]  ;;  %2149 = vmatpush.msra.mxu1 %v1465_v7  ;;  %v698_v7 = vld [vmem:[%s5560_s12 + $0x590] sm:$0xff] }
 0x148   : > { %v1721_v11 = vld [vmem:[%s5560_s12 + $0x2588] sm:$0xff]  ;;  %2170 = vmatpush.msra.mxu2 %v1585_v10  ;;  %v818_v10 = vld [vmem:[%s5560_s12 + $0x950] sm:$0xff] }
 0x149   : > { %v1321_v12 = vld [vmem:[%s5560_s12 + $0x1908] sm:$0xff]  ;;  %2189 = vmatpush.msra.mxu3 %v1721_v11  ;;  %v954_v11 = vld [vmem:[%s5560_s12 + $0xd90] sm:$0xff] }
 0x14a   : > { %v1457_v13 = vld [vmem:[%s5560_s12 + $0x1d48] sm:$0xff]  ;;  %2131 = vmatpush.msra.mxu0 %v1321_v12  ;;  %v554_v12 = vld [vmem:[%s5560_s12 + $0x110] sm:$0xff] }
 0x14b   : > { %v1577_v15 = vld [vmem:[%s5560_s12 + $0x2108] sm:$0xff]  ;;  %2150 = vmatpush.msra.mxu1 %v1457_v13  ;;  %v690_v13 = vld [vmem:[%s5560_s12 + $0x550] sm:$0xff] }
 0x14c   : > { %v1713_v16 = vld [vmem:[%s5560_s12 + $0x2548] sm:$0xff]  ;;  %2171 = vmatpush.msra.mxu2 %v1577_v15  ;;  %v810_v15 = vld [vmem:[%s5560_s12 + $0x910] sm:$0xff] }
 0x14d   : > { %v1313_v17 = vld [vmem:[%s5560_s12 + $0x18c8] sm:$0xff]  ;;  %2190 = vmatpush.msra.mxu3 %v1713_v16  ;;  %v946_v16 = vld [vmem:[%s5560_s12 + $0xd50] sm:$0xff] }
 0x14e   : > { %v1449_v18 = vld [vmem:[%s5560_s12 + $0x1d08] sm:$0xff]  ;;  %2132 = vmatpush.msra.mxu0 %v1313_v17  ;;  %v546_v17 = vld [vmem:[%s5560_s12 + $0xd0] sm:$0xff] }
 0x14f   : > { %v1569_v20 = vld [vmem:[%s5560_s12 + $0x20c8] sm:$0xff]  ;;  %2151 = vmatpush.msra.mxu1 %v1449_v18  ;;  %v682_v18 = vld [vmem:[%s5560_s12 + $0x510] sm:$0xff] }
 0x150   : > { %v1705_v21 = vld [vmem:[%s5560_s12 + $0x2508] sm:$0xff]  ;;  %2172 = vmatpush.msra.mxu2 %v1569_v20  ;;  %v802_v20 = vld [vmem:[%s5560_s12 + $0x8d0] sm:$0xff] }
 0x151   : > { %v1305_v22 = vld [vmem:[%s5560_s12 + $0x1888] sm:$0xff]  ;;  %2191 = vmatpush.msra.mxu3 %v1705_v21  ;;  %v938_v21 = vld [vmem:[%s5560_s12 + $0xd10] sm:$0xff] }
 0x152   : > { %v1441_v24 = vld [vmem:[%s5560_s12 + $0x1cc8] sm:$0xff]  ;;  %2133 = vmatpush.msra.mxu0 %v1305_v22  ;;  %v538_v22 = vld [vmem:[%s5560_s12 + $0x90] sm:$0xff] }
 0x153   : > { %v1561_v26 = vld [vmem:[%s5560_s12 + $0x2088] sm:$0xff]  ;;  %2152 = vmatpush.msra.mxu1 %v1441_v24  ;;  %v674_v24 = vld [vmem:[%s5560_s12 + $0x4d0] sm:$0xff] }
 0x154   : > { %v1697_v27 = vld [vmem:[%s5560_s12 + $0x24c8] sm:$0xff]  ;;  %2173 = vmatpush.msra.mxu2 %v1561_v26  ;;  %v794_v26 = vld [vmem:[%s5560_s12 + $0x890] sm:$0xff] }
 0x155   : > { %v1297_v30 = vld [vmem:[%s5560_s12 + $0x1848] sm:$0xff]  ;;  %2192 = vmatpush.msra.mxu3 %v1697_v27  ;;  %v930_v27 = vld [vmem:[%s5560_s12 + $0xcd0] sm:$0xff] }
 0x156   : > { %v1433_v31 = vld [vmem:[%s5560_s12 + $0x1c88] sm:$0xff]  ;;  %2134 = vmatpush.msra.mxu0 %v1297_v30  ;;  %v530_v30 = vld [vmem:[%s5560_s12 + $0x50] sm:$0xff] }
 0x157   : > { %v1553_v32 = vld [vmem:[%s5560_s12 + $0x2048] sm:$0xff]  ;;  %2153 = vmatpush.msra.mxu1 %v1433_v31  ;;  %v666_v31 = vld [vmem:[%s5560_s12 + $0x490] sm:$0xff] }
 0x158   : > { %v1689_v33 = vld [vmem:[%s5560_s12 + $0x2488] sm:$0xff]  ;;  %2174 = vmatpush.msra.mxu2 %v1553_v32  ;;  %v786_v32 = vld [vmem:[%s5560_s12 + $0x850] sm:$0xff] }
 0x159   : > { %v1289_v35 = vld [vmem:[%s5560_s12 + $0x1808] sm:$0xff]  ;;  %2193 = vmatpush.msra.mxu3 %v1689_v33  ;;  %v922_v33 = vld [vmem:[%s5560_s12 + $0xc90] sm:$0xff] }
 0x15a   : > { %v1425_v36 = vld [vmem:[%s5560_s12 + $0x1c48] sm:$0xff]  ;;  %2135 = vmatpush.msra.mxu0 %v1289_v35  ;;  %v522_v35 = vld [vmem:[%s5560_s12 + $0x10] sm:$0xff] }
 0x15b   : > { %v1545_v37 = vld [vmem:[%s5560_s12 + $0x2008] sm:$0xff]  ;;  %2154 = vmatpush.msra.mxu1 %v1425_v36  ;;  %2136 = vmatmul.f32.vlgmr.msra.gmra.mxu0 %v5745_v23  ;;  %v626_v23 = vld [vmem:[%s5560_s12 + $0x350] sm:$0xff] }
 0x15c   : > { %v1681_v38 = vld [vmem:[%s5560_s12 + $0x2448] sm:$0xff]  ;;  %2175 = vmatpush.msra.mxu2 %v1545_v37  ;;  %2200 = vmatpush.msrb.mxu0 %v642_v39  ;;  %v658_v36 = vld [vmem:[%s5560_s12 + $0x450] sm:$0xff]  ;;  %v1837_v37 = vpop.f32.mrf.mxu1 }
 0x15d   : > { %2194 = vmatpush.msra.mxu3 %v1681_v38  ;;  %v1417_v8 = vld [vmem:[%s5560_s12 + $0x1c08] sm:$0xff]  ;;  %2176 = vmatmul.f32.vlgmr.msra.gmra.mxu2 %v5813_v19  ;;  %v762_v19 = vld [vmem:[%s5560_s12 + $0x790] sm:$0xff] }
 0x15e   : > { %v1673_v41 = vld [vmem:[%s5560_s12 + $0x2408] sm:$0xff]  ;;  %2240 = vmatpush.msrb.mxu2 %v898_v40  ;;  %2155 = vmatpush.msra.mxu1 %v1417_v8  ;;  %v778_v38 = vld [vmem:[%s5560_s12 + $0x810] sm:$0xff] }
 0x15f   : > { %2195 = vmatpush.msra.mxu3 %v1673_v41  ;;  %2156 = vmatmul.f32.vlgmr.msra.gmra.mxu1 %v5756_v29  ;;  %v874_v29 = vld [vmem:[%s5560_s12 + $0xb10] sm:$0xff]  ;;  %v1817_v41 = vpop.f32.mrf.mxu0 }
 0x160   : > { %2196 = vmatmul.f32.vlgmr.msra.gmra.mxu3 %v5820_v25  ;;  %2201 = vmatpush.msrb.mxu0 %v634_v42  ;;  %v1010_v25 = vld [vmem:[%s5560_s12 + $0xf50] sm:$0xff] }
 0x161   : > { %2220 = vmatpush.msrb.mxu1 %v770_v43  ;;  %2241 = vmatpush.msrb.mxu2 %v890_v44  ;;  %v914_v39 = vld [vmem:[%s5560_s12 + $0xc50] sm:$0xff]  ;;  %v1838_v44 = vadd.f32 %v1837_v37, %v1817_v41 }
 0x162   : > { %2260 = vmatpush.msrb.mxu3 %v1026_v45  ;;  %2202 = vmatpush.msrb.mxu0 %v626_v23  ;;  %v1154_v40 = vld [vmem:[%s5560_s12 + $0x13d0] sm:$0xff] }
 0x163   : > { %2221 = vmatpush.msrb.mxu1 %v762_v19  ;;  %2242 = vmatpush.msrb.mxu2 %v882_v14  ;;  %v1410_v8 = vld [vmem:[%s5560_s12 + $0x1bd0] sm:$0xff]  ;;  %v1857_v19 = vpop.f32.mrf.mxu2 }
 0x164   : > { %2261 = vmatpush.msrb.mxu3 %v1018_v46  ;;  %2203 = vmatpush.msrb.mxu0 %v618_v47  ;;  %v650_v42 = vld [vmem:[%s5560_s12 + $0x410] sm:$0xff] }
 0x165   : > { %2222 = vmatpush.msrb.mxu1 %v754_v48  ;;  %2243 = vmatpush.msrb.mxu2 %v874_v29  ;;  %v906_v43 = vld [vmem:[%s5560_s12 + $0xc10] sm:$0xff] }
 0x166   : > { %2262 = vmatpush.msrb.mxu3 %v1010_v25  ;;  %2204 = vmatpush.msrb.mxu0 %v610_v49  ;;  %v1146_v45 = vld [vmem:[%s5560_s12 + $0x1390] sm:$0xff]  ;;  %v1858_v49 = vadd.f32 %v1857_v19, %v1838_v44 }
 0x167   : > { %2223 = vmatpush.msrb.mxu1 %v746_v50  ;;  %2244 = vmatpush.msrb.mxu2 %v866_v51  ;;  %v1282_v23 = vld [vmem:[%s5560_s12 + $0x17d0] sm:$0xff] }
 0x168   : > { %2263 = vmatpush.msrb.mxu3 %v1002_v52  ;;  %2205 = vmatpush.msrb.mxu0 %v602_v28  ;;  %v1402_v14 = vld [vmem:[%s5560_s12 + $0x1b90] sm:$0xff]  ;;  %v1877_v52 = vpop.f32.mrf.mxu3 }
 0x169   : > { %2224 = vmatpush.msrb.mxu1 %v738_v53  ;;  %2245 = vmatpush.msrb.mxu2 %v858_v54  ;;  %v1538_v46 = vld [vmem:[%s5560_s12 + $0x1fd0] sm:$0xff] }
 0x16a   : > { %2264 = vmatpush.msrb.mxu3 %v994_v55  ;;  %2206 = vmatpush.msrb.mxu0 %v594_v3  ;;  %v1138_v47 = vld [vmem:[%s5560_s12 + $0x1350] sm:$0xff]  ;;  %v1878_v3 = vadd.f32 %v1877_v52, %v1858_v49 }
 0x16b   : > { %2225 = vmatpush.msrb.mxu1 %v730_v56  ;;  %2246 = vmatpush.msrb.mxu2 %v850_v34  ;;  %v1274_v48 = vld [vmem:[%s5560_s12 + $0x1790] sm:$0xff] }
 0x16c   : > { %2265 = vmatpush.msrb.mxu3 %v986_v57  ;;  %2207 = vmatpush.msrb.mxu0 %v586_v58  ;;  %v1394_v29 = vld [vmem:[%s5560_s12 + $0x1b50] sm:$0xff]  ;;  %v1897_v57 = vpop.f32.mrf.mxu0 }
 0x16d   : > { %2226 = vmatpush.msrb.mxu1 %v722_v59  ;;  %2247 = vmatpush.msrb.mxu2 %v842_v60  ;;  %v1530_v25 = vld [vmem:[%s5560_s12 + $0x1f90] sm:$0xff] }
 0x16e   : > { %2266 = vmatpush.msrb.mxu3 %v978_v9  ;;  %2208 = vmatpush.msrb.mxu0 %v578_v61  ;;  %v1130_v50 = vld [vmem:[%s5560_s12 + $0x1310] sm:$0xff] }
 0x16f   : > { %2227 = vmatpush.msrb.mxu1 %v714_v62  ;;  %2248 = vmatpush.msrb.mxu2 %v834_v63  ;;  %v1266_v51 = vld [vmem:[%s5560_s12 + $0x1750] sm:$0xff]  ;;  %v1898_v63 = vadd.f32 %v1897_v57, %v1878_v3  ;;  %v6099_v57 = vld [vmem:[%s5586_s19 + $0x18] sm:$0xff] }
 0x170   : > { %2267 = vmatpush.msrb.mxu3 %v970_v0  ;;  %2209 = vmatpush.msrb.mxu0 %v570_v1  ;;  %v1386_v28 = vld [vmem:[%s5560_s12 + $0x1b10] sm:$0xff] }
 0x171   : > { %2228 = vmatpush.msrb.mxu1 %v706_v2  ;;  %2249 = vmatpush.msrb.mxu2 %v826_v4  ;;  %v1522_v53 = vld [vmem:[%s5560_s12 + $0x1f50] sm:$0xff]  ;;  %v1917_v2 = vpop.f32.mrf.mxu1 }
 0x172   : > { %2268 = vmatpush.msrb.mxu3 %v962_v5  ;;  %2210 = vmatpush.msrb.mxu0 %v562_v6  ;;  %v1122_v54 = vld [vmem:[%s5560_s12 + $0x12d0] sm:$0xff] }
 0x173   : > { %2229 = vmatpush.msrb.mxu1 %v698_v7  ;;  %2250 = vmatpush.msrb.mxu2 %v818_v10  ;;  %v1258_v55 = vld [vmem:[%s5560_s12 + $0x1710] sm:$0xff] }
 0x174   : > { %2269 = vmatpush.msrb.mxu3 %v954_v11  ;;  %2211 = vmatpush.msrb.mxu0 %v554_v12  ;;  %v1378_v56 = vld [vmem:[%s5560_s12 + $0x1ad0] sm:$0xff]  ;;  %v1918_v12 = vadd.f32 %v1917_v2, %v1898_v63 }
 0x175   : > { %2230 = vmatpush.msrb.mxu1 %v690_v13  ;;  %2251 = vmatpush.msrb.mxu2 %v810_v15  ;;  %v1514_v34 = vld [vmem:[%s5560_s12 + $0x1f10] sm:$0xff] }
 0x176   : > { %2270 = vmatpush.msrb.mxu3 %v946_v16  ;;  %2212 = vmatpush.msrb.mxu0 %v546_v17  ;;  %v1114_v58 = vld [vmem:[%s5560_s12 + $0x1290] sm:$0xff]  ;;  %v1937_v16 = vpop.f32.mrf.mxu2 }
 0x177   : > { %2231 = vmatpush.msrb.mxu1 %v682_v18  ;;  %2252 = vmatpush.msrb.mxu2 %v802_v20  ;;  %v1250_v59 = vld [vmem:[%s5560_s12 + $0x16d0] sm:$0xff] }
 0x178   : > { %2271 = vmatpush.msrb.mxu3 %v938_v21  ;;  %2213 = vmatpush.msrb.mxu0 %v538_v22  ;;  %v1370_v60 = vld [vmem:[%s5560_s12 + $0x1a90] sm:$0xff] }
 0x179   : > { %2232 = vmatpush.msrb.mxu1 %v674_v24  ;;  %2253 = vmatpush.msrb.mxu2 %v794_v26  ;;  %v1506_v9 = vld [vmem:[%s5560_s12 + $0x1ed0] sm:$0xff]  ;;  %v1938_v26 = vadd.f32 %v1937_v16, %v1918_v12  ;;  %v611_v12 = vld [vmem:[%s5560_s12 + $0x2d8] sm:$0xff] }
 0x17a   : > { %2272 = vmatpush.msrb.mxu3 %v930_v27  ;;  %2214 = vmatpush.msrb.mxu0 %v530_v30  ;;  %v1106_v61 = vld [vmem:[%s5560_s12 + $0x1250] sm:$0xff]  ;;  %v6131_v16 = vld [vmem:[%s5586_s19 + $0x38] sm:$0xff] }
 0x17b   : > { %2233 = vmatpush.msrb.mxu1 %v666_v31  ;;  %2254 = vmatpush.msrb.mxu2 %v786_v32  ;;  %v1242_v62 = vld [vmem:[%s5560_s12 + $0x1690] sm:$0xff]  ;;  %v1957_v31 = vpop.f32.mrf.mxu3 }
 0x17c   : > { %2273 = vmatpush.msrb.mxu3 %v922_v33  ;;  %2215 = vmatpush.msrb.mxu0 %v522_v35  ;;  %v1362_v0 = vld [vmem:[%s5560_s12 + $0x1a50] sm:$0xff] }
 0x17d   : > { %2234 = vmatpush.msrb.mxu1 %v658_v36  ;;  %2255 = vmatpush.msrb.mxu2 %v778_v38  ;;  %v1498_v1 = vld [vmem:[%s5560_s12 + $0x1e90] sm:$0xff] }
 0x17e   : > { %2274 = vmatpush.msrb.mxu3 %v914_v39  ;;  %2280 = vmatpush.msra.mxu0 %v1154_v40  ;;  %v1098_v4 = vld [vmem:[%s5560_s12 + $0x1210] sm:$0xff]  ;;  %v1958_v39 = vadd.f32 %v1957_v31, %v1938_v26 }
 0x17f   : > { %2320 = vmatpush.msra.mxu2 %v1410_v8  ;;  %2235 = vmatpush.msrb.mxu1 %v650_v42  ;;  %v1234_v5 = vld [vmem:[%s5560_s12 + $0x1650] sm:$0xff] }
 0x180   : > { %2275 = vmatpush.msrb.mxu3 %v906_v43  ;;  %2281 = vmatpush.msra.mxu0 %v1146_v45  ;;  %v1354_v6 = vld [vmem:[%s5560_s12 + $0x1a10] sm:$0xff]  ;;  %v1977_v43 = vpop.f32.mrf.mxu0 }
 0x181   : > { %2300 = vmatpush.msra.mxu1 %v1282_v23  ;;  %2321 = vmatpush.msra.mxu2 %v1402_v14  ;;  %v1490_v7 = vld [vmem:[%s5560_s12 + $0x1e50] sm:$0xff]  ;;  %v1978_v23 = vadd.f32 %v1977_v43, %v1958_v39  ;;  %v715_v39 = vld [vmem:[%s5560_s12 + $0x618] sm:$0xff] }
 0x182   : > { %2340 = vmatpush.msra.mxu3 %v1538_v46  ;;  %2282 = vmatpush.msra.mxu0 %v1138_v47  ;;  %v1090_v10 = vld [vmem:[%s5560_s12 + $0x11d0] sm:$0xff]  ;;  %v1997_v47 = vpop.f32.mrf.mxu1 }
 0x183   : > { %2301 = vmatpush.msra.mxu1 %v1274_v48  ;;  %2322 = vmatpush.msra.mxu2 %v1394_v29  ;;  %v1226_v11 = vld [vmem:[%s5560_s12 + $0x1610] sm:$0xff] }
 0x184   : > { %2341 = vmatpush.msra.mxu3 %v1530_v25  ;;  %2283 = vmatpush.msra.mxu0 %v1130_v50  ;;  %v1346_v13 = vld [vmem:[%s5560_s12 + $0x19d0] sm:$0xff]  ;;  %v1998_v25 = vadd.f32 %v1997_v47, %v1978_v23  ;;  %v699_v23 = vld [vmem:[%s5560_s12 + $0x598] sm:$0xff] }
 0x185   : > { %2302 = vmatpush.msra.mxu1 %v1266_v51  ;;  %2323 = vmatpush.msra.mxu2 %v1386_v28  ;;  %v1482_v15 = vld [vmem:[%s5560_s12 + $0x1e10] sm:$0xff]  ;;  %v691_v47 = vld [vmem:[%s5560_s12 + $0x558] sm:$0xff] }
 0x186   : > { %2342 = vmatpush.msra.mxu3 %v1522_v53  ;;  %2284 = vmatpush.msra.mxu0 %v1122_v54  ;;  %v1082_v17 = vld [vmem:[%s5560_s12 + $0x1190] sm:$0xff] }
 0x187   : > { %2303 = vmatpush.msra.mxu1 %v1258_v55  ;;  %2324 = vmatpush.msra.mxu2 %v1378_v56  ;;  %v1218_v18 = vld [vmem:[%s5560_s12 + $0x15d0] sm:$0xff]  ;;  %v643_v55 = vld [vmem:[%s5560_s12 + $0x3d8] sm:$0xff]  ;;  %v6094_v56 = vld [vmem:[%s5586_s19] sm:$0xff] }
 0x188   : > { %2343 = vmatpush.msra.mxu3 %v1514_v34  ;;  %2285 = vmatpush.msra.mxu0 %v1114_v58  ;;  %v1338_v20 = vld [vmem:[%s5560_s12 + $0x1990] sm:$0xff] }
 0x189   : > { %2304 = vmatpush.msra.mxu1 %v1250_v59  ;;  %2325 = vmatpush.msra.mxu2 %v1370_v60  ;;  %v1474_v21 = vld [vmem:[%s5560_s12 + $0x1dd0] sm:$0xff]  ;;  %v635_v60 = vld [vmem:[%s5560_s12 + $0x398] sm:$0xff] }
 0x18a   : > { %2344 = vmatpush.msra.mxu3 %v1506_v9  ;;  %2286 = vmatpush.msra.mxu0 %v1106_v61  ;;  %v1074_v22 = vld [vmem:[%s5560_s12 + $0x1150] sm:$0xff]  ;;  %v771_v9 = vld [vmem:[%s5560_s12 + $0x7d8] sm:$0xff]  ;;  %v6107_v61 = vld [vmem:[%s5586_s19 + $0x8] sm:$0xff] }
 0x18b   : > { %2305 = vmatpush.msra.mxu1 %v1242_v62  ;;  %2326 = vmatpush.msra.mxu2 %v1362_v0  ;;  %v1210_v24 = vld [vmem:[%s5560_s12 + $0x1590] sm:$0xff]  ;;  %v627_v0 = vld [vmem:[%s5560_s12 + $0x358] sm:$0xff] }
 0x18c   : > { %2345 = vmatpush.msra.mxu3 %v1498_v1  ;;  %2287 = vmatpush.msra.mxu0 %v1098_v4  ;;  %v1330_v27 = vld [vmem:[%s5560_s12 + $0x1950] sm:$0xff]  ;;  %v763_v1 = vld [vmem:[%s5560_s12 + $0x798] sm:$0xff] }
 0x18d   : > { %2306 = vmatpush.msra.mxu1 %v1234_v5  ;;  %2327 = vmatpush.msra.mxu2 %v1354_v6  ;;  %v1466_v30 = vld [vmem:[%s5560_s12 + $0x1d90] sm:$0xff]  ;;  %v619_v5 = vld [vmem:[%s5560_s12 + $0x318] sm:$0xff] }
 0x18e   : > { %2346 = vmatpush.msra.mxu3 %v1490_v7  ;;  %2288 = vmatpush.msra.mxu0 %v1090_v10  ;;  %v1066_v32 = vld [vmem:[%s5560_s12 + $0x1110] sm:$0xff]  ;;  %v755_v6 = vld [vmem:[%s5560_s12 + $0x758] sm:$0xff] }
 0x18f   : > { %2307 = vmatpush.msra.mxu1 %v1226_v11  ;;  %2328 = vmatpush.msra.mxu2 %v1346_v13  ;;  %v1202_v33 = vld [vmem:[%s5560_s12 + $0x1550] sm:$0xff]  ;;  %v6126_v13 = vld [vmem:[%s5586_s19 + $0x20] sm:$0xff] }
 0x190   : > { %2347 = vmatpush.msra.mxu3 %v1482_v15  ;;  %2289 = vmatpush.msra.mxu0 %v1082_v17  ;;  %v1322_v35 = vld [vmem:[%s5560_s12 + $0x1910] sm:$0xff]  ;;  %v747_v15 = vld [vmem:[%s5560_s12 + $0x718] sm:$0xff] }
 0x191   : > { %2308 = vmatpush.msra.mxu1 %v1218_v18  ;;  %2329 = vmatpush.msra.mxu2 %v1338_v20  ;;  %v1458_v36 = vld [vmem:[%s5560_s12 + $0x1d50] sm:$0xff]  ;;  %v603_v20 = vld [vmem:[%s5560_s12 + $0x298] sm:$0xff] }
 0x192   : > { %2348 = vmatpush.msra.mxu3 %v1474_v21  ;;  %2290 = vmatpush.msra.mxu0 %v1074_v22  ;;  %v1058_v37 = vld [vmem:[%s5560_s12 + $0x10d0] sm:$0xff]  ;;  %v739_v21 = vld [vmem:[%s5560_s12 + $0x6d8] sm:$0xff]  ;;  %v6139_v22 = vld [vmem:[%s5586_s19 + $0x28] sm:$0xff] }
 0x193   : > { %2309 = vmatpush.msra.mxu1 %v1210_v24  ;;  %2330 = vmatpush.msra.mxu2 %v1330_v27  ;;  %v1194_v38 = vld [vmem:[%s5560_s12 + $0x1510] sm:$0xff]  ;;  %v595_v27 = vld [vmem:[%s5560_s12 + $0x258] sm:$0xff] }
 0x194   : > { %2349 = vmatpush.msra.mxu3 %v1466_v30  ;;  %2291 = vmatpush.msra.mxu0 %v1066_v32  ;;  %v1314_v40 = vld [vmem:[%s5560_s12 + $0x18d0] sm:$0xff]  ;;  %v731_v30 = vld [vmem:[%s5560_s12 + $0x698] sm:$0xff] }
 0x195   : > { %2310 = vmatpush.msra.mxu1 %v1202_v33  ;;  %v1450_v8 = vld [vmem:[%s5560_s12 + $0x1d10] sm:$0xff]  ;;  %2331 = vmatpush.msra.mxu2 %v1322_v35  ;;  %v587_v33 = vld [vmem:[%s5560_s12 + $0x218] sm:$0xff] }
 0x196   : > { %2350 = vmatpush.msra.mxu3 %v1458_v36  ;;  %v1050_v41 = vld [vmem:[%s5560_s12 + $0x1090] sm:$0xff]  ;;  %2292 = vmatpush.msra.mxu0 %v1058_v37  ;;  %v723_v35 = vld [vmem:[%s5560_s12 + $0x658] sm:$0xff] }
 0x197   : > { %v1186_v42 = vld [vmem:[%s5560_s12 + $0x14d0] sm:$0xff]  ;;  %2311 = vmatpush.msra.mxu1 %v1194_v38  ;;  %2332 = vmatpush.msra.mxu2 %v1314_v40  ;;  %v579_v38 = vld [vmem:[%s5560_s12 + $0x1d8] sm:$0xff] }
 0x198   : > { %v1306_v44 = vld [vmem:[%s5560_s12 + $0x1890] sm:$0xff]  ;;  %2351 = vmatpush.msra.mxu3 %v1450_v8  ;;  %2293 = vmatpush.msra.mxu0 %v1050_v41  ;;  %v571_v41 = vld [vmem:[%s5560_s12 + $0x198] sm:$0xff] }
 0x199   : > { %v1442_v45 = vld [vmem:[%s5560_s12 + $0x1cd0] sm:$0xff]  ;;  %2312 = vmatpush.msra.mxu1 %v1186_v42  ;;  %2333 = vmatpush.msra.mxu2 %v1306_v44  ;;  %v707_v42 = vld [vmem:[%s5560_s12 + $0x5d8] sm:$0xff] }
 0x19a   : > { %v1042_v19 = vld [vmem:[%s5560_s12 + $0x1050] sm:$0xff]  ;;  %2352 = vmatpush.msra.mxu3 %v1442_v45  ;;  %2216 = vmatmul.f32.vlgmr.msrb.gmra.mxu0 %v6094_v56  ;;  %v563_v45 = vld [vmem:[%s5560_s12 + $0x158] sm:$0xff] }
 0x19b   : > { %v1178_v14 = vld [vmem:[%s5560_s12 + $0x1490] sm:$0xff]  ;;  %2294 = vmatpush.msra.mxu0 %v1042_v19  ;;  %2276 = vmatmul.f32.vlgmr.msrb.gmra.mxu3 %v6099_v57 }
 0x19c   : > { %v502_v46 = vld [vmem:[#allocation2 + $0x30] sm:$0xff]  ;;  %2313 = vmatpush.msra.mxu1 %v1178_v14 }
 0x19d   : > { %v1298_v48 = vld [vmem:[%s5560_s12 + $0x1850] sm:$0xff]  ;;  %v3400_v52 = vadd.f32 %v1998_v25, %v502_v46  ;;  %2236 = vmatmul.f32.vlgmr.msrb.gmra.mxu1 %v6107_v61  ;;  %v555_v46 = vld [vmem:[%s5560_s12 + $0x118] sm:$0xff] }
 0x19e   : > { %v1434_v29 = vld [vmem:[%s5560_s12 + $0x1c90] sm:$0xff]  ;;  %2334 = vmatpush.msra.mxu2 %v1298_v48  ;;  %v547_v25 = vld [vmem:[%s5560_s12 + $0xd8] sm:$0xff] }
 0x19f   : > { %v1034_v49 = vld [vmem:[%s5560_s12 + $0x1010] sm:$0xff]  ;;  %2353 = vmatpush.msra.mxu3 %v1434_v29  ;;  %3408 = vst [vmem:[#allocation2 + $0x30] sm:$0xff] %v3400_v52  ;;  %v539_v52 = vld [vmem:[%s5560_s12 + $0x98] sm:$0xff] }
 0x1a0   : > { %v1170_v50 = vld [vmem:[%s5560_s12 + $0x1450] sm:$0xff]  ;;  %2295 = vmatpush.msra.mxu0 %v1034_v49  ;;  %v683_v49 = vld [vmem:[%s5560_s12 + $0x518] sm:$0xff] }
 0x1a1   : > { %v1290_v51 = vld [vmem:[%s5560_s12 + $0x1810] sm:$0xff]  ;;  %2314 = vmatpush.msra.mxu1 %v1170_v50 }
 0x1a2   : > { %v1426_v28 = vld [vmem:[%s5560_s12 + $0x1c50] sm:$0xff]  ;;  %2335 = vmatpush.msra.mxu2 %v1290_v51  ;;  %2296 = vmatmul.f32.vlgmr.msra.gmra.mxu0 %v6126_v13 }
 0x1a3   : > { %v6087_v53 = vld [vmem:[%s5586_s19 + $0x10] sm:$0xff]  ;;  %2354 = vmatpush.msra.mxu3 %v1426_v28  ;;  %v675_v28 = vld [vmem:[%s5560_s12 + $0x4d8] sm:$0xff] }
 0x1a4   : > { %2256 = vmatmul.f32.vlgmr.msrb.gmra.mxu2 %v6087_v53  ;;  %v1666_v54 = vld [vmem:[%s5560_s12 + $0x23d0] sm:$0xff] }
 0x1a5   : > { %v1162_v3 = vld [vmem:[%s5560_s12 + $0x1410] sm:$0xff]  ;;  %2360 = vmatpush.msrb.mxu0 %v1666_v54  ;;  %2400 = vmatpush.msrb.mxu2 %v643_v55 }
 0x1a6   : > { %v1418_v34 = vld [vmem:[%s5560_s12 + $0x1c10] sm:$0xff]  ;;  %2315 = vmatpush.msra.mxu1 %v1162_v3  ;;  %v531_v3 = vld [vmem:[%s5560_s12 + $0x58] sm:$0xff] }
 0x1a7   : > { %v1658_v58 = vld [vmem:[%s5560_s12 + $0x2390] sm:$0xff]  ;;  %2355 = vmatpush.msra.mxu3 %v1418_v34  ;;  %2401 = vmatpush.msrb.mxu2 %v635_v60  ;;  %v667_v34 = vld [vmem:[%s5560_s12 + $0x498] sm:$0xff] }
 0x1a8   : > { %v1794_v59 = vld [vmem:[%s5560_s12 + $0x27d0] sm:$0xff]  ;;  %2361 = vmatpush.msrb.mxu0 %v1658_v58  ;;  %2356 = vmatmul.f32.vlgmr.msra.gmra.mxu3 %v6131_v16  ;;  %v523_v60 = vld [vmem:[%s5560_s12 + $0x18] sm:$0xff] }
 0x1a9   : > { %v1650_v62 = vld [vmem:[%s5560_s12 + $0x2350] sm:$0xff]  ;;  %2380 = vmatpush.msrb.mxu1 %v1794_v59  ;;  %2420 = vmatpush.msrb.mxu3 %v771_v9  ;;  %v659_v9 = vld [vmem:[%s5560_s12 + $0x458] sm:$0xff] }
 0x1aa   : > { %v1786_v63 = vld [vmem:[%s5560_s12 + $0x2790] sm:$0xff]  ;;  %2362 = vmatpush.msrb.mxu0 %v1650_v62  ;;  %2402 = vmatpush.msrb.mxu2 %v627_v0  ;;  %v1155_v62 = vld [vmem:[%s5560_s12 + $0x13d8] sm:$0xff] }
 0x1ab   : > { %v1642_v2 = vld [vmem:[%s5560_s12 + $0x2310] sm:$0xff]  ;;  %2381 = vmatpush.msrb.mxu1 %v1786_v63  ;;  %2421 = vmatpush.msrb.mxu3 %v763_v1  ;;  %v899_v63 = vld [vmem:[%s5560_s12 + $0xbd8] sm:$0xff] }
 0x1ac   : > { %v1778_v4 = vld [vmem:[%s5560_s12 + $0x2750] sm:$0xff]  ;;  %2363 = vmatpush.msrb.mxu0 %v1642_v2  ;;  %2403 = vmatpush.msrb.mxu2 %v619_v5  ;;  %v651_v1 = vld [vmem:[%s5560_s12 + $0x418] sm:$0xff]  ;;  %v6187_v2 = vld [vmem:[%s5586_s19 + $0x40] sm:$0xff] }
 0x1ad   : > { %v6119_v7 = vld [vmem:[%s5586_s19 + $0x30] sm:$0xff]  ;;  %2382 = vmatpush.msrb.mxu1 %v1778_v4  ;;  %2422 = vmatpush.msrb.mxu3 %v755_v6  ;;  %v891_v4 = vld [vmem:[%s5560_s12 + $0xb98] sm:$0xff] }
 0x1ae   : > { %2336 = vmatmul.f32.vlgmr.msra.gmra.mxu2 %v6119_v7  ;;  %v1634_v10 = vld [vmem:[%s5560_s12 + $0x22d0] sm:$0xff]  ;;  %2316 = vmatmul.f32.vlgmr.msra.gmra.mxu1 %v6139_v22  ;;  %v1027_v5 = vld [vmem:[%s5560_s12 + $0xfd8] sm:$0xff] }
 0x1af   : > { %v1770_v11 = vld [vmem:[%s5560_s12 + $0x2710] sm:$0xff]  ;;  %2364 = vmatpush.msrb.mxu0 %v1634_v10  ;;  %2404 = vmatpush.msrb.mxu2 %v611_v12  ;;  %v1147_v6 = vld [vmem:[%s5560_s12 + $0x1398] sm:$0xff] }
 0x1b0   : > { %v1626_v17 = vld [vmem:[%s5560_s12 + $0x2290] sm:$0xff]  ;;  %2383 = vmatpush.msrb.mxu1 %v1770_v11  ;;  %2423 = vmatpush.msrb.mxu3 %v747_v15  ;;  %v1283_v10 = vld [vmem:[%s5560_s12 + $0x17d8] sm:$0xff]  ;;  %v6195_v11 = vld [vmem:[%s5586_s19 + $0x48] sm:$0xff] }
 0x1b1   : > { %v1762_v18 = vld [vmem:[%s5560_s12 + $0x26d0] sm:$0xff]  ;;  %2365 = vmatpush.msrb.mxu0 %v1626_v17  ;;  %2405 = vmatpush.msrb.mxu2 %v603_v20  ;;  %v883_v12 = vld [vmem:[%s5560_s12 + $0xb58] sm:$0xff]  ;;  %v2037_v20 = vpop.f32.mrf.mxu3 }
 0x1b2   : > { %v1618_v24 = vld [vmem:[%s5560_s12 + $0x2250] sm:$0xff]  ;;  %2384 = vmatpush.msrb.mxu1 %v1762_v18  ;;  %2424 = vmatpush.msrb.mxu3 %v739_v21  ;;  %v1019_v15 = vld [vmem:[%s5560_s12 + $0xf98] sm:$0xff] }
 0x1b3   : > { %v1754_v26 = vld [vmem:[%s5560_s12 + $0x2690] sm:$0xff]  ;;  %2366 = vmatpush.msrb.mxu0 %v1618_v24  ;;  %2406 = vmatpush.msrb.mxu2 %v595_v27  ;;  %v1139_v17 = vld [vmem:[%s5560_s12 + $0x1358] sm:$0xff] }
 0x1b4   : > { %v1610_v31 = vld [vmem:[%s5560_s12 + $0x2210] sm:$0xff]  ;;  %2385 = vmatpush.msrb.mxu1 %v1754_v26  ;;  %2425 = vmatpush.msrb.mxu3 %v731_v30  ;;  %v1275_v18 = vld [vmem:[%s5560_s12 + $0x1798] sm:$0xff]  ;;  %v2017_v26 = vpop.f32.mrf.mxu2 }
 0x1b5   : > { %v1746_v32 = vld [vmem:[%s5560_s12 + $0x2650] sm:$0xff]  ;;  %2367 = vmatpush.msrb.mxu0 %v1610_v31  ;;  %2407 = vmatpush.msrb.mxu2 %v587_v33  ;;  %v875_v21 = vld [vmem:[%s5560_s12 + $0xb18] sm:$0xff]  ;;  %v2038_v31 = vadd.f32 %v2037_v20, %v2017_v26 }
 0x1b6   : > { %v1602_v36 = vld [vmem:[%s5560_s12 + $0x21d0] sm:$0xff]  ;;  %2386 = vmatpush.msrb.mxu1 %v1746_v32  ;;  %2426 = vmatpush.msrb.mxu3 %v723_v35  ;;  %v1011_v24 = vld [vmem:[%s5560_s12 + $0xf58] sm:$0xff] }
 0x1b7   : > { %v1738_v37 = vld [vmem:[%s5560_s12 + $0x2610] sm:$0xff]  ;;  %2368 = vmatpush.msrb.mxu0 %v1602_v36  ;;  %2408 = vmatpush.msrb.mxu2 %v579_v38  ;;  %v1131_v27 = vld [vmem:[%s5560_s12 + $0x1318] sm:$0xff] }
 0x1b8   : > { %v1594_v40 = vld [vmem:[%s5560_s12 + $0x2190] sm:$0xff]  ;;  %2387 = vmatpush.msrb.mxu1 %v1738_v37  ;;  %2427 = vmatpush.msrb.mxu3 %v715_v39  ;;  %v1267_v30 = vld [vmem:[%s5560_s12 + $0x1758] sm:$0xff]  ;;  %v2057_v37 = vpop.f32.mrf.mxu0 }
 0x1b9   : > { %v1730_v8 = vld [vmem:[%s5560_s12 + $0x25d0] sm:$0xff]  ;;  %2369 = vmatpush.msrb.mxu0 %v1594_v40  ;;  %2409 = vmatpush.msrb.mxu2 %v571_v41  ;;  %v867_v32 = vld [vmem:[%s5560_s12 + $0xad8] sm:$0xff]  ;;  %v2058_v41 = vadd.f32 %v2057_v37, %v2038_v31 }
 0x1ba   : > { %v1586_v43 = vld [vmem:[%s5560_s12 + $0x2150] sm:$0xff]  ;;  %2388 = vmatpush.msrb.mxu1 %v1730_v8  ;;  %2428 = vmatpush.msrb.mxu3 %v707_v42  ;;  %v1003_v33 = vld [vmem:[%s5560_s12 + $0xf18] sm:$0xff] }
 0x1bb   : > { %v1722_v44 = vld [vmem:[%s5560_s12 + $0x2590] sm:$0xff]  ;;  %2370 = vmatpush.msrb.mxu0 %v1586_v43  ;;  %2410 = vmatpush.msrb.mxu2 %v563_v45  ;;  %v1123_v35 = vld [vmem:[%s5560_s12 + $0x12d8] sm:$0xff] }
 0x1bc   : > { %v1578_v19 = vld [vmem:[%s5560_s12 + $0x2110] sm:$0xff]  ;;  %2389 = vmatpush.msrb.mxu1 %v1722_v44  ;;  %2429 = vmatpush.msrb.mxu3 %v699_v23  ;;  %v1259_v36 = vld [vmem:[%s5560_s12 + $0x1718] sm:$0xff]  ;;  %v2077_v44 = vpop.f32.mrf.mxu1 }
 0x1bd   : > { %v1714_v14 = vld [vmem:[%s5560_s12 + $0x2550] sm:$0xff]  ;;  %2371 = vmatpush.msrb.mxu0 %v1578_v19  ;;  %2411 = vmatpush.msrb.mxu2 %v555_v46  ;;  %v859_v38 = vld [vmem:[%s5560_s12 + $0xa98] sm:$0xff] }
 0x1be   : > { %v1570_v48 = vld [vmem:[%s5560_s12 + $0x20d0] sm:$0xff]  ;;  %2390 = vmatpush.msrb.mxu1 %v1714_v14  ;;  %2430 = vmatpush.msrb.mxu3 %v691_v47  ;;  %v995_v39 = vld [vmem:[%s5560_s12 + $0xed8] sm:$0xff] }
 0x1bf   : > { %v1706_v29 = vld [vmem:[%s5560_s12 + $0x2510] sm:$0xff]  ;;  %2372 = vmatpush.msrb.mxu0 %v1570_v48  ;;  %2412 = vmatpush.msrb.mxu2 %v547_v25  ;;  %v1115_v40 = vld [vmem:[%s5560_s12 + $0x1298] sm:$0xff]  ;;  %v2078_v48 = vadd.f32 %v2077_v44, %v2058_v41  ;;  %v503_v44 = vld [vmem:[#allocation2] sm:$0xff] }
 0x1c0   : > { %v1562_v50 = vld [vmem:[%s5560_s12 + $0x2090] sm:$0xff]  ;;  %2391 = vmatpush.msrb.mxu1 %v1706_v29  ;;  %2431 = vmatpush.msrb.mxu3 %v683_v49  ;;  %v1251_v8 = vld [vmem:[%s5560_s12 + $0x16d8] sm:$0xff]  ;;  %v2097_v49 = vpop.f32.mrf.mxu2 }
 0x1c1   : > { %v1698_v51 = vld [vmem:[%s5560_s12 + $0x24d0] sm:$0xff]  ;;  %2373 = vmatpush.msrb.mxu0 %v1562_v50  ;;  %2413 = vmatpush.msrb.mxu2 %v539_v52  ;;  %v851_v42 = vld [vmem:[%s5560_s12 + $0xa58] sm:$0xff] }
 0x1c2   : > { %v1554_v54 = vld [vmem:[%s5560_s12 + $0x2050] sm:$0xff]  ;;  %2392 = vmatpush.msrb.mxu1 %v1698_v51  ;;  %2432 = vmatpush.msrb.mxu3 %v675_v28  ;;  %v987_v43 = vld [vmem:[%s5560_s12 + $0xe98] sm:$0xff] }
 0x1c3   : > { %v1690_v55 = vld [vmem:[%s5560_s12 + $0x2490] sm:$0xff]  ;;  %2374 = vmatpush.msrb.mxu0 %v1554_v54  ;;  %2414 = vmatpush.msrb.mxu2 %v531_v3  ;;  %v1107_v45 = vld [vmem:[%s5560_s12 + $0x1258] sm:$0xff]  ;;  %v2098_v3 = vadd.f32 %v2097_v49, %v2078_v48 }
 0x1c4   : > { %v1546_v58 = vld [vmem:[%s5560_s12 + $0x2010] sm:$0xff]  ;;  %2393 = vmatpush.msrb.mxu1 %v1690_v55  ;;  %2433 = vmatpush.msrb.mxu3 %v667_v34  ;;  %v1243_v23 = vld [vmem:[%s5560_s12 + $0x1698] sm:$0xff] }
 0x1c5   : > { %v1682_v59 = vld [vmem:[%s5560_s12 + $0x2450] sm:$0xff]  ;;  %2375 = vmatpush.msrb.mxu0 %v1546_v58  ;;  %2415 = vmatpush.msrb.mxu2 %v523_v60  ;;  %v843_v19 = vld [vmem:[%s5560_s12 + $0xa18] sm:$0xff] }
 0x1c6   : > { %2394 = vmatpush.msrb.mxu1 %v1682_v59  ;;  %v1674_v0 = vld [vmem:[%s5560_s12 + $0x2410] sm:$0xff]  ;;  %2434 = vmatpush.msrb.mxu3 %v659_v9  ;;  %v979_v14 = vld [vmem:[%s5560_s12 + $0xe58] sm:$0xff]  ;;  %v2117_v59 = vpop.f32.mrf.mxu3 }
 0x1c7   : > { %2376 = vmatmul.f32.vlgmr.msrb.gmra.mxu0 %v6187_v2  ;;  %2480 = vmatpush.msra.mxu2 %v1155_v62  ;;  %v1099_v46 = vld [vmem:[%s5560_s12 + $0x1218] sm:$0xff] }
 0x1c8   : > { %2440 = vmatpush.msra.mxu0 %v899_v63  ;;  %2395 = vmatpush.msrb.mxu1 %v1674_v0  ;;  %v1235_v47 = vld [vmem:[%s5560_s12 + $0x1658] sm:$0xff] }
 0x1c9   : > { %2435 = vmatpush.msrb.mxu3 %v651_v1  ;;  %2396 = vmatmul.f32.vlgmr.msrb.gmra.mxu1 %v6195_v11  ;;  %v835_v29 = vld [vmem:[%s5560_s12 + $0x9d8] sm:$0xff] }
 0x1ca   : > { %2441 = vmatpush.msra.mxu0 %v891_v4  ;;  %2460 = vmatpush.msra.mxu1 %v1027_v5  ;;  %v971_v25 = vld [vmem:[%s5560_s12 + $0xe18] sm:$0xff]  ;;  %v2118_v4 = vadd.f32 %v2117_v59, %v2098_v3 }
 0x1cb   : > { %2481 = vmatpush.msra.mxu2 %v1147_v6  ;;  %2500 = vmatpush.msra.mxu3 %v1283_v10  ;;  %v1091_v50 = vld [vmem:[%s5560_s12 + $0x11d8] sm:$0xff] }
 0x1cc   : > { %2442 = vmatpush.msra.mxu0 %v883_v12  ;;  %2461 = vmatpush.msra.mxu1 %v1019_v15  ;;  %v1227_v51 = vld [vmem:[%s5560_s12 + $0x1618] sm:$0xff] }
 0x1cd   : > { %2482 = vmatpush.msra.mxu2 %v1139_v17  ;;  %2501 = vmatpush.msra.mxu3 %v1275_v18  ;;  %v827_v52 = vld [vmem:[%s5560_s12 + $0x998] sm:$0xff] }
 0x1ce   : > { %2443 = vmatpush.msra.mxu0 %v875_v21  ;;  %2462 = vmatpush.msra.mxu1 %v1011_v24  ;;  %v963_v28 = vld [vmem:[%s5560_s12 + $0xdd8] sm:$0xff] }
 0x1cf   : > { %2483 = vmatpush.msra.mxu2 %v1131_v27  ;;  %2502 = vmatpush.msra.mxu3 %v1267_v30  ;;  %v1083_v54 = vld [vmem:[%s5560_s12 + $0x1198] sm:$0xff] }
 0x1d0   : > { %2444 = vmatpush.msra.mxu0 %v867_v32  ;;  %2463 = vmatpush.msra.mxu1 %v1003_v33  ;;  %v1219_v55 = vld [vmem:[%s5560_s12 + $0x15d8] sm:$0xff] }
 0x1d1   : > { %2484 = vmatpush.msra.mxu2 %v1123_v35  ;;  %2503 = vmatpush.msra.mxu3 %v1259_v36  ;;  %v819_v34 = vld [vmem:[%s5560_s12 + $0x958] sm:$0xff] }
 0x1d2   : > { %2445 = vmatpush.msra.mxu0 %v859_v38  ;;  %2464 = vmatpush.msra.mxu1 %v995_v39  ;;  %v955_v58 = vld [vmem:[%s5560_s12 + $0xd98] sm:$0xff] }
 0x1d3   : > { %2485 = vmatpush.msra.mxu2 %v1115_v40  ;;  %2504 = vmatpush.msra.mxu3 %v1251_v8  ;;  %v1075_v60 = vld [vmem:[%s5560_s12 + $0x1158] sm:$0xff] }
 0x1d4   : > { %2446 = vmatpush.msra.mxu0 %v851_v42  ;;  %2465 = vmatpush.msra.mxu1 %v987_v43  ;;  %v1211_v9 = vld [vmem:[%s5560_s12 + $0x1598] sm:$0xff] }
 0x1d5   : > { %2486 = vmatpush.msra.mxu2 %v1107_v45  ;;  %2505 = vmatpush.msra.mxu3 %v1243_v23  ;;  %v811_v62 = vld [vmem:[%s5560_s12 + $0x918] sm:$0xff] }
 0x1d6   : > { %2447 = vmatpush.msra.mxu0 %v843_v19  ;;  %2466 = vmatpush.msra.mxu1 %v979_v14  ;;  %v947_v63 = vld [vmem:[%s5560_s12 + $0xd58] sm:$0xff] }
 0x1d7   : > { %2487 = vmatpush.msra.mxu2 %v1099_v46  ;;  %2506 = vmatpush.msra.mxu3 %v1235_v47  ;;  %v1067_v0 = vld [vmem:[%s5560_s12 + $0x1118] sm:$0xff] }
 0x1d8   : > { %2448 = vmatpush.msra.mxu0 %v835_v29  ;;  %2467 = vmatpush.msra.mxu1 %v971_v25  ;;  %v1203_v1 = vld [vmem:[%s5560_s12 + $0x1558] sm:$0xff]  ;;  %v2137_v15 = vpop.f32.mrf.mxu0 }
 0x1d9   : > { %2488 = vmatpush.msra.mxu2 %v1091_v50  ;;  %2507 = vmatpush.msra.mxu3 %v1227_v51  ;;  %v803_v5 = vld [vmem:[%s5560_s12 + $0x8d8] sm:$0xff]  ;;  %v2138_v20 = vadd.f32 %v2137_v15, %v2118_v4 }
 0x1da   : > { %2449 = vmatpush.msra.mxu0 %v827_v52  ;;  %2468 = vmatpush.msra.mxu1 %v963_v28  ;;  %v939_v6 = vld [vmem:[%s5560_s12 + $0xd18] sm:$0xff] }
 0x1db   : > { %2489 = vmatpush.msra.mxu2 %v1083_v54  ;;  %2508 = vmatpush.msra.mxu3 %v1219_v55  ;;  %v1059_v10 = vld [vmem:[%s5560_s12 + $0x10d8] sm:$0xff] }
 0x1dc   : > { %2450 = vmatpush.msra.mxu0 %v819_v34  ;;  %2469 = vmatpush.msra.mxu1 %v955_v58  ;;  %v1195_v12 = vld [vmem:[%s5560_s12 + $0x1518] sm:$0xff]  ;;  %v2157_v30 = vpop.f32.mrf.mxu1 }
 0x1dd   : > { %2490 = vmatpush.msra.mxu2 %v1075_v60  ;;  %2509 = vmatpush.msra.mxu3 %v1211_v9  ;;  %v795_v17 = vld [vmem:[%s5560_s12 + $0x898] sm:$0xff]  ;;  %v2158_v35 = vadd.f32 %v2157_v30, %v2138_v20 }
 0x1de   : > { %2451 = vmatpush.msra.mxu0 %v811_v62  ;;  %2470 = vmatpush.msra.mxu1 %v947_v63  ;;  %v931_v18 = vld [vmem:[%s5560_s12 + $0xcd8] sm:$0xff] }
 0x1df   : > { %2491 = vmatpush.msra.mxu2 %v1067_v0  ;;  %2510 = vmatpush.msra.mxu3 %v1203_v1  ;;  %v1051_v21 = vld [vmem:[%s5560_s12 + $0x1098] sm:$0xff] }
 0x1e0   : > { %2452 = vmatpush.msra.mxu0 %v803_v5  ;;  %2471 = vmatpush.msra.mxu1 %v939_v6  ;;  %v1187_v24 = vld [vmem:[%s5560_s12 + $0x14d8] sm:$0xff]  ;;  %v2177_v38 = vpop.f32.mrf.mxu2 }
 0x1e1   : > { %2492 = vmatpush.msra.mxu2 %v1059_v10  ;;  %2511 = vmatpush.msra.mxu3 %v1195_v12  ;;  %v787_v26 = vld [vmem:[%s5560_s12 + $0x858] sm:$0xff]  ;;  %v2178_v8 = vadd.f32 %v2177_v38, %v2158_v35 }
 0x1e2   : > { %v923_v27 = vld [vmem:[%s5560_s12 + $0xc98] sm:$0xff]  ;;  %2453 = vmatpush.msra.mxu0 %v795_v17  ;;  %2472 = vmatpush.msra.mxu1 %v931_v18 }
 0x1e3   : > { %v1043_v31 = vld [vmem:[%s5560_s12 + $0x1058] sm:$0xff]  ;;  %2493 = vmatpush.msra.mxu2 %v1051_v21  ;;  %2512 = vmatpush.msra.mxu3 %v1187_v24  ;;  %v2197_v45 = vpop.f32.mrf.mxu3 }
 0x1e4   : > { %v1179_v32 = vld [vmem:[%s5560_s12 + $0x1498] sm:$0xff]  ;;  %2454 = vmatpush.msra.mxu0 %v787_v26  ;;  %2473 = vmatpush.msra.mxu1 %v923_v27  ;;  %v2198_v14 = vadd.f32 %v2197_v45, %v2178_v8 }
 0x1e5   : > { %v779_v33 = vld [vmem:[%s5560_s12 + $0x818] sm:$0xff]  ;;  %2494 = vmatpush.msra.mxu2 %v1043_v31  ;;  %2513 = vmatpush.msra.mxu3 %v1179_v32 }
 0x1e6   : > { %v915_v36 = vld [vmem:[%s5560_s12 + $0xc58] sm:$0xff]  ;;  %2416 = vmatmul.f32.vlgmr.msrb.gmra.mxu2 %v6094_v56  ;;  %2455 = vmatpush.msra.mxu0 %v779_v33  ;;  %v3401_v29 = vadd.f32 %v2198_v14, %v503_v44  ;;  %v644_v14 = vld [vmem:[%s5560_s12 + $0x3e0] sm:$0xff] }
 0x1e7   : > { %v1035_v37 = vld [vmem:[%s5560_s12 + $0x1018] sm:$0xff]  ;;  %2474 = vmatpush.msra.mxu1 %v915_v36  ;;  %2436 = vmatmul.f32.vlgmr.msrb.gmra.mxu3 %v6107_v61 }
 0x1e8   : > { %v1171_v39 = vld [vmem:[%s5560_s12 + $0x1458] sm:$0xff]  ;;  %2495 = vmatpush.msra.mxu2 %v1035_v37  ;;  %3409 = vst [vmem:[#allocation2] sm:$0xff] %v3401_v29  ;;  %2456 = vmatmul.f32.vlgmr.msra.gmra.mxu0 %v6087_v53  ;;  %v772_v29 = vld [vmem:[%s5560_s12 + $0x7e0] sm:$0xff] }
 0x1e9   : > { %v1411_v40 = vld [vmem:[%s5560_s12 + $0x1bd8] sm:$0xff]  ;;  %2514 = vmatpush.msra.mxu3 %v1171_v39 }
 0x1ea   : > { %v1667_v41 = vld [vmem:[%s5560_s12 + $0x23d8] sm:$0xff]  ;;  %2520 = vmatpush.msrb.mxu0 %v1411_v40 }
 0x1eb   : > { %v907_v42 = vld [vmem:[%s5560_s12 + $0xc18] sm:$0xff]  ;;  %2560 = vmatpush.msrb.mxu2 %v1667_v41 }
 0x1ec   : > { %v1163_v43 = vld [vmem:[%s5560_s12 + $0x1418] sm:$0xff]  ;;  %2475 = vmatpush.msra.mxu1 %v907_v42 }
 0x1ed   : > { %v1403_v23 = vld [vmem:[%s5560_s12 + $0x1b98] sm:$0xff]  ;;  %2515 = vmatpush.msra.mxu3 %v1163_v43  ;;  %2476 = vmatmul.f32.vlgmr.msra.gmra.mxu1 %v6099_v57 }
 0x1ee   : > { %v1539_v19 = vld [vmem:[%s5560_s12 + $0x1fd8] sm:$0xff]  ;;  %2521 = vmatpush.msrb.mxu0 %v1403_v23  ;;  %2496 = vmatmul.f32.vlgmr.msra.gmra.mxu2 %v6126_v13 }
 0x1ef   : > { %v1659_v56 = vld [vmem:[%s5560_s12 + $0x2398] sm:$0xff]  ;;  %2540 = vmatpush.msrb.mxu1 %v1539_v19  ;;  %2516 = vmatmul.f32.vlgmr.msra.gmra.mxu3 %v6139_v22 }
 0x1f0   : > { %v1795_v46 = vld [vmem:[%s5560_s12 + $0x27d8] sm:$0xff]  ;;  %2561 = vmatpush.msrb.mxu2 %v1659_v56  ;;  %v900_v56 = vld [vmem:[%s5560_s12 + $0xbe0] sm:$0xff] }
 0x1f1   : > { %v1395_v47 = vld [vmem:[%s5560_s12 + $0x1b58] sm:$0xff]  ;;  %2580 = vmatpush.msrb.mxu3 %v1795_v46 }
 0x1f2   : > { %v1531_v48 = vld [vmem:[%s5560_s12 + $0x1f98] sm:$0xff]  ;;  %2522 = vmatpush.msrb.mxu0 %v1395_v47 }
 0x1f3   : > { %v1651_v25 = vld [vmem:[%s5560_s12 + $0x2358] sm:$0xff]  ;;  %2541 = vmatpush.msrb.mxu1 %v1531_v48  ;;  %v636_v48 = vld [vmem:[%s5560_s12 + $0x3a0] sm:$0xff] }
 0x1f4   : > { %v1787_v49 = vld [vmem:[%s5560_s12 + $0x2798] sm:$0xff]  ;;  %2562 = vmatpush.msrb.mxu2 %v1651_v25  ;;  %v892_v25 = vld [vmem:[%s5560_s12 + $0xba0] sm:$0xff] }
 0x1f5   : > { %v1387_v61 = vld [vmem:[%s5560_s12 + $0x1b18] sm:$0xff]  ;;  %2581 = vmatpush.msrb.mxu3 %v1787_v49  ;;  %v1028_v49 = vld [vmem:[%s5560_s12 + $0xfe0] sm:$0xff] }
 0x1f6   : > { %v1523_v50 = vld [vmem:[%s5560_s12 + $0x1f58] sm:$0xff]  ;;  %2523 = vmatpush.msrb.mxu0 %v1387_v61  ;;  %v884_v61 = vld [vmem:[%s5560_s12 + $0xb60] sm:$0xff] }
 0x1f7   : > { %v1643_v51 = vld [vmem:[%s5560_s12 + $0x2318] sm:$0xff]  ;;  %2542 = vmatpush.msrb.mxu1 %v1523_v50  ;;  %v1020_v50 = vld [vmem:[%s5560_s12 + $0xfa0] sm:$0xff] }
 0x1f8   : > { %v1779_v52 = vld [vmem:[%s5560_s12 + $0x2758] sm:$0xff]  ;;  %2563 = vmatpush.msrb.mxu2 %v1643_v51  ;;  %v620_v51 = vld [vmem:[%s5560_s12 + $0x320] sm:$0xff] }
 0x1f9   : > { %v1379_v28 = vld [vmem:[%s5560_s12 + $0x1ad8] sm:$0xff]  ;;  %2582 = vmatpush.msrb.mxu3 %v1779_v52  ;;  %v756_v52 = vld [vmem:[%s5560_s12 + $0x760] sm:$0xff] }
 0x1fa   : > { %v1515_v54 = vld [vmem:[%s5560_s12 + $0x1f18] sm:$0xff]  ;;  %2524 = vmatpush.msrb.mxu0 %v1379_v28  ;;  %v612_v28 = vld [vmem:[%s5560_s12 + $0x2e0] sm:$0xff] }
 0x1fb   : > { %v1635_v55 = vld [vmem:[%s5560_s12 + $0x22d8] sm:$0xff]  ;;  %2543 = vmatpush.msrb.mxu1 %v1515_v54  ;;  %v748_v54 = vld [vmem:[%s5560_s12 + $0x720] sm:$0xff] }
 0x1fc   : > { %v1771_v3 = vld [vmem:[%s5560_s12 + $0x2718] sm:$0xff]  ;;  %2564 = vmatpush.msrb.mxu2 %v1635_v55  ;;  %v868_v55 = vld [vmem:[%s5560_s12 + $0xae0] sm:$0xff] }
 0x1fd   : > { %v1371_v13 = vld [vmem:[%s5560_s12 + $0x1a98] sm:$0xff]  ;;  %2583 = vmatpush.msrb.mxu3 %v1771_v3  ;;  %v1004_v3 = vld [vmem:[%s5560_s12 + $0xf20] sm:$0xff] }
 0x1fe   : > { %v1507_v34 = vld [vmem:[%s5560_s12 + $0x1ed8] sm:$0xff]  ;;  %2525 = vmatpush.msrb.mxu0 %v1371_v13  ;;  %v604_v13 = vld [vmem:[%s5560_s12 + $0x2a0] sm:$0xff] }
 0x1ff   : > { %v1627_v58 = vld [vmem:[%s5560_s12 + $0x2298] sm:$0xff]  ;;  %2544 = vmatpush.msrb.mxu1 %v1507_v34  ;;  %v740_v34 = vld [vmem:[%s5560_s12 + $0x6e0] sm:$0xff] }
 0x200   : > { %v1763_v59 = vld [vmem:[%s5560_s12 + $0x26d8] sm:$0xff]  ;;  %2565 = vmatpush.msrb.mxu2 %v1627_v58  ;;  %v860_v58 = vld [vmem:[%s5560_s12 + $0xaa0] sm:$0xff] }
 0x201   : > { %v1363_v53 = vld [vmem:[%s5560_s12 + $0x1a58] sm:$0xff]  ;;  %2584 = vmatpush.msrb.mxu3 %v1763_v59  ;;  %v996_v59 = vld [vmem:[%s5560_s12 + $0xee0] sm:$0xff] }
 0x202   : > { %v1499_v60 = vld [vmem:[%s5560_s12 + $0x1e98] sm:$0xff]  ;;  %2526 = vmatpush.msrb.mxu0 %v1363_v53  ;;  %v596_v53 = vld [vmem:[%s5560_s12 + $0x260] sm:$0xff] }
 0x203   : > { %v1619_v22 = vld [vmem:[%s5560_s12 + $0x2258] sm:$0xff]  ;;  %2545 = vmatpush.msrb.mxu1 %v1499_v60  ;;  %v732_v60 = vld [vmem:[%s5560_s12 + $0x6a0] sm:$0xff] }
 0x204   : > { %v1755_v9 = vld [vmem:[%s5560_s12 + $0x2698] sm:$0xff]  ;;  %2566 = vmatpush.msrb.mxu2 %v1619_v22  ;;  %v852_v22 = vld [vmem:[%s5560_s12 + $0xa60] sm:$0xff] }
 0x205   : > { %v1355_v62 = vld [vmem:[%s5560_s12 + $0x1a18] sm:$0xff]  ;;  %2585 = vmatpush.msrb.mxu3 %v1755_v9  ;;  %v988_v9 = vld [vmem:[%s5560_s12 + $0xea0] sm:$0xff] }
 0x206   : > { %v1491_v63 = vld [vmem:[%s5560_s12 + $0x1e58] sm:$0xff]  ;;  %2527 = vmatpush.msrb.mxu0 %v1355_v62  ;;  %v588_v62 = vld [vmem:[%s5560_s12 + $0x220] sm:$0xff] }
 0x207   : > { %v1611_v0 = vld [vmem:[%s5560_s12 + $0x2218] sm:$0xff]  ;;  %2546 = vmatpush.msrb.mxu1 %v1491_v63  ;;  %v724_v63 = vld [vmem:[%s5560_s12 + $0x660] sm:$0xff] }
 0x208   : > { %v1747_v57 = vld [vmem:[%s5560_s12 + $0x2658] sm:$0xff]  ;;  %2567 = vmatpush.msrb.mxu2 %v1611_v0  ;;  %v844_v0 = vld [vmem:[%s5560_s12 + $0xa20] sm:$0xff] }
 0x209   : > { %v1347_v1 = vld [vmem:[%s5560_s12 + $0x19d8] sm:$0xff]  ;;  %2586 = vmatpush.msrb.mxu3 %v1747_v57  ;;  %v980_v57 = vld [vmem:[%s5560_s12 + $0xe60] sm:$0xff] }
 0x20a   : > { %v1483_v4 = vld [vmem:[%s5560_s12 + $0x1e18] sm:$0xff]  ;;  %2528 = vmatpush.msrb.mxu0 %v1347_v1  ;;  %v580_v1 = vld [vmem:[%s5560_s12 + $0x1e0] sm:$0xff] }
 0x20b   : > { %v1603_v5 = vld [vmem:[%s5560_s12 + $0x21d8] sm:$0xff]  ;;  %2547 = vmatpush.msrb.mxu1 %v1483_v4  ;;  %v716_v4 = vld [vmem:[%s5560_s12 + $0x620] sm:$0xff] }
 0x20c   : > { %v1739_v6 = vld [vmem:[%s5560_s12 + $0x2618] sm:$0xff]  ;;  %2568 = vmatpush.msrb.mxu2 %v1603_v5  ;;  %v836_v5 = vld [vmem:[%s5560_s12 + $0x9e0] sm:$0xff] }
 0x20d   : > { %v1339_v10 = vld [vmem:[%s5560_s12 + $0x1998] sm:$0xff]  ;;  %2587 = vmatpush.msrb.mxu3 %v1739_v6  ;;  %v972_v6 = vld [vmem:[%s5560_s12 + $0xe20] sm:$0xff] }
 0x20e   : > { %v1475_v12 = vld [vmem:[%s5560_s12 + $0x1dd8] sm:$0xff]  ;;  %2529 = vmatpush.msrb.mxu0 %v1339_v10  ;;  %v572_v10 = vld [vmem:[%s5560_s12 + $0x1a0] sm:$0xff] }
 0x20f   : > { %v1595_v15 = vld [vmem:[%s5560_s12 + $0x2198] sm:$0xff]  ;;  %2548 = vmatpush.msrb.mxu1 %v1475_v12  ;;  %v708_v12 = vld [vmem:[%s5560_s12 + $0x5e0] sm:$0xff] }
 0x210   : > { %v1731_v17 = vld [vmem:[%s5560_s12 + $0x25d8] sm:$0xff]  ;;  %2569 = vmatpush.msrb.mxu2 %v1595_v15  ;;  %v828_v15 = vld [vmem:[%s5560_s12 + $0x9a0] sm:$0xff] }
 0x211   : > { %v1331_v18 = vld [vmem:[%s5560_s12 + $0x1958] sm:$0xff]  ;;  %2588 = vmatpush.msrb.mxu3 %v1731_v17  ;;  %v964_v17 = vld [vmem:[%s5560_s12 + $0xde0] sm:$0xff] }
 0x212   : > { %v1467_v20 = vld [vmem:[%s5560_s12 + $0x1d98] sm:$0xff]  ;;  %2530 = vmatpush.msrb.mxu0 %v1331_v18  ;;  %v564_v18 = vld [vmem:[%s5560_s12 + $0x160] sm:$0xff] }
 0x213   : > { %v1587_v21 = vld [vmem:[%s5560_s12 + $0x2158] sm:$0xff]  ;;  %2549 = vmatpush.msrb.mxu1 %v1467_v20  ;;  %v700_v20 = vld [vmem:[%s5560_s12 + $0x5a0] sm:$0xff] }
 0x214   : > { %v1723_v24 = vld [vmem:[%s5560_s12 + $0x2598] sm:$0xff]  ;;  %2570 = vmatpush.msrb.mxu2 %v1587_v21  ;;  %v820_v21 = vld [vmem:[%s5560_s12 + $0x960] sm:$0xff] }
 0x215   : > { %v1323_v26 = vld [vmem:[%s5560_s12 + $0x1918] sm:$0xff]  ;;  %2589 = vmatpush.msrb.mxu3 %v1723_v24  ;;  %v956_v24 = vld [vmem:[%s5560_s12 + $0xda0] sm:$0xff] }
 0x216   : > { %v1459_v27 = vld [vmem:[%s5560_s12 + $0x1d58] sm:$0xff]  ;;  %2531 = vmatpush.msrb.mxu0 %v1323_v26  ;;  %v556_v26 = vld [vmem:[%s5560_s12 + $0x120] sm:$0xff] }
 0x217   : > { %v1579_v30 = vld [vmem:[%s5560_s12 + $0x2118] sm:$0xff]  ;;  %2550 = vmatpush.msrb.mxu1 %v1459_v27  ;;  %v692_v27 = vld [vmem:[%s5560_s12 + $0x560] sm:$0xff] }
 0x218   : > { %v1715_v31 = vld [vmem:[%s5560_s12 + $0x2558] sm:$0xff]  ;;  %2571 = vmatpush.msrb.mxu2 %v1579_v30  ;;  %v812_v30 = vld [vmem:[%s5560_s12 + $0x920] sm:$0xff] }
 0x219   : > { %v1315_v32 = vld [vmem:[%s5560_s12 + $0x18d8] sm:$0xff]  ;;  %2590 = vmatpush.msrb.mxu3 %v1715_v31  ;;  %v948_v31 = vld [vmem:[%s5560_s12 + $0xd60] sm:$0xff] }
 0x21a   : > { %v1451_v33 = vld [vmem:[%s5560_s12 + $0x1d18] sm:$0xff]  ;;  %2532 = vmatpush.msrb.mxu0 %v1315_v32  ;;  %v548_v32 = vld [vmem:[%s5560_s12 + $0xe0] sm:$0xff] }
 0x21b   : > { %v1571_v35 = vld [vmem:[%s5560_s12 + $0x20d8] sm:$0xff]  ;;  %2551 = vmatpush.msrb.mxu1 %v1451_v33  ;;  %v684_v33 = vld [vmem:[%s5560_s12 + $0x520] sm:$0xff] }
 0x21c   : > { %v1707_v36 = vld [vmem:[%s5560_s12 + $0x2518] sm:$0xff]  ;;  %2572 = vmatpush.msrb.mxu2 %v1571_v35  ;;  %v804_v35 = vld [vmem:[%s5560_s12 + $0x8e0] sm:$0xff] }
 0x21d   : > { %v1307_v37 = vld [vmem:[%s5560_s12 + $0x1898] sm:$0xff]  ;;  %2591 = vmatpush.msrb.mxu3 %v1707_v36  ;;  %v940_v36 = vld [vmem:[%s5560_s12 + $0xd20] sm:$0xff] }
 0x21e   : > { %v1443_v38 = vld [vmem:[%s5560_s12 + $0x1cd8] sm:$0xff]  ;;  %2533 = vmatpush.msrb.mxu0 %v1307_v37  ;;  %v540_v37 = vld [vmem:[%s5560_s12 + $0xa0] sm:$0xff] }
 0x21f   : > { %v1563_v39 = vld [vmem:[%s5560_s12 + $0x2098] sm:$0xff]  ;;  %2552 = vmatpush.msrb.mxu1 %v1443_v38  ;;  %v676_v38 = vld [vmem:[%s5560_s12 + $0x4e0] sm:$0xff] }
 0x220   : > { %v1699_v40 = vld [vmem:[%s5560_s12 + $0x24d8] sm:$0xff]  ;;  %2573 = vmatpush.msrb.mxu2 %v1563_v39  ;;  %v796_v39 = vld [vmem:[%s5560_s12 + $0x8a0] sm:$0xff] }
 0x221   : > { %v1299_v8 = vld [vmem:[%s5560_s12 + $0x1858] sm:$0xff]  ;;  %2592 = vmatpush.msrb.mxu3 %v1699_v40  ;;  %v932_v40 = vld [vmem:[%s5560_s12 + $0xce0] sm:$0xff] }
 0x222   : > { %v1435_v41 = vld [vmem:[%s5560_s12 + $0x1c98] sm:$0xff]  ;;  %2534 = vmatpush.msrb.mxu0 %v1299_v8  ;;  %v532_v8 = vld [vmem:[%s5560_s12 + $0x60] sm:$0xff] }
 0x223   : > { %v1555_v42 = vld [vmem:[%s5560_s12 + $0x2058] sm:$0xff]  ;;  %2553 = vmatpush.msrb.mxu1 %v1435_v41  ;;  %v668_v41 = vld [vmem:[%s5560_s12 + $0x4a0] sm:$0xff] }
 0x224   : > { %v1691_v43 = vld [vmem:[%s5560_s12 + $0x2498] sm:$0xff]  ;;  %2574 = vmatpush.msrb.mxu2 %v1555_v42  ;;  %v788_v42 = vld [vmem:[%s5560_s12 + $0x860] sm:$0xff] }
 0x225   : > { %v1291_v44 = vld [vmem:[%s5560_s12 + $0x1818] sm:$0xff]  ;;  %2593 = vmatpush.msrb.mxu3 %v1691_v43  ;;  %v924_v43 = vld [vmem:[%s5560_s12 + $0xca0] sm:$0xff] }
 0x226   : > { %v1427_v45 = vld [vmem:[%s5560_s12 + $0x1c58] sm:$0xff]  ;;  %2535 = vmatpush.msrb.mxu0 %v1291_v44  ;;  %v524_v44 = vld [vmem:[%s5560_s12 + $0x20] sm:$0xff] }
 0x227   : > { %v1547_v23 = vld [vmem:[%s5560_s12 + $0x2018] sm:$0xff]  ;;  %2554 = vmatpush.msrb.mxu1 %v1427_v45  ;;  %2536 = vmatmul.f32.vlgmr.msrb.gmra.mxu0 %v6119_v7  ;;  %v628_v7 = vld [vmem:[%s5560_s12 + $0x360] sm:$0xff] }
 0x228   : > { %v1683_v19 = vld [vmem:[%s5560_s12 + $0x2458] sm:$0xff]  ;;  %2575 = vmatpush.msrb.mxu2 %v1547_v23  ;;  %2600 = vmatpush.msra.mxu0 %v644_v14  ;;  %v660_v45 = vld [vmem:[%s5560_s12 + $0x460] sm:$0xff]  ;;  %v2237_v23 = vpop.f32.mrf.mxu1 }
 0x229   : > { %2594 = vmatpush.msrb.mxu3 %v1683_v19  ;;  %v1419_v46 = vld [vmem:[%s5560_s12 + $0x1c18] sm:$0xff]  ;;  %2576 = vmatmul.f32.vlgmr.msrb.gmra.mxu2 %v6187_v2  ;;  %v764_v2 = vld [vmem:[%s5560_s12 + $0x7a0] sm:$0xff] }
 0x22a   : > { %v1675_v47 = vld [vmem:[%s5560_s12 + $0x2418] sm:$0xff]  ;;  %2640 = vmatpush.msra.mxu2 %v900_v56  ;;  %2555 = vmatpush.msrb.mxu1 %v1419_v46  ;;  %v780_v19 = vld [vmem:[%s5560_s12 + $0x820] sm:$0xff] }
 0x22b   : > { %2595 = vmatpush.msrb.mxu3 %v1675_v47  ;;  %2556 = vmatmul.f32.vlgmr.msrb.gmra.mxu1 %v6131_v16  ;;  %v876_v16 = vld [vmem:[%s5560_s12 + $0xb20] sm:$0xff]  ;;  %v2217_v47 = vpop.f32.mrf.mxu0 }
 0x22c   : > { %2596 = vmatmul.f32.vlgmr.msrb.gmra.mxu3 %v6195_v11  ;;  %2601 = vmatpush.msra.mxu0 %v636_v48  ;;  %v1012_v11 = vld [vmem:[%s5560_s12 + $0xf60] sm:$0xff] }
 0x22d   : > { %2620 = vmatpush.msra.mxu1 %v772_v29  ;;  %2641 = vmatpush.msra.mxu2 %v892_v25  ;;  %v916_v14 = vld [vmem:[%s5560_s12 + $0xc60] sm:$0xff]  ;;  %v2238_v25 = vadd.f32 %v2237_v23, %v2217_v47 }
 0x22e   : > { %2660 = vmatpush.msra.mxu3 %v1028_v49  ;;  %2602 = vmatpush.msra.mxu0 %v628_v7  ;;  %v1156_v56 = vld [vmem:[%s5560_s12 + $0x13e0] sm:$0xff] }
 0x22f   : > { %2621 = vmatpush.msra.mxu1 %v764_v2  ;;  %2642 = vmatpush.msra.mxu2 %v884_v61  ;;  %v1412_v46 = vld [vmem:[%s5560_s12 + $0x1be0] sm:$0xff]  ;;  %v2257_v2 = vpop.f32.mrf.mxu2 }
 0x230   : > { %2661 = vmatpush.msra.mxu3 %v1020_v50  ;;  %2603 = vmatpush.msra.mxu0 %v620_v51  ;;  %v652_v48 = vld [vmem:[%s5560_s12 + $0x420] sm:$0xff] }
 0x231   : > { %2622 = vmatpush.msra.mxu1 %v756_v52  ;;  %2643 = vmatpush.msra.mxu2 %v876_v16  ;;  %v908_v29 = vld [vmem:[%s5560_s12 + $0xc20] sm:$0xff] }
 0x232   : > { %2662 = vmatpush.msra.mxu3 %v1012_v11  ;;  %2604 = vmatpush.msra.mxu0 %v612_v28  ;;  %v1148_v49 = vld [vmem:[%s5560_s12 + $0x13a0] sm:$0xff]  ;;  %v2258_v28 = vadd.f32 %v2257_v2, %v2238_v25 }
 0x233   : > { %2623 = vmatpush.msra.mxu1 %v748_v54  ;;  %2644 = vmatpush.msra.mxu2 %v868_v55  ;;  %v1284_v7 = vld [vmem:[%s5560_s12 + $0x17e0] sm:$0xff] }
 0x234   : > { %2663 = vmatpush.msra.mxu3 %v1004_v3  ;;  %2605 = vmatpush.msra.mxu0 %v604_v13  ;;  %v1404_v61 = vld [vmem:[%s5560_s12 + $0x1ba0] sm:$0xff]  ;;  %v2277_v3 = vpop.f32.mrf.mxu3 }
 0x235   : > { %2624 = vmatpush.msra.mxu1 %v740_v34  ;;  %2645 = vmatpush.msra.mxu2 %v860_v58  ;;  %v1540_v50 = vld [vmem:[%s5560_s12 + $0x1fe0] sm:$0xff] }
 0x236   : > { %2664 = vmatpush.msra.mxu3 %v996_v59  ;;  %2606 = vmatpush.msra.mxu0 %v596_v53  ;;  %v1140_v51 = vld [vmem:[%s5560_s12 + $0x1360] sm:$0xff]  ;;  %v2278_v53 = vadd.f32 %v2277_v3, %v2258_v28 }
 0x237   : > { %2625 = vmatpush.msra.mxu1 %v732_v60  ;;  %2646 = vmatpush.msra.mxu2 %v852_v22  ;;  %v1276_v52 = vld [vmem:[%s5560_s12 + $0x17a0] sm:$0xff] }
 0x238   : > { %2665 = vmatpush.msra.mxu3 %v988_v9  ;;  %2607 = vmatpush.msra.mxu0 %v588_v62  ;;  %v1396_v16 = vld [vmem:[%s5560_s12 + $0x1b60] sm:$0xff]  ;;  %v2297_v9 = vpop.f32.mrf.mxu0 }
 0x239   : > { %2626 = vmatpush.msra.mxu1 %v724_v63  ;;  %2647 = vmatpush.msra.mxu2 %v844_v0  ;;  %v1532_v11 = vld [vmem:[%s5560_s12 + $0x1fa0] sm:$0xff] }
 0x23a   : > { %2666 = vmatpush.msra.mxu3 %v980_v57  ;;  %2608 = vmatpush.msra.mxu0 %v580_v1  ;;  %v1132_v54 = vld [vmem:[%s5560_s12 + $0x1320] sm:$0xff] }
 0x23b   : > { %2627 = vmatpush.msra.mxu1 %v716_v4  ;;  %2648 = vmatpush.msra.mxu2 %v836_v5  ;;  %v1268_v55 = vld [vmem:[%s5560_s12 + $0x1760] sm:$0xff]  ;;  %v2298_v5 = vadd.f32 %v2297_v9, %v2278_v53  ;;  %v6469_v9 = vld [vmem:[%s5586_s19 + $0x18] sm:$0xff] }
 0x23c   : > { %2667 = vmatpush.msra.mxu3 %v972_v6  ;;  %2609 = vmatpush.msra.mxu0 %v572_v10  ;;  %v1388_v13 = vld [vmem:[%s5560_s12 + $0x1b20] sm:$0xff] }
 0x23d   : > { %2628 = vmatpush.msra.mxu1 %v708_v12  ;;  %2649 = vmatpush.msra.mxu2 %v828_v15  ;;  %v1524_v34 = vld [vmem:[%s5560_s12 + $0x1f60] sm:$0xff]  ;;  %v2317_v12 = vpop.f32.mrf.mxu1 }
 0x23e   : > { %2668 = vmatpush.msra.mxu3 %v964_v17  ;;  %2610 = vmatpush.msra.mxu0 %v564_v18  ;;  %v1124_v58 = vld [vmem:[%s5560_s12 + $0x12e0] sm:$0xff] }
 0x23f   : > { %2629 = vmatpush.msra.mxu1 %v700_v20  ;;  %2650 = vmatpush.msra.mxu2 %v820_v21  ;;  %v1260_v59 = vld [vmem:[%s5560_s12 + $0x1720] sm:$0xff] }
 0x240   : > { %2669 = vmatpush.msra.mxu3 %v956_v24  ;;  %2611 = vmatpush.msra.mxu0 %v556_v26  ;;  %v1380_v60 = vld [vmem:[%s5560_s12 + $0x1ae0] sm:$0xff]  ;;  %v2318_v26 = vadd.f32 %v2317_v12, %v2298_v5 }
 0x241   : > { %2630 = vmatpush.msra.mxu1 %v692_v27  ;;  %2651 = vmatpush.msra.mxu2 %v812_v30  ;;  %v1516_v22 = vld [vmem:[%s5560_s12 + $0x1f20] sm:$0xff] }
 0x242   : > { %2670 = vmatpush.msra.mxu3 %v948_v31  ;;  %2612 = vmatpush.msra.mxu0 %v548_v32  ;;  %v1116_v62 = vld [vmem:[%s5560_s12 + $0x12a0] sm:$0xff]  ;;  %v2337_v31 = vpop.f32.mrf.mxu2 }
 0x243   : > { %2631 = vmatpush.msra.mxu1 %v684_v33  ;;  %2652 = vmatpush.msra.mxu2 %v804_v35  ;;  %v1252_v63 = vld [vmem:[%s5560_s12 + $0x16e0] sm:$0xff] }
 0x244   : > { %2671 = vmatpush.msra.mxu3 %v940_v36  ;;  %2613 = vmatpush.msra.mxu0 %v540_v37  ;;  %v1372_v0 = vld [vmem:[%s5560_s12 + $0x1aa0] sm:$0xff] }
 0x245   : > { %2632 = vmatpush.msra.mxu1 %v676_v38  ;;  %2653 = vmatpush.msra.mxu2 %v796_v39  ;;  %v1508_v57 = vld [vmem:[%s5560_s12 + $0x1ee0] sm:$0xff]  ;;  %v2338_v39 = vadd.f32 %v2337_v31, %v2318_v26  ;;  %v613_v26 = vld [vmem:[%s5560_s12 + $0x2e8] sm:$0xff]  ;;  %v6501_v31 = vld [vmem:[%s5586_s19 + $0x38] sm:$0xff] }
 0x246   : > { %2672 = vmatpush.msra.mxu3 %v932_v40  ;;  %2614 = vmatpush.msra.mxu0 %v532_v8  ;;  %v1108_v1 = vld [vmem:[%s5560_s12 + $0x1260] sm:$0xff] }
 0x247   : > { %2633 = vmatpush.msra.mxu1 %v668_v41  ;;  %2654 = vmatpush.msra.mxu2 %v788_v42  ;;  %v1244_v4 = vld [vmem:[%s5560_s12 + $0x16a0] sm:$0xff]  ;;  %v2357_v41 = vpop.f32.mrf.mxu3 }
 0x248   : > { %2673 = vmatpush.msra.mxu3 %v924_v43  ;;  %2615 = vmatpush.msra.mxu0 %v524_v44  ;;  %v1364_v6 = vld [vmem:[%s5560_s12 + $0x1a60] sm:$0xff] }
 0x249   : > { %2634 = vmatpush.msra.mxu1 %v660_v45  ;;  %2655 = vmatpush.msra.mxu2 %v780_v19  ;;  %v1500_v10 = vld [vmem:[%s5560_s12 + $0x1ea0] sm:$0xff] }
 0x24a   : > { %2674 = vmatpush.msra.mxu3 %v916_v14  ;;  %2680 = vmatpush.msrb.mxu0 %v1156_v56  ;;  %v1100_v15 = vld [vmem:[%s5560_s12 + $0x1220] sm:$0xff]  ;;  %v2358_v14 = vadd.f32 %v2357_v41, %v2338_v39 }
 0x24b   : > { %2720 = vmatpush.msrb.mxu2 %v1412_v46  ;;  %2635 = vmatpush.msra.mxu1 %v652_v48  ;;  %v1236_v17 = vld [vmem:[%s5560_s12 + $0x1660] sm:$0xff] }
 0x24c   : > { %2675 = vmatpush.msra.mxu3 %v908_v29  ;;  %2681 = vmatpush.msrb.mxu0 %v1148_v49  ;;  %v1356_v18 = vld [vmem:[%s5560_s12 + $0x1a20] sm:$0xff]  ;;  %v2377_v29 = vpop.f32.mrf.mxu0 }
 0x24d   : > { %2700 = vmatpush.msrb.mxu1 %v1284_v7  ;;  %2721 = vmatpush.msrb.mxu2 %v1404_v61  ;;  %v1492_v20 = vld [vmem:[%s5560_s12 + $0x1e60] sm:$0xff]  ;;  %v2378_v7 = vadd.f32 %v2377_v29, %v2358_v14  ;;  %v717_v14 = vld [vmem:[%s5560_s12 + $0x628] sm:$0xff] }
 0x24e   : > { %2740 = vmatpush.msrb.mxu3 %v1540_v50  ;;  %2682 = vmatpush.msrb.mxu0 %v1140_v51  ;;  %v1092_v21 = vld [vmem:[%s5560_s12 + $0x11e0] sm:$0xff]  ;;  %v504_v50 = vld [vmem:[#allocation2 + $0x18] sm:$0xff]  ;;  %v2397_v51 = vpop.f32.mrf.mxu1 }
 0x24f   : > { %2701 = vmatpush.msrb.mxu1 %v1276_v52  ;;  %2722 = vmatpush.msrb.mxu2 %v1396_v16  ;;  %v1228_v24 = vld [vmem:[%s5560_s12 + $0x1620] sm:$0xff] }
 0x250   : > { %2741 = vmatpush.msrb.mxu3 %v1532_v11  ;;  %2683 = vmatpush.msrb.mxu0 %v1132_v54  ;;  %v1348_v27 = vld [vmem:[%s5560_s12 + $0x19e0] sm:$0xff]  ;;  %v2398_v11 = vadd.f32 %v2397_v51, %v2378_v7  ;;  %v701_v7 = vld [vmem:[%s5560_s12 + $0x5a8] sm:$0xff] }
 0x251   : > { %2702 = vmatpush.msrb.mxu1 %v1268_v55  ;;  %2723 = vmatpush.msrb.mxu2 %v1388_v13  ;;  %v1484_v30 = vld [vmem:[%s5560_s12 + $0x1e20] sm:$0xff]  ;;  %v693_v51 = vld [vmem:[%s5560_s12 + $0x568] sm:$0xff] }
 0x252   : > { %2742 = vmatpush.msrb.mxu3 %v1524_v34  ;;  %2684 = vmatpush.msrb.mxu0 %v1124_v58  ;;  %v1084_v32 = vld [vmem:[%s5560_s12 + $0x11a0] sm:$0xff]  ;;  %v3402_v3 = vadd.f32 %v2398_v11, %v504_v50  ;;  %v6457_v34 = vld [vmem:[%s5586_s19 + $0x10] sm:$0xff]  ;;  %v557_v50 = vld [vmem:[%s5560_s12 + $0x128] sm:$0xff] }
 0x253   : > { %2703 = vmatpush.msrb.mxu1 %v1260_v59  ;;  %2724 = vmatpush.msrb.mxu2 %v1380_v60  ;;  %v1220_v33 = vld [vmem:[%s5560_s12 + $0x15e0] sm:$0xff]  ;;  %v645_v59 = vld [vmem:[%s5560_s12 + $0x3e8] sm:$0xff] }
 0x254   : > { %2743 = vmatpush.msrb.mxu3 %v1516_v22  ;;  %2685 = vmatpush.msrb.mxu0 %v1116_v62  ;;  %v1340_v35 = vld [vmem:[%s5560_s12 + $0x19a0] sm:$0xff]  ;;  %3410 = vst [vmem:[#allocation2 + $0x18] sm:$0xff] %v3402_v3  ;;  %v549_v11 = vld [vmem:[%s5560_s12 + $0xe8] sm:$0xff] }
 0x255   : > { %2704 = vmatpush.msrb.mxu1 %v1252_v63  ;;  %2725 = vmatpush.msrb.mxu2 %v1372_v0  ;;  %v1476_v36 = vld [vmem:[%s5560_s12 + $0x1de0] sm:$0xff]  ;;  %v637_v0 = vld [vmem:[%s5560_s12 + $0x3a8] sm:$0xff] }
 0x256   : > { %2744 = vmatpush.msrb.mxu3 %v1508_v57  ;;  %2686 = vmatpush.msrb.mxu0 %v1108_v1  ;;  %v1076_v37 = vld [vmem:[%s5560_s12 + $0x1160] sm:$0xff]  ;;  %v773_v57 = vld [vmem:[%s5560_s12 + $0x7e8] sm:$0xff] }
 0x257   : > { %2705 = vmatpush.msrb.mxu1 %v1244_v4  ;;  %2726 = vmatpush.msrb.mxu2 %v1364_v6  ;;  %v1212_v38 = vld [vmem:[%s5560_s12 + $0x15a0] sm:$0xff]  ;;  %v6477_v1 = vld [vmem:[%s5586_s19 + $0x8] sm:$0xff] }
 0x258   : > { %2745 = vmatpush.msrb.mxu3 %v1500_v10  ;;  %2687 = vmatpush.msrb.mxu0 %v1100_v15  ;;  %v1332_v40 = vld [vmem:[%s5560_s12 + $0x1960] sm:$0xff]  ;;  %v629_v6 = vld [vmem:[%s5560_s12 + $0x368] sm:$0xff] }
 0x259   : > { %2706 = vmatpush.msrb.mxu1 %v1236_v17  ;;  %2727 = vmatpush.msrb.mxu2 %v1356_v18  ;;  %v1468_v8 = vld [vmem:[%s5560_s12 + $0x1da0] sm:$0xff]  ;;  %v765_v10 = vld [vmem:[%s5560_s12 + $0x7a8] sm:$0xff] }
 0x25a   : > { %2746 = vmatpush.msrb.mxu3 %v1492_v20  ;;  %2688 = vmatpush.msrb.mxu0 %v1092_v21  ;;  %v1068_v42 = vld [vmem:[%s5560_s12 + $0x1120] sm:$0xff]  ;;  %v621_v17 = vld [vmem:[%s5560_s12 + $0x328] sm:$0xff]  ;;  %v6489_v20 = vld [vmem:[%s5586_s19 + $0x30] sm:$0xff] }
 0x25b   : > { %2707 = vmatpush.msrb.mxu1 %v1228_v24  ;;  %2728 = vmatpush.msrb.mxu2 %v1348_v27  ;;  %v1204_v43 = vld [vmem:[%s5560_s12 + $0x1560] sm:$0xff]  ;;  %v757_v18 = vld [vmem:[%s5560_s12 + $0x768] sm:$0xff] }
 0x25c   : > { %2747 = vmatpush.msrb.mxu3 %v1484_v30  ;;  %2689 = vmatpush.msrb.mxu0 %v1084_v32  ;;  %v1324_v44 = vld [vmem:[%s5560_s12 + $0x1920] sm:$0xff]  ;;  %v749_v30 = vld [vmem:[%s5560_s12 + $0x728] sm:$0xff] }
 0x25d   : > { %2708 = vmatpush.msrb.mxu1 %v1220_v33  ;;  %2729 = vmatpush.msrb.mxu2 %v1340_v35  ;;  %v1460_v45 = vld [vmem:[%s5560_s12 + $0x1d60] sm:$0xff]  ;;  %v605_v35 = vld [vmem:[%s5560_s12 + $0x2a8] sm:$0xff] }
 0x25e   : > { %2748 = vmatpush.msrb.mxu3 %v1476_v36  ;;  %2690 = vmatpush.msrb.mxu0 %v1076_v37  ;;  %v1060_v23 = vld [vmem:[%s5560_s12 + $0x10e0] sm:$0xff]  ;;  %v741_v36 = vld [vmem:[%s5560_s12 + $0x6e8] sm:$0xff] }
 0x25f   : > { %2709 = vmatpush.msrb.mxu1 %v1212_v38  ;;  %2730 = vmatpush.msrb.mxu2 %v1332_v40  ;;  %v1196_v19 = vld [vmem:[%s5560_s12 + $0x1520] sm:$0xff]  ;;  %v6509_v37 = vld [vmem:[%s5586_s19 + $0x28] sm:$0xff] }
 0x260   : > { %2749 = vmatpush.msrb.mxu3 %v1468_v8  ;;  %2691 = vmatpush.msrb.mxu0 %v1068_v42  ;;  %v1316_v56 = vld [vmem:[%s5560_s12 + $0x18e0] sm:$0xff]  ;;  %v597_v40 = vld [vmem:[%s5560_s12 + $0x268] sm:$0xff] }
 0x261   : > { %2710 = vmatpush.msrb.mxu1 %v1204_v43  ;;  %v1452_v46 = vld [vmem:[%s5560_s12 + $0x1d20] sm:$0xff]  ;;  %2731 = vmatpush.msrb.mxu2 %v1324_v44  ;;  %v733_v8 = vld [vmem:[%s5560_s12 + $0x6a8] sm:$0xff] }
 0x262   : > { %2750 = vmatpush.msrb.mxu3 %v1460_v45  ;;  %v1052_v47 = vld [vmem:[%s5560_s12 + $0x10a0] sm:$0xff]  ;;  %2692 = vmatpush.msrb.mxu0 %v1060_v23  ;;  %v589_v43 = vld [vmem:[%s5560_s12 + $0x228] sm:$0xff] }
 0x263   : > { %v1188_v48 = vld [vmem:[%s5560_s12 + $0x14e0] sm:$0xff]  ;;  %2711 = vmatpush.msrb.mxu1 %v1196_v19  ;;  %2732 = vmatpush.msrb.mxu2 %v1316_v56  ;;  %v725_v44 = vld [vmem:[%s5560_s12 + $0x668] sm:$0xff] }
 0x264   : > { %v1308_v25 = vld [vmem:[%s5560_s12 + $0x18a0] sm:$0xff]  ;;  %2751 = vmatpush.msrb.mxu3 %v1452_v46  ;;  %2693 = vmatpush.msrb.mxu0 %v1052_v47  ;;  %v581_v19 = vld [vmem:[%s5560_s12 + $0x1e8] sm:$0xff] }
 0x265   : > { %v1444_v49 = vld [vmem:[%s5560_s12 + $0x1ce0] sm:$0xff]  ;;  %2712 = vmatpush.msrb.mxu1 %v1188_v48  ;;  %2733 = vmatpush.msrb.mxu2 %v1308_v25  ;;  %v573_v47 = vld [vmem:[%s5560_s12 + $0x1a8] sm:$0xff] }
 0x266   : > { %v1044_v2 = vld [vmem:[%s5560_s12 + $0x1060] sm:$0xff]  ;;  %2752 = vmatpush.msrb.mxu3 %v1444_v49  ;;  %2656 = vmatmul.f32.vlgmr.msra.gmra.mxu2 %v6457_v34  ;;  %v709_v48 = vld [vmem:[%s5560_s12 + $0x5e8] sm:$0xff] }
 0x267   : > { %v1180_v61 = vld [vmem:[%s5560_s12 + $0x14a0] sm:$0xff]  ;;  %2694 = vmatpush.msrb.mxu0 %v1044_v2  ;;  %2676 = vmatmul.f32.vlgmr.msra.gmra.mxu3 %v6469_v9  ;;  %v565_v49 = vld [vmem:[%s5560_s12 + $0x168] sm:$0xff] }
 0x268   : > { %v1300_v52 = vld [vmem:[%s5560_s12 + $0x1860] sm:$0xff]  ;;  %2713 = vmatpush.msrb.mxu1 %v1180_v61  ;;  %v541_v3 = vld [vmem:[%s5560_s12 + $0xa8] sm:$0xff] }
 0x269   : > { %v1436_v16 = vld [vmem:[%s5560_s12 + $0x1ca0] sm:$0xff]  ;;  %2734 = vmatpush.msrb.mxu2 %v1300_v52  ;;  %2636 = vmatmul.f32.vlgmr.msra.gmra.mxu1 %v6477_v1 }
 0x26a   : > { %v1036_v28 = vld [vmem:[%s5560_s12 + $0x1020] sm:$0xff]  ;;  %2753 = vmatpush.msrb.mxu3 %v1436_v16 }
 0x26b   : > { %v1172_v54 = vld [vmem:[%s5560_s12 + $0x1460] sm:$0xff]  ;;  %2695 = vmatpush.msrb.mxu0 %v1036_v28  ;;  %v685_v28 = vld [vmem:[%s5560_s12 + $0x528] sm:$0xff] }
 0x26c   : > { %v1292_v55 = vld [vmem:[%s5560_s12 + $0x1820] sm:$0xff]  ;;  %2714 = vmatpush.msrb.mxu1 %v1172_v54 }
 0x26d   : > { %v1428_v13 = vld [vmem:[%s5560_s12 + $0x1c60] sm:$0xff]  ;;  %2735 = vmatpush.msrb.mxu2 %v1292_v55 }
 0x26e   : > { %v1668_v58 = vld [vmem:[%s5560_s12 + $0x23e0] sm:$0xff]  ;;  %2754 = vmatpush.msrb.mxu3 %v1428_v13  ;;  %2736 = vmatmul.f32.vlgmr.msrb.gmra.mxu2 %v6489_v20  ;;  %v677_v13 = vld [vmem:[%s5560_s12 + $0x4e8] sm:$0xff] }
 0x26f   : > { %v1164_v53 = vld [vmem:[%s5560_s12 + $0x1420] sm:$0xff]  ;;  %2800 = vmatpush.msra.mxu2 %v645_v59 }
 0x270   : > { %v6464_v60 = vld [vmem:[%s5586_s19] sm:$0xff]  ;;  %2715 = vmatpush.msrb.mxu1 %v1164_v53  ;;  %v533_v53 = vld [vmem:[%s5560_s12 + $0x68] sm:$0xff] }
 0x271   : > { %2616 = vmatmul.f32.vlgmr.msra.gmra.mxu0 %v6464_v60  ;;  %v1420_v22 = vld [vmem:[%s5560_s12 + $0x1c20] sm:$0xff]  ;;  %2801 = vmatpush.msra.mxu2 %v637_v0  ;;  %v525_v0 = vld [vmem:[%s5560_s12 + $0x28] sm:$0xff] }
 0x272   : > { %2760 = vmatpush.msra.mxu0 %v1668_v58  ;;  %v1660_v62 = vld [vmem:[%s5560_s12 + $0x23a0] sm:$0xff]  ;;  %2755 = vmatpush.msrb.mxu3 %v1420_v22  ;;  %v669_v22 = vld [vmem:[%s5560_s12 + $0x4a8] sm:$0xff] }
 0x273   : > { %v1796_v63 = vld [vmem:[%s5560_s12 + $0x27e0] sm:$0xff]  ;;  %2802 = vmatpush.msra.mxu2 %v629_v6  ;;  %2756 = vmatmul.f32.vlgmr.msrb.gmra.mxu3 %v6501_v31 }
 0x274   : > { %v1652_v4 = vld [vmem:[%s5560_s12 + $0x2360] sm:$0xff]  ;;  %2761 = vmatpush.msra.mxu0 %v1660_v62  ;;  %2780 = vmatpush.msra.mxu1 %v1796_v63 }
 0x275   : > { %v1788_v5 = vld [vmem:[%s5560_s12 + $0x27a0] sm:$0xff]  ;;  %2820 = vmatpush.msra.mxu3 %v773_v57  ;;  %2803 = vmatpush.msra.mxu2 %v621_v17  ;;  %v661_v57 = vld [vmem:[%s5560_s12 + $0x468] sm:$0xff] }
 0x276   : > { %v1644_v12 = vld [vmem:[%s5560_s12 + $0x2320] sm:$0xff]  ;;  %2762 = vmatpush.msra.mxu0 %v1652_v4  ;;  %2781 = vmatpush.msra.mxu1 %v1788_v5  ;;  %v1157_v4 = vld [vmem:[%s5560_s12 + $0x13e8] sm:$0xff] }
 0x277   : > { %v1780_v15 = vld [vmem:[%s5560_s12 + $0x2760] sm:$0xff]  ;;  %2821 = vmatpush.msra.mxu3 %v765_v10  ;;  %2804 = vmatpush.msra.mxu2 %v613_v26  ;;  %v901_v5 = vld [vmem:[%s5560_s12 + $0xbe8] sm:$0xff] }
 0x278   : > { %2763 = vmatpush.msra.mxu0 %v1644_v12  ;;  %v1636_v21 = vld [vmem:[%s5560_s12 + $0x22e0] sm:$0xff]  ;;  %2782 = vmatpush.msra.mxu1 %v1780_v15  ;;  %v653_v10 = vld [vmem:[%s5560_s12 + $0x428] sm:$0xff] }
 0x279   : > { %v1772_v24 = vld [vmem:[%s5560_s12 + $0x2720] sm:$0xff]  ;;  %2822 = vmatpush.msra.mxu3 %v757_v18  ;;  %2716 = vmatmul.f32.vlgmr.msrb.gmra.mxu1 %v6509_v37  ;;  %v893_v15 = vld [vmem:[%s5560_s12 + $0xba8] sm:$0xff] }
 0x27a   : > { %v6496_v27 = vld [vmem:[%s5586_s19 + $0x20] sm:$0xff]  ;;  %2764 = vmatpush.msra.mxu0 %v1636_v21  ;;  %2783 = vmatpush.msra.mxu1 %v1772_v24  ;;  %v1029_v17 = vld [vmem:[%s5560_s12 + $0xfe8] sm:$0xff] }
 0x27b   : > { %2696 = vmatmul.f32.vlgmr.msrb.gmra.mxu0 %v6496_v27  ;;  %v1628_v32 = vld [vmem:[%s5560_s12 + $0x22a0] sm:$0xff]  ;;  %2823 = vmatpush.msra.mxu3 %v749_v30  ;;  %v1149_v18 = vld [vmem:[%s5560_s12 + $0x13a8] sm:$0xff] }
 0x27c   : > { %v1764_v33 = vld [vmem:[%s5560_s12 + $0x26e0] sm:$0xff]  ;;  %2765 = vmatpush.msra.mxu0 %v1628_v32  ;;  %2805 = vmatpush.msra.mxu2 %v605_v35  ;;  %v1285_v21 = vld [vmem:[%s5560_s12 + $0x17e8] sm:$0xff]  ;;  %v2437_v35 = vpop.f32.mrf.mxu3 }
 0x27d   : > { %v1620_v38 = vld [vmem:[%s5560_s12 + $0x2260] sm:$0xff]  ;;  %2784 = vmatpush.msra.mxu1 %v1764_v33  ;;  %2824 = vmatpush.msra.mxu3 %v741_v36  ;;  %v6565_v24 = vld [vmem:[%s5586_s19 + $0x48] sm:$0xff] }
 0x27e   : > { %v1756_v39 = vld [vmem:[%s5560_s12 + $0x26a0] sm:$0xff]  ;;  %2766 = vmatpush.msra.mxu0 %v1620_v38  ;;  %2806 = vmatpush.msra.mxu2 %v597_v40  ;;  %v885_v26 = vld [vmem:[%s5560_s12 + $0xb68] sm:$0xff] }
 0x27f   : > { %v1612_v41 = vld [vmem:[%s5560_s12 + $0x2220] sm:$0xff]  ;;  %2785 = vmatpush.msra.mxu1 %v1756_v39  ;;  %2825 = vmatpush.msra.mxu3 %v733_v8  ;;  %v1021_v30 = vld [vmem:[%s5560_s12 + $0xfa8] sm:$0xff]  ;;  %v2417_v39 = vpop.f32.mrf.mxu2 }
 0x280   : > { %v1748_v42 = vld [vmem:[%s5560_s12 + $0x2660] sm:$0xff]  ;;  %2767 = vmatpush.msra.mxu0 %v1612_v41  ;;  %2807 = vmatpush.msra.mxu2 %v589_v43  ;;  %v1141_v32 = vld [vmem:[%s5560_s12 + $0x1368] sm:$0xff]  ;;  %v2438_v41 = vadd.f32 %v2437_v35, %v2417_v39 }
 0x281   : > { %v1604_v45 = vld [vmem:[%s5560_s12 + $0x21e0] sm:$0xff]  ;;  %2786 = vmatpush.msra.mxu1 %v1748_v42  ;;  %2826 = vmatpush.msra.mxu3 %v725_v44  ;;  %v1277_v33 = vld [vmem:[%s5560_s12 + $0x17a8] sm:$0xff] }
 0x282   : > { %v1740_v23 = vld [vmem:[%s5560_s12 + $0x2620] sm:$0xff]  ;;  %2768 = vmatpush.msra.mxu0 %v1604_v45  ;;  %2808 = vmatpush.msra.mxu2 %v581_v19  ;;  %v877_v36 = vld [vmem:[%s5560_s12 + $0xb28] sm:$0xff] }
 0x283   : > { %v1596_v56 = vld [vmem:[%s5560_s12 + $0x21a0] sm:$0xff]  ;;  %2787 = vmatpush.msra.mxu1 %v1740_v23  ;;  %2827 = vmatpush.msra.mxu3 %v717_v14  ;;  %v1013_v38 = vld [vmem:[%s5560_s12 + $0xf68] sm:$0xff]  ;;  %v2457_v23 = vpop.f32.mrf.mxu0 }
 0x284   : > { %v1732_v46 = vld [vmem:[%s5560_s12 + $0x25e0] sm:$0xff]  ;;  %2769 = vmatpush.msra.mxu0 %v1596_v56  ;;  %2809 = vmatpush.msra.mxu2 %v573_v47  ;;  %v1133_v40 = vld [vmem:[%s5560_s12 + $0x1328] sm:$0xff]  ;;  %v2458_v47 = vadd.f32 %v2457_v23, %v2438_v41 }
 0x285   : > { %v1588_v29 = vld [vmem:[%s5560_s12 + $0x2160] sm:$0xff]  ;;  %2788 = vmatpush.msra.mxu1 %v1732_v46  ;;  %2828 = vmatpush.msra.mxu3 %v709_v48  ;;  %v1269_v8 = vld [vmem:[%s5560_s12 + $0x1768] sm:$0xff] }
 0x286   : > { %v1724_v25 = vld [vmem:[%s5560_s12 + $0x25a0] sm:$0xff]  ;;  %2770 = vmatpush.msra.mxu0 %v1588_v29  ;;  %2810 = vmatpush.msra.mxu2 %v565_v49  ;;  %v869_v42 = vld [vmem:[%s5560_s12 + $0xae8] sm:$0xff] }
 0x287   : > { %v1580_v2 = vld [vmem:[%s5560_s12 + $0x2120] sm:$0xff]  ;;  %2789 = vmatpush.msra.mxu1 %v1724_v25  ;;  %2829 = vmatpush.msra.mxu3 %v701_v7  ;;  %v1005_v43 = vld [vmem:[%s5560_s12 + $0xf28] sm:$0xff]  ;;  %v2477_v25 = vpop.f32.mrf.mxu1 }
 0x288   : > { %v1716_v61 = vld [vmem:[%s5560_s12 + $0x2560] sm:$0xff]  ;;  %2771 = vmatpush.msra.mxu0 %v1580_v2  ;;  %2811 = vmatpush.msra.mxu2 %v557_v50  ;;  %v1125_v44 = vld [vmem:[%s5560_s12 + $0x12e8] sm:$0xff] }
 0x289   : > { %v1572_v52 = vld [vmem:[%s5560_s12 + $0x20e0] sm:$0xff]  ;;  %2790 = vmatpush.msra.mxu1 %v1716_v61  ;;  %2830 = vmatpush.msra.mxu3 %v693_v51  ;;  %v1261_v45 = vld [vmem:[%s5560_s12 + $0x1728] sm:$0xff] }
 0x28a   : > { %v1708_v16 = vld [vmem:[%s5560_s12 + $0x2520] sm:$0xff]  ;;  %2772 = vmatpush.msra.mxu0 %v1572_v52  ;;  %2812 = vmatpush.msra.mxu2 %v549_v11  ;;  %v861_v19 = vld [vmem:[%s5560_s12 + $0xaa8] sm:$0xff]  ;;  %v2478_v52 = vadd.f32 %v2477_v25, %v2458_v47  ;;  %v505_v25 = vld [vmem:[#allocation2 + $0x10] sm:$0xff] }
 0x28b   : > { %v1564_v54 = vld [vmem:[%s5560_s12 + $0x20a0] sm:$0xff]  ;;  %2791 = vmatpush.msra.mxu1 %v1708_v16  ;;  %2831 = vmatpush.msra.mxu3 %v685_v28  ;;  %v997_v14 = vld [vmem:[%s5560_s12 + $0xee8] sm:$0xff]  ;;  %v2497_v28 = vpop.f32.mrf.mxu2 }
 0x28c   : > { %v1700_v55 = vld [vmem:[%s5560_s12 + $0x24e0] sm:$0xff]  ;;  %2773 = vmatpush.msra.mxu0 %v1564_v54  ;;  %2813 = vmatpush.msra.mxu2 %v541_v3  ;;  %v1117_v56 = vld [vmem:[%s5560_s12 + $0x12a8] sm:$0xff] }
 0x28d   : > { %v1556_v58 = vld [vmem:[%s5560_s12 + $0x2060] sm:$0xff]  ;;  %2792 = vmatpush.msra.mxu1 %v1700_v55  ;;  %2832 = vmatpush.msra.mxu3 %v677_v13  ;;  %v1253_v46 = vld [vmem:[%s5560_s12 + $0x16e8] sm:$0xff] }
 0x28e   : > { %v1692_v59 = vld [vmem:[%s5560_s12 + $0x24a0] sm:$0xff]  ;;  %2774 = vmatpush.msra.mxu0 %v1556_v58  ;;  %2814 = vmatpush.msra.mxu2 %v533_v53  ;;  %v853_v48 = vld [vmem:[%s5560_s12 + $0xa68] sm:$0xff]  ;;  %v2498_v53 = vadd.f32 %v2497_v28, %v2478_v52 }
 0x28f   : > { %v1548_v62 = vld [vmem:[%s5560_s12 + $0x2020] sm:$0xff]  ;;  %2793 = vmatpush.msra.mxu1 %v1692_v59  ;;  %2833 = vmatpush.msra.mxu3 %v669_v22  ;;  %v989_v29 = vld [vmem:[%s5560_s12 + $0xea8] sm:$0xff] }
 0x290   : > { %v1684_v63 = vld [vmem:[%s5560_s12 + $0x2460] sm:$0xff]  ;;  %2775 = vmatpush.msra.mxu0 %v1548_v62  ;;  %2815 = vmatpush.msra.mxu2 %v525_v0  ;;  %v1109_v49 = vld [vmem:[%s5560_s12 + $0x1268] sm:$0xff] }
 0x291   : > { %2794 = vmatpush.msra.mxu1 %v1684_v63  ;;  %v1676_v6 = vld [vmem:[%s5560_s12 + $0x2420] sm:$0xff]  ;;  %2834 = vmatpush.msra.mxu3 %v661_v57  ;;  %v1245_v7 = vld [vmem:[%s5560_s12 + $0x16a8] sm:$0xff]  ;;  %v2517_v63 = vpop.f32.mrf.mxu3 }
 0x292   : > { %v6557_v12 = vld [vmem:[%s5586_s19 + $0x40] sm:$0xff]  ;;  %2880 = vmatpush.msrb.mxu2 %v1157_v4  ;;  %2840 = vmatpush.msrb.mxu0 %v901_v5  ;;  %v845_v2 = vld [vmem:[%s5560_s12 + $0xa28] sm:$0xff] }
 0x293   : > { %2776 = vmatmul.f32.vlgmr.msra.gmra.mxu0 %v6557_v12  ;;  %2795 = vmatpush.msra.mxu1 %v1676_v6  ;;  %v981_v61 = vld [vmem:[%s5560_s12 + $0xe68] sm:$0xff] }
 0x294   : > { %2835 = vmatpush.msra.mxu3 %v653_v10  ;;  %2796 = vmatmul.f32.vlgmr.msra.gmra.mxu1 %v6565_v24  ;;  %v1101_v50 = vld [vmem:[%s5560_s12 + $0x1228] sm:$0xff] }
 0x295   : > { %2841 = vmatpush.msrb.mxu0 %v893_v15  ;;  %2860 = vmatpush.msrb.mxu1 %v1029_v17  ;;  %v1237_v51 = vld [vmem:[%s5560_s12 + $0x1668] sm:$0xff]  ;;  %v2518_v15 = vadd.f32 %v2517_v63, %v2498_v53 }
 0x296   : > { %2881 = vmatpush.msrb.mxu2 %v1149_v18  ;;  %2900 = vmatpush.msrb.mxu3 %v1285_v21  ;;  %v837_v16 = vld [vmem:[%s5560_s12 + $0x9e8] sm:$0xff] }
 0x297   : > { %2842 = vmatpush.msrb.mxu0 %v885_v26  ;;  %2861 = vmatpush.msrb.mxu1 %v1021_v30  ;;  %v973_v11 = vld [vmem:[%s5560_s12 + $0xe28] sm:$0xff] }
 0x298   : > { %2882 = vmatpush.msrb.mxu2 %v1141_v32  ;;  %2901 = vmatpush.msrb.mxu3 %v1277_v33  ;;  %v1093_v54 = vld [vmem:[%s5560_s12 + $0x11e8] sm:$0xff] }
 0x299   : > { %2843 = vmatpush.msrb.mxu0 %v877_v36  ;;  %2862 = vmatpush.msrb.mxu1 %v1013_v38  ;;  %v1229_v55 = vld [vmem:[%s5560_s12 + $0x1628] sm:$0xff] }
 0x29a   : > { %2883 = vmatpush.msrb.mxu2 %v1133_v40  ;;  %2902 = vmatpush.msrb.mxu3 %v1269_v8  ;;  %v829_v3 = vld [vmem:[%s5560_s12 + $0x9a8] sm:$0xff] }
 0x29b   : > { %2844 = vmatpush.msrb.mxu0 %v869_v42  ;;  %2863 = vmatpush.msrb.mxu1 %v1005_v43  ;;  %v965_v13 = vld [vmem:[%s5560_s12 + $0xde8] sm:$0xff] }
 0x29c   : > { %2884 = vmatpush.msrb.mxu2 %v1125_v44  ;;  %2903 = vmatpush.msrb.mxu3 %v1261_v45  ;;  %v1085_v58 = vld [vmem:[%s5560_s12 + $0x11a8] sm:$0xff] }
 0x29d   : > { %2845 = vmatpush.msrb.mxu0 %v861_v19  ;;  %2864 = vmatpush.msrb.mxu1 %v997_v14  ;;  %v1221_v59 = vld [vmem:[%s5560_s12 + $0x15e8] sm:$0xff] }
 0x29e   : > { %2885 = vmatpush.msrb.mxu2 %v1117_v56  ;;  %2904 = vmatpush.msrb.mxu3 %v1253_v46  ;;  %v821_v22 = vld [vmem:[%s5560_s12 + $0x968] sm:$0xff] }
 0x29f   : > { %2846 = vmatpush.msrb.mxu0 %v853_v48  ;;  %2865 = vmatpush.msrb.mxu1 %v989_v29  ;;  %v957_v62 = vld [vmem:[%s5560_s12 + $0xda8] sm:$0xff] }
 0x2a0   : > { %2886 = vmatpush.msrb.mxu2 %v1109_v49  ;;  %2905 = vmatpush.msrb.mxu3 %v1245_v7  ;;  %v1077_v0 = vld [vmem:[%s5560_s12 + $0x1168] sm:$0xff] }
 0x2a1   : > { %2847 = vmatpush.msrb.mxu0 %v845_v2  ;;  %2866 = vmatpush.msrb.mxu1 %v981_v61  ;;  %v1213_v57 = vld [vmem:[%s5560_s12 + $0x15a8] sm:$0xff] }
 0x2a2   : > { %2887 = vmatpush.msrb.mxu2 %v1101_v50  ;;  %2906 = vmatpush.msrb.mxu3 %v1237_v51  ;;  %v813_v4 = vld [vmem:[%s5560_s12 + $0x928] sm:$0xff] }
 0x2a3   : > { %2848 = vmatpush.msrb.mxu0 %v837_v16  ;;  %2867 = vmatpush.msrb.mxu1 %v973_v11  ;;  %v949_v5 = vld [vmem:[%s5560_s12 + $0xd68] sm:$0xff] }
 0x2a4   : > { %2888 = vmatpush.msrb.mxu2 %v1093_v54  ;;  %2907 = vmatpush.msrb.mxu3 %v1229_v55  ;;  %v1069_v6 = vld [vmem:[%s5560_s12 + $0x1128] sm:$0xff]  ;;  %v2537_v30 = vpop.f32.mrf.mxu0 }
 0x2a5   : > { %2849 = vmatpush.msrb.mxu0 %v829_v3  ;;  %2868 = vmatpush.msrb.mxu1 %v965_v13  ;;  %v1205_v10 = vld [vmem:[%s5560_s12 + $0x1568] sm:$0xff]  ;;  %v2538_v35 = vadd.f32 %v2537_v30, %v2518_v15 }
 0x2a6   : > { %2889 = vmatpush.msrb.mxu2 %v1085_v58  ;;  %2908 = vmatpush.msrb.mxu3 %v1221_v59  ;;  %v805_v17 = vld [vmem:[%s5560_s12 + $0x8e8] sm:$0xff] }
 0x2a7   : > { %2850 = vmatpush.msrb.mxu0 %v821_v22  ;;  %2869 = vmatpush.msrb.mxu1 %v957_v62  ;;  %v941_v18 = vld [vmem:[%s5560_s12 + $0xd28] sm:$0xff] }
 0x2a8   : > { %2890 = vmatpush.msrb.mxu2 %v1077_v0  ;;  %2909 = vmatpush.msrb.mxu3 %v1213_v57  ;;  %v1061_v21 = vld [vmem:[%s5560_s12 + $0x10e8] sm:$0xff]  ;;  %v2557_v8 = vpop.f32.mrf.mxu1 }
 0x2a9   : > { %2851 = vmatpush.msrb.mxu0 %v813_v4  ;;  %2870 = vmatpush.msrb.mxu1 %v949_v5  ;;  %v1197_v26 = vld [vmem:[%s5560_s12 + $0x1528] sm:$0xff]  ;;  %v2558_v44 = vadd.f32 %v2557_v8, %v2538_v35 }
 0x2aa   : > { %2891 = vmatpush.msrb.mxu2 %v1069_v6  ;;  %2910 = vmatpush.msrb.mxu3 %v1205_v10  ;;  %v797_v32 = vld [vmem:[%s5560_s12 + $0x8a8] sm:$0xff] }
 0x2ab   : > { %v933_v33 = vld [vmem:[%s5560_s12 + $0xce8] sm:$0xff]  ;;  %2852 = vmatpush.msrb.mxu0 %v805_v17  ;;  %2871 = vmatpush.msrb.mxu1 %v941_v18 }
 0x2ac   : > { %v1053_v36 = vld [vmem:[%s5560_s12 + $0x10a8] sm:$0xff]  ;;  %2892 = vmatpush.msrb.mxu2 %v1061_v21  ;;  %2911 = vmatpush.msrb.mxu3 %v1197_v26  ;;  %v2577_v19 = vpop.f32.mrf.mxu2 }
 0x2ad   : > { %v1189_v38 = vld [vmem:[%s5560_s12 + $0x14e8] sm:$0xff]  ;;  %2853 = vmatpush.msrb.mxu0 %v797_v32  ;;  %2872 = vmatpush.msrb.mxu1 %v933_v33  ;;  %v2578_v46 = vadd.f32 %v2577_v19, %v2558_v44 }
 0x2ae   : > { %v789_v39 = vld [vmem:[%s5560_s12 + $0x868] sm:$0xff]  ;;  %2893 = vmatpush.msrb.mxu2 %v1053_v36  ;;  %2912 = vmatpush.msrb.mxu3 %v1189_v38 }
 0x2af   : > { %v925_v40 = vld [vmem:[%s5560_s12 + $0xca8] sm:$0xff]  ;;  %2854 = vmatpush.msrb.mxu0 %v789_v39  ;;  %2816 = vmatmul.f32.vlgmr.msra.gmra.mxu2 %v6464_v60  ;;  %v2597_v49 = vpop.f32.mrf.mxu3 }
 0x2b0   : > { %v1045_v41 = vld [vmem:[%s5560_s12 + $0x1068] sm:$0xff]  ;;  %2873 = vmatpush.msrb.mxu1 %v925_v40  ;;  %v2598_v61 = vadd.f32 %v2597_v49, %v2578_v46  ;;  %2836 = vmatmul.f32.vlgmr.msra.gmra.mxu3 %v6477_v1 }
 0x2b1   : > { %v1181_v42 = vld [vmem:[%s5560_s12 + $0x14a8] sm:$0xff]  ;;  %2894 = vmatpush.msrb.mxu2 %v1045_v41 }
 0x2b2   : > { %v781_v43 = vld [vmem:[%s5560_s12 + $0x828] sm:$0xff]  ;;  %2913 = vmatpush.msrb.mxu3 %v1181_v42  ;;  %v3403_v16 = vadd.f32 %v2598_v61, %v505_v25  ;;  %v646_v61 = vld [vmem:[%s5560_s12 + $0x3f0] sm:$0xff] }
 0x2b3   : > { %v917_v45 = vld [vmem:[%s5560_s12 + $0xc68] sm:$0xff]  ;;  %2855 = vmatpush.msrb.mxu0 %v781_v43 }
 0x2b4   : > { %v1037_v23 = vld [vmem:[%s5560_s12 + $0x1028] sm:$0xff]  ;;  %2874 = vmatpush.msrb.mxu1 %v917_v45  ;;  %3411 = vst [vmem:[#allocation2 + $0x10] sm:$0xff] %v3403_v16  ;;  %2856 = vmatmul.f32.vlgmr.msrb.gmra.mxu0 %v6457_v34  ;;  %v774_v16 = vld [vmem:[%s5560_s12 + $0x7f0] sm:$0xff] }
 0x2b5   : > { %v1173_v14 = vld [vmem:[%s5560_s12 + $0x1468] sm:$0xff]  ;;  %2895 = vmatpush.msrb.mxu2 %v1037_v23 }
 0x2b6   : > { %v1413_v56 = vld [vmem:[%s5560_s12 + $0x1be8] sm:$0xff]  ;;  %2914 = vmatpush.msrb.mxu3 %v1173_v14 }
 0x2b7   : > { %v1669_v47 = vld [vmem:[%s5560_s12 + $0x23e8] sm:$0xff]  ;;  %2920 = vmatpush.msra.mxu0 %v1413_v56  ;;  %2896 = vmatmul.f32.vlgmr.msrb.gmra.mxu2 %v6496_v27 }
 0x2b8   : > { %v909_v48 = vld [vmem:[%s5560_s12 + $0xc28] sm:$0xff]  ;;  %2960 = vmatpush.msra.mxu2 %v1669_v47 }
 0x2b9   : > { %v1165_v29 = vld [vmem:[%s5560_s12 + $0x1428] sm:$0xff]  ;;  %2875 = vmatpush.msrb.mxu1 %v909_v48 }
 0x2ba   : > { %v1405_v7 = vld [vmem:[%s5560_s12 + $0x1ba8] sm:$0xff]  ;;  %2915 = vmatpush.msrb.mxu3 %v1165_v29  ;;  %2876 = vmatmul.f32.vlgmr.msrb.gmra.mxu1 %v6469_v9 }
 0x2bb   : > { %v1541_v2 = vld [vmem:[%s5560_s12 + $0x1fe8] sm:$0xff]  ;;  %2921 = vmatpush.msra.mxu0 %v1405_v7  ;;  %2916 = vmatmul.f32.vlgmr.msrb.gmra.mxu3 %v6509_v37 }
 0x2bc   : > { %v1661_v60 = vld [vmem:[%s5560_s12 + $0x23a8] sm:$0xff]  ;;  %2940 = vmatpush.msra.mxu1 %v1541_v2 }
 0x2bd   : > { %v1797_v50 = vld [vmem:[%s5560_s12 + $0x27e8] sm:$0xff]  ;;  %2961 = vmatpush.msra.mxu2 %v1661_v60  ;;  %v902_v60 = vld [vmem:[%s5560_s12 + $0xbf0] sm:$0xff] }
 0x2be   : > { %v1397_v51 = vld [vmem:[%s5560_s12 + $0x1b68] sm:$0xff]  ;;  %2980 = vmatpush.msra.mxu3 %v1797_v50 }
 0x2bf   : > { %v1533_v52 = vld [vmem:[%s5560_s12 + $0x1fa8] sm:$0xff]  ;;  %2922 = vmatpush.msra.mxu0 %v1397_v51 }
 0x2c0   : > { %v1653_v11 = vld [vmem:[%s5560_s12 + $0x2368] sm:$0xff]  ;;  %2941 = vmatpush.msra.mxu1 %v1533_v52  ;;  %v638_v52 = vld [vmem:[%s5560_s12 + $0x3b0] sm:$0xff] }
 0x2c1   : > { %v1789_v28 = vld [vmem:[%s5560_s12 + $0x27a8] sm:$0xff]  ;;  %2962 = vmatpush.msra.mxu2 %v1653_v11  ;;  %v894_v11 = vld [vmem:[%s5560_s12 + $0xbb0] sm:$0xff] }
 0x2c2   : > { %v1389_v1 = vld [vmem:[%s5560_s12 + $0x1b28] sm:$0xff]  ;;  %2981 = vmatpush.msra.mxu3 %v1789_v28  ;;  %v1030_v28 = vld [vmem:[%s5560_s12 + $0xff0] sm:$0xff] }
 0x2c3   : > { %v1525_v54 = vld [vmem:[%s5560_s12 + $0x1f68] sm:$0xff]  ;;  %2923 = vmatpush.msra.mxu0 %v1389_v1  ;;  %v886_v1 = vld [vmem:[%s5560_s12 + $0xb70] sm:$0xff] }
 0x2c4   : > { %v1645_v55 = vld [vmem:[%s5560_s12 + $0x2328] sm:$0xff]  ;;  %2942 = vmatpush.msra.mxu1 %v1525_v54  ;;  %v1022_v54 = vld [vmem:[%s5560_s12 + $0xfb0] sm:$0xff] }
 0x2c5   : > { %v1781_v3 = vld [vmem:[%s5560_s12 + $0x2768] sm:$0xff]  ;;  %2963 = vmatpush.msra.mxu2 %v1645_v55  ;;  %v622_v55 = vld [vmem:[%s5560_s12 + $0x330] sm:$0xff] }
 0x2c6   : > { %v1381_v13 = vld [vmem:[%s5560_s12 + $0x1ae8] sm:$0xff]  ;;  %2982 = vmatpush.msra.mxu3 %v1781_v3  ;;  %v758_v3 = vld [vmem:[%s5560_s12 + $0x770] sm:$0xff] }
 0x2c7   : > { %v1517_v58 = vld [vmem:[%s5560_s12 + $0x1f28] sm:$0xff]  ;;  %2924 = vmatpush.msra.mxu0 %v1381_v13  ;;  %v614_v13 = vld [vmem:[%s5560_s12 + $0x2f0] sm:$0xff] }
 0x2c8   : > { %v1637_v59 = vld [vmem:[%s5560_s12 + $0x22e8] sm:$0xff]  ;;  %2943 = vmatpush.msra.mxu1 %v1517_v58  ;;  %v750_v58 = vld [vmem:[%s5560_s12 + $0x730] sm:$0xff] }
 0x2c9   : > { %v1773_v53 = vld [vmem:[%s5560_s12 + $0x2728] sm:$0xff]  ;;  %2964 = vmatpush.msra.mxu2 %v1637_v59  ;;  %v870_v59 = vld [vmem:[%s5560_s12 + $0xaf0] sm:$0xff] }
 0x2ca   : > { %v1373_v27 = vld [vmem:[%s5560_s12 + $0x1aa8] sm:$0xff]  ;;  %2983 = vmatpush.msra.mxu3 %v1773_v53  ;;  %v1006_v53 = vld [vmem:[%s5560_s12 + $0xf30] sm:$0xff] }
 0x2cb   : > { %v1509_v22 = vld [vmem:[%s5560_s12 + $0x1ee8] sm:$0xff]  ;;  %2925 = vmatpush.msra.mxu0 %v1373_v27  ;;  %v606_v27 = vld [vmem:[%s5560_s12 + $0x2b0] sm:$0xff] }
 0x2cc   : > { %v1629_v62 = vld [vmem:[%s5560_s12 + $0x22a8] sm:$0xff]  ;;  %2944 = vmatpush.msra.mxu1 %v1509_v22  ;;  %v742_v22 = vld [vmem:[%s5560_s12 + $0x6f0] sm:$0xff] }
 0x2cd   : > { %v1765_v63 = vld [vmem:[%s5560_s12 + $0x26e8] sm:$0xff]  ;;  %2965 = vmatpush.msra.mxu2 %v1629_v62  ;;  %v862_v62 = vld [vmem:[%s5560_s12 + $0xab0] sm:$0xff] }
 0x2ce   : > { %v1365_v34 = vld [vmem:[%s5560_s12 + $0x1a68] sm:$0xff]  ;;  %2984 = vmatpush.msra.mxu3 %v1765_v63  ;;  %v998_v63 = vld [vmem:[%s5560_s12 + $0xef0] sm:$0xff] }
 0x2cf   : > { %v1501_v0 = vld [vmem:[%s5560_s12 + $0x1ea8] sm:$0xff]  ;;  %2926 = vmatpush.msra.mxu0 %v1365_v34  ;;  %v598_v34 = vld [vmem:[%s5560_s12 + $0x270] sm:$0xff] }
 0x2d0   : > { %v1621_v37 = vld [vmem:[%s5560_s12 + $0x2268] sm:$0xff]  ;;  %2945 = vmatpush.msra.mxu1 %v1501_v0  ;;  %v734_v0 = vld [vmem:[%s5560_s12 + $0x6b0] sm:$0xff] }
 0x2d1   : > { %v1757_v57 = vld [vmem:[%s5560_s12 + $0x26a8] sm:$0xff]  ;;  %2966 = vmatpush.msra.mxu2 %v1621_v37  ;;  %v854_v37 = vld [vmem:[%s5560_s12 + $0xa70] sm:$0xff] }
 0x2d2   : > { %v1357_v4 = vld [vmem:[%s5560_s12 + $0x1a28] sm:$0xff]  ;;  %2985 = vmatpush.msra.mxu3 %v1757_v57  ;;  %v990_v57 = vld [vmem:[%s5560_s12 + $0xeb0] sm:$0xff] }
 0x2d3   : > { %v1493_v5 = vld [vmem:[%s5560_s12 + $0x1e68] sm:$0xff]  ;;  %2927 = vmatpush.msra.mxu0 %v1357_v4  ;;  %v590_v4 = vld [vmem:[%s5560_s12 + $0x230] sm:$0xff] }
 0x2d4   : > { %v1613_v6 = vld [vmem:[%s5560_s12 + $0x2228] sm:$0xff]  ;;  %2946 = vmatpush.msra.mxu1 %v1493_v5  ;;  %v726_v5 = vld [vmem:[%s5560_s12 + $0x670] sm:$0xff] }
 0x2d5   : > { %v1749_v9 = vld [vmem:[%s5560_s12 + $0x2668] sm:$0xff]  ;;  %2967 = vmatpush.msra.mxu2 %v1613_v6  ;;  %v846_v6 = vld [vmem:[%s5560_s12 + $0xa30] sm:$0xff] }
 0x2d6   : > { %v1349_v10 = vld [vmem:[%s5560_s12 + $0x19e8] sm:$0xff]  ;;  %2986 = vmatpush.msra.mxu3 %v1749_v9  ;;  %v982_v9 = vld [vmem:[%s5560_s12 + $0xe70] sm:$0xff] }
 0x2d7   : > { %v1485_v15 = vld [vmem:[%s5560_s12 + $0x1e28] sm:$0xff]  ;;  %2928 = vmatpush.msra.mxu0 %v1349_v10  ;;  %v582_v10 = vld [vmem:[%s5560_s12 + $0x1f0] sm:$0xff] }
 0x2d8   : > { %v1605_v17 = vld [vmem:[%s5560_s12 + $0x21e8] sm:$0xff]  ;;  %2947 = vmatpush.msra.mxu1 %v1485_v15  ;;  %v718_v15 = vld [vmem:[%s5560_s12 + $0x630] sm:$0xff] }
 0x2d9   : > { %v1741_v18 = vld [vmem:[%s5560_s12 + $0x2628] sm:$0xff]  ;;  %2968 = vmatpush.msra.mxu2 %v1605_v17  ;;  %v838_v17 = vld [vmem:[%s5560_s12 + $0x9f0] sm:$0xff] }
 0x2da   : > { %v1341_v21 = vld [vmem:[%s5560_s12 + $0x19a8] sm:$0xff]  ;;  %2987 = vmatpush.msra.mxu3 %v1741_v18  ;;  %v974_v18 = vld [vmem:[%s5560_s12 + $0xe30] sm:$0xff] }
 0x2db   : > { %v1477_v26 = vld [vmem:[%s5560_s12 + $0x1de8] sm:$0xff]  ;;  %2929 = vmatpush.msra.mxu0 %v1341_v21  ;;  %v574_v21 = vld [vmem:[%s5560_s12 + $0x1b0] sm:$0xff] }
 0x2dc   : > { %v1597_v30 = vld [vmem:[%s5560_s12 + $0x21a8] sm:$0xff]  ;;  %2948 = vmatpush.msra.mxu1 %v1477_v26  ;;  %v710_v26 = vld [vmem:[%s5560_s12 + $0x5f0] sm:$0xff] }
 0x2dd   : > { %v1733_v32 = vld [vmem:[%s5560_s12 + $0x25e8] sm:$0xff]  ;;  %2969 = vmatpush.msra.mxu2 %v1597_v30  ;;  %v830_v30 = vld [vmem:[%s5560_s12 + $0x9b0] sm:$0xff] }
 0x2de   : > { %v1333_v33 = vld [vmem:[%s5560_s12 + $0x1968] sm:$0xff]  ;;  %2988 = vmatpush.msra.mxu3 %v1733_v32  ;;  %v966_v32 = vld [vmem:[%s5560_s12 + $0xdf0] sm:$0xff] }
 0x2df   : > { %v1469_v35 = vld [vmem:[%s5560_s12 + $0x1da8] sm:$0xff]  ;;  %2930 = vmatpush.msra.mxu0 %v1333_v33  ;;  %v566_v33 = vld [vmem:[%s5560_s12 + $0x170] sm:$0xff] }
 0x2e0   : > { %v1589_v36 = vld [vmem:[%s5560_s12 + $0x2168] sm:$0xff]  ;;  %2949 = vmatpush.msra.mxu1 %v1469_v35  ;;  %v702_v35 = vld [vmem:[%s5560_s12 + $0x5b0] sm:$0xff] }
 0x2e1   : > { %v1725_v38 = vld [vmem:[%s5560_s12 + $0x25a8] sm:$0xff]  ;;  %2970 = vmatpush.msra.mxu2 %v1589_v36  ;;  %v822_v36 = vld [vmem:[%s5560_s12 + $0x970] sm:$0xff] }
 0x2e2   : > { %v1325_v39 = vld [vmem:[%s5560_s12 + $0x1928] sm:$0xff]  ;;  %2989 = vmatpush.msra.mxu3 %v1725_v38  ;;  %v958_v38 = vld [vmem:[%s5560_s12 + $0xdb0] sm:$0xff] }
 0x2e3   : > { %v1461_v40 = vld [vmem:[%s5560_s12 + $0x1d68] sm:$0xff]  ;;  %2931 = vmatpush.msra.mxu0 %v1325_v39  ;;  %v558_v39 = vld [vmem:[%s5560_s12 + $0x130] sm:$0xff] }
 0x2e4   : > { %v1581_v8 = vld [vmem:[%s5560_s12 + $0x2128] sm:$0xff]  ;;  %2950 = vmatpush.msra.mxu1 %v1461_v40  ;;  %v694_v40 = vld [vmem:[%s5560_s12 + $0x570] sm:$0xff] }
 0x2e5   : > { %v1717_v41 = vld [vmem:[%s5560_s12 + $0x2568] sm:$0xff]  ;;  %2971 = vmatpush.msra.mxu2 %v1581_v8  ;;  %v814_v8 = vld [vmem:[%s5560_s12 + $0x930] sm:$0xff] }
 0x2e6   : > { %v1317_v42 = vld [vmem:[%s5560_s12 + $0x18e8] sm:$0xff]  ;;  %2990 = vmatpush.msra.mxu3 %v1717_v41  ;;  %v950_v41 = vld [vmem:[%s5560_s12 + $0xd70] sm:$0xff] }
 0x2e7   : > { %v1453_v43 = vld [vmem:[%s5560_s12 + $0x1d28] sm:$0xff]  ;;  %2932 = vmatpush.msra.mxu0 %v1317_v42  ;;  %v550_v42 = vld [vmem:[%s5560_s12 + $0xf0] sm:$0xff] }
 0x2e8   : > { %v1573_v44 = vld [vmem:[%s5560_s12 + $0x20e8] sm:$0xff]  ;;  %2951 = vmatpush.msra.mxu1 %v1453_v43  ;;  %v686_v43 = vld [vmem:[%s5560_s12 + $0x530] sm:$0xff] }
 0x2e9   : > { %v1709_v45 = vld [vmem:[%s5560_s12 + $0x2528] sm:$0xff]  ;;  %2972 = vmatpush.msra.mxu2 %v1573_v44  ;;  %v806_v44 = vld [vmem:[%s5560_s12 + $0x8f0] sm:$0xff] }
 0x2ea   : > { %v1309_v23 = vld [vmem:[%s5560_s12 + $0x18a8] sm:$0xff]  ;;  %2991 = vmatpush.msra.mxu3 %v1709_v45  ;;  %v942_v45 = vld [vmem:[%s5560_s12 + $0xd30] sm:$0xff] }
 0x2eb   : > { %v1445_v19 = vld [vmem:[%s5560_s12 + $0x1ce8] sm:$0xff]  ;;  %2933 = vmatpush.msra.mxu0 %v1309_v23  ;;  %v542_v23 = vld [vmem:[%s5560_s12 + $0xb0] sm:$0xff] }
 0x2ec   : > { %v1565_v14 = vld [vmem:[%s5560_s12 + $0x20a8] sm:$0xff]  ;;  %2952 = vmatpush.msra.mxu1 %v1445_v19  ;;  %v678_v19 = vld [vmem:[%s5560_s12 + $0x4f0] sm:$0xff] }
 0x2ed   : > { %v1701_v56 = vld [vmem:[%s5560_s12 + $0x24e8] sm:$0xff]  ;;  %2973 = vmatpush.msra.mxu2 %v1565_v14  ;;  %v798_v14 = vld [vmem:[%s5560_s12 + $0x8b0] sm:$0xff] }
 0x2ee   : > { %v1301_v46 = vld [vmem:[%s5560_s12 + $0x1868] sm:$0xff]  ;;  %2992 = vmatpush.msra.mxu3 %v1701_v56  ;;  %v934_v56 = vld [vmem:[%s5560_s12 + $0xcf0] sm:$0xff] }
 0x2ef   : > { %v1437_v47 = vld [vmem:[%s5560_s12 + $0x1ca8] sm:$0xff]  ;;  %2934 = vmatpush.msra.mxu0 %v1301_v46  ;;  %v534_v46 = vld [vmem:[%s5560_s12 + $0x70] sm:$0xff] }
 0x2f0   : > { %v1557_v48 = vld [vmem:[%s5560_s12 + $0x2068] sm:$0xff]  ;;  %2953 = vmatpush.msra.mxu1 %v1437_v47  ;;  %v670_v47 = vld [vmem:[%s5560_s12 + $0x4b0] sm:$0xff] }
 0x2f1   : > { %v1693_v29 = vld [vmem:[%s5560_s12 + $0x24a8] sm:$0xff]  ;;  %2974 = vmatpush.msra.mxu2 %v1557_v48  ;;  %v790_v48 = vld [vmem:[%s5560_s12 + $0x870] sm:$0xff] }
 0x2f2   : > { %v1293_v25 = vld [vmem:[%s5560_s12 + $0x1828] sm:$0xff]  ;;  %2993 = vmatpush.msra.mxu3 %v1693_v29  ;;  %v926_v29 = vld [vmem:[%s5560_s12 + $0xcb0] sm:$0xff] }
 0x2f3   : > { %v1429_v49 = vld [vmem:[%s5560_s12 + $0x1c68] sm:$0xff]  ;;  %2935 = vmatpush.msra.mxu0 %v1293_v25  ;;  %v526_v25 = vld [vmem:[%s5560_s12 + $0x30] sm:$0xff] }
 0x2f4   : > { %v1549_v7 = vld [vmem:[%s5560_s12 + $0x2028] sm:$0xff]  ;;  %2954 = vmatpush.msra.mxu1 %v1429_v49  ;;  %2936 = vmatmul.f32.vlgmr.msra.gmra.mxu0 %v6489_v20  ;;  %v630_v20 = vld [vmem:[%s5560_s12 + $0x370] sm:$0xff] }
 0x2f5   : > { %v1685_v2 = vld [vmem:[%s5560_s12 + $0x2468] sm:$0xff]  ;;  %2975 = vmatpush.msra.mxu2 %v1549_v7  ;;  %3000 = vmatpush.msrb.mxu0 %v646_v61  ;;  %v662_v49 = vld [vmem:[%s5560_s12 + $0x470] sm:$0xff]  ;;  %v2637_v7 = vpop.f32.mrf.mxu1 }
 0x2f6   : > { %2994 = vmatpush.msra.mxu3 %v1685_v2  ;;  %v1421_v50 = vld [vmem:[%s5560_s12 + $0x1c28] sm:$0xff]  ;;  %2976 = vmatmul.f32.vlgmr.msra.gmra.mxu2 %v6557_v12  ;;  %v766_v12 = vld [vmem:[%s5560_s12 + $0x7b0] sm:$0xff] }
 0x2f7   : > { %v1677_v51 = vld [vmem:[%s5560_s12 + $0x2428] sm:$0xff]  ;;  %3040 = vmatpush.msrb.mxu2 %v902_v60  ;;  %2955 = vmatpush.msra.mxu1 %v1421_v50  ;;  %v782_v2 = vld [vmem:[%s5560_s12 + $0x830] sm:$0xff] }
 0x2f8   : > { %2995 = vmatpush.msra.mxu3 %v1677_v51  ;;  %2956 = vmatmul.f32.vlgmr.msra.gmra.mxu1 %v6501_v31  ;;  %v878_v31 = vld [vmem:[%s5560_s12 + $0xb30] sm:$0xff]  ;;  %v2617_v51 = vpop.f32.mrf.mxu0 }
 0x2f9   : > { %2996 = vmatmul.f32.vlgmr.msra.gmra.mxu3 %v6565_v24  ;;  %3001 = vmatpush.msrb.mxu0 %v638_v52  ;;  %v1014_v24 = vld [vmem:[%s5560_s12 + $0xf70] sm:$0xff] }
 0x2fa   : > { %3020 = vmatpush.msrb.mxu1 %v774_v16  ;;  %3041 = vmatpush.msrb.mxu2 %v894_v11  ;;  %v918_v61 = vld [vmem:[%s5560_s12 + $0xc70] sm:$0xff]  ;;  %v2638_v11 = vadd.f32 %v2637_v7, %v2617_v51 }
 0x2fb   : > { %3060 = vmatpush.msrb.mxu3 %v1030_v28  ;;  %3002 = vmatpush.msrb.mxu0 %v630_v20  ;;  %v1158_v60 = vld [vmem:[%s5560_s12 + $0x13f0] sm:$0xff] }
 0x2fc   : > { %3021 = vmatpush.msrb.mxu1 %v766_v12  ;;  %3042 = vmatpush.msrb.mxu2 %v886_v1  ;;  %v1414_v50 = vld [vmem:[%s5560_s12 + $0x1bf0] sm:$0xff]  ;;  %v2657_v12 = vpop.f32.mrf.mxu2 }
 0x2fd   : > { %3061 = vmatpush.msrb.mxu3 %v1022_v54  ;;  %3003 = vmatpush.msrb.mxu0 %v622_v55  ;;  %v654_v52 = vld [vmem:[%s5560_s12 + $0x430] sm:$0xff] }
 0x2fe   : > { %3022 = vmatpush.msrb.mxu1 %v758_v3  ;;  %3043 = vmatpush.msrb.mxu2 %v878_v31  ;;  %v910_v16 = vld [vmem:[%s5560_s12 + $0xc30] sm:$0xff] }
 0x2ff   : > { %3062 = vmatpush.msrb.mxu3 %v1014_v24  ;;  %3004 = vmatpush.msrb.mxu0 %v614_v13  ;;  %v1150_v28 = vld [vmem:[%s5560_s12 + $0x13b0] sm:$0xff]  ;;  %v2658_v13 = vadd.f32 %v2657_v12, %v2638_v11 }
 0x300   : > { %3023 = vmatpush.msrb.mxu1 %v750_v58  ;;  %3044 = vmatpush.msrb.mxu2 %v870_v59  ;;  %v1286_v20 = vld [vmem:[%s5560_s12 + $0x17f0] sm:$0xff] }
 0x301   : > { %3063 = vmatpush.msrb.mxu3 %v1006_v53  ;;  %3005 = vmatpush.msrb.mxu0 %v606_v27  ;;  %v1406_v1 = vld [vmem:[%s5560_s12 + $0x1bb0] sm:$0xff]  ;;  %v2677_v53 = vpop.f32.mrf.mxu3 }
 0x302   : > { %3024 = vmatpush.msrb.mxu1 %v742_v22  ;;  %3045 = vmatpush.msrb.mxu2 %v862_v62  ;;  %v1542_v54 = vld [vmem:[%s5560_s12 + $0x1ff0] sm:$0xff] }
 0x303   : > { %3064 = vmatpush.msrb.mxu3 %v998_v63  ;;  %3006 = vmatpush.msrb.mxu0 %v598_v34  ;;  %v1142_v55 = vld [vmem:[%s5560_s12 + $0x1370] sm:$0xff]  ;;  %v2678_v34 = vadd.f32 %v2677_v53, %v2658_v13 }
 0x304   : > { %3025 = vmatpush.msrb.mxu1 %v734_v0  ;;  %3046 = vmatpush.msrb.mxu2 %v854_v37  ;;  %v1278_v3 = vld [vmem:[%s5560_s12 + $0x17b0] sm:$0xff] }
 0x305   : > { %3065 = vmatpush.msrb.mxu3 %v990_v57  ;;  %3007 = vmatpush.msrb.mxu0 %v590_v4  ;;  %v1398_v31 = vld [vmem:[%s5560_s12 + $0x1b70] sm:$0xff]  ;;  %v2697_v57 = vpop.f32.mrf.mxu0 }
 0x306   : > { %3026 = vmatpush.msrb.mxu1 %v726_v5  ;;  %3047 = vmatpush.msrb.mxu2 %v846_v6  ;;  %v1534_v24 = vld [vmem:[%s5560_s12 + $0x1fb0] sm:$0xff] }
 0x307   : > { %3066 = vmatpush.msrb.mxu3 %v982_v9  ;;  %3008 = vmatpush.msrb.mxu0 %v582_v10  ;;  %v1134_v58 = vld [vmem:[%s5560_s12 + $0x1330] sm:$0xff] }
 0x308   : > { %3027 = vmatpush.msrb.mxu1 %v718_v15  ;;  %3048 = vmatpush.msrb.mxu2 %v838_v17  ;;  %v1270_v59 = vld [vmem:[%s5560_s12 + $0x1770] sm:$0xff]  ;;  %v2698_v17 = vadd.f32 %v2697_v57, %v2678_v34  ;;  %v6839_v57 = vld [vmem:[%s5586_s19 + $0x18] sm:$0xff] }
 0x309   : > { %3067 = vmatpush.msrb.mxu3 %v974_v18  ;;  %3009 = vmatpush.msrb.mxu0 %v574_v21  ;;  %v1390_v27 = vld [vmem:[%s5560_s12 + $0x1b30] sm:$0xff] }
 0x30a   : > { %3028 = vmatpush.msrb.mxu1 %v710_v26  ;;  %3049 = vmatpush.msrb.mxu2 %v830_v30  ;;  %v1526_v22 = vld [vmem:[%s5560_s12 + $0x1f70] sm:$0xff]  ;;  %v2717_v26 = vpop.f32.mrf.mxu1 }
 0x30b   : > { %3068 = vmatpush.msrb.mxu3 %v966_v32  ;;  %3010 = vmatpush.msrb.mxu0 %v566_v33  ;;  %v1126_v62 = vld [vmem:[%s5560_s12 + $0x12f0] sm:$0xff] }
 0x30c   : > { %3029 = vmatpush.msrb.mxu1 %v702_v35  ;;  %3050 = vmatpush.msrb.mxu2 %v822_v36  ;;  %v1262_v63 = vld [vmem:[%s5560_s12 + $0x1730] sm:$0xff] }
 0x30d   : > { %3069 = vmatpush.msrb.mxu3 %v958_v38  ;;  %3011 = vmatpush.msrb.mxu0 %v558_v39  ;;  %v1382_v0 = vld [vmem:[%s5560_s12 + $0x1af0] sm:$0xff]  ;;  %v2718_v39 = vadd.f32 %v2717_v26, %v2698_v17 }
 0x30e   : > { %3030 = vmatpush.msrb.mxu1 %v694_v40  ;;  %3051 = vmatpush.msrb.mxu2 %v814_v8  ;;  %v1518_v37 = vld [vmem:[%s5560_s12 + $0x1f30] sm:$0xff] }
 0x30f   : > { %3070 = vmatpush.msrb.mxu3 %v950_v41  ;;  %3012 = vmatpush.msrb.mxu0 %v550_v42  ;;  %v1118_v4 = vld [vmem:[%s5560_s12 + $0x12b0] sm:$0xff]  ;;  %v2737_v41 = vpop.f32.mrf.mxu2 }
 0x310   : > { %3031 = vmatpush.msrb.mxu1 %v686_v43  ;;  %3052 = vmatpush.msrb.mxu2 %v806_v44  ;;  %v1254_v5 = vld [vmem:[%s5560_s12 + $0x16f0] sm:$0xff] }
 0x311   : > { %3071 = vmatpush.msrb.mxu3 %v942_v45  ;;  %3013 = vmatpush.msrb.mxu0 %v542_v23  ;;  %v1374_v6 = vld [vmem:[%s5560_s12 + $0x1ab0] sm:$0xff] }
 0x312   : > { %3032 = vmatpush.msrb.mxu1 %v678_v19  ;;  %3053 = vmatpush.msrb.mxu2 %v798_v14  ;;  %v1510_v9 = vld [vmem:[%s5560_s12 + $0x1ef0] sm:$0xff]  ;;  %v2738_v14 = vadd.f32 %v2737_v41, %v2718_v39  ;;  %v615_v39 = vld [vmem:[%s5560_s12 + $0x2f8] sm:$0xff] }
 0x313   : > { %3072 = vmatpush.msrb.mxu3 %v934_v56  ;;  %3014 = vmatpush.msrb.mxu0 %v534_v46  ;;  %v1110_v10 = vld [vmem:[%s5560_s12 + $0x1270] sm:$0xff]  ;;  %v6871_v41 = vld [vmem:[%s5586_s19 + $0x38] sm:$0xff] }
 0x314   : > { %3033 = vmatpush.msrb.mxu1 %v670_v47  ;;  %3054 = vmatpush.msrb.mxu2 %v790_v48  ;;  %v1246_v15 = vld [vmem:[%s5560_s12 + $0x16b0] sm:$0xff]  ;;  %v2757_v47 = vpop.f32.mrf.mxu3 }
 0x315   : > { %3073 = vmatpush.msrb.mxu3 %v926_v29  ;;  %3015 = vmatpush.msrb.mxu0 %v526_v25  ;;  %v1366_v18 = vld [vmem:[%s5560_s12 + $0x1a70] sm:$0xff] }
 0x316   : > { %3034 = vmatpush.msrb.mxu1 %v662_v49  ;;  %3055 = vmatpush.msrb.mxu2 %v782_v2  ;;  %v1502_v21 = vld [vmem:[%s5560_s12 + $0x1eb0] sm:$0xff] }
 0x317   : > { %3074 = vmatpush.msrb.mxu3 %v918_v61  ;;  %3080 = vmatpush.msra.mxu0 %v1158_v60  ;;  %v1102_v30 = vld [vmem:[%s5560_s12 + $0x1230] sm:$0xff]  ;;  %v2758_v61 = vadd.f32 %v2757_v47, %v2738_v14 }
 0x318   : > { %3120 = vmatpush.msra.mxu2 %v1414_v50  ;;  %3035 = vmatpush.msrb.mxu1 %v654_v52  ;;  %v1238_v32 = vld [vmem:[%s5560_s12 + $0x1670] sm:$0xff] }
 0x319   : > { %3075 = vmatpush.msrb.mxu3 %v910_v16  ;;  %3081 = vmatpush.msra.mxu0 %v1150_v28  ;;  %v1358_v33 = vld [vmem:[%s5560_s12 + $0x1a30] sm:$0xff]  ;;  %v2777_v16 = vpop.f32.mrf.mxu0 }
 0x31a   : > { %3100 = vmatpush.msra.mxu1 %v1286_v20  ;;  %3121 = vmatpush.msra.mxu2 %v1406_v1  ;;  %v1494_v35 = vld [vmem:[%s5560_s12 + $0x1e70] sm:$0xff]  ;;  %v2778_v20 = vadd.f32 %v2777_v16, %v2758_v61  ;;  %v719_v61 = vld [vmem:[%s5560_s12 + $0x638] sm:$0xff] }
 0x31b   : > { %3140 = vmatpush.msra.mxu3 %v1542_v54  ;;  %3082 = vmatpush.msra.mxu0 %v1142_v55  ;;  %v1094_v36 = vld [vmem:[%s5560_s12 + $0x11f0] sm:$0xff]  ;;  %v506_v54 = vld [vmem:[#allocation2 + $0x8] sm:$0xff]  ;;  %v2797_v55 = vpop.f32.mrf.mxu1 }
 0x31c   : > { %3101 = vmatpush.msra.mxu1 %v1278_v3  ;;  %3122 = vmatpush.msra.mxu2 %v1398_v31  ;;  %v1230_v38 = vld [vmem:[%s5560_s12 + $0x1630] sm:$0xff] }
 0x31d   : > { %3141 = vmatpush.msra.mxu3 %v1534_v24  ;;  %3083 = vmatpush.msra.mxu0 %v1134_v58  ;;  %v1350_v40 = vld [vmem:[%s5560_s12 + $0x19f0] sm:$0xff]  ;;  %v2798_v24 = vadd.f32 %v2797_v55, %v2778_v20  ;;  %v703_v20 = vld [vmem:[%s5560_s12 + $0x5b8] sm:$0xff] }
 0x31e   : > { %3102 = vmatpush.msra.mxu1 %v1270_v59  ;;  %3123 = vmatpush.msra.mxu2 %v1390_v27  ;;  %v1486_v8 = vld [vmem:[%s5560_s12 + $0x1e30] sm:$0xff]  ;;  %v695_v55 = vld [vmem:[%s5560_s12 + $0x578] sm:$0xff] }
 0x31f   : > { %3142 = vmatpush.msra.mxu3 %v1526_v22  ;;  %3084 = vmatpush.msra.mxu0 %v1126_v62  ;;  %v1086_v42 = vld [vmem:[%s5560_s12 + $0x11b0] sm:$0xff]  ;;  %v3404_v53 = vadd.f32 %v2798_v24, %v506_v54  ;;  %v559_v54 = vld [vmem:[%s5560_s12 + $0x138] sm:$0xff] }
 0x320   : > { %3103 = vmatpush.msra.mxu1 %v1262_v63  ;;  %3124 = vmatpush.msra.mxu2 %v1382_v0  ;;  %v1222_v43 = vld [vmem:[%s5560_s12 + $0x15f0] sm:$0xff]  ;;  %v647_v63 = vld [vmem:[%s5560_s12 + $0x3f8] sm:$0xff]  ;;  %v6834_v0 = vld [vmem:[%s5586_s19] sm:$0xff] }
 0x321   : > { %3143 = vmatpush.msra.mxu3 %v1518_v37  ;;  %3085 = vmatpush.msra.mxu0 %v1118_v4  ;;  %v1342_v44 = vld [vmem:[%s5560_s12 + $0x19b0] sm:$0xff]  ;;  %3412 = vst [vmem:[#allocation2 + $0x8] sm:$0xff] %v3404_v53  ;;  %v551_v24 = vld [vmem:[%s5560_s12 + $0xf8] sm:$0xff] }
 0x322   : > { %3104 = vmatpush.msra.mxu1 %v1254_v5  ;;  %3125 = vmatpush.msra.mxu2 %v1374_v6  ;;  %v1478_v45 = vld [vmem:[%s5560_s12 + $0x1df0] sm:$0xff]  ;;  %v639_v6 = vld [vmem:[%s5560_s12 + $0x3b8] sm:$0xff] }
 0x323   : > { %3144 = vmatpush.msra.mxu3 %v1510_v9  ;;  %3086 = vmatpush.msra.mxu0 %v1110_v10  ;;  %v1078_v23 = vld [vmem:[%s5560_s12 + $0x1170] sm:$0xff]  ;;  %v775_v9 = vld [vmem:[%s5560_s12 + $0x7f8] sm:$0xff]  ;;  %v6847_v10 = vld [vmem:[%s5586_s19 + $0x8] sm:$0xff] }
 0x324   : > { %3105 = vmatpush.msra.mxu1 %v1246_v15  ;;  %3126 = vmatpush.msra.mxu2 %v1366_v18  ;;  %v1214_v19 = vld [vmem:[%s5560_s12 + $0x15b0] sm:$0xff]  ;;  %v631_v18 = vld [vmem:[%s5560_s12 + $0x378] sm:$0xff] }
 0x325   : > { %3145 = vmatpush.msra.mxu3 %v1502_v21  ;;  %3087 = vmatpush.msra.mxu0 %v1102_v30  ;;  %v1334_v56 = vld [vmem:[%s5560_s12 + $0x1970] sm:$0xff]  ;;  %v767_v21 = vld [vmem:[%s5560_s12 + $0x7b8] sm:$0xff] }
 0x326   : > { %3106 = vmatpush.msra.mxu1 %v1238_v32  ;;  %3127 = vmatpush.msra.mxu2 %v1358_v33  ;;  %v1470_v46 = vld [vmem:[%s5560_s12 + $0x1db0] sm:$0xff]  ;;  %v623_v32 = vld [vmem:[%s5560_s12 + $0x338] sm:$0xff] }
 0x327   : > { %3146 = vmatpush.msra.mxu3 %v1494_v35  ;;  %3088 = vmatpush.msra.mxu0 %v1094_v36  ;;  %v1070_v48 = vld [vmem:[%s5560_s12 + $0x1130] sm:$0xff]  ;;  %v759_v33 = vld [vmem:[%s5560_s12 + $0x778] sm:$0xff] }
 0x328   : > { %3107 = vmatpush.msra.mxu1 %v1230_v38  ;;  %3128 = vmatpush.msra.mxu2 %v1350_v40  ;;  %v1206_v29 = vld [vmem:[%s5560_s12 + $0x1570] sm:$0xff]  ;;  %v6866_v40 = vld [vmem:[%s5586_s19 + $0x20] sm:$0xff]  ;;  %v543_v53 = vld [vmem:[%s5560_s12 + $0xb8] sm:$0xff] }
 0x329   : > { %3147 = vmatpush.msra.mxu3 %v1486_v8  ;;  %3089 = vmatpush.msra.mxu0 %v1086_v42  ;;  %v1326_v25 = vld [vmem:[%s5560_s12 + $0x1930] sm:$0xff]  ;;  %v751_v8 = vld [vmem:[%s5560_s12 + $0x738] sm:$0xff] }
 0x32a   : > { %3108 = vmatpush.msra.mxu1 %v1222_v43  ;;  %3129 = vmatpush.msra.mxu2 %v1342_v44  ;;  %v1462_v49 = vld [vmem:[%s5560_s12 + $0x1d70] sm:$0xff]  ;;  %v607_v44 = vld [vmem:[%s5560_s12 + $0x2b8] sm:$0xff] }
 0x32b   : > { %3148 = vmatpush.msra.mxu3 %v1478_v45  ;;  %3090 = vmatpush.msra.mxu0 %v1078_v23  ;;  %v1062_v7 = vld [vmem:[%s5560_s12 + $0x10f0] sm:$0xff]  ;;  %v743_v45 = vld [vmem:[%s5560_s12 + $0x6f8] sm:$0xff]  ;;  %v6879_v23 = vld [vmem:[%s5586_s19 + $0x28] sm:$0xff] }
 0x32c   : > { %3109 = vmatpush.msra.mxu1 %v1214_v19  ;;  %3130 = vmatpush.msra.mxu2 %v1334_v56  ;;  %v1198_v2 = vld [vmem:[%s5560_s12 + $0x1530] sm:$0xff]  ;;  %v599_v56 = vld [vmem:[%s5560_s12 + $0x278] sm:$0xff] }
 0x32d   : > { %3149 = vmatpush.msra.mxu3 %v1470_v46  ;;  %3091 = vmatpush.msra.mxu0 %v1070_v48  ;;  %v1318_v60 = vld [vmem:[%s5560_s12 + $0x18f0] sm:$0xff]  ;;  %v735_v46 = vld [vmem:[%s5560_s12 + $0x6b8] sm:$0xff] }
 0x32e   : > { %3110 = vmatpush.msra.mxu1 %v1206_v29  ;;  %v1454_v50 = vld [vmem:[%s5560_s12 + $0x1d30] sm:$0xff]  ;;  %3131 = vmatpush.msra.mxu2 %v1326_v25  ;;  %v591_v29 = vld [vmem:[%s5560_s12 + $0x238] sm:$0xff] }
 0x32f   : > { %3150 = vmatpush.msra.mxu3 %v1462_v49  ;;  %v1054_v51 = vld [vmem:[%s5560_s12 + $0x10b0] sm:$0xff]  ;;  %3092 = vmatpush.msra.mxu0 %v1062_v7  ;;  %v727_v25 = vld [vmem:[%s5560_s12 + $0x678] sm:$0xff] }
 0x330   : > { %v1190_v52 = vld [vmem:[%s5560_s12 + $0x14f0] sm:$0xff]  ;;  %3111 = vmatpush.msra.mxu1 %v1198_v2  ;;  %3132 = vmatpush.msra.mxu2 %v1318_v60  ;;  %v583_v2 = vld [vmem:[%s5560_s12 + $0x1f8] sm:$0xff] }
 0x331   : > { %v1310_v11 = vld [vmem:[%s5560_s12 + $0x18b0] sm:$0xff]  ;;  %3151 = vmatpush.msra.mxu3 %v1454_v50  ;;  %3093 = vmatpush.msra.mxu0 %v1054_v51  ;;  %v575_v51 = vld [vmem:[%s5560_s12 + $0x1b8] sm:$0xff] }
 0x332   : > { %v1446_v28 = vld [vmem:[%s5560_s12 + $0x1cf0] sm:$0xff]  ;;  %3112 = vmatpush.msra.mxu1 %v1190_v52  ;;  %3133 = vmatpush.msra.mxu2 %v1310_v11  ;;  %v711_v52 = vld [vmem:[%s5560_s12 + $0x5f8] sm:$0xff] }
 0x333   : > { %v1046_v12 = vld [vmem:[%s5560_s12 + $0x1070] sm:$0xff]  ;;  %3152 = vmatpush.msra.mxu3 %v1446_v28  ;;  %3016 = vmatmul.f32.vlgmr.msrb.gmra.mxu0 %v6834_v0  ;;  %v567_v28 = vld [vmem:[%s5560_s12 + $0x178] sm:$0xff] }
 0x334   : > { %v1182_v1 = vld [vmem:[%s5560_s12 + $0x14b0] sm:$0xff]  ;;  %3094 = vmatpush.msra.mxu0 %v1046_v12  ;;  %3076 = vmatmul.f32.vlgmr.msrb.gmra.mxu3 %v6839_v57 }
 0x335   : > { %v1302_v3 = vld [vmem:[%s5560_s12 + $0x1870] sm:$0xff]  ;;  %3113 = vmatpush.msra.mxu1 %v1182_v1 }
 0x336   : > { %v1438_v31 = vld [vmem:[%s5560_s12 + $0x1cb0] sm:$0xff]  ;;  %3134 = vmatpush.msra.mxu2 %v1302_v3  ;;  %3036 = vmatmul.f32.vlgmr.msrb.gmra.mxu1 %v6847_v10 }
 0x337   : > { %v1038_v13 = vld [vmem:[%s5560_s12 + $0x1030] sm:$0xff]  ;;  %3153 = vmatpush.msra.mxu3 %v1438_v31 }
 0x338   : > { %v1174_v58 = vld [vmem:[%s5560_s12 + $0x1470] sm:$0xff]  ;;  %3095 = vmatpush.msra.mxu0 %v1038_v13  ;;  %v687_v13 = vld [vmem:[%s5560_s12 + $0x538] sm:$0xff] }
 0x339   : > { %v1294_v59 = vld [vmem:[%s5560_s12 + $0x1830] sm:$0xff]  ;;  %3114 = vmatpush.msra.mxu1 %v1174_v58 }
 0x33a   : > { %v1430_v27 = vld [vmem:[%s5560_s12 + $0x1c70] sm:$0xff]  ;;  %3135 = vmatpush.msra.mxu2 %v1294_v59 }
 0x33b   : > { %v6827_v22 = vld [vmem:[%s5586_s19 + $0x10] sm:$0xff]  ;;  %3154 = vmatpush.msra.mxu3 %v1430_v27  ;;  %3096 = vmatmul.f32.vlgmr.msra.gmra.mxu0 %v6866_v40  ;;  %v679_v27 = vld [vmem:[%s5560_s12 + $0x4f8] sm:$0xff] }
 0x33c   : > { %3056 = vmatmul.f32.vlgmr.msrb.gmra.mxu2 %v6827_v22  ;;  %v1670_v62 = vld [vmem:[%s5560_s12 + $0x23f0] sm:$0xff] }
 0x33d   : > { %v1166_v34 = vld [vmem:[%s5560_s12 + $0x1430] sm:$0xff]  ;;  %3160 = vmatpush.msrb.mxu0 %v1670_v62  ;;  %3200 = vmatpush.msrb.mxu2 %v647_v63 }
 0x33e   : > { %v1422_v37 = vld [vmem:[%s5560_s12 + $0x1c30] sm:$0xff]  ;;  %3115 = vmatpush.msra.mxu1 %v1166_v34  ;;  %v535_v34 = vld [vmem:[%s5560_s12 + $0x78] sm:$0xff] }
 0x33f   : > { %v1662_v4 = vld [vmem:[%s5560_s12 + $0x23b0] sm:$0xff]  ;;  %3155 = vmatpush.msra.mxu3 %v1422_v37  ;;  %3201 = vmatpush.msrb.mxu2 %v639_v6  ;;  %v671_v37 = vld [vmem:[%s5560_s12 + $0x4b8] sm:$0xff] }
 0x340   : > { %v1798_v5 = vld [vmem:[%s5560_s12 + $0x27f0] sm:$0xff]  ;;  %3161 = vmatpush.msrb.mxu0 %v1662_v4  ;;  %3156 = vmatmul.f32.vlgmr.msra.gmra.mxu3 %v6871_v41  ;;  %v527_v6 = vld [vmem:[%s5560_s12 + $0x38] sm:$0xff] }
 0x341   : > { %v1654_v15 = vld [vmem:[%s5560_s12 + $0x2370] sm:$0xff]  ;;  %3180 = vmatpush.msrb.mxu1 %v1798_v5  ;;  %3220 = vmatpush.msrb.mxu3 %v775_v9  ;;  %v663_v9 = vld [vmem:[%s5560_s12 + $0x478] sm:$0xff] }
 0x342   : > { %v1790_v17 = vld [vmem:[%s5560_s12 + $0x27b0] sm:$0xff]  ;;  %3162 = vmatpush.msrb.mxu0 %v1654_v15  ;;  %3202 = vmatpush.msrb.mxu2 %v631_v18  ;;  %v1159_v15 = vld [vmem:[%s5560_s12 + $0x13f8] sm:$0xff] }
 0x343   : > { %v1646_v26 = vld [vmem:[%s5560_s12 + $0x2330] sm:$0xff]  ;;  %3181 = vmatpush.msrb.mxu1 %v1790_v17  ;;  %3221 = vmatpush.msrb.mxu3 %v767_v21  ;;  %v903_v17 = vld [vmem:[%s5560_s12 + $0xbf8] sm:$0xff] }
 0x344   : > { %v1782_v30 = vld [vmem:[%s5560_s12 + $0x2770] sm:$0xff]  ;;  %3163 = vmatpush.msrb.mxu0 %v1646_v26  ;;  %3203 = vmatpush.msrb.mxu2 %v623_v32  ;;  %v655_v21 = vld [vmem:[%s5560_s12 + $0x438] sm:$0xff]  ;;  %v6927_v26 = vld [vmem:[%s5586_s19 + $0x40] sm:$0xff] }
 0x345   : > { %v6859_v35 = vld [vmem:[%s5586_s19 + $0x30] sm:$0xff]  ;;  %3182 = vmatpush.msrb.mxu1 %v1782_v30  ;;  %3222 = vmatpush.msrb.mxu3 %v759_v33  ;;  %v895_v30 = vld [vmem:[%s5560_s12 + $0xbb8] sm:$0xff] }
 0x346   : > { %3136 = vmatmul.f32.vlgmr.msra.gmra.mxu2 %v6859_v35  ;;  %v1638_v36 = vld [vmem:[%s5560_s12 + $0x22f0] sm:$0xff]  ;;  %3116 = vmatmul.f32.vlgmr.msra.gmra.mxu1 %v6879_v23  ;;  %v1031_v32 = vld [vmem:[%s5560_s12 + $0xff8] sm:$0xff] }
 0x347   : > { %v1774_v38 = vld [vmem:[%s5560_s12 + $0x2730] sm:$0xff]  ;;  %3164 = vmatpush.msrb.mxu0 %v1638_v36  ;;  %3204 = vmatpush.msrb.mxu2 %v615_v39  ;;  %v1151_v33 = vld [vmem:[%s5560_s12 + $0x13b8] sm:$0xff] }
 0x348   : > { %v1630_v42 = vld [vmem:[%s5560_s12 + $0x22b0] sm:$0xff]  ;;  %3183 = vmatpush.msrb.mxu1 %v1774_v38  ;;  %3223 = vmatpush.msrb.mxu3 %v751_v8  ;;  %v1287_v36 = vld [vmem:[%s5560_s12 + $0x17f8] sm:$0xff]  ;;  %v6935_v38 = vld [vmem:[%s5586_s19 + $0x48] sm:$0xff] }
 0x349   : > { %v1766_v43 = vld [vmem:[%s5560_s12 + $0x26f0] sm:$0xff]  ;;  %3165 = vmatpush.msrb.mxu0 %v1630_v42  ;;  %3205 = vmatpush.msrb.mxu2 %v607_v44  ;;  %v887_v39 = vld [vmem:[%s5560_s12 + $0xb78] sm:$0xff]  ;;  %v2837_v44 = vpop.f32.mrf.mxu3 }
 0x34a   : > { %v1622_v19 = vld [vmem:[%s5560_s12 + $0x2270] sm:$0xff]  ;;  %3184 = vmatpush.msrb.mxu1 %v1766_v43  ;;  %3224 = vmatpush.msrb.mxu3 %v743_v45  ;;  %v1023_v8 = vld [vmem:[%s5560_s12 + $0xfb8] sm:$0xff] }
 0x34b   : > { %v1758_v14 = vld [vmem:[%s5560_s12 + $0x26b0] sm:$0xff]  ;;  %3166 = vmatpush.msrb.mxu0 %v1622_v19  ;;  %3206 = vmatpush.msrb.mxu2 %v599_v56  ;;  %v1143_v42 = vld [vmem:[%s5560_s12 + $0x1378] sm:$0xff] }
 0x34c   : > { %v1614_v47 = vld [vmem:[%s5560_s12 + $0x2230] sm:$0xff]  ;;  %3185 = vmatpush.msrb.mxu1 %v1758_v14  ;;  %3225 = vmatpush.msrb.mxu3 %v735_v46  ;;  %v1279_v43 = vld [vmem:[%s5560_s12 + $0x17b8] sm:$0xff]  ;;  %v2817_v14 = vpop.f32.mrf.mxu2 }
 0x34d   : > { %v1750_v48 = vld [vmem:[%s5560_s12 + $0x2670] sm:$0xff]  ;;  %3167 = vmatpush.msrb.mxu0 %v1614_v47  ;;  %3207 = vmatpush.msrb.mxu2 %v591_v29  ;;  %v879_v45 = vld [vmem:[%s5560_s12 + $0xb38] sm:$0xff]  ;;  %v2838_v47 = vadd.f32 %v2837_v44, %v2817_v14 }
 0x34e   : > { %v1606_v49 = vld [vmem:[%s5560_s12 + $0x21f0] sm:$0xff]  ;;  %3186 = vmatpush.msrb.mxu1 %v1750_v48  ;;  %3226 = vmatpush.msrb.mxu3 %v727_v25  ;;  %v1015_v19 = vld [vmem:[%s5560_s12 + $0xf78] sm:$0xff] }
 0x34f   : > { %v1742_v7 = vld [vmem:[%s5560_s12 + $0x2630] sm:$0xff]  ;;  %3168 = vmatpush.msrb.mxu0 %v1606_v49  ;;  %3208 = vmatpush.msrb.mxu2 %v583_v2  ;;  %v1135_v56 = vld [vmem:[%s5560_s12 + $0x1338] sm:$0xff] }
 0x350   : > { %v1598_v60 = vld [vmem:[%s5560_s12 + $0x21b0] sm:$0xff]  ;;  %3187 = vmatpush.msrb.mxu1 %v1742_v7  ;;  %3227 = vmatpush.msrb.mxu3 %v719_v61  ;;  %v1271_v46 = vld [vmem:[%s5560_s12 + $0x1778] sm:$0xff]  ;;  %v2857_v7 = vpop.f32.mrf.mxu0 }
 0x351   : > { %v1734_v50 = vld [vmem:[%s5560_s12 + $0x25f0] sm:$0xff]  ;;  %3169 = vmatpush.msrb.mxu0 %v1598_v60  ;;  %3209 = vmatpush.msrb.mxu2 %v575_v51  ;;  %v871_v48 = vld [vmem:[%s5560_s12 + $0xaf8] sm:$0xff]  ;;  %v2858_v51 = vadd.f32 %v2857_v7, %v2838_v47 }
 0x352   : > { %v1590_v16 = vld [vmem:[%s5560_s12 + $0x2170] sm:$0xff]  ;;  %3188 = vmatpush.msrb.mxu1 %v1734_v50  ;;  %3228 = vmatpush.msrb.mxu3 %v711_v52  ;;  %v1007_v29 = vld [vmem:[%s5560_s12 + $0xf38] sm:$0xff] }
 0x353   : > { %v1726_v11 = vld [vmem:[%s5560_s12 + $0x25b0] sm:$0xff]  ;;  %3170 = vmatpush.msrb.mxu0 %v1590_v16  ;;  %3210 = vmatpush.msrb.mxu2 %v567_v28  ;;  %v1127_v25 = vld [vmem:[%s5560_s12 + $0x12f8] sm:$0xff] }
 0x354   : > { %v1582_v12 = vld [vmem:[%s5560_s12 + $0x2130] sm:$0xff]  ;;  %3189 = vmatpush.msrb.mxu1 %v1726_v11  ;;  %3229 = vmatpush.msrb.mxu3 %v703_v20  ;;  %v1263_v49 = vld [vmem:[%s5560_s12 + $0x1738] sm:$0xff]  ;;  %v2877_v11 = vpop.f32.mrf.mxu1 }
 0x355   : > { %v1718_v1 = vld [vmem:[%s5560_s12 + $0x2570] sm:$0xff]  ;;  %3171 = vmatpush.msrb.mxu0 %v1582_v12  ;;  %3211 = vmatpush.msrb.mxu2 %v559_v54  ;;  %v863_v2 = vld [vmem:[%s5560_s12 + $0xab8] sm:$0xff] }
 0x356   : > { %v1574_v3 = vld [vmem:[%s5560_s12 + $0x20f0] sm:$0xff]  ;;  %3190 = vmatpush.msrb.mxu1 %v1718_v1  ;;  %3230 = vmatpush.msrb.mxu3 %v695_v55  ;;  %v999_v61 = vld [vmem:[%s5560_s12 + $0xef8] sm:$0xff] }
 0x357   : > { %v1710_v31 = vld [vmem:[%s5560_s12 + $0x2530] sm:$0xff]  ;;  %3172 = vmatpush.msrb.mxu0 %v1574_v3  ;;  %3212 = vmatpush.msrb.mxu2 %v551_v24  ;;  %v1119_v60 = vld [vmem:[%s5560_s12 + $0x12b8] sm:$0xff]  ;;  %v2878_v3 = vadd.f32 %v2877_v11, %v2858_v51  ;;  %v507_v11 = vld [vmem:[#allocation2 + $0x20] sm:$0xff] }
 0x358   : > { %v1566_v58 = vld [vmem:[%s5560_s12 + $0x20b0] sm:$0xff]  ;;  %3191 = vmatpush.msrb.mxu1 %v1710_v31  ;;  %3231 = vmatpush.msrb.mxu3 %v687_v13  ;;  %v1255_v50 = vld [vmem:[%s5560_s12 + $0x16f8] sm:$0xff]  ;;  %v2897_v13 = vpop.f32.mrf.mxu2 }
 0x359   : > { %v1702_v59 = vld [vmem:[%s5560_s12 + $0x24f0] sm:$0xff]  ;;  %3173 = vmatpush.msrb.mxu0 %v1566_v58  ;;  %3213 = vmatpush.msrb.mxu2 %v543_v53  ;;  %v855_v52 = vld [vmem:[%s5560_s12 + $0xa78] sm:$0xff] }
 0x35a   : > { %v1558_v62 = vld [vmem:[%s5560_s12 + $0x2070] sm:$0xff]  ;;  %3192 = vmatpush.msrb.mxu1 %v1702_v59  ;;  %3232 = vmatpush.msrb.mxu3 %v679_v27  ;;  %v991_v16 = vld [vmem:[%s5560_s12 + $0xeb8] sm:$0xff] }
 0x35b   : > { %v1694_v63 = vld [vmem:[%s5560_s12 + $0x24b0] sm:$0xff]  ;;  %3174 = vmatpush.msrb.mxu0 %v1558_v62  ;;  %3214 = vmatpush.msrb.mxu2 %v535_v34  ;;  %v1111_v28 = vld [vmem:[%s5560_s12 + $0x1278] sm:$0xff]  ;;  %v2898_v34 = vadd.f32 %v2897_v13, %v2878_v3 }
 0x35c   : > { %v1550_v4 = vld [vmem:[%s5560_s12 + $0x2030] sm:$0xff]  ;;  %3193 = vmatpush.msrb.mxu1 %v1694_v63  ;;  %3233 = vmatpush.msrb.mxu3 %v671_v37  ;;  %v1247_v20 = vld [vmem:[%s5560_s12 + $0x16b8] sm:$0xff] }
 0x35d   : > { %v1686_v5 = vld [vmem:[%s5560_s12 + $0x2470] sm:$0xff]  ;;  %3175 = vmatpush.msrb.mxu0 %v1550_v4  ;;  %3215 = vmatpush.msrb.mxu2 %v527_v6  ;;  %v847_v12 = vld [vmem:[%s5560_s12 + $0xa38] sm:$0xff] }
 0x35e   : > { %3194 = vmatpush.msrb.mxu1 %v1686_v5  ;;  %v1678_v18 = vld [vmem:[%s5560_s12 + $0x2430] sm:$0xff]  ;;  %3234 = vmatpush.msrb.mxu3 %v663_v9  ;;  %v983_v1 = vld [vmem:[%s5560_s12 + $0xe78] sm:$0xff]  ;;  %v2917_v5 = vpop.f32.mrf.mxu3 }
 0x35f   : > { %3176 = vmatmul.f32.vlgmr.msrb.gmra.mxu0 %v6927_v26  ;;  %3280 = vmatpush.msra.mxu2 %v1159_v15  ;;  %v1103_v54 = vld [vmem:[%s5560_s12 + $0x1238] sm:$0xff] }
 0x360   : > { %3240 = vmatpush.msra.mxu0 %v903_v17  ;;  %3195 = vmatpush.msrb.mxu1 %v1678_v18  ;;  %v1239_v55 = vld [vmem:[%s5560_s12 + $0x1678] sm:$0xff] }
 0x361   : > { %3235 = vmatpush.msrb.mxu3 %v655_v21  ;;  %3196 = vmatmul.f32.vlgmr.msrb.gmra.mxu1 %v6935_v38  ;;  %v839_v31 = vld [vmem:[%s5560_s12 + $0x9f8] sm:$0xff] }
 0x362   : > { %3241 = vmatpush.msra.mxu0 %v895_v30  ;;  %3260 = vmatpush.msra.mxu1 %v1031_v32  ;;  %v975_v24 = vld [vmem:[%s5560_s12 + $0xe38] sm:$0xff]  ;;  %v2918_v30 = vadd.f32 %v2917_v5, %v2898_v34 }
 0x363   : > { %3281 = vmatpush.msra.mxu2 %v1151_v33  ;;  %3300 = vmatpush.msra.mxu3 %v1287_v36  ;;  %v1095_v58 = vld [vmem:[%s5560_s12 + $0x11f8] sm:$0xff] }
 0x364   : > { %3242 = vmatpush.msra.mxu0 %v887_v39  ;;  %3261 = vmatpush.msra.mxu1 %v1023_v8  ;;  %v1231_v59 = vld [vmem:[%s5560_s12 + $0x1638] sm:$0xff] }
 0x365   : > { %3282 = vmatpush.msra.mxu2 %v1143_v42  ;;  %3301 = vmatpush.msra.mxu3 %v1279_v43  ;;  %v831_v53 = vld [vmem:[%s5560_s12 + $0x9b8] sm:$0xff] }
 0x366   : > { %3243 = vmatpush.msra.mxu0 %v879_v45  ;;  %3262 = vmatpush.msra.mxu1 %v1015_v19  ;;  %v967_v27 = vld [vmem:[%s5560_s12 + $0xdf8] sm:$0xff] }
 0x367   : > { %3283 = vmatpush.msra.mxu2 %v1135_v56  ;;  %3302 = vmatpush.msra.mxu3 %v1271_v46  ;;  %v1087_v62 = vld [vmem:[%s5560_s12 + $0x11b8] sm:$0xff] }
 0x368   : > { %3244 = vmatpush.msra.mxu0 %v871_v48  ;;  %3263 = vmatpush.msra.mxu1 %v1007_v29  ;;  %v1223_v63 = vld [vmem:[%s5560_s12 + $0x15f8] sm:$0xff] }
 0x369   : > { %3284 = vmatpush.msra.mxu2 %v1127_v25  ;;  %3303 = vmatpush.msra.mxu3 %v1263_v49  ;;  %v823_v37 = vld [vmem:[%s5560_s12 + $0x978] sm:$0xff] }
 0x36a   : > { %3245 = vmatpush.msra.mxu0 %v863_v2  ;;  %3264 = vmatpush.msra.mxu1 %v999_v61  ;;  %v959_v4 = vld [vmem:[%s5560_s12 + $0xdb8] sm:$0xff] }
 0x36b   : > { %3285 = vmatpush.msra.mxu2 %v1119_v60  ;;  %3304 = vmatpush.msra.mxu3 %v1255_v50  ;;  %v1079_v6 = vld [vmem:[%s5560_s12 + $0x1178] sm:$0xff] }
 0x36c   : > { %3246 = vmatpush.msra.mxu0 %v855_v52  ;;  %3265 = vmatpush.msra.mxu1 %v991_v16  ;;  %v1215_v9 = vld [vmem:[%s5560_s12 + $0x15b8] sm:$0xff] }
 0x36d   : > { %3286 = vmatpush.msra.mxu2 %v1111_v28  ;;  %3305 = vmatpush.msra.mxu3 %v1247_v20  ;;  %v815_v15 = vld [vmem:[%s5560_s12 + $0x938] sm:$0xff] }
 0x36e   : > { %3247 = vmatpush.msra.mxu0 %v847_v12  ;;  %3266 = vmatpush.msra.mxu1 %v983_v1  ;;  %v951_v17 = vld [vmem:[%s5560_s12 + $0xd78] sm:$0xff] }
 0x36f   : > { %3287 = vmatpush.msra.mxu2 %v1103_v54  ;;  %3306 = vmatpush.msra.mxu3 %v1239_v55  ;;  %v1071_v18 = vld [vmem:[%s5560_s12 + $0x1138] sm:$0xff] }
 0x370   : > { %3248 = vmatpush.msra.mxu0 %v839_v31  ;;  %3267 = vmatpush.msra.mxu1 %v975_v24  ;;  %v1207_v21 = vld [vmem:[%s5560_s12 + $0x1578] sm:$0xff] }
 0x371   : > { %3288 = vmatpush.msra.mxu2 %v1095_v58  ;;  %3307 = vmatpush.msra.mxu3 %v1231_v59  ;;  %v807_v32 = vld [vmem:[%s5560_s12 + $0x8f8] sm:$0xff]  ;;  %v2937_v8 = vpop.f32.mrf.mxu0 }
 0x372   : > { %3249 = vmatpush.msra.mxu0 %v831_v53  ;;  %3268 = vmatpush.msra.mxu1 %v967_v27  ;;  %v943_v33 = vld [vmem:[%s5560_s12 + $0xd38] sm:$0xff]  ;;  %v2938_v44 = vadd.f32 %v2937_v8, %v2918_v30 }
 0x373   : > { %3289 = vmatpush.msra.mxu2 %v1087_v62  ;;  %3308 = vmatpush.msra.mxu3 %v1223_v63  ;;  %v1063_v36 = vld [vmem:[%s5560_s12 + $0x10f8] sm:$0xff] }
 0x374   : > { %3250 = vmatpush.msra.mxu0 %v823_v37  ;;  %3269 = vmatpush.msra.mxu1 %v959_v4  ;;  %v1199_v39 = vld [vmem:[%s5560_s12 + $0x1538] sm:$0xff] }
 0x375   : > { %3290 = vmatpush.msra.mxu2 %v1079_v6  ;;  %3309 = vmatpush.msra.mxu3 %v1215_v9  ;;  %v799_v42 = vld [vmem:[%s5560_s12 + $0x8b8] sm:$0xff]  ;;  %v2957_v46 = vpop.f32.mrf.mxu1 }
 0x376   : > { %3251 = vmatpush.msra.mxu0 %v815_v15  ;;  %3270 = vmatpush.msra.mxu1 %v951_v17  ;;  %v935_v43 = vld [vmem:[%s5560_s12 + $0xcf8] sm:$0xff]  ;;  %v2958_v25 = vadd.f32 %v2957_v46, %v2938_v44 }
 0x377   : > { %3291 = vmatpush.msra.mxu2 %v1071_v18  ;;  %3310 = vmatpush.msra.mxu3 %v1207_v21  ;;  %v1055_v45 = vld [vmem:[%s5560_s12 + $0x10b8] sm:$0xff] }
 0x378   : > { %3252 = vmatpush.msra.mxu0 %v807_v32  ;;  %3271 = vmatpush.msra.mxu1 %v943_v33  ;;  %v1191_v19 = vld [vmem:[%s5560_s12 + $0x14f8] sm:$0xff] }
 0x379   : > { %3292 = vmatpush.msra.mxu2 %v1063_v36  ;;  %3311 = vmatpush.msra.mxu3 %v1199_v39  ;;  %v791_v14 = vld [vmem:[%s5560_s12 + $0x878] sm:$0xff]  ;;  %v2977_v2 = vpop.f32.mrf.mxu2 }
 0x37a   : > { %v927_v56 = vld [vmem:[%s5560_s12 + $0xcb8] sm:$0xff]  ;;  %3253 = vmatpush.msra.mxu0 %v799_v42  ;;  %3272 = vmatpush.msra.mxu1 %v935_v43  ;;  %v2978_v50 = vadd.f32 %v2977_v2, %v2958_v25 }
 0x37b   : > { %v1047_v47 = vld [vmem:[%s5560_s12 + $0x1078] sm:$0xff]  ;;  %3293 = vmatpush.msra.mxu2 %v1055_v45  ;;  %3312 = vmatpush.msra.mxu3 %v1191_v19 }
 0x37c   : > { %v1183_v48 = vld [vmem:[%s5560_s12 + $0x14b8] sm:$0xff]  ;;  %3254 = vmatpush.msra.mxu0 %v791_v14  ;;  %3273 = vmatpush.msra.mxu1 %v927_v56  ;;  %v2997_v28 = vpop.f32.mrf.mxu3 }
 0x37d   : > { %v783_v29 = vld [vmem:[%s5560_s12 + $0x838] sm:$0xff]  ;;  %3294 = vmatpush.msra.mxu2 %v1047_v47  ;;  %3313 = vmatpush.msra.mxu3 %v1183_v48  ;;  %v2998_v1 = vadd.f32 %v2997_v28, %v2978_v50 }
 0x37e   : > { %v919_v49 = vld [vmem:[%s5560_s12 + $0xc78] sm:$0xff]  ;;  %3216 = vmatmul.f32.vlgmr.msrb.gmra.mxu2 %v6834_v0  ;;  %3255 = vmatpush.msra.mxu0 %v783_v29 }
 0x37f   : > { %v1039_v7 = vld [vmem:[%s5560_s12 + $0x1038] sm:$0xff]  ;;  %3274 = vmatpush.msra.mxu1 %v919_v49  ;;  %3236 = vmatmul.f32.vlgmr.msrb.gmra.mxu3 %v6847_v10  ;;  %v3405_v31 = vadd.f32 %v2998_v1, %v507_v11 }
 0x380   : > { %v1175_v61 = vld [vmem:[%s5560_s12 + $0x1478] sm:$0xff]  ;;  %3295 = vmatpush.msra.mxu2 %v1039_v7  ;;  %3256 = vmatmul.f32.vlgmr.msra.gmra.mxu0 %v6827_v22 }
 0x381   : > { %v1415_v60 = vld [vmem:[%s5560_s12 + $0x1bf8] sm:$0xff]  ;;  %3314 = vmatpush.msra.mxu3 %v1175_v61  ;;  %3413 = vst [vmem:[#allocation2 + $0x20] sm:$0xff] %v3405_v31 }
 0x382   : > { %v1671_v51 = vld [vmem:[%s5560_s12 + $0x23f8] sm:$0xff]  ;;  %3320 = vmatpush.msrb.mxu0 %v1415_v60 }
 0x383   : > { %v911_v52 = vld [vmem:[%s5560_s12 + $0xc38] sm:$0xff]  ;;  %3360 = vmatpush.msrb.mxu2 %v1671_v51 }
 0x384   : > { %v1167_v16 = vld [vmem:[%s5560_s12 + $0x1438] sm:$0xff]  ;;  %3275 = vmatpush.msra.mxu1 %v911_v52 }
 0x385   : > { %v1407_v20 = vld [vmem:[%s5560_s12 + $0x1bb8] sm:$0xff]  ;;  %3315 = vmatpush.msra.mxu3 %v1167_v16  ;;  %3276 = vmatmul.f32.vlgmr.msra.gmra.mxu1 %v6839_v57 }
 0x386   : > { %v1543_v12 = vld [vmem:[%s5560_s12 + $0x1ff8] sm:$0xff]  ;;  %3321 = vmatpush.msrb.mxu0 %v1407_v20  ;;  %3296 = vmatmul.f32.vlgmr.msra.gmra.mxu2 %v6866_v40 }
 0x387   : > { %v1663_v0 = vld [vmem:[%s5560_s12 + $0x23b8] sm:$0xff]  ;;  %3340 = vmatpush.msrb.mxu1 %v1543_v12  ;;  %3316 = vmatmul.f32.vlgmr.msra.gmra.mxu3 %v6879_v23 }
 0x388   : > { %v1799_v54 = vld [vmem:[%s5560_s12 + $0x27f8] sm:$0xff]  ;;  %3361 = vmatpush.msrb.mxu2 %v1663_v0 }
 0x389   : > { %v1399_v55 = vld [vmem:[%s5560_s12 + $0x1b78] sm:$0xff]  ;;  %3380 = vmatpush.msrb.mxu3 %v1799_v54 }
 0x38a   : > { %v1535_v3 = vld [vmem:[%s5560_s12 + $0x1fb8] sm:$0xff]  ;;  %3322 = vmatpush.msrb.mxu0 %v1399_v55 }
 0x38b   : > { %v1655_v24 = vld [vmem:[%s5560_s12 + $0x2378] sm:$0xff]  ;;  %3341 = vmatpush.msrb.mxu1 %v1535_v3 }
 0x38c   : > { %v1791_v13 = vld [vmem:[%s5560_s12 + $0x27b8] sm:$0xff]  ;;  %3362 = vmatpush.msrb.mxu2 %v1655_v24 }
 0x38d   : > { %v1391_v10 = vld [vmem:[%s5560_s12 + $0x1b38] sm:$0xff]  ;;  %3381 = vmatpush.msrb.mxu3 %v1791_v13 }
 0x38e   : > { %v1527_v58 = vld [vmem:[%s5560_s12 + $0x1f78] sm:$0xff]  ;;  %3323 = vmatpush.msrb.mxu0 %v1391_v10 }
 0x38f   : > { %v1647_v59 = vld [vmem:[%s5560_s12 + $0x2338] sm:$0xff]  ;;  %3342 = vmatpush.msrb.mxu1 %v1527_v58 }
 0x390   : > { %v1783_v53 = vld [vmem:[%s5560_s12 + $0x2778] sm:$0xff]  ;;  %3363 = vmatpush.msrb.mxu2 %v1647_v59 }
 0x391   : > { %v1383_v27 = vld [vmem:[%s5560_s12 + $0x1af8] sm:$0xff]  ;;  %3382 = vmatpush.msrb.mxu3 %v1783_v53 }
 0x392   : > { %v1519_v62 = vld [vmem:[%s5560_s12 + $0x1f38] sm:$0xff]  ;;  %3324 = vmatpush.msrb.mxu0 %v1383_v27 }
 0x393   : > { %v1639_v63 = vld [vmem:[%s5560_s12 + $0x22f8] sm:$0xff]  ;;  %3343 = vmatpush.msrb.mxu1 %v1519_v62 }
 0x394   : > { %v1775_v34 = vld [vmem:[%s5560_s12 + $0x2738] sm:$0xff]  ;;  %3364 = vmatpush.msrb.mxu2 %v1639_v63 }
 0x395   : > { %v1375_v40 = vld [vmem:[%s5560_s12 + $0x1ab8] sm:$0xff]  ;;  %3383 = vmatpush.msrb.mxu3 %v1775_v34 }
 0x396   : > { %v1511_v37 = vld [vmem:[%s5560_s12 + $0x1ef8] sm:$0xff]  ;;  %3325 = vmatpush.msrb.mxu0 %v1375_v40 }
 0x397   : > { %v1631_v4 = vld [vmem:[%s5560_s12 + $0x22b8] sm:$0xff]  ;;  %3344 = vmatpush.msrb.mxu1 %v1511_v37 }
 0x398   : > { %v1767_v5 = vld [vmem:[%s5560_s12 + $0x26f8] sm:$0xff]  ;;  %3365 = vmatpush.msrb.mxu2 %v1631_v4 }
 0x399   : > { %v1367_v22 = vld [vmem:[%s5560_s12 + $0x1a78] sm:$0xff]  ;;  %3384 = vmatpush.msrb.mxu3 %v1767_v5 }
 0x39a   : > { %v1503_v6 = vld [vmem:[%s5560_s12 + $0x1eb8] sm:$0xff]  ;;  %3326 = vmatpush.msrb.mxu0 %v1367_v22 }
 0x39b   : > { %v1623_v23 = vld [vmem:[%s5560_s12 + $0x2278] sm:$0xff]  ;;  %3345 = vmatpush.msrb.mxu1 %v1503_v6 }
 0x39c   : > { %v1759_v9 = vld [vmem:[%s5560_s12 + $0x26b8] sm:$0xff]  ;;  %3366 = vmatpush.msrb.mxu2 %v1623_v23 }
 0x39d   : > { %v1359_v15 = vld [vmem:[%s5560_s12 + $0x1a38] sm:$0xff]  ;;  %3385 = vmatpush.msrb.mxu3 %v1759_v9 }
 0x39e   : > { %v1495_v17 = vld [vmem:[%s5560_s12 + $0x1e78] sm:$0xff]  ;;  %3327 = vmatpush.msrb.mxu0 %v1359_v15 }
 0x39f   : > { %v1615_v18 = vld [vmem:[%s5560_s12 + $0x2238] sm:$0xff]  ;;  %3346 = vmatpush.msrb.mxu1 %v1495_v17 }
 0x3a0   : > { %v1751_v57 = vld [vmem:[%s5560_s12 + $0x2678] sm:$0xff]  ;;  %3367 = vmatpush.msrb.mxu2 %v1615_v18 }
 0x3a1   : > { %v1351_v21 = vld [vmem:[%s5560_s12 + $0x19f8] sm:$0xff]  ;;  %3386 = vmatpush.msrb.mxu3 %v1751_v57 }
 0x3a2   : > { %v1487_v30 = vld [vmem:[%s5560_s12 + $0x1e38] sm:$0xff]  ;;  %3328 = vmatpush.msrb.mxu0 %v1351_v21 }
 0x3a3   : > { %v1607_v32 = vld [vmem:[%s5560_s12 + $0x21f8] sm:$0xff]  ;;  %3347 = vmatpush.msrb.mxu1 %v1487_v30 }
 0x3a4   : > { %v1743_v33 = vld [vmem:[%s5560_s12 + $0x2638] sm:$0xff]  ;;  %3368 = vmatpush.msrb.mxu2 %v1607_v32 }
 0x3a5   : > { %v1343_v36 = vld [vmem:[%s5560_s12 + $0x19b8] sm:$0xff]  ;;  %3387 = vmatpush.msrb.mxu3 %v1743_v33 }
 0x3a6   : > { %v1479_v39 = vld [vmem:[%s5560_s12 + $0x1df8] sm:$0xff]  ;;  %3329 = vmatpush.msrb.mxu0 %v1343_v36 }
 0x3a7   : > { %v1599_v8 = vld [vmem:[%s5560_s12 + $0x21b8] sm:$0xff]  ;;  %3348 = vmatpush.msrb.mxu1 %v1479_v39 }
 0x3a8   : > { %v1735_v42 = vld [vmem:[%s5560_s12 + $0x25f8] sm:$0xff]  ;;  %3369 = vmatpush.msrb.mxu2 %v1599_v8 }
 0x3a9   : > { %v1335_v43 = vld [vmem:[%s5560_s12 + $0x1978] sm:$0xff]  ;;  %3388 = vmatpush.msrb.mxu3 %v1735_v42 }
 0x3aa   : > { %v1471_v44 = vld [vmem:[%s5560_s12 + $0x1db8] sm:$0xff]  ;;  %3330 = vmatpush.msrb.mxu0 %v1335_v43 }
 0x3ab   : > { %v1591_v45 = vld [vmem:[%s5560_s12 + $0x2178] sm:$0xff]  ;;  %3349 = vmatpush.msrb.mxu1 %v1471_v44 }
 0x3ac   : > { %v1727_v19 = vld [vmem:[%s5560_s12 + $0x25b8] sm:$0xff]  ;;  %3370 = vmatpush.msrb.mxu2 %v1591_v45 }
 0x3ad   : > { %v1327_v14 = vld [vmem:[%s5560_s12 + $0x1938] sm:$0xff]  ;;  %3389 = vmatpush.msrb.mxu3 %v1727_v19 }
 0x3ae   : > { %v1463_v56 = vld [vmem:[%s5560_s12 + $0x1d78] sm:$0xff]  ;;  %3331 = vmatpush.msrb.mxu0 %v1327_v14 }
 0x3af   : > { %v1583_v46 = vld [vmem:[%s5560_s12 + $0x2138] sm:$0xff]  ;;  %3350 = vmatpush.msrb.mxu1 %v1463_v56 }
 0x3b0   : > { %v1719_v47 = vld [vmem:[%s5560_s12 + $0x2578] sm:$0xff]  ;;  %3371 = vmatpush.msrb.mxu2 %v1583_v46  ;;  %v3017_v55 = vpop.f32.mrf.mxu0 }
 0x3b1   : > { %v1319_v48 = vld [vmem:[%s5560_s12 + $0x18f8] sm:$0xff]  ;;  %3390 = vmatpush.msrb.mxu3 %v1719_v47 }
 0x3b2   : > { %v1455_v29 = vld [vmem:[%s5560_s12 + $0x1d38] sm:$0xff]  ;;  %3332 = vmatpush.msrb.mxu0 %v1319_v48 }
 0x3b3   : > { %v1575_v25 = vld [vmem:[%s5560_s12 + $0x20f8] sm:$0xff]  ;;  %3351 = vmatpush.msrb.mxu1 %v1455_v29  ;;  %v3037_v54 = vpop.f32.mrf.mxu1 }
 0x3b4   : > { %v1711_v49 = vld [vmem:[%s5560_s12 + $0x2538] sm:$0xff]  ;;  %3372 = vmatpush.msrb.mxu2 %v1575_v25  ;;  %v3038_v3 = vadd.f32 %v3037_v54, %v3017_v55 }
 0x3b5   : > { %v1311_v7 = vld [vmem:[%s5560_s12 + $0x18b8] sm:$0xff]  ;;  %3391 = vmatpush.msrb.mxu3 %v1711_v49 }
 0x3b6   : > { %v1447_v2 = vld [vmem:[%s5560_s12 + $0x1cf8] sm:$0xff]  ;;  %3333 = vmatpush.msrb.mxu0 %v1311_v7 }
 0x3b7   : > { %v1567_v61 = vld [vmem:[%s5560_s12 + $0x20b8] sm:$0xff]  ;;  %3352 = vmatpush.msrb.mxu1 %v1447_v2  ;;  %v3077_v13 = vpop.f32.mrf.mxu3 }
 0x3b8   : > { %v1703_v60 = vld [vmem:[%s5560_s12 + $0x24f8] sm:$0xff]  ;;  %3373 = vmatpush.msrb.mxu2 %v1567_v61  ;;  %v3097_v58 = vpop.f32.mrf.mxu0 }
 0x3b9   : > { %v1303_v50 = vld [vmem:[%s5560_s12 + $0x1878] sm:$0xff]  ;;  %3392 = vmatpush.msrb.mxu3 %v1703_v60 }
 0x3ba   : > { %v1439_v51 = vld [vmem:[%s5560_s12 + $0x1cb8] sm:$0xff]  ;;  %3334 = vmatpush.msrb.mxu0 %v1303_v50 }
 0x3bb   : > { %v1559_v52 = vld [vmem:[%s5560_s12 + $0x2078] sm:$0xff]  ;;  %3353 = vmatpush.msrb.mxu1 %v1439_v51 }
 0x3bc   : > { %v1695_v16 = vld [vmem:[%s5560_s12 + $0x24b8] sm:$0xff]  ;;  %3374 = vmatpush.msrb.mxu2 %v1559_v52 }
 0x3bd   : > { %v1295_v11 = vld [vmem:[%s5560_s12 + $0x1838] sm:$0xff]  ;;  %3393 = vmatpush.msrb.mxu3 %v1695_v16 }
 0x3be   : > { %v1431_v28 = vld [vmem:[%s5560_s12 + $0x1c78] sm:$0xff]  ;;  %3335 = vmatpush.msrb.mxu0 %v1295_v11 }
 0x3bf   : > { %v1551_v20 = vld [vmem:[%s5560_s12 + $0x2038] sm:$0xff]  ;;  %3354 = vmatpush.msrb.mxu1 %v1431_v28  ;;  %3336 = vmatmul.f32.vlgmr.msrb.gmra.mxu0 %v6859_v35  ;;  %v3057_v31 = vpop.f32.mrf.mxu2 }
 0x3c0   : > { %v1687_v12 = vld [vmem:[%s5560_s12 + $0x2478] sm:$0xff]  ;;  %3375 = vmatpush.msrb.mxu2 %v1551_v20  ;;  %v3058_v24 = vadd.f32 %v3057_v31, %v3038_v3 }
 0x3c1   : > { %v1423_v1 = vld [vmem:[%s5560_s12 + $0x1c38] sm:$0xff]  ;;  %3394 = vmatpush.msrb.mxu3 %v1687_v12  ;;  %3376 = vmatmul.f32.vlgmr.msrb.gmra.mxu2 %v6927_v26 }
 0x3c2   : > { %v1679_v0 = vld [vmem:[%s5560_s12 + $0x2438] sm:$0xff]  ;;  %3355 = vmatpush.msrb.mxu1 %v1423_v1  ;;  %v3078_v10 = vadd.f32 %v3077_v13, %v3058_v24 }
 0x3c3   : > { %3395 = vmatpush.msrb.mxu3 %v1679_v0  ;;  %3356 = vmatmul.f32.vlgmr.msrb.gmra.mxu1 %v6871_v41  ;;  %v3117_v53 = vpop.f32.mrf.mxu1  ;;  %v3157_v26 = vpop.f32.mrf.mxu3  ;;  %v508_v41 = vld [vmem:[#allocation2 + $0x28] sm:$0xff]  ;;  %v509_v43 = vld [vmem:[#allocation2 + $0x38] sm:$0xff] }
 0x3c4   : > { %3396 = vmatmul.f32.vlgmr.msrb.gmra.mxu3 %v6935_v38  ;;  %v3098_v59 = vadd.f32 %v3097_v58, %v3078_v10 }
 0x3c6   : > { %v3118_v27 = vadd.f32 %v3117_v53, %v3098_v59 }
 0x3c9   : > { %v3137_v35 = vpop.f32.mrf.mxu2 }
 0x3ca   : > { %v3138_v62 = vadd.f32 %v3137_v35, %v3118_v27 }
 0x3cc   : > { %v3158_v63 = vadd.f32 %v3157_v26, %v3138_v62 }
 0x3dc   : > { %v3177_v34 = vpop.f32.mrf.mxu0 }
 0x3dd   : > { %v3178_v40 = vadd.f32 %v3177_v34, %v3158_v63 }
 0x3de   : > { %v3197_v37 = vpop.f32.mrf.mxu1 }
 0x3df   : > { %v3198_v38 = vadd.f32 %v3197_v37, %v3178_v40 }
 0x3e1   : > { %v3406_v4 = vadd.f32 %v3198_v38, %v508_v41 }
 0x3e3   : > { %3414 = vst [vmem:[#allocation2 + $0x28] sm:$0xff] %v3406_v4 }
 0x3fd   : > { %v3257_v23 = vpop.f32.mrf.mxu0 }
 0x401   : > { %v3217_v22 = vpop.f32.mrf.mxu2 }
 0x402   : > { %v3237_v5 = vpop.f32.mrf.mxu3  ;;  %v3277_v15 = vpop.f32.mrf.mxu1 }
 0x403   : > { %v3238_v6 = vadd.f32 %v3237_v5, %v3217_v22 }
 0x405   : > { %v3258_v9 = vadd.f32 %v3257_v23, %v3238_v6 }
 0x407   : > { %v3278_v17 = vadd.f32 %v3277_v15, %v3258_v9 }
 0x409   : > { %v3297_v18 = vpop.f32.mrf.mxu2 }
 0x40a   : > { %v3298_v57 = vadd.f32 %v3297_v18, %v3278_v17  ;;  %v3317_v21 = vpop.f32.mrf.mxu3 }
 0x40c   : > { %v3318_v30 = vadd.f32 %v3317_v21, %v3298_v57 }
 0x43c   : > { %v3337_v32 = vpop.f32.mrf.mxu0 }
 0x43d   : > { %v3338_v33 = vadd.f32 %v3337_v32, %v3318_v30 }
 0x440   : > { %v3357_v36 = vpop.f32.mrf.mxu1 }
 0x441   : > { %v3358_v39 = vadd.f32 %v3357_v36, %v3338_v33 }
 0x444   : > { %v3377_v8 = vpop.f32.mrf.mxu2 }
 0x445   : > { %v3378_v42 = vadd.f32 %v3377_v8, %v3358_v39 }
 0x447   : > { %v3397_v44 = vpop.f32.mrf.mxu3 }
 0x448   : > { %v3398_v45 = vadd.f32 %v3397_v44, %v3378_v42  ;;  %3419 = sbr.rel (%p4932_p1) target bundleno = 1872 (0x750), region = 96 }
 0x44a   : > { %v3407_v19 = vadd.f32 %v3398_v45, %v509_v43 }
 0x44c   : > { %3415 = vst [vmem:[#allocation2 + $0x38] sm:$0xff] %v3407_v19 }
 0x44d   : > { %v3496_v14 = vld [vmem:[#allocation7 + $0x1e0] sm:$0xff] }
 0x44e   : > { %v3560_v56 = vld [vmem:[#allocation7 + $0x3e0] sm:$0xff]  ;;  %3958 = vmatpush.msra.mxu0 %v3496_v14 }
 0x44f   : > { %v3624_v46 = vld [vmem:[#allocation7 + $0x5e0] sm:$0xff]  ;;  %3978 = vmatpush.msra.mxu1 %v3560_v56 }
 0x450   : > { %v3492_v47 = vld [vmem:[#allocation7 + $0x1c0] sm:$0xff]  ;;  %3998 = vmatpush.msra.mxu2 %v3624_v46 }
 0x451   : > { %v3556_v48 = vld [vmem:[#allocation7 + $0x3c0] sm:$0xff]  ;;  %3959 = vmatpush.msra.mxu0 %v3492_v47 }
 0x452   : > { %v3620_v29 = vld [vmem:[#allocation7 + $0x5c0] sm:$0xff]  ;;  %3979 = vmatpush.msra.mxu1 %v3556_v48 }
 0x453   : > { %v3688_v25 = vld [vmem:[#allocation7 + $0x7e0] sm:$0xff]  ;;  %3999 = vmatpush.msra.mxu2 %v3620_v29 }
 0x454   : > { %v3488_v49 = vld [vmem:[#allocation7 + $0x1a0] sm:$0xff]  ;;  %4018 = vmatpush.msra.mxu3 %v3688_v25 }
 0x455   : > { %v3552_v7 = vld [vmem:[#allocation7 + $0x3a0] sm:$0xff]  ;;  %3960 = vmatpush.msra.mxu0 %v3488_v49 }
 0x456   : > { %v3616_v2 = vld [vmem:[#allocation7 + $0x5a0] sm:$0xff]  ;;  %3980 = vmatpush.msra.mxu1 %v3552_v7 }
 0x457   : > { %v3684_v61 = vld [vmem:[#allocation7 + $0x7c0] sm:$0xff]  ;;  %4000 = vmatpush.msra.mxu2 %v3616_v2 }
 0x458   : > { %v3484_v60 = vld [vmem:[#allocation7 + $0x180] sm:$0xff]  ;;  %4019 = vmatpush.msra.mxu3 %v3684_v61 }
 0x459   : > { %v3548_v50 = vld [vmem:[#allocation7 + $0x380] sm:$0xff]  ;;  %3961 = vmatpush.msra.mxu0 %v3484_v60 }
 0x45a   : > { %v3612_v51 = vld [vmem:[#allocation7 + $0x580] sm:$0xff]  ;;  %3981 = vmatpush.msra.mxu1 %v3548_v50 }
 0x45b   : > { %v3680_v52 = vld [vmem:[#allocation7 + $0x7a0] sm:$0xff]  ;;  %4001 = vmatpush.msra.mxu2 %v3612_v51 }
 0x45c   : > { %v3480_v16 = vld [vmem:[#allocation7 + $0x160] sm:$0xff]  ;;  %4020 = vmatpush.msra.mxu3 %v3680_v52 }
 0x45d   : > { %v3544_v11 = vld [vmem:[#allocation7 + $0x360] sm:$0xff]  ;;  %3962 = vmatpush.msra.mxu0 %v3480_v16 }
 0x45e   : > { %v3608_v28 = vld [vmem:[#allocation7 + $0x560] sm:$0xff]  ;;  %3982 = vmatpush.msra.mxu1 %v3544_v11 }
 0x45f   : > { %v3676_v20 = vld [vmem:[#allocation7 + $0x780] sm:$0xff]  ;;  %4002 = vmatpush.msra.mxu2 %v3608_v28 }
 0x460   : > { %v3476_v12 = vld [vmem:[#allocation7 + $0x140] sm:$0xff]  ;;  %4021 = vmatpush.msra.mxu3 %v3676_v20 }
 0x461   : > { %v3540_v1 = vld [vmem:[#allocation7 + $0x340] sm:$0xff]  ;;  %3963 = vmatpush.msra.mxu0 %v3476_v12 }
 0x462   : > { %v3604_v0 = vld [vmem:[#allocation7 + $0x540] sm:$0xff]  ;;  %3983 = vmatpush.msra.mxu1 %v3540_v1 }
 0x463   : > { %v3672_v54 = vld [vmem:[#allocation7 + $0x760] sm:$0xff]  ;;  %4003 = vmatpush.msra.mxu2 %v3604_v0 }
 0x464   : > { %v3472_v55 = vld [vmem:[#allocation7 + $0x120] sm:$0xff]  ;;  %4022 = vmatpush.msra.mxu3 %v3672_v54 }
 0x465   : > { %v3536_v3 = vld [vmem:[#allocation7 + $0x320] sm:$0xff]  ;;  %3964 = vmatpush.msra.mxu0 %v3472_v55 }
 0x466   : > { %v3600_v31 = vld [vmem:[#allocation7 + $0x520] sm:$0xff]  ;;  %3984 = vmatpush.msra.mxu1 %v3536_v3 }
 0x467   : > { %v3668_v24 = vld [vmem:[#allocation7 + $0x740] sm:$0xff]  ;;  %4004 = vmatpush.msra.mxu2 %v3600_v31 }
 0x468   : > { %v3468_v13 = vld [vmem:[#allocation7 + $0x100] sm:$0xff]  ;;  %4023 = vmatpush.msra.mxu3 %v3668_v24 }
 0x469   : > { %v3532_v10 = vld [vmem:[#allocation7 + $0x300] sm:$0xff]  ;;  %3965 = vmatpush.msra.mxu0 %v3468_v13 }
 0x46a   : > { %v3596_v58 = vld [vmem:[#allocation7 + $0x500] sm:$0xff]  ;;  %3985 = vmatpush.msra.mxu1 %v3532_v10 }
 0x46b   : > { %v3664_v59 = vld [vmem:[#allocation7 + $0x720] sm:$0xff]  ;;  %4005 = vmatpush.msra.mxu2 %v3596_v58 }
 0x46c   : > { %v3464_v53 = vld [vmem:[#allocation7 + $0xe0] sm:$0xff]  ;;  %4024 = vmatpush.msra.mxu3 %v3664_v59 }
 0x46d   : > { %v3528_v27 = vld [vmem:[#allocation7 + $0x2e0] sm:$0xff]  ;;  %3966 = vmatpush.msra.mxu0 %v3464_v53 }
 0x46e   : > { %v3592_v35 = vld [vmem:[#allocation7 + $0x4e0] sm:$0xff]  ;;  %3986 = vmatpush.msra.mxu1 %v3528_v27 }
 0x46f   : > { %v3660_v62 = vld [vmem:[#allocation7 + $0x700] sm:$0xff]  ;;  %4006 = vmatpush.msra.mxu2 %v3592_v35 }
 0x470   : > { %v3460_v26 = vld [vmem:[#allocation7 + $0xc0] sm:$0xff]  ;;  %4025 = vmatpush.msra.mxu3 %v3660_v62 }
 0x471   : > { %v3524_v63 = vld [vmem:[#allocation7 + $0x2c0] sm:$0xff]  ;;  %3967 = vmatpush.msra.mxu0 %v3460_v26 }
 0x472   : > { %v3588_v34 = vld [vmem:[#allocation7 + $0x4c0] sm:$0xff]  ;;  %3987 = vmatpush.msra.mxu1 %v3524_v63 }
 0x473   : > { %v3656_v40 = vld [vmem:[#allocation7 + $0x6e0] sm:$0xff]  ;;  %4007 = vmatpush.msra.mxu2 %v3588_v34 }
 0x474   : > { %v3456_v41 = vld [vmem:[#allocation7 + $0xa0] sm:$0xff]  ;;  %4026 = vmatpush.msra.mxu3 %v3656_v40 }
 0x475   : > { %v3520_v37 = vld [vmem:[#allocation7 + $0x2a0] sm:$0xff]  ;;  %3968 = vmatpush.msra.mxu0 %v3456_v41 }
 0x476   : > { %v3584_v38 = vld [vmem:[#allocation7 + $0x4a0] sm:$0xff]  ;;  %3988 = vmatpush.msra.mxu1 %v3520_v37 }
 0x477   : > { %v3652_v4 = vld [vmem:[#allocation7 + $0x6c0] sm:$0xff]  ;;  %4008 = vmatpush.msra.mxu2 %v3584_v38 }
 0x478   : > { %v3452_v5 = vld [vmem:[#allocation7 + $0x80] sm:$0xff]  ;;  %4027 = vmatpush.msra.mxu3 %v3652_v4 }
 0x479   : > { %v3516_v22 = vld [vmem:[#allocation7 + $0x280] sm:$0xff]  ;;  %3969 = vmatpush.msra.mxu0 %v3452_v5 }
 0x47a   : > { %v3580_v6 = vld [vmem:[#allocation7 + $0x480] sm:$0xff]  ;;  %3989 = vmatpush.msra.mxu1 %v3516_v22 }
 0x47b   : > { %v3648_v23 = vld [vmem:[#allocation7 + $0x6a0] sm:$0xff]  ;;  %4009 = vmatpush.msra.mxu2 %v3580_v6 }
 0x47c   : > { %v3448_v9 = vld [vmem:[#allocation7 + $0x60] sm:$0xff]  ;;  %4028 = vmatpush.msra.mxu3 %v3648_v23 }
 0x47d   : > { %v3512_v15 = vld [vmem:[#allocation7 + $0x260] sm:$0xff]  ;;  %3970 = vmatpush.msra.mxu0 %v3448_v9 }
 0x47e   : > { %v3576_v17 = vld [vmem:[#allocation7 + $0x460] sm:$0xff]  ;;  %3990 = vmatpush.msra.mxu1 %v3512_v15 }
 0x47f   : > { %v3644_v18 = vld [vmem:[#allocation7 + $0x680] sm:$0xff]  ;;  %4010 = vmatpush.msra.mxu2 %v3576_v17 }
 0x480   : > { %v3444_v57 = vld [vmem:[#allocation7 + $0x40] sm:$0xff]  ;;  %4029 = vmatpush.msra.mxu3 %v3644_v18 }
 0x481   : > { %v3508_v21 = vld [vmem:[#allocation7 + $0x240] sm:$0xff]  ;;  %3971 = vmatpush.msra.mxu0 %v3444_v57 }
 0x482   : > { %v3572_v30 = vld [vmem:[#allocation7 + $0x440] sm:$0xff]  ;;  %3991 = vmatpush.msra.mxu1 %v3508_v21 }
 0x483   : > { %v3640_v32 = vld [vmem:[#allocation7 + $0x660] sm:$0xff]  ;;  %4011 = vmatpush.msra.mxu2 %v3572_v30 }
 0x484   : > { %v3440_v33 = vld [vmem:[#allocation7 + $0x20] sm:$0xff]  ;;  %4030 = vmatpush.msra.mxu3 %v3640_v32 }
 0x485   : > { %v3504_v36 = vld [vmem:[#allocation7 + $0x220] sm:$0xff]  ;;  %3972 = vmatpush.msra.mxu0 %v3440_v33 }
 0x486   : > { %v3568_v39 = vld [vmem:[#allocation7 + $0x420] sm:$0xff]  ;;  %3992 = vmatpush.msra.mxu1 %v3504_v36 }
 0x487   : > { %v3636_v8 = vld [vmem:[#allocation7 + $0x640] sm:$0xff]  ;;  %4012 = vmatpush.msra.mxu2 %v3568_v39  ;;  %v3420_v39 = vld [vmem:[#allocation2 + $0x30] sm:$0xff] }
 0x488   : > { %v3436_v42 = vld [vmem:[#allocation7] sm:$0xff]  ;;  %4031 = vmatpush.msra.mxu3 %v3636_v8  ;;  %v3421_v8 = vld [vmem:[#allocation2] sm:$0xff] }
 0x489   : > { %v3500_v43 = vld [vmem:[#allocation7 + $0x200] sm:$0xff]  ;;  %3973 = vmatpush.msra.mxu0 %v3436_v42 }
 0x48a   : > { %v3564_v44 = vld [vmem:[#allocation7 + $0x400] sm:$0xff]  ;;  %3993 = vmatpush.msra.mxu1 %v3500_v43 }
 0x48b   : > { %v3632_v45 = vld [vmem:[#allocation7 + $0x620] sm:$0xff]  ;;  %4013 = vmatpush.msra.mxu2 %v3564_v44  ;;  %v3422_v44 = vld [vmem:[#allocation2 + $0x18] sm:$0xff] }
 0x48c   : > { %v3752_v19 = vld [vmem:[#allocation7 + $0x9e0] sm:$0xff]  ;;  %4032 = vmatpush.msra.mxu3 %v3632_v45 }
 0x48d   : > { %v3816_v14 = vld [vmem:[#allocation7 + $0xbe0] sm:$0xff]  ;;  %4038 = vmatpush.msrb.mxu0 %v3752_v19 }
 0x48e   : > { %v3880_v56 = vld [vmem:[#allocation7 + $0xde0] sm:$0xff]  ;;  %4058 = vmatpush.msrb.mxu1 %v3816_v14 }
 0x48f   : > { %v3628_v46 = vld [vmem:[#allocation7 + $0x600] sm:$0xff]  ;;  %4078 = vmatpush.msrb.mxu2 %v3880_v56 }
 0x490   : > { %v3748_v47 = vld [vmem:[#allocation7 + $0x9c0] sm:$0xff]  ;;  %4033 = vmatpush.msra.mxu3 %v3628_v46  ;;  %v7071_v46 = vmax.f32 %v3420_v39, 0.0  ;;  %v3585_v39 = vld [vmem:[#allocation7 + $0x4a8] sm:$0xff] }
 0x491   : > { %v3812_v48 = vld [vmem:[#allocation7 + $0xbc0] sm:$0xff]  ;;  %4039 = vmatpush.msrb.mxu0 %v3748_v47  ;;  %v7073_v47 = vmax.f32 %v3421_v8, 0.0  ;;  %v3653_v8 = vld [vmem:[#allocation7 + $0x6c8] sm:$0xff] }
 0x492   : > { %v3876_v29 = vld [vmem:[#allocation7 + $0xdc0] sm:$0xff]  ;;  %4059 = vmatpush.msrb.mxu1 %v3812_v48  ;;  %v7075_v48 = vmax.f32 %v3422_v44, 0.0  ;;  %3974 = vmatmul.f32.vlgmr.msra.gmra.mxu0 %v7071_v46  ;;  %v3581_v44 = vld [vmem:[#allocation7 + $0x488] sm:$0xff] }
 0x493   : > { %v3944_v25 = vld [vmem:[#allocation7 + $0xfe0] sm:$0xff]  ;;  %4079 = vmatpush.msrb.mxu2 %v3876_v29  ;;  %v3423_v29 = vld [vmem:[#allocation2 + $0x10] sm:$0xff]  ;;  %3994 = vmatmul.f32.vlgmr.msra.gmra.mxu1 %v7073_v47 }
 0x494   : > { %v3744_v49 = vld [vmem:[#allocation7 + $0x9a0] sm:$0xff]  ;;  %4098 = vmatpush.msrb.mxu3 %v3944_v25  ;;  %v3497_v25 = vld [vmem:[#allocation7 + $0x1e8] sm:$0xff]  ;;  %4014 = vmatmul.f32.vlgmr.msra.gmra.mxu2 %v7075_v48 }
 0x495   : > { %v3808_v7 = vld [vmem:[#allocation7 + $0xba0] sm:$0xff]  ;;  %4040 = vmatpush.msrb.mxu0 %v3744_v49  ;;  %v3561_v49 = vld [vmem:[#allocation7 + $0x3e8] sm:$0xff] }
 0x496   : > { %v3872_v2 = vld [vmem:[#allocation7 + $0xda0] sm:$0xff]  ;;  %4060 = vmatpush.msrb.mxu1 %v3808_v7  ;;  %v3625_v7 = vld [vmem:[#allocation7 + $0x5e8] sm:$0xff] }
 0x497   : > { %v3940_v61 = vld [vmem:[#allocation7 + $0xfc0] sm:$0xff]  ;;  %4080 = vmatpush.msrb.mxu2 %v3872_v2 }
 0x498   : > { %v3740_v60 = vld [vmem:[#allocation7 + $0x980] sm:$0xff]  ;;  %4099 = vmatpush.msrb.mxu3 %v3940_v61  ;;  %v7079_v61 = vmax.f32 %v3423_v29, 0.0  ;;  %v3645_v29 = vld [vmem:[#allocation7 + $0x688] sm:$0xff] }
 0x499   : > { %v3804_v50 = vld [vmem:[#allocation7 + $0xb80] sm:$0xff]  ;;  %4041 = vmatpush.msrb.mxu0 %v3740_v60  ;;  %v3493_v60 = vld [vmem:[#allocation7 + $0x1c8] sm:$0xff] }
 0x49a   : > { %v3868_v51 = vld [vmem:[#allocation7 + $0xd80] sm:$0xff]  ;;  %4061 = vmatpush.msrb.mxu1 %v3804_v50  ;;  %v3557_v50 = vld [vmem:[#allocation7 + $0x3c8] sm:$0xff]  ;;  %4034 = vmatmul.f32.vlgmr.msra.gmra.mxu3 %v7079_v61 }
 0x49b   : > { %v3936_v52 = vld [vmem:[#allocation7 + $0xfa0] sm:$0xff]  ;;  %4081 = vmatpush.msrb.mxu2 %v3868_v51  ;;  %v3621_v51 = vld [vmem:[#allocation7 + $0x5c8] sm:$0xff] }
 0x49c   : > { %v3736_v16 = vld [vmem:[#allocation7 + $0x960] sm:$0xff]  ;;  %4100 = vmatpush.msrb.mxu3 %v3936_v52  ;;  %v3689_v52 = vld [vmem:[#allocation7 + $0x7e8] sm:$0xff] }
 0x49d   : > { %v3800_v11 = vld [vmem:[#allocation7 + $0xb60] sm:$0xff]  ;;  %4042 = vmatpush.msrb.mxu0 %v3736_v16  ;;  %v3489_v16 = vld [vmem:[#allocation7 + $0x1a8] sm:$0xff] }
 0x49e   : > { %v3864_v28 = vld [vmem:[#allocation7 + $0xd60] sm:$0xff]  ;;  %4062 = vmatpush.msrb.mxu1 %v3800_v11  ;;  %v3553_v11 = vld [vmem:[#allocation7 + $0x3a8] sm:$0xff] }
 0x49f   : > { %v3932_v20 = vld [vmem:[#allocation7 + $0xf80] sm:$0xff]  ;;  %4082 = vmatpush.msrb.mxu2 %v3864_v28 }
 0x4a0   : > { %v3732_v12 = vld [vmem:[#allocation7 + $0x940] sm:$0xff]  ;;  %4101 = vmatpush.msrb.mxu3 %v3932_v20  ;;  %v3617_v20 = vld [vmem:[#allocation7 + $0x5a8] sm:$0xff] }
 0x4a1   : > { %v3796_v1 = vld [vmem:[#allocation7 + $0xb40] sm:$0xff]  ;;  %4043 = vmatpush.msrb.mxu0 %v3732_v12  ;;  %v3685_v12 = vld [vmem:[#allocation7 + $0x7c8] sm:$0xff] }
 0x4a2   : > { %v3860_v0 = vld [vmem:[#allocation7 + $0xd40] sm:$0xff]  ;;  %4063 = vmatpush.msrb.mxu1 %v3796_v1  ;;  %v3485_v1 = vld [vmem:[#allocation7 + $0x188] sm:$0xff] }
 0x4a3   : > { %v3928_v54 = vld [vmem:[#allocation7 + $0xf60] sm:$0xff]  ;;  %4083 = vmatpush.msrb.mxu2 %v3860_v0  ;;  %v3549_v0 = vld [vmem:[#allocation7 + $0x388] sm:$0xff] }
 0x4a4   : > { %v3728_v55 = vld [vmem:[#allocation7 + $0x920] sm:$0xff]  ;;  %4102 = vmatpush.msrb.mxu3 %v3928_v54 }
 0x4a5   : > { %v3792_v3 = vld [vmem:[#allocation7 + $0xb20] sm:$0xff]  ;;  %4044 = vmatpush.msrb.mxu0 %v3728_v55  ;;  %v3613_v55 = vld [vmem:[#allocation7 + $0x588] sm:$0xff] }
 0x4a6   : > { %v3856_v31 = vld [vmem:[#allocation7 + $0xd20] sm:$0xff]  ;;  %4064 = vmatpush.msrb.mxu1 %v3792_v3  ;;  %v3681_v3 = vld [vmem:[#allocation7 + $0x7a8] sm:$0xff] }
 0x4a7   : > { %v3924_v24 = vld [vmem:[#allocation7 + $0xf40] sm:$0xff]  ;;  %4084 = vmatpush.msrb.mxu2 %v3856_v31 }
 0x4a8   : > { %v3724_v13 = vld [vmem:[#allocation7 + $0x900] sm:$0xff]  ;;  %4103 = vmatpush.msrb.mxu3 %v3924_v24  ;;  %v3427_v24 = vld [vmem:[#allocation2 + $0x38] sm:$0xff] }
 0x4a9   : > { %v3788_v10 = vld [vmem:[#allocation7 + $0xb00] sm:$0xff]  ;;  %4045 = vmatpush.msrb.mxu0 %v3724_v13  ;;  %v3481_v13 = vld [vmem:[#allocation7 + $0x168] sm:$0xff] }
 0x4aa   : > { %v3852_v58 = vld [vmem:[#allocation7 + $0xd00] sm:$0xff]  ;;  %4065 = vmatpush.msrb.mxu1 %v3788_v10  ;;  %v3545_v10 = vld [vmem:[#allocation7 + $0x368] sm:$0xff] }
 0x4ab   : > { %v3920_v59 = vld [vmem:[#allocation7 + $0xf20] sm:$0xff]  ;;  %4085 = vmatpush.msrb.mxu2 %v3852_v58  ;;  %v3609_v58 = vld [vmem:[#allocation7 + $0x568] sm:$0xff] }
 0x4ac   : > { %v3720_v53 = vld [vmem:[#allocation7 + $0x8e0] sm:$0xff]  ;;  %4104 = vmatpush.msrb.mxu3 %v3920_v59 }
 0x4ad   : > { %v3784_v27 = vld [vmem:[#allocation7 + $0xae0] sm:$0xff]  ;;  %4046 = vmatpush.msrb.mxu0 %v3720_v53  ;;  %v3425_v53 = vld [vmem:[#allocation2 + $0x20] sm:$0xff] }
 0x4ae   : > { %v3848_v35 = vld [vmem:[#allocation7 + $0xce0] sm:$0xff]  ;;  %4066 = vmatpush.msrb.mxu1 %v3784_v27  ;;  %v3677_v27 = vld [vmem:[#allocation7 + $0x788] sm:$0xff] }
 0x4af   : > { %v3916_v62 = vld [vmem:[#allocation7 + $0xf00] sm:$0xff]  ;;  %4086 = vmatpush.msrb.mxu2 %v3848_v35  ;;  %v7087_v35 = vmax.f32 %v3427_v24, 0.0  ;;  %v3877_v24 = vld [vmem:[#allocation7 + $0xdc8] sm:$0xff] }
 0x4b0   : > { %v3716_v26 = vld [vmem:[#allocation7 + $0x8c0] sm:$0xff]  ;;  %4105 = vmatpush.msrb.mxu3 %v3916_v62  ;;  %v3477_v62 = vld [vmem:[#allocation7 + $0x148] sm:$0xff] }
 0x4b1   : > { %v3780_v63 = vld [vmem:[#allocation7 + $0xac0] sm:$0xff]  ;;  %4047 = vmatpush.msrb.mxu0 %v3716_v26  ;;  %v3541_v26 = vld [vmem:[#allocation7 + $0x348] sm:$0xff] }
 0x4b2   : > { %v3844_v34 = vld [vmem:[#allocation7 + $0xcc0] sm:$0xff]  ;;  %4067 = vmatpush.msrb.mxu1 %v3780_v63  ;;  %v3605_v63 = vld [vmem:[#allocation7 + $0x548] sm:$0xff] }
 0x4b3   : > { %v3912_v40 = vld [vmem:[#allocation7 + $0xee0] sm:$0xff]  ;;  %4087 = vmatpush.msrb.mxu2 %v3844_v34  ;;  %v7090_v34 = vmax.f32 %v3425_v53, 0.0  ;;  %v3873_v53 = vld [vmem:[#allocation7 + $0xda8] sm:$0xff] }
 0x4b4   : > { %v3712_v41 = vld [vmem:[#allocation7 + $0x8a0] sm:$0xff]  ;;  %4106 = vmatpush.msrb.mxu3 %v3912_v40  ;;  %v3673_v40 = vld [vmem:[#allocation7 + $0x768] sm:$0xff] }
 0x4b5   : > { %v3776_v37 = vld [vmem:[#allocation7 + $0xaa0] sm:$0xff]  ;;  %4048 = vmatpush.msrb.mxu0 %v3712_v41  ;;  %v3473_v41 = vld [vmem:[#allocation7 + $0x128] sm:$0xff] }
 0x4b6   : > { %v3840_v38 = vld [vmem:[#allocation7 + $0xca0] sm:$0xff]  ;;  %4068 = vmatpush.msrb.mxu1 %v3776_v37  ;;  %v3537_v37 = vld [vmem:[#allocation7 + $0x328] sm:$0xff] }
 0x4b7   : > { %v3908_v4 = vld [vmem:[#allocation7 + $0xec0] sm:$0xff]  ;;  %4088 = vmatpush.msrb.mxu2 %v3840_v38  ;;  %v3601_v38 = vld [vmem:[#allocation7 + $0x528] sm:$0xff] }
 0x4b8   : > { %v3708_v5 = vld [vmem:[#allocation7 + $0x880] sm:$0xff]  ;;  %4107 = vmatpush.msrb.mxu3 %v3908_v4  ;;  %v3669_v4 = vld [vmem:[#allocation7 + $0x748] sm:$0xff] }
 0x4b9   : > { %v3772_v22 = vld [vmem:[#allocation7 + $0xa80] sm:$0xff]  ;;  %4049 = vmatpush.msrb.mxu0 %v3708_v5  ;;  %v3469_v5 = vld [vmem:[#allocation7 + $0x108] sm:$0xff] }
 0x4ba   : > { %v3836_v6 = vld [vmem:[#allocation7 + $0xc80] sm:$0xff]  ;;  %4069 = vmatpush.msrb.mxu1 %v3772_v22  ;;  %v3533_v22 = vld [vmem:[#allocation7 + $0x308] sm:$0xff] }
 0x4bb   : > { %v3904_v23 = vld [vmem:[#allocation7 + $0xea0] sm:$0xff]  ;;  %4089 = vmatpush.msrb.mxu2 %v3836_v6  ;;  %v3597_v6 = vld [vmem:[#allocation7 + $0x508] sm:$0xff] }
 0x4bc   : > { %v3704_v9 = vld [vmem:[#allocation7 + $0x860] sm:$0xff]  ;;  %4108 = vmatpush.msrb.mxu3 %v3904_v23  ;;  %v3665_v23 = vld [vmem:[#allocation7 + $0x728] sm:$0xff] }
 0x4bd   : > { %v3768_v15 = vld [vmem:[#allocation7 + $0xa60] sm:$0xff]  ;;  %4050 = vmatpush.msrb.mxu0 %v3704_v9  ;;  %v3465_v9 = vld [vmem:[#allocation7 + $0xe8] sm:$0xff] }
 0x4be   : > { %v3832_v17 = vld [vmem:[#allocation7 + $0xc60] sm:$0xff]  ;;  %4070 = vmatpush.msrb.mxu1 %v3768_v15  ;;  %v3529_v15 = vld [vmem:[#allocation7 + $0x2e8] sm:$0xff] }
 0x4bf   : > { %v3900_v18 = vld [vmem:[#allocation7 + $0xe80] sm:$0xff]  ;;  %4090 = vmatpush.msrb.mxu2 %v3832_v17  ;;  %v3593_v17 = vld [vmem:[#allocation7 + $0x4e8] sm:$0xff] }
 0x4c0   : > { %v3700_v57 = vld [vmem:[#allocation7 + $0x840] sm:$0xff]  ;;  %4109 = vmatpush.msrb.mxu3 %v3900_v18  ;;  %v3661_v18 = vld [vmem:[#allocation7 + $0x708] sm:$0xff] }
 0x4c1   : > { %v3764_v21 = vld [vmem:[#allocation7 + $0xa40] sm:$0xff]  ;;  %4051 = vmatpush.msrb.mxu0 %v3700_v57  ;;  %v3461_v57 = vld [vmem:[#allocation7 + $0xc8] sm:$0xff] }
 0x4c2   : > { %v3828_v30 = vld [vmem:[#allocation7 + $0xc40] sm:$0xff]  ;;  %4071 = vmatpush.msrb.mxu1 %v3764_v21  ;;  %v3525_v21 = vld [vmem:[#allocation7 + $0x2c8] sm:$0xff] }
 0x4c3   : > { %v3896_v32 = vld [vmem:[#allocation7 + $0xe60] sm:$0xff]  ;;  %4091 = vmatpush.msrb.mxu2 %v3828_v30  ;;  %v3589_v30 = vld [vmem:[#allocation7 + $0x4c8] sm:$0xff] }
 0x4c4   : > { %v3696_v33 = vld [vmem:[#allocation7 + $0x820] sm:$0xff]  ;;  %4110 = vmatpush.msrb.mxu3 %v3896_v32  ;;  %v3657_v32 = vld [vmem:[#allocation7 + $0x6e8] sm:$0xff] }
 0x4c5   : > { %v3760_v36 = vld [vmem:[#allocation7 + $0xa20] sm:$0xff]  ;;  %4052 = vmatpush.msrb.mxu0 %v3696_v33  ;;  %v3457_v33 = vld [vmem:[#allocation7 + $0xa8] sm:$0xff] }
 0x4c6   : > { %v3824_v42 = vld [vmem:[#allocation7 + $0xc20] sm:$0xff]  ;;  %4072 = vmatpush.msrb.mxu1 %v3760_v36  ;;  %v3521_v36 = vld [vmem:[#allocation7 + $0x2a8] sm:$0xff] }
 0x4c7   : > { %v3892_v43 = vld [vmem:[#allocation7 + $0xe40] sm:$0xff]  ;;  %4092 = vmatpush.msrb.mxu2 %v3824_v42  ;;  %v3453_v42 = vld [vmem:[#allocation7 + $0x88] sm:$0xff] }
 0x4c8   : > { %v3692_v45 = vld [vmem:[#allocation7 + $0x800] sm:$0xff]  ;;  %4111 = vmatpush.msrb.mxu3 %v3892_v43  ;;  %v3517_v43 = vld [vmem:[#allocation7 + $0x288] sm:$0xff] }
 0x4c9   : > { %v3756_v19 = vld [vmem:[#allocation7 + $0xa00] sm:$0xff]  ;;  %4053 = vmatpush.msrb.mxu0 %v3692_v45  ;;  %v3649_v45 = vld [vmem:[#allocation7 + $0x6a8] sm:$0xff] }
 0x4ca   : > { %v3820_v14 = vld [vmem:[#allocation7 + $0xc00] sm:$0xff]  ;;  %4073 = vmatpush.msrb.mxu1 %v3756_v19  ;;  %v3449_v19 = vld [vmem:[#allocation7 + $0x68] sm:$0xff] }
 0x4cb   : > { %v3888_v56 = vld [vmem:[#allocation7 + $0xe20] sm:$0xff]  ;;  %4093 = vmatpush.msrb.mxu2 %v3820_v14  ;;  %4118 = vmatpush.msra.mxu0 %v3497_v25  ;;  %v3513_v14 = vld [vmem:[#allocation7 + $0x268] sm:$0xff] }
 0x4cc   : > { %4112 = vmatpush.msrb.mxu3 %v3888_v56  ;;  %v3884_v2 = vld [vmem:[#allocation7 + $0xe00] sm:$0xff]  ;;  %4138 = vmatpush.msra.mxu1 %v3561_v49  ;;  %v3577_v56 = vld [vmem:[#allocation7 + $0x468] sm:$0xff] }
 0x4cd   : > { %4158 = vmatpush.msra.mxu2 %v3625_v7  ;;  %4119 = vmatpush.msra.mxu0 %v3493_v60  ;;  %v3426_v28 = vld [vmem:[#allocation2 + $0x28] sm:$0xff]  ;;  %v3445_v25 = vld [vmem:[#allocation7 + $0x48] sm:$0xff] }
 0x4ce   : > { %4113 = vmatpush.msrb.mxu3 %v3884_v2  ;;  %4139 = vmatpush.msra.mxu1 %v3557_v50  ;;  %v3424_v54 = vld [vmem:[#allocation2 + $0x8] sm:$0xff]  ;;  %v7083_v31 = vmax.f32 %v3426_v28, 0.0  ;;  %v3509_v49 = vld [vmem:[#allocation7 + $0x248] sm:$0xff] }
 0x4cf   : > { %4159 = vmatpush.msra.mxu2 %v3621_v51  ;;  %4120 = vmatpush.msra.mxu0 %v3489_v16  ;;  %v7085_v59 = vmax.f32 %v3424_v54, 0.0  ;;  %v3573_v7 = vld [vmem:[#allocation7 + $0x448] sm:$0xff] }
 0x4d0   : > { %4178 = vmatpush.msra.mxu3 %v3689_v52  ;;  %4140 = vmatpush.msra.mxu1 %v3553_v11  ;;  %v3641_v2 = vld [vmem:[#allocation7 + $0x668] sm:$0xff] }
 0x4d1   : > { %4160 = vmatpush.msra.mxu2 %v3617_v20  ;;  %4121 = vmatpush.msra.mxu0 %v3485_v1  ;;  %v3441_v60 = vld [vmem:[#allocation7 + $0x28] sm:$0xff] }
 0x4d2   : > { %4179 = vmatpush.msra.mxu3 %v3685_v12  ;;  %4141 = vmatpush.msra.mxu1 %v3549_v0  ;;  %v3505_v50 = vld [vmem:[#allocation7 + $0x228] sm:$0xff] }
 0x4d3   : > { %4161 = vmatpush.msra.mxu2 %v3613_v55  ;;  %4122 = vmatpush.msra.mxu0 %v3481_v13  ;;  %v3569_v51 = vld [vmem:[#allocation7 + $0x428] sm:$0xff] }
 0x4d4   : > { %4180 = vmatpush.msra.mxu3 %v3681_v3  ;;  %4094 = vmatmul.f32.vlgmr.msrb.gmra.mxu2 %v7083_v31  ;;  %v3637_v52 = vld [vmem:[#allocation7 + $0x648] sm:$0xff] }
 0x4d5   : > { %4142 = vmatpush.msra.mxu1 %v3545_v10  ;;  %4162 = vmatpush.msra.mxu2 %v3609_v58  ;;  %v3437_v16 = vld [vmem:[#allocation7 + $0x8] sm:$0xff] }
 0x4d6   : > { %4181 = vmatpush.msra.mxu3 %v3677_v27  ;;  %4054 = vmatmul.f32.vlgmr.msrb.gmra.mxu0 %v7085_v59  ;;  %v3501_v11 = vld [vmem:[#allocation7 + $0x208] sm:$0xff] }
 0x4d7   : > { %4114 = vmatmul.f32.vlgmr.msrb.gmra.mxu3 %v7087_v35  ;;  %4123 = vmatpush.msra.mxu0 %v3477_v62  ;;  %v3565_v28 = vld [vmem:[#allocation7 + $0x408] sm:$0xff] }
 0x4d8   : > { %4143 = vmatpush.msra.mxu1 %v3541_v26  ;;  %4163 = vmatpush.msra.mxu2 %v3605_v63  ;;  %v3633_v20 = vld [vmem:[#allocation7 + $0x628] sm:$0xff] }
 0x4d9   : > { %4182 = vmatpush.msra.mxu3 %v3673_v40  ;;  %4074 = vmatmul.f32.vlgmr.msrb.gmra.mxu1 %v7090_v34  ;;  %v3753_v12 = vld [vmem:[#allocation7 + $0x9e8] sm:$0xff] }
 0x4da   : > { %4124 = vmatpush.msra.mxu0 %v3473_v41  ;;  %4144 = vmatpush.msra.mxu1 %v3537_v37  ;;  %v3817_v1 = vld [vmem:[#allocation7 + $0xbe8] sm:$0xff] }
 0x4db   : > { %4164 = vmatpush.msra.mxu2 %v3601_v38  ;;  %4183 = vmatpush.msra.mxu3 %v3669_v4  ;;  %v3881_v0 = vld [vmem:[#allocation7 + $0xde8] sm:$0xff] }
 0x4dc   : > { %4125 = vmatpush.msra.mxu0 %v3469_v5  ;;  %4145 = vmatpush.msra.mxu1 %v3533_v22  ;;  %v3629_v54 = vld [vmem:[#allocation7 + $0x608] sm:$0xff] }
 0x4dd   : > { %4165 = vmatpush.msra.mxu2 %v3597_v6  ;;  %4184 = vmatpush.msra.mxu3 %v3665_v23  ;;  %v3749_v55 = vld [vmem:[#allocation7 + $0x9c8] sm:$0xff] }
 0x4de   : > { %4126 = vmatpush.msra.mxu0 %v3465_v9  ;;  %4146 = vmatpush.msra.mxu1 %v3529_v15  ;;  %v3813_v3 = vld [vmem:[#allocation7 + $0xbc8] sm:$0xff] }
 0x4df   : > { %4166 = vmatpush.msra.mxu2 %v3593_v17  ;;  %4185 = vmatpush.msra.mxu3 %v3661_v18  ;;  %v3945_v13 = vld [vmem:[#allocation7 + $0xfe8] sm:$0xff] }
 0x4e0   : > { %4127 = vmatpush.msra.mxu0 %v3461_v57  ;;  %4147 = vmatpush.msra.mxu1 %v3525_v21  ;;  %v3745_v10 = vld [vmem:[#allocation7 + $0x9a8] sm:$0xff] }
 0x4e1   : > { %4167 = vmatpush.msra.mxu2 %v3589_v30  ;;  %4186 = vmatpush.msra.mxu3 %v3657_v32  ;;  %v3809_v58 = vld [vmem:[#allocation7 + $0xba8] sm:$0xff] }
 0x4e2   : > { %4128 = vmatpush.msra.mxu0 %v3457_v33  ;;  %4148 = vmatpush.msra.mxu1 %v3521_v36  ;;  %v3941_v27 = vld [vmem:[#allocation7 + $0xfc8] sm:$0xff] }
 0x4e3   : > { %4168 = vmatpush.msra.mxu2 %v3585_v39  ;;  %4187 = vmatpush.msra.mxu3 %v3653_v8  ;;  %v3741_v62 = vld [vmem:[#allocation7 + $0x988] sm:$0xff] }
 0x4e4   : > { %4129 = vmatpush.msra.mxu0 %v3453_v42  ;;  %4149 = vmatpush.msra.mxu1 %v3517_v43  ;;  %v3805_v26 = vld [vmem:[#allocation7 + $0xb88] sm:$0xff] }
 0x4e5   : > { %4169 = vmatpush.msra.mxu2 %v3581_v44  ;;  %4188 = vmatpush.msra.mxu3 %v3649_v45  ;;  %v3869_v63 = vld [vmem:[#allocation7 + $0xd88] sm:$0xff] }
 0x4e6   : > { %4130 = vmatpush.msra.mxu0 %v3449_v19  ;;  %4150 = vmatpush.msra.mxu1 %v3513_v14  ;;  %v3937_v40 = vld [vmem:[#allocation7 + $0xfa8] sm:$0xff] }
 0x4e7   : > { %4170 = vmatpush.msra.mxu2 %v3577_v56  ;;  %4189 = vmatpush.msra.mxu3 %v3645_v29  ;;  %v3737_v41 = vld [vmem:[#allocation7 + $0x968] sm:$0xff] }
 0x4e8   : > { %4131 = vmatpush.msra.mxu0 %v3445_v25  ;;  %4151 = vmatpush.msra.mxu1 %v3509_v49  ;;  %v3801_v37 = vld [vmem:[#allocation7 + $0xb68] sm:$0xff] }
 0x4e9   : > { %4171 = vmatpush.msra.mxu2 %v3573_v7  ;;  %4190 = vmatpush.msra.mxu3 %v3641_v2  ;;  %v3865_v38 = vld [vmem:[#allocation7 + $0xd68] sm:$0xff] }
 0x4ea   : > { %4132 = vmatpush.msra.mxu0 %v3441_v60  ;;  %4152 = vmatpush.msra.mxu1 %v3505_v50  ;;  %v3933_v4 = vld [vmem:[#allocation7 + $0xf88] sm:$0xff] }
 0x4eb   : > { %4172 = vmatpush.msra.mxu2 %v3569_v51  ;;  %4191 = vmatpush.msra.mxu3 %v3637_v52  ;;  %v3733_v5 = vld [vmem:[#allocation7 + $0x948] sm:$0xff] }
 0x4ec   : > { %4133 = vmatpush.msra.mxu0 %v3437_v16  ;;  %4153 = vmatpush.msra.mxu1 %v3501_v11  ;;  %v3797_v22 = vld [vmem:[#allocation7 + $0xb48] sm:$0xff] }
 0x4ed   : > { %4173 = vmatpush.msra.mxu2 %v3565_v28  ;;  %4192 = vmatpush.msra.mxu3 %v3633_v20  ;;  %v3861_v6 = vld [vmem:[#allocation7 + $0xd48] sm:$0xff] }
 0x4ee   : > { %4198 = vmatpush.msrb.mxu0 %v3753_v12  ;;  %4218 = vmatpush.msrb.mxu1 %v3817_v1  ;;  %v3929_v23 = vld [vmem:[#allocation7 + $0xf68] sm:$0xff] }
 0x4ef   : > { %4238 = vmatpush.msrb.mxu2 %v3881_v0  ;;  %4193 = vmatpush.msra.mxu3 %v3629_v54  ;;  %v3729_v9 = vld [vmem:[#allocation7 + $0x928] sm:$0xff] }
 0x4f0   : > { %4199 = vmatpush.msrb.mxu0 %v3749_v55  ;;  %4219 = vmatpush.msrb.mxu1 %v3813_v3  ;;  %v3793_v15 = vld [vmem:[#allocation7 + $0xb28] sm:$0xff] }
 0x4f1   : > { %4239 = vmatpush.msrb.mxu2 %v3877_v24  ;;  %4258 = vmatpush.msrb.mxu3 %v3945_v13  ;;  %v3857_v17 = vld [vmem:[#allocation7 + $0xd28] sm:$0xff] }
 0x4f2   : > { %4200 = vmatpush.msrb.mxu0 %v3745_v10  ;;  %4220 = vmatpush.msrb.mxu1 %v3809_v58  ;;  %v3925_v18 = vld [vmem:[#allocation7 + $0xf48] sm:$0xff]  ;;  %v3498_v10 = vld [vmem:[#allocation7 + $0x1f0] sm:$0xff] }
 0x4f3   : > { %4240 = vmatpush.msrb.mxu2 %v3873_v53  ;;  %4259 = vmatpush.msrb.mxu3 %v3941_v27  ;;  %v3725_v57 = vld [vmem:[#allocation7 + $0x908] sm:$0xff]  ;;  %v3562_v58 = vld [vmem:[#allocation7 + $0x3f0] sm:$0xff] }
 0x4f4   : > { %4201 = vmatpush.msrb.mxu0 %v3741_v62  ;;  %4221 = vmatpush.msrb.mxu1 %v3805_v26  ;;  %v3789_v21 = vld [vmem:[#allocation7 + $0xb08] sm:$0xff]  ;;  %v3626_v53 = vld [vmem:[#allocation7 + $0x5f0] sm:$0xff] }
 0x4f5   : > { %4241 = vmatpush.msrb.mxu2 %v3869_v63  ;;  %4260 = vmatpush.msrb.mxu3 %v3937_v40  ;;  %v3853_v30 = vld [vmem:[#allocation7 + $0xd08] sm:$0xff]  ;;  %v3494_v62 = vld [vmem:[#allocation7 + $0x1d0] sm:$0xff] }
 0x4f6   : > { %4202 = vmatpush.msrb.mxu0 %v3737_v41  ;;  %4222 = vmatpush.msrb.mxu1 %v3801_v37  ;;  %v3921_v32 = vld [vmem:[#allocation7 + $0xf28] sm:$0xff]  ;;  %v3558_v26 = vld [vmem:[#allocation7 + $0x3d0] sm:$0xff] }
 0x4f7   : > { %4242 = vmatpush.msrb.mxu2 %v3865_v38  ;;  %4261 = vmatpush.msrb.mxu3 %v3933_v4  ;;  %v3721_v33 = vld [vmem:[#allocation7 + $0x8e8] sm:$0xff]  ;;  %v3622_v63 = vld [vmem:[#allocation7 + $0x5d0] sm:$0xff] }
 0x4f8   : > { %4203 = vmatpush.msrb.mxu0 %v3733_v5  ;;  %4223 = vmatpush.msrb.mxu1 %v3797_v22  ;;  %v3785_v36 = vld [vmem:[#allocation7 + $0xae8] sm:$0xff]  ;;  %v3690_v40 = vld [vmem:[#allocation7 + $0x7f0] sm:$0xff] }
 0x4f9   : > { %4243 = vmatpush.msrb.mxu2 %v3861_v6  ;;  %4262 = vmatpush.msrb.mxu3 %v3929_v23  ;;  %v3849_v39 = vld [vmem:[#allocation7 + $0xce8] sm:$0xff]  ;;  %v3490_v41 = vld [vmem:[#allocation7 + $0x1b0] sm:$0xff] }
 0x4fa   : > { %4204 = vmatpush.msrb.mxu0 %v3729_v9  ;;  %4224 = vmatpush.msrb.mxu1 %v3793_v15  ;;  %v3917_v8 = vld [vmem:[#allocation7 + $0xf08] sm:$0xff]  ;;  %v3554_v37 = vld [vmem:[#allocation7 + $0x3b0] sm:$0xff] }
 0x4fb   : > { %4244 = vmatpush.msrb.mxu2 %v3857_v17  ;;  %4263 = vmatpush.msrb.mxu3 %v3925_v18  ;;  %v3717_v42 = vld [vmem:[#allocation7 + $0x8c8] sm:$0xff]  ;;  %v3618_v38 = vld [vmem:[#allocation7 + $0x5b0] sm:$0xff] }
 0x4fc   : > { %4205 = vmatpush.msrb.mxu0 %v3725_v57  ;;  %4225 = vmatpush.msrb.mxu1 %v3789_v21  ;;  %v3781_v43 = vld [vmem:[#allocation7 + $0xac8] sm:$0xff]  ;;  %v3686_v4 = vld [vmem:[#allocation7 + $0x7d0] sm:$0xff] }
 0x4fd   : > { %4245 = vmatpush.msrb.mxu2 %v3853_v30  ;;  %4264 = vmatpush.msrb.mxu3 %v3921_v32  ;;  %v3845_v44 = vld [vmem:[#allocation7 + $0xcc8] sm:$0xff]  ;;  %v3486_v5 = vld [vmem:[#allocation7 + $0x190] sm:$0xff] }
 0x4fe   : > { %4206 = vmatpush.msrb.mxu0 %v3721_v33  ;;  %4226 = vmatpush.msrb.mxu1 %v3785_v36  ;;  %v3913_v45 = vld [vmem:[#allocation7 + $0xee8] sm:$0xff]  ;;  %v3550_v22 = vld [vmem:[#allocation7 + $0x390] sm:$0xff] }
 0x4ff   : > { %4246 = vmatpush.msrb.mxu2 %v3849_v39  ;;  %4265 = vmatpush.msrb.mxu3 %v3917_v8  ;;  %v3713_v19 = vld [vmem:[#allocation7 + $0x8a8] sm:$0xff]  ;;  %v3614_v6 = vld [vmem:[#allocation7 + $0x590] sm:$0xff] }
 0x500   : > { %v3777_v14 = vld [vmem:[#allocation7 + $0xaa8] sm:$0xff]  ;;  %4207 = vmatpush.msrb.mxu0 %v3717_v42  ;;  %4227 = vmatpush.msrb.mxu1 %v3781_v43  ;;  %v3682_v23 = vld [vmem:[#allocation7 + $0x7b0] sm:$0xff] }
 0x501   : > { %v3841_v56 = vld [vmem:[#allocation7 + $0xca8] sm:$0xff]  ;;  %4247 = vmatpush.msrb.mxu2 %v3845_v44  ;;  %4266 = vmatpush.msrb.mxu3 %v3913_v45  ;;  %v3482_v9 = vld [vmem:[#allocation7 + $0x170] sm:$0xff] }
 0x502   : > { %v3909_v29 = vld [vmem:[#allocation7 + $0xec8] sm:$0xff]  ;;  %4208 = vmatpush.msrb.mxu0 %v3713_v19  ;;  %4228 = vmatpush.msrb.mxu1 %v3777_v14  ;;  %v3546_v15 = vld [vmem:[#allocation7 + $0x370] sm:$0xff] }
 0x503   : > { %v3709_v25 = vld [vmem:[#allocation7 + $0x888] sm:$0xff]  ;;  %4248 = vmatpush.msrb.mxu2 %v3841_v56  ;;  %4267 = vmatpush.msrb.mxu3 %v3909_v29  ;;  %v3610_v17 = vld [vmem:[#allocation7 + $0x570] sm:$0xff] }
 0x504   : > { %v3773_v49 = vld [vmem:[#allocation7 + $0xa88] sm:$0xff]  ;;  %4209 = vmatpush.msrb.mxu0 %v3709_v25  ;;  %4154 = vmatmul.f32.vlgmr.msra.gmra.mxu1 %v7073_v47  ;;  %v3678_v18 = vld [vmem:[#allocation7 + $0x790] sm:$0xff] }
 0x505   : > { %v3837_v7 = vld [vmem:[#allocation7 + $0xc88] sm:$0xff]  ;;  %4229 = vmatpush.msrb.mxu1 %v3773_v49  ;;  %4134 = vmatmul.f32.vlgmr.msra.gmra.mxu0 %v7071_v46  ;;  %v3478_v57 = vld [vmem:[#allocation7 + $0x150] sm:$0xff] }
 0x506   : > { %v3905_v2 = vld [vmem:[#allocation7 + $0xea8] sm:$0xff]  ;;  %4249 = vmatpush.msrb.mxu2 %v3837_v7  ;;  %4194 = vmatmul.f32.vlgmr.msra.gmra.mxu3 %v7079_v61  ;;  %v3542_v21 = vld [vmem:[#allocation7 + $0x350] sm:$0xff] }
 0x507   : > { %v3705_v60 = vld [vmem:[#allocation7 + $0x868] sm:$0xff]  ;;  %4268 = vmatpush.msrb.mxu3 %v3905_v2  ;;  %4174 = vmatmul.f32.vlgmr.msra.gmra.mxu2 %v7075_v48  ;;  %v3606_v30 = vld [vmem:[#allocation7 + $0x550] sm:$0xff] }
 0x508   : > { %v3769_v50 = vld [vmem:[#allocation7 + $0xa68] sm:$0xff]  ;;  %4210 = vmatpush.msrb.mxu0 %v3705_v60  ;;  %v3674_v32 = vld [vmem:[#allocation7 + $0x770] sm:$0xff] }
 0x509   : > { %v3833_v51 = vld [vmem:[#allocation7 + $0xc68] sm:$0xff]  ;;  %4230 = vmatpush.msrb.mxu1 %v3769_v50  ;;  %v3474_v33 = vld [vmem:[#allocation7 + $0x130] sm:$0xff] }
 0x50a   : > { %v3901_v52 = vld [vmem:[#allocation7 + $0xe88] sm:$0xff]  ;;  %4250 = vmatpush.msrb.mxu2 %v3833_v51  ;;  %v3538_v36 = vld [vmem:[#allocation7 + $0x330] sm:$0xff] }
 0x50b   : > { %v3701_v16 = vld [vmem:[#allocation7 + $0x848] sm:$0xff]  ;;  %4269 = vmatpush.msrb.mxu3 %v3901_v52  ;;  %v3602_v39 = vld [vmem:[#allocation7 + $0x530] sm:$0xff] }
 0x50c   : > { %v3765_v11 = vld [vmem:[#allocation7 + $0xa48] sm:$0xff]  ;;  %4211 = vmatpush.msrb.mxu0 %v3701_v16  ;;  %v3670_v8 = vld [vmem:[#allocation7 + $0x750] sm:$0xff] }
 0x50d   : > { %v3829_v28 = vld [vmem:[#allocation7 + $0xc48] sm:$0xff]  ;;  %4231 = vmatpush.msrb.mxu1 %v3765_v11  ;;  %v3470_v42 = vld [vmem:[#allocation7 + $0x110] sm:$0xff] }
 0x50e   : > { %v3897_v20 = vld [vmem:[#allocation7 + $0xe68] sm:$0xff]  ;;  %4251 = vmatpush.msrb.mxu2 %v3829_v28  ;;  %v3534_v43 = vld [vmem:[#allocation7 + $0x310] sm:$0xff] }
 0x50f   : > { %v3697_v12 = vld [vmem:[#allocation7 + $0x828] sm:$0xff]  ;;  %4270 = vmatpush.msrb.mxu3 %v3897_v20  ;;  %v3598_v44 = vld [vmem:[#allocation7 + $0x510] sm:$0xff] }
 0x510   : > { %v3761_v1 = vld [vmem:[#allocation7 + $0xa28] sm:$0xff]  ;;  %4212 = vmatpush.msrb.mxu0 %v3697_v12  ;;  %v3666_v45 = vld [vmem:[#allocation7 + $0x730] sm:$0xff] }
 0x511   : > { %v3825_v0 = vld [vmem:[#allocation7 + $0xc28] sm:$0xff]  ;;  %4232 = vmatpush.msrb.mxu1 %v3761_v1  ;;  %v3466_v19 = vld [vmem:[#allocation7 + $0xf0] sm:$0xff] }
 0x512   : > { %v3893_v54 = vld [vmem:[#allocation7 + $0xe48] sm:$0xff]  ;;  %4252 = vmatpush.msrb.mxu2 %v3825_v0  ;;  %v3530_v14 = vld [vmem:[#allocation7 + $0x2f0] sm:$0xff] }
 0x513   : > { %v3693_v55 = vld [vmem:[#allocation7 + $0x808] sm:$0xff]  ;;  %4271 = vmatpush.msrb.mxu3 %v3893_v54  ;;  %v3594_v56 = vld [vmem:[#allocation7 + $0x4f0] sm:$0xff] }
 0x514   : > { %v3757_v3 = vld [vmem:[#allocation7 + $0xa08] sm:$0xff]  ;;  %4213 = vmatpush.msrb.mxu0 %v3693_v55  ;;  %v3662_v29 = vld [vmem:[#allocation7 + $0x710] sm:$0xff] }
 0x515   : > { %v3821_v24 = vld [vmem:[#allocation7 + $0xc08] sm:$0xff]  ;;  %4233 = vmatpush.msrb.mxu1 %v3757_v3  ;;  %4214 = vmatmul.f32.vlgmr.msrb.gmra.mxu0 %v7085_v59  ;;  %v3462_v25 = vld [vmem:[#allocation7 + $0xd0] sm:$0xff] }
 0x516   : > { %v3889_v13 = vld [vmem:[#allocation7 + $0xe28] sm:$0xff]  ;;  %4253 = vmatpush.msrb.mxu2 %v3821_v24  ;;  %4278 = vmatpush.msra.mxu0 %v3498_v10  ;;  %v3526_v49 = vld [vmem:[#allocation7 + $0x2d0] sm:$0xff] }
 0x517   : > { %4272 = vmatpush.msrb.mxu3 %v3889_v13  ;;  %v3885_v27 = vld [vmem:[#allocation7 + $0xe08] sm:$0xff]  ;;  %4298 = vmatpush.msra.mxu1 %v3562_v58  ;;  %v3590_v7 = vld [vmem:[#allocation7 + $0x4d0] sm:$0xff] }
 0x518   : > { %4318 = vmatpush.msra.mxu2 %v3626_v53  ;;  %4279 = vmatpush.msra.mxu0 %v3494_v62  ;;  %v3658_v2 = vld [vmem:[#allocation7 + $0x6f0] sm:$0xff] }
 0x519   : > { %4273 = vmatpush.msrb.mxu3 %v3885_v27  ;;  %4299 = vmatpush.msra.mxu1 %v3558_v26  ;;  %v3458_v60 = vld [vmem:[#allocation7 + $0xb0] sm:$0xff] }
 0x51a   : > { %4319 = vmatpush.msra.mxu2 %v3622_v63  ;;  %4280 = vmatpush.msra.mxu0 %v3490_v41  ;;  %v3522_v50 = vld [vmem:[#allocation7 + $0x2b0] sm:$0xff] }
 0x51b   : > { %4338 = vmatpush.msra.mxu3 %v3690_v40  ;;  %4300 = vmatpush.msra.mxu1 %v3554_v37  ;;  %v3586_v51 = vld [vmem:[#allocation7 + $0x4b0] sm:$0xff] }
 0x51c   : > { %4320 = vmatpush.msra.mxu2 %v3618_v38  ;;  %4281 = vmatpush.msra.mxu0 %v3486_v5  ;;  %v3654_v52 = vld [vmem:[#allocation7 + $0x6d0] sm:$0xff] }
 0x51d   : > { %4339 = vmatpush.msra.mxu3 %v3686_v4  ;;  %4301 = vmatpush.msra.mxu1 %v3550_v22  ;;  %v3454_v16 = vld [vmem:[#allocation7 + $0x90] sm:$0xff] }
 0x51e   : > { %4321 = vmatpush.msra.mxu2 %v3614_v6  ;;  %4282 = vmatpush.msra.mxu0 %v3482_v9  ;;  %v3518_v11 = vld [vmem:[#allocation7 + $0x290] sm:$0xff] }
 0x51f   : > { %4340 = vmatpush.msra.mxu3 %v3682_v23  ;;  %4254 = vmatmul.f32.vlgmr.msrb.gmra.mxu2 %v7083_v31  ;;  %v3582_v28 = vld [vmem:[#allocation7 + $0x490] sm:$0xff] }
 0x520   : > { %4302 = vmatpush.msra.mxu1 %v3546_v15  ;;  %4322 = vmatpush.msra.mxu2 %v3610_v17  ;;  %v3650_v20 = vld [vmem:[#allocation7 + $0x6b0] sm:$0xff] }
 0x521   : > { %4341 = vmatpush.msra.mxu3 %v3678_v18  ;;  %4283 = vmatpush.msra.mxu0 %v3478_v57  ;;  %v3450_v12 = vld [vmem:[#allocation7 + $0x70] sm:$0xff] }
 0x522   : > { %4274 = vmatmul.f32.vlgmr.msrb.gmra.mxu3 %v7087_v35  ;;  %4303 = vmatpush.msra.mxu1 %v3542_v21  ;;  %v3514_v1 = vld [vmem:[#allocation7 + $0x270] sm:$0xff] }
 0x523   : > { %4323 = vmatpush.msra.mxu2 %v3606_v30  ;;  %4342 = vmatpush.msra.mxu3 %v3674_v32  ;;  %v3578_v0 = vld [vmem:[#allocation7 + $0x470] sm:$0xff] }
 0x524   : > { %4234 = vmatmul.f32.vlgmr.msrb.gmra.mxu1 %v7090_v34  ;;  %4284 = vmatpush.msra.mxu0 %v3474_v33  ;;  %v3646_v54 = vld [vmem:[#allocation7 + $0x690] sm:$0xff] }
 0x525   : > { %4304 = vmatpush.msra.mxu1 %v3538_v36  ;;  %4324 = vmatpush.msra.mxu2 %v3602_v39  ;;  %v3446_v55 = vld [vmem:[#allocation7 + $0x50] sm:$0xff] }
 0x526   : > { %4343 = vmatpush.msra.mxu3 %v3670_v8  ;;  %4285 = vmatpush.msra.mxu0 %v3470_v42  ;;  %v3510_v3 = vld [vmem:[#allocation7 + $0x250] sm:$0xff] }
 0x527   : > { %4305 = vmatpush.msra.mxu1 %v3534_v43  ;;  %4325 = vmatpush.msra.mxu2 %v3598_v44  ;;  %v3574_v24 = vld [vmem:[#allocation7 + $0x450] sm:$0xff] }
 0x528   : > { %4344 = vmatpush.msra.mxu3 %v3666_v45  ;;  %4286 = vmatpush.msra.mxu0 %v3466_v19  ;;  %v3642_v13 = vld [vmem:[#allocation7 + $0x670] sm:$0xff] }
 0x529   : > { %4306 = vmatpush.msra.mxu1 %v3530_v14  ;;  %4326 = vmatpush.msra.mxu2 %v3594_v56  ;;  %v3442_v10 = vld [vmem:[#allocation7 + $0x30] sm:$0xff] }
 0x52a   : > { %4345 = vmatpush.msra.mxu3 %v3662_v29  ;;  %4287 = vmatpush.msra.mxu0 %v3462_v25  ;;  %v3506_v58 = vld [vmem:[#allocation7 + $0x230] sm:$0xff] }
 0x52b   : > { %4307 = vmatpush.msra.mxu1 %v3526_v49  ;;  %4327 = vmatpush.msra.mxu2 %v3590_v7  ;;  %v3570_v53 = vld [vmem:[#allocation7 + $0x430] sm:$0xff] }
 0x52c   : > { %4346 = vmatpush.msra.mxu3 %v3658_v2  ;;  %4288 = vmatpush.msra.mxu0 %v3458_v60  ;;  %v3638_v27 = vld [vmem:[#allocation7 + $0x650] sm:$0xff] }
 0x52d   : > { %4308 = vmatpush.msra.mxu1 %v3522_v50  ;;  %4328 = vmatpush.msra.mxu2 %v3586_v51  ;;  %v3438_v62 = vld [vmem:[#allocation7 + $0x10] sm:$0xff] }
 0x52e   : > { %4347 = vmatpush.msra.mxu3 %v3654_v52  ;;  %4289 = vmatpush.msra.mxu0 %v3454_v16  ;;  %v3502_v26 = vld [vmem:[#allocation7 + $0x210] sm:$0xff] }
 0x52f   : > { %4309 = vmatpush.msra.mxu1 %v3518_v11  ;;  %4329 = vmatpush.msra.mxu2 %v3582_v28  ;;  %v3566_v63 = vld [vmem:[#allocation7 + $0x410] sm:$0xff] }
 0x530   : > { %4348 = vmatpush.msra.mxu3 %v3650_v20  ;;  %4290 = vmatpush.msra.mxu0 %v3450_v12  ;;  %v3634_v40 = vld [vmem:[#allocation7 + $0x630] sm:$0xff] }
 0x531   : > { %4310 = vmatpush.msra.mxu1 %v3514_v1  ;;  %4330 = vmatpush.msra.mxu2 %v3578_v0  ;;  %v3754_v41 = vld [vmem:[#allocation7 + $0x9f0] sm:$0xff] }
 0x532   : > { %4349 = vmatpush.msra.mxu3 %v3646_v54  ;;  %4291 = vmatpush.msra.mxu0 %v3446_v55  ;;  %v3818_v37 = vld [vmem:[#allocation7 + $0xbf0] sm:$0xff] }
 0x533   : > { %4311 = vmatpush.msra.mxu1 %v3510_v3  ;;  %4331 = vmatpush.msra.mxu2 %v3574_v24  ;;  %v3882_v38 = vld [vmem:[#allocation7 + $0xdf0] sm:$0xff] }
 0x534   : > { %4350 = vmatpush.msra.mxu3 %v3642_v13  ;;  %4292 = vmatpush.msra.mxu0 %v3442_v10  ;;  %v3630_v4 = vld [vmem:[#allocation7 + $0x610] sm:$0xff] }
 0x535   : > { %4312 = vmatpush.msra.mxu1 %v3506_v58  ;;  %4332 = vmatpush.msra.mxu2 %v3570_v53  ;;  %v3750_v5 = vld [vmem:[#allocation7 + $0x9d0] sm:$0xff] }
 0x536   : > { %4351 = vmatpush.msra.mxu3 %v3638_v27  ;;  %4293 = vmatpush.msra.mxu0 %v3438_v62  ;;  %v3814_v22 = vld [vmem:[#allocation7 + $0xbd0] sm:$0xff] }
 0x537   : > { %4313 = vmatpush.msra.mxu1 %v3502_v26  ;;  %4333 = vmatpush.msra.mxu2 %v3566_v63  ;;  %v3878_v6 = vld [vmem:[#allocation7 + $0xdd0] sm:$0xff] }
 0x538   : > { %4352 = vmatpush.msra.mxu3 %v3634_v40  ;;  %4358 = vmatpush.msrb.mxu0 %v3754_v41  ;;  %v3946_v23 = vld [vmem:[#allocation7 + $0xff0] sm:$0xff] }
 0x539   : > { %4378 = vmatpush.msrb.mxu1 %v3818_v37  ;;  %4398 = vmatpush.msrb.mxu2 %v3882_v38  ;;  %v3746_v9 = vld [vmem:[#allocation7 + $0x9b0] sm:$0xff] }
 0x53a   : > { %4353 = vmatpush.msra.mxu3 %v3630_v4  ;;  %v3810_v15 = vld [vmem:[#allocation7 + $0xbb0] sm:$0xff]  ;;  %4359 = vmatpush.msrb.mxu0 %v3750_v5 }
 0x53b   : > { %4379 = vmatpush.msrb.mxu1 %v3814_v22  ;;  %v3874_v17 = vld [vmem:[#allocation7 + $0xdb0] sm:$0xff]  ;;  %4399 = vmatpush.msrb.mxu2 %v3878_v6 }
 0x53c   : > { %v3942_v18 = vld [vmem:[#allocation7 + $0xfd0] sm:$0xff]  ;;  %4418 = vmatpush.msrb.mxu3 %v3946_v23  ;;  %4360 = vmatpush.msrb.mxu0 %v3746_v9  ;;  %v3499_v9 = vld [vmem:[#allocation7 + $0x1f8] sm:$0xff] }
 0x53d   : > { %v3742_v57 = vld [vmem:[#allocation7 + $0x990] sm:$0xff]  ;;  %4380 = vmatpush.msrb.mxu1 %v3810_v15  ;;  %4400 = vmatpush.msrb.mxu2 %v3874_v17  ;;  %v3563_v15 = vld [vmem:[#allocation7 + $0x3f8] sm:$0xff] }
 0x53e   : > { %v3806_v21 = vld [vmem:[#allocation7 + $0xb90] sm:$0xff]  ;;  %4419 = vmatpush.msrb.mxu3 %v3942_v18  ;;  %4361 = vmatpush.msrb.mxu0 %v3742_v57  ;;  %v3627_v17 = vld [vmem:[#allocation7 + $0x5f8] sm:$0xff] }
 0x53f   : > { %v3870_v30 = vld [vmem:[#allocation7 + $0xd90] sm:$0xff]  ;;  %4381 = vmatpush.msrb.mxu1 %v3806_v21  ;;  %4334 = vmatmul.f32.vlgmr.msra.gmra.mxu2 %v7075_v48  ;;  %v3495_v57 = vld [vmem:[#allocation7 + $0x1d8] sm:$0xff] }
 0x540   : > { %v3938_v32 = vld [vmem:[#allocation7 + $0xfb0] sm:$0xff]  ;;  %4401 = vmatpush.msrb.mxu2 %v3870_v30  ;;  %4294 = vmatmul.f32.vlgmr.msra.gmra.mxu0 %v7071_v46  ;;  %v3559_v21 = vld [vmem:[#allocation7 + $0x3d8] sm:$0xff] }
 0x541   : > { %v3738_v33 = vld [vmem:[#allocation7 + $0x970] sm:$0xff]  ;;  %4420 = vmatpush.msrb.mxu3 %v3938_v32  ;;  %4314 = vmatmul.f32.vlgmr.msra.gmra.mxu1 %v7073_v47  ;;  %v3623_v30 = vld [vmem:[#allocation7 + $0x5d8] sm:$0xff] }
 0x542   : > { %v3802_v36 = vld [vmem:[#allocation7 + $0xb70] sm:$0xff]  ;;  %4362 = vmatpush.msrb.mxu0 %v3738_v33  ;;  %4354 = vmatmul.f32.vlgmr.msra.gmra.mxu3 %v7079_v61  ;;  %v3691_v32 = vld [vmem:[#allocation7 + $0x7f8] sm:$0xff] }
 0x543   : > { %v3866_v39 = vld [vmem:[#allocation7 + $0xd70] sm:$0xff]  ;;  %4382 = vmatpush.msrb.mxu1 %v3802_v36  ;;  %v3491_v33 = vld [vmem:[#allocation7 + $0x1b8] sm:$0xff] }
 0x544   : > { %v3934_v8 = vld [vmem:[#allocation7 + $0xf90] sm:$0xff]  ;;  %4402 = vmatpush.msrb.mxu2 %v3866_v39  ;;  %v3555_v36 = vld [vmem:[#allocation7 + $0x3b8] sm:$0xff] }
 0x545   : > { %v3734_v42 = vld [vmem:[#allocation7 + $0x950] sm:$0xff]  ;;  %4421 = vmatpush.msrb.mxu3 %v3934_v8  ;;  %v3619_v39 = vld [vmem:[#allocation7 + $0x5b8] sm:$0xff] }
 0x546   : > { %v3798_v43 = vld [vmem:[#allocation7 + $0xb50] sm:$0xff]  ;;  %4363 = vmatpush.msrb.mxu0 %v3734_v42  ;;  %v3687_v8 = vld [vmem:[#allocation7 + $0x7d8] sm:$0xff] }
 0x547   : > { %v3862_v44 = vld [vmem:[#allocation7 + $0xd50] sm:$0xff]  ;;  %4383 = vmatpush.msrb.mxu1 %v3798_v43  ;;  %v3487_v42 = vld [vmem:[#allocation7 + $0x198] sm:$0xff] }
 0x548   : > { %v3930_v45 = vld [vmem:[#allocation7 + $0xf70] sm:$0xff]  ;;  %4403 = vmatpush.msrb.mxu2 %v3862_v44  ;;  %v3551_v43 = vld [vmem:[#allocation7 + $0x398] sm:$0xff] }
 0x549   : > { %v3730_v19 = vld [vmem:[#allocation7 + $0x930] sm:$0xff]  ;;  %4422 = vmatpush.msrb.mxu3 %v3930_v45  ;;  %v3615_v44 = vld [vmem:[#allocation7 + $0x598] sm:$0xff] }
 0x54a   : > { %v3794_v14 = vld [vmem:[#allocation7 + $0xb30] sm:$0xff]  ;;  %4364 = vmatpush.msrb.mxu0 %v3730_v19  ;;  %v3683_v45 = vld [vmem:[#allocation7 + $0x7b8] sm:$0xff] }
 0x54b   : > { %v3858_v56 = vld [vmem:[#allocation7 + $0xd30] sm:$0xff]  ;;  %4384 = vmatpush.msrb.mxu1 %v3794_v14  ;;  %v3483_v19 = vld [vmem:[#allocation7 + $0x178] sm:$0xff] }
 0x54c   : > { %v3926_v29 = vld [vmem:[#allocation7 + $0xf50] sm:$0xff]  ;;  %4404 = vmatpush.msrb.mxu2 %v3858_v56  ;;  %v3547_v14 = vld [vmem:[#allocation7 + $0x378] sm:$0xff] }
 0x54d   : > { %v3726_v25 = vld [vmem:[#allocation7 + $0x910] sm:$0xff]  ;;  %4423 = vmatpush.msrb.mxu3 %v3926_v29  ;;  %v3611_v56 = vld [vmem:[#allocation7 + $0x578] sm:$0xff] }
 0x54e   : > { %v3790_v49 = vld [vmem:[#allocation7 + $0xb10] sm:$0xff]  ;;  %4365 = vmatpush.msrb.mxu0 %v3726_v25  ;;  %v3679_v29 = vld [vmem:[#allocation7 + $0x798] sm:$0xff] }
 0x54f   : > { %v3854_v7 = vld [vmem:[#allocation7 + $0xd10] sm:$0xff]  ;;  %4385 = vmatpush.msrb.mxu1 %v3790_v49  ;;  %v3479_v25 = vld [vmem:[#allocation7 + $0x158] sm:$0xff] }
 0x550   : > { %v3922_v2 = vld [vmem:[#allocation7 + $0xf30] sm:$0xff]  ;;  %4405 = vmatpush.msrb.mxu2 %v3854_v7  ;;  %v3543_v49 = vld [vmem:[#allocation7 + $0x358] sm:$0xff] }
 0x551   : > { %v3722_v60 = vld [vmem:[#allocation7 + $0x8f0] sm:$0xff]  ;;  %4424 = vmatpush.msrb.mxu3 %v3922_v2  ;;  %v3607_v7 = vld [vmem:[#allocation7 + $0x558] sm:$0xff] }
 0x552   : > { %v3786_v50 = vld [vmem:[#allocation7 + $0xaf0] sm:$0xff]  ;;  %4366 = vmatpush.msrb.mxu0 %v3722_v60  ;;  %v3675_v2 = vld [vmem:[#allocation7 + $0x778] sm:$0xff] }
 0x553   : > { %v3850_v51 = vld [vmem:[#allocation7 + $0xcf0] sm:$0xff]  ;;  %4386 = vmatpush.msrb.mxu1 %v3786_v50  ;;  %v3475_v60 = vld [vmem:[#allocation7 + $0x138] sm:$0xff] }
 0x554   : > { %v3918_v52 = vld [vmem:[#allocation7 + $0xf10] sm:$0xff]  ;;  %4406 = vmatpush.msrb.mxu2 %v3850_v51  ;;  %v3539_v50 = vld [vmem:[#allocation7 + $0x338] sm:$0xff] }
 0x555   : > { %v3718_v16 = vld [vmem:[#allocation7 + $0x8d0] sm:$0xff]  ;;  %4425 = vmatpush.msrb.mxu3 %v3918_v52  ;;  %v3603_v51 = vld [vmem:[#allocation7 + $0x538] sm:$0xff] }
 0x556   : > { %v3782_v11 = vld [vmem:[#allocation7 + $0xad0] sm:$0xff]  ;;  %4367 = vmatpush.msrb.mxu0 %v3718_v16  ;;  %v3671_v52 = vld [vmem:[#allocation7 + $0x758] sm:$0xff] }
 0x557   : > { %v3846_v28 = vld [vmem:[#allocation7 + $0xcd0] sm:$0xff]  ;;  %4387 = vmatpush.msrb.mxu1 %v3782_v11  ;;  %v3471_v16 = vld [vmem:[#allocation7 + $0x118] sm:$0xff] }
 0x558   : > { %v3914_v20 = vld [vmem:[#allocation7 + $0xef0] sm:$0xff]  ;;  %4407 = vmatpush.msrb.mxu2 %v3846_v28  ;;  %v3535_v11 = vld [vmem:[#allocation7 + $0x318] sm:$0xff] }
 0x559   : > { %v3714_v12 = vld [vmem:[#allocation7 + $0x8b0] sm:$0xff]  ;;  %4426 = vmatpush.msrb.mxu3 %v3914_v20  ;;  %v3599_v28 = vld [vmem:[#allocation7 + $0x518] sm:$0xff] }
 0x55a   : > { %v3778_v1 = vld [vmem:[#allocation7 + $0xab0] sm:$0xff]  ;;  %4368 = vmatpush.msrb.mxu0 %v3714_v12  ;;  %v3667_v20 = vld [vmem:[#allocation7 + $0x738] sm:$0xff] }
 0x55b   : > { %v3842_v0 = vld [vmem:[#allocation7 + $0xcb0] sm:$0xff]  ;;  %4388 = vmatpush.msrb.mxu1 %v3778_v1  ;;  %v3467_v12 = vld [vmem:[#allocation7 + $0xf8] sm:$0xff] }
 0x55c   : > { %v3910_v54 = vld [vmem:[#allocation7 + $0xed0] sm:$0xff]  ;;  %4408 = vmatpush.msrb.mxu2 %v3842_v0  ;;  %v3531_v1 = vld [vmem:[#allocation7 + $0x2f8] sm:$0xff] }
 0x55d   : > { %v3710_v55 = vld [vmem:[#allocation7 + $0x890] sm:$0xff]  ;;  %4427 = vmatpush.msrb.mxu3 %v3910_v54  ;;  %v3595_v0 = vld [vmem:[#allocation7 + $0x4f8] sm:$0xff] }
 0x55e   : > { %v3774_v3 = vld [vmem:[#allocation7 + $0xa90] sm:$0xff]  ;;  %4369 = vmatpush.msrb.mxu0 %v3710_v55  ;;  %v3663_v54 = vld [vmem:[#allocation7 + $0x718] sm:$0xff] }
 0x55f   : > { %v3838_v24 = vld [vmem:[#allocation7 + $0xc90] sm:$0xff]  ;;  %4389 = vmatpush.msrb.mxu1 %v3774_v3  ;;  %v3463_v55 = vld [vmem:[#allocation7 + $0xd8] sm:$0xff] }
 0x560   : > { %v3906_v13 = vld [vmem:[#allocation7 + $0xeb0] sm:$0xff]  ;;  %4409 = vmatpush.msrb.mxu2 %v3838_v24  ;;  %v3527_v3 = vld [vmem:[#allocation7 + $0x2d8] sm:$0xff] }
 0x561   : > { %v3706_v10 = vld [vmem:[#allocation7 + $0x870] sm:$0xff]  ;;  %4428 = vmatpush.msrb.mxu3 %v3906_v13  ;;  %v3591_v24 = vld [vmem:[#allocation7 + $0x4d8] sm:$0xff] }
 0x562   : > { %v3770_v58 = vld [vmem:[#allocation7 + $0xa70] sm:$0xff]  ;;  %4370 = vmatpush.msrb.mxu0 %v3706_v10  ;;  %v3659_v13 = vld [vmem:[#allocation7 + $0x6f8] sm:$0xff] }
 0x563   : > { %v3834_v53 = vld [vmem:[#allocation7 + $0xc70] sm:$0xff]  ;;  %4390 = vmatpush.msrb.mxu1 %v3770_v58  ;;  %v3459_v10 = vld [vmem:[#allocation7 + $0xb8] sm:$0xff] }
 0x564   : > { %v3902_v27 = vld [vmem:[#allocation7 + $0xe90] sm:$0xff]  ;;  %4410 = vmatpush.msrb.mxu2 %v3834_v53  ;;  %v3523_v58 = vld [vmem:[#allocation7 + $0x2b8] sm:$0xff] }
 0x565   : > { %v3702_v62 = vld [vmem:[#allocation7 + $0x850] sm:$0xff]  ;;  %4429 = vmatpush.msrb.mxu3 %v3902_v27  ;;  %v3587_v53 = vld [vmem:[#allocation7 + $0x4b8] sm:$0xff] }
 0x566   : > { %v3766_v26 = vld [vmem:[#allocation7 + $0xa50] sm:$0xff]  ;;  %4371 = vmatpush.msrb.mxu0 %v3702_v62  ;;  %v3655_v27 = vld [vmem:[#allocation7 + $0x6d8] sm:$0xff] }
 0x567   : > { %v3830_v63 = vld [vmem:[#allocation7 + $0xc50] sm:$0xff]  ;;  %4391 = vmatpush.msrb.mxu1 %v3766_v26  ;;  %v3455_v62 = vld [vmem:[#allocation7 + $0x98] sm:$0xff] }
 0x568   : > { %v3898_v40 = vld [vmem:[#allocation7 + $0xe70] sm:$0xff]  ;;  %4411 = vmatpush.msrb.mxu2 %v3830_v63  ;;  %v3519_v26 = vld [vmem:[#allocation7 + $0x298] sm:$0xff] }
 0x569   : > { %v3698_v41 = vld [vmem:[#allocation7 + $0x830] sm:$0xff]  ;;  %4430 = vmatpush.msrb.mxu3 %v3898_v40  ;;  %v3583_v63 = vld [vmem:[#allocation7 + $0x498] sm:$0xff] }
 0x56a   : > { %v3762_v37 = vld [vmem:[#allocation7 + $0xa30] sm:$0xff]  ;;  %4372 = vmatpush.msrb.mxu0 %v3698_v41  ;;  %v3651_v40 = vld [vmem:[#allocation7 + $0x6b8] sm:$0xff] }
 0x56b   : > { %v3826_v38 = vld [vmem:[#allocation7 + $0xc30] sm:$0xff]  ;;  %4392 = vmatpush.msrb.mxu1 %v3762_v37  ;;  %v3451_v41 = vld [vmem:[#allocation7 + $0x78] sm:$0xff] }
 0x56c   : > { %v3894_v4 = vld [vmem:[#allocation7 + $0xe50] sm:$0xff]  ;;  %4412 = vmatpush.msrb.mxu2 %v3826_v38  ;;  %v3515_v37 = vld [vmem:[#allocation7 + $0x278] sm:$0xff] }
 0x56d   : > { %v3694_v5 = vld [vmem:[#allocation7 + $0x810] sm:$0xff]  ;;  %4431 = vmatpush.msrb.mxu3 %v3894_v4  ;;  %v3579_v38 = vld [vmem:[#allocation7 + $0x478] sm:$0xff] }
 0x56e   : > { %v3758_v22 = vld [vmem:[#allocation7 + $0xa10] sm:$0xff]  ;;  %4373 = vmatpush.msrb.mxu0 %v3694_v5  ;;  %v3647_v4 = vld [vmem:[#allocation7 + $0x698] sm:$0xff] }
 0x56f   : > { %v3822_v6 = vld [vmem:[#allocation7 + $0xc10] sm:$0xff]  ;;  %4393 = vmatpush.msrb.mxu1 %v3758_v22  ;;  %4374 = vmatmul.f32.vlgmr.msrb.gmra.mxu0 %v7085_v59  ;;  %v3447_v5 = vld [vmem:[#allocation7 + $0x58] sm:$0xff] }
 0x570   : > { %v3890_v23 = vld [vmem:[#allocation7 + $0xe30] sm:$0xff]  ;;  %4413 = vmatpush.msrb.mxu2 %v3822_v6  ;;  %4438 = vmatpush.msra.mxu0 %v3499_v9  ;;  %v3511_v22 = vld [vmem:[#allocation7 + $0x258] sm:$0xff] }
 0x571   : > { %4432 = vmatpush.msrb.mxu3 %v3890_v23  ;;  %v3886_v18 = vld [vmem:[#allocation7 + $0xe10] sm:$0xff]  ;;  %4414 = vmatmul.f32.vlgmr.msrb.gmra.mxu2 %v7083_v31  ;;  %v3575_v6 = vld [vmem:[#allocation7 + $0x458] sm:$0xff] }
 0x572   : > { %4458 = vmatpush.msra.mxu1 %v3563_v15  ;;  %4478 = vmatpush.msra.mxu2 %v3627_v17  ;;  %v3643_v23 = vld [vmem:[#allocation7 + $0x678] sm:$0xff] }
 0x573   : > { %4433 = vmatpush.msrb.mxu3 %v3886_v18  ;;  %4439 = vmatpush.msra.mxu0 %v3495_v57  ;;  %v3443_v9 = vld [vmem:[#allocation7 + $0x38] sm:$0xff] }
 0x574   : > { %4434 = vmatmul.f32.vlgmr.msrb.gmra.mxu3 %v7087_v35  ;;  %4459 = vmatpush.msra.mxu1 %v3559_v21  ;;  %v3507_v15 = vld [vmem:[#allocation7 + $0x238] sm:$0xff] }
 0x575   : > { %4479 = vmatpush.msra.mxu2 %v3623_v30  ;;  %4498 = vmatpush.msra.mxu3 %v3691_v32  ;;  %v3571_v17 = vld [vmem:[#allocation7 + $0x438] sm:$0xff] }
 0x576   : > { %4394 = vmatmul.f32.vlgmr.msrb.gmra.mxu1 %v7090_v34  ;;  %4440 = vmatpush.msra.mxu0 %v3491_v33  ;;  %v3639_v18 = vld [vmem:[#allocation7 + $0x658] sm:$0xff] }
 0x577   : > { %4460 = vmatpush.msra.mxu1 %v3555_v36  ;;  %4480 = vmatpush.msra.mxu2 %v3619_v39  ;;  %v3439_v57 = vld [vmem:[#allocation7 + $0x18] sm:$0xff] }
 0x578   : > { %4499 = vmatpush.msra.mxu3 %v3687_v8  ;;  %4441 = vmatpush.msra.mxu0 %v3487_v42  ;;  %v3503_v21 = vld [vmem:[#allocation7 + $0x218] sm:$0xff] }
 0x579   : > { %4461 = vmatpush.msra.mxu1 %v3551_v43  ;;  %4481 = vmatpush.msra.mxu2 %v3615_v44  ;;  %v3567_v30 = vld [vmem:[#allocation7 + $0x418] sm:$0xff] }
 0x57a   : > { %4500 = vmatpush.msra.mxu3 %v3683_v45  ;;  %4442 = vmatpush.msra.mxu0 %v3483_v19  ;;  %v3635_v32 = vld [vmem:[#allocation7 + $0x638] sm:$0xff] }
 0x57b   : > { %4462 = vmatpush.msra.mxu1 %v3547_v14  ;;  %4482 = vmatpush.msra.mxu2 %v3611_v56  ;;  %v3755_v33 = vld [vmem:[#allocation7 + $0x9f8] sm:$0xff] }
 0x57c   : > { %4501 = vmatpush.msra.mxu3 %v3679_v29  ;;  %4443 = vmatpush.msra.mxu0 %v3479_v25  ;;  %v3819_v36 = vld [vmem:[#allocation7 + $0xbf8] sm:$0xff] }
 0x57d   : > { %4463 = vmatpush.msra.mxu1 %v3543_v49  ;;  %4483 = vmatpush.msra.mxu2 %v3607_v7  ;;  %v3883_v39 = vld [vmem:[#allocation7 + $0xdf8] sm:$0xff] }
 0x57e   : > { %4502 = vmatpush.msra.mxu3 %v3675_v2  ;;  %4444 = vmatpush.msra.mxu0 %v3475_v60  ;;  %v3631_v8 = vld [vmem:[#allocation7 + $0x618] sm:$0xff] }
 0x57f   : > { %4464 = vmatpush.msra.mxu1 %v3539_v50  ;;  %4484 = vmatpush.msra.mxu2 %v3603_v51  ;;  %v3751_v42 = vld [vmem:[#allocation7 + $0x9d8] sm:$0xff] }
 0x580   : > { %4503 = vmatpush.msra.mxu3 %v3671_v52  ;;  %4445 = vmatpush.msra.mxu0 %v3471_v16  ;;  %v3815_v43 = vld [vmem:[#allocation7 + $0xbd8] sm:$0xff] }
 0x581   : > { %4465 = vmatpush.msra.mxu1 %v3535_v11  ;;  %4485 = vmatpush.msra.mxu2 %v3599_v28  ;;  %v3879_v44 = vld [vmem:[#allocation7 + $0xdd8] sm:$0xff] }
 0x582   : > { %4504 = vmatpush.msra.mxu3 %v3667_v20  ;;  %4446 = vmatpush.msra.mxu0 %v3467_v12  ;;  %v3947_v45 = vld [vmem:[#allocation7 + $0xff8] sm:$0xff] }
 0x583   : > { %4466 = vmatpush.msra.mxu1 %v3531_v1  ;;  %4486 = vmatpush.msra.mxu2 %v3595_v0  ;;  %v3747_v19 = vld [vmem:[#allocation7 + $0x9b8] sm:$0xff] }
 0x584   : > { %4505 = vmatpush.msra.mxu3 %v3663_v54  ;;  %4447 = vmatpush.msra.mxu0 %v3463_v55  ;;  %v3811_v14 = vld [vmem:[#allocation7 + $0xbb8] sm:$0xff]  ;;  %v7111_v55 = vpop.f32.mrf.mxu0 }
 0x585   : > { %4467 = vmatpush.msra.mxu1 %v3527_v3  ;;  %4487 = vmatpush.msra.mxu2 %v3591_v24  ;;  %v3875_v56 = vld [vmem:[#allocation7 + $0xdb8] sm:$0xff] }
 0x586   : > { %4506 = vmatpush.msra.mxu3 %v3659_v13  ;;  %4448 = vmatpush.msra.mxu0 %v3459_v10  ;;  %v3943_v29 = vld [vmem:[#allocation7 + $0xfd8] sm:$0xff] }
 0x587   : > { %4468 = vmatpush.msra.mxu1 %v3523_v58  ;;  %4488 = vmatpush.msra.mxu2 %v3587_v53  ;;  %v3743_v25 = vld [vmem:[#allocation7 + $0x998] sm:$0xff] }
 0x588   : > { %4507 = vmatpush.msra.mxu3 %v3655_v27  ;;  %4449 = vmatpush.msra.mxu0 %v3455_v62  ;;  %v3807_v49 = vld [vmem:[#allocation7 + $0xb98] sm:$0xff] }
 0x589   : > { %4469 = vmatpush.msra.mxu1 %v3519_v26  ;;  %4489 = vmatpush.msra.mxu2 %v3583_v63  ;;  %v3871_v7 = vld [vmem:[#allocation7 + $0xd98] sm:$0xff]  ;;  %v7113_v26 = vpop.f32.mrf.mxu1 }
 0x58a   : > { %4508 = vmatpush.msra.mxu3 %v3651_v40  ;;  %4450 = vmatpush.msra.mxu0 %v3451_v41  ;;  %v3939_v2 = vld [vmem:[#allocation7 + $0xfb8] sm:$0xff] }
 0x58b   : > { %4470 = vmatpush.msra.mxu1 %v3515_v37  ;;  %4490 = vmatpush.msra.mxu2 %v3579_v38  ;;  %v3739_v60 = vld [vmem:[#allocation7 + $0x978] sm:$0xff] }
 0x58c   : > { %4509 = vmatpush.msra.mxu3 %v3647_v4  ;;  %4451 = vmatpush.msra.mxu0 %v3447_v5  ;;  %v3803_v50 = vld [vmem:[#allocation7 + $0xb78] sm:$0xff] }
 0x58d   : > { %4471 = vmatpush.msra.mxu1 %v3511_v22  ;;  %4491 = vmatpush.msra.mxu2 %v3575_v6  ;;  %v3867_v51 = vld [vmem:[#allocation7 + $0xd78] sm:$0xff]  ;;  %v7115_v6 = vpop.f32.mrf.mxu2 }
 0x58e   : > { %4510 = vmatpush.msra.mxu3 %v3643_v23  ;;  %4452 = vmatpush.msra.mxu0 %v3443_v9  ;;  %v3935_v52 = vld [vmem:[#allocation7 + $0xf98] sm:$0xff] }
 0x58f   : > { %4472 = vmatpush.msra.mxu1 %v3507_v15  ;;  %4492 = vmatpush.msra.mxu2 %v3571_v17  ;;  %v3735_v16 = vld [vmem:[#allocation7 + $0x958] sm:$0xff] }
 0x590   : > { %4511 = vmatpush.msra.mxu3 %v3639_v18  ;;  %4453 = vmatpush.msra.mxu0 %v3439_v57  ;;  %v3799_v11 = vld [vmem:[#allocation7 + $0xb58] sm:$0xff]  ;;  %v7117_v18 = vpop.f32.mrf.mxu0 }
 0x591   : > { %4473 = vmatpush.msra.mxu1 %v3503_v21  ;;  %4493 = vmatpush.msra.mxu2 %v3567_v30  ;;  %v3863_v28 = vld [vmem:[#allocation7 + $0xd58] sm:$0xff] }
 0x592   : > { %4512 = vmatpush.msra.mxu3 %v3635_v32  ;;  %4518 = vmatpush.msrb.mxu0 %v3755_v33  ;;  %v3931_v20 = vld [vmem:[#allocation7 + $0xf78] sm:$0xff]  ;;  %v7119_v32 = vpop.f32.mrf.mxu3 }
 0x593   : > { %4538 = vmatpush.msrb.mxu1 %v3819_v36  ;;  %4558 = vmatpush.msrb.mxu2 %v3883_v39  ;;  %v3731_v12 = vld [vmem:[#allocation7 + $0x938] sm:$0xff]  ;;  %v7122_v39 = vld [vmem:[#allocation8] sm:$0xf] }
 0x594   : > { %4513 = vmatpush.msra.mxu3 %v3631_v8  ;;  %4519 = vmatpush.msrb.mxu0 %v3751_v42  ;;  %v3795_v1 = vld [vmem:[#allocation7 + $0xb38] sm:$0xff]  ;;  %v7124_v8 = vpop.f32.mrf.mxu1 }
 0x595   : > { %4539 = vmatpush.msrb.mxu1 %v3815_v43  ;;  %4559 = vmatpush.msrb.mxu2 %v3879_v44  ;;  %v3859_v0 = vld [vmem:[#allocation7 + $0xd38] sm:$0xff] }
 0x596   : > { %4578 = vmatpush.msrb.mxu3 %v3947_v45  ;;  %4520 = vmatpush.msrb.mxu0 %v3747_v19  ;;  %v3927_v54 = vld [vmem:[#allocation7 + $0xf58] sm:$0xff] }
 0x597   : > { %4540 = vmatpush.msrb.mxu1 %v3811_v14  ;;  %4560 = vmatpush.msrb.mxu2 %v3875_v56  ;;  %v3727_v3 = vld [vmem:[#allocation7 + $0x918] sm:$0xff] }
 0x598   : > { %4579 = vmatpush.msrb.mxu3 %v3943_v29  ;;  %4521 = vmatpush.msrb.mxu0 %v3743_v25  ;;  %v3791_v24 = vld [vmem:[#allocation7 + $0xb18] sm:$0xff]  ;;  %v3951_v29 = vperm.slane %v7122_v39, 1  ;;  %v7130_v25 = vpop.f32.mrf.mxu2 }
 0x599   : > { %4541 = vmatpush.msrb.mxu1 %v3807_v49  ;;  %4561 = vmatpush.msrb.mxu2 %v3871_v7  ;;  %v3855_v13 = vld [vmem:[#allocation7 + $0xd18] sm:$0xff]  ;;  %v4135_v7 = vpop.f32.mrf.mxu0 }
 0x59a   : > { %4580 = vmatpush.msrb.mxu3 %v3939_v2  ;;  %4522 = vmatpush.msrb.mxu0 %v3739_v60  ;;  %v3923_v10 = vld [vmem:[#allocation7 + $0xf38] sm:$0xff] }
 0x59b   : > { %4542 = vmatpush.msrb.mxu1 %v3803_v50  ;;  %4562 = vmatpush.msrb.mxu2 %v3867_v51  ;;  %v3723_v58 = vld [vmem:[#allocation7 + $0x8f8] sm:$0xff] }
 0x59c   : > { %4581 = vmatpush.msrb.mxu3 %v3935_v52  ;;  %4523 = vmatpush.msrb.mxu0 %v3735_v16  ;;  %v3787_v53 = vld [vmem:[#allocation7 + $0xaf8] sm:$0xff]  ;;  %v4136_v16 = vadd.f32 %v4135_v7, %v3951_v29 }
 0x59d   : > { %4543 = vmatpush.msrb.mxu1 %v3799_v11  ;;  %4563 = vmatpush.msrb.mxu2 %v3863_v28  ;;  %v3851_v27 = vld [vmem:[#allocation7 + $0xcf8] sm:$0xff]  ;;  %v7134_v11 = vpop.f32.mrf.mxu3 }
 0x59e   : > { %4582 = vmatpush.msrb.mxu3 %v3931_v20  ;;  %4524 = vmatpush.msrb.mxu0 %v3731_v12  ;;  %v3919_v62 = vld [vmem:[#allocation7 + $0xf18] sm:$0xff] }
 0x59f   : > { %4544 = vmatpush.msrb.mxu1 %v3795_v1  ;;  %4564 = vmatpush.msrb.mxu2 %v3859_v0  ;;  %v3719_v63 = vld [vmem:[#allocation7 + $0x8d8] sm:$0xff]  ;;  %v4615_v0 = vld [vmem:[#allocation10 + $0x68] sm:$0xff] }
 0x5a0   : > { %4583 = vmatpush.msrb.mxu3 %v3927_v54  ;;  %4525 = vmatpush.msrb.mxu0 %v3727_v3  ;;  %v3783_v40 = vld [vmem:[#allocation7 + $0xad8] sm:$0xff]  ;;  %v4631_v54 = vld [vmem:[#allocation10 + $0xe8] sm:$0xff]  ;;  %v4175_v3 = vpop.f32.mrf.mxu2 }
 0x5a1   : > { %4545 = vmatpush.msrb.mxu1 %v3791_v24  ;;  %4565 = vmatpush.msrb.mxu2 %v3855_v13  ;;  %v3847_v41 = vld [vmem:[#allocation7 + $0xcd8] sm:$0xff]  ;;  %v4630_v13 = vld [vmem:[#allocation10 + $0xe0] sm:$0xff] }
 0x5a2   : > { %4584 = vmatpush.msrb.mxu3 %v3923_v10  ;;  %4526 = vmatpush.msrb.mxu0 %v3723_v58  ;;  %v3915_v37 = vld [vmem:[#allocation7 + $0xef8] sm:$0xff]  ;;  %v4647_v10 = vld [vmem:[#allocation10 + $0x168] sm:$0xff] }
 0x5a3   : > { %4546 = vmatpush.msrb.mxu1 %v3787_v53  ;;  %4566 = vmatpush.msrb.mxu2 %v3851_v27  ;;  %v3715_v38 = vld [vmem:[#allocation7 + $0x8b8] sm:$0xff] }
 0x5a4   : > { %4585 = vmatpush.msrb.mxu3 %v3919_v62  ;;  %v3779_v4 = vld [vmem:[#allocation7 + $0xab8] sm:$0xff]  ;;  %4527 = vmatpush.msrb.mxu0 %v3719_v63  ;;  %v4646_v62 = vld [vmem:[#allocation10 + $0x160] sm:$0xff] }
 0x5a5   : > { %4547 = vmatpush.msrb.mxu1 %v3783_v40  ;;  %v3843_v5 = vld [vmem:[#allocation7 + $0xcb8] sm:$0xff]  ;;  %4567 = vmatpush.msrb.mxu2 %v3847_v41  ;;  %v4195_v27 = vpop.f32.mrf.mxu3 }
 0x5a6   : > { %v3911_v22 = vld [vmem:[#allocation7 + $0xed8] sm:$0xff]  ;;  %4586 = vmatpush.msrb.mxu3 %v3915_v37  ;;  %4528 = vmatpush.msrb.mxu0 %v3715_v38  ;;  %v4611_v37 = vld [vmem:[#allocation10 + $0x48] sm:$0xff] }
 0x5a7   : > { %v3711_v23 = vld [vmem:[#allocation7 + $0x898] sm:$0xff]  ;;  %4548 = vmatpush.msrb.mxu1 %v3779_v4  ;;  %4568 = vmatpush.msrb.mxu2 %v3843_v5  ;;  %v4627_v38 = vld [vmem:[#allocation10 + $0xc8] sm:$0xff]  ;;  %v4215_v4 = vpop.f32.mrf.mxu0 }
 0x5a8   : > { %v3775_v9 = vld [vmem:[#allocation7 + $0xa98] sm:$0xff]  ;;  %4587 = vmatpush.msrb.mxu3 %v3911_v22  ;;  %4529 = vmatpush.msrb.mxu0 %v3711_v23  ;;  %v4610_v22 = vld [vmem:[#allocation10 + $0x40] sm:$0xff] }
 0x5a9   : > { %v3839_v15 = vld [vmem:[#allocation7 + $0xc98] sm:$0xff]  ;;  %4549 = vmatpush.msrb.mxu1 %v3775_v9  ;;  %4494 = vmatmul.f32.vlgmr.msra.gmra.mxu2 %v7075_v48  ;;  %v3950_v48 = vperm.slane %v7122_v39, 0 }
 0x5aa   : > { %v3907_v17 = vld [vmem:[#allocation7 + $0xeb8] sm:$0xff]  ;;  %4569 = vmatpush.msrb.mxu2 %v3839_v15  ;;  %4454 = vmatmul.f32.vlgmr.msra.gmra.mxu0 %v7071_v46 }
 0x5ab   : > { %v3707_v57 = vld [vmem:[#allocation7 + $0x878] sm:$0xff]  ;;  %4588 = vmatpush.msrb.mxu3 %v3907_v17  ;;  %4474 = vmatmul.f32.vlgmr.msra.gmra.mxu1 %v7073_v47  ;;  %v3976_v50 = vadd.f32 %v7111_v55, %v3950_v48  ;;  %v4155_v47 = vpop.f32.mrf.mxu1 }
 0x5ac   : > { %v3771_v21 = vld [vmem:[#allocation7 + $0xa78] sm:$0xff]  ;;  %4530 = vmatpush.msrb.mxu0 %v3707_v57  ;;  %4514 = vmatmul.f32.vlgmr.msra.gmra.mxu3 %v7079_v61  ;;  %v4156_v55 = vadd.f32 %v4155_v47, %v4136_v16  ;;  %v4639_v16 = vld [vmem:[#allocation10 + $0x128] sm:$0xff] }
 0x5ad   : > { %v3835_v30 = vld [vmem:[#allocation7 + $0xc78] sm:$0xff]  ;;  %4550 = vmatpush.msrb.mxu1 %v3771_v21  ;;  %v3996_v1 = vadd.f32 %v7113_v26, %v3976_v50  ;;  %v4603_v50 = vld [vmem:[#allocation10 + $0x8] sm:$0xff] }
 0x5ae   : > { %v3903_v33 = vld [vmem:[#allocation7 + $0xe98] sm:$0xff]  ;;  %4570 = vmatpush.msrb.mxu2 %v3835_v30 }
 0x5af   : > { %v3703_v36 = vld [vmem:[#allocation7 + $0x858] sm:$0xff]  ;;  %4589 = vmatpush.msrb.mxu3 %v3903_v33  ;;  %v4016_v58 = vadd.f32 %v7115_v6, %v3996_v1  ;;  %v4626_v6 = vld [vmem:[#allocation10 + $0xc0] sm:$0xff]  ;;  %v4635_v1 = vld [vmem:[#allocation10 + $0x108] sm:$0xff] }
 0x5b0   : > { %v3767_v42 = vld [vmem:[#allocation7 + $0xa58] sm:$0xff]  ;;  %4531 = vmatpush.msrb.mxu0 %v3703_v36  ;;  %v4607_v36 = vld [vmem:[#allocation10 + $0x28] sm:$0xff] }
 0x5b1   : > { %v3831_v43 = vld [vmem:[#allocation7 + $0xc58] sm:$0xff]  ;;  %4551 = vmatpush.msrb.mxu1 %v3767_v42  ;;  %v4036_v40 = vadd.f32 %v7119_v32, %v4016_v58  ;;  %v4623_v42 = vld [vmem:[#allocation10 + $0xa8] sm:$0xff] }
 0x5b2   : > { %v3899_v44 = vld [vmem:[#allocation7 + $0xe78] sm:$0xff]  ;;  %4571 = vmatpush.msrb.mxu2 %v3831_v43  ;;  %v4643_v43 = vld [vmem:[#allocation10 + $0x148] sm:$0xff] }
 0x5b3   : > { %v3699_v45 = vld [vmem:[#allocation7 + $0x838] sm:$0xff]  ;;  %4590 = vmatpush.msrb.mxu3 %v3899_v44  ;;  %v4056_v23 = vadd.f32 %v7117_v18, %v4036_v40  ;;  %v4235_v57 = vpop.f32.mrf.mxu1  ;;  %v4255_v44 = vpop.f32.mrf.mxu2  ;;  %v4606_v18 = vld [vmem:[#allocation10 + $0x20] sm:$0xff] }
 0x5b4   : > { %v3763_v19 = vld [vmem:[#allocation7 + $0xa38] sm:$0xff]  ;;  %4532 = vmatpush.msrb.mxu0 %v3699_v45  ;;  %v4622_v45 = vld [vmem:[#allocation10 + $0xa0] sm:$0xff] }
 0x5b5   : > { %v3827_v14 = vld [vmem:[#allocation7 + $0xc38] sm:$0xff]  ;;  %4552 = vmatpush.msrb.mxu1 %v3763_v19  ;;  %v4076_v32 = vadd.f32 %v7124_v8, %v4056_v23  ;;  %v4642_v19 = vld [vmem:[#allocation10 + $0x140] sm:$0xff]  ;;  %v4275_v8 = vpop.f32.mrf.mxu3  ;;  %v4659_v23 = vld [vmem:[#allocation10 + $0x1c8] sm:$0xff] }
 0x5b6   : > { %v3895_v56 = vld [vmem:[#allocation7 + $0xe58] sm:$0xff]  ;;  %4572 = vmatpush.msrb.mxu2 %v3827_v14 }
 0x5b7   : > { %v3695_v46 = vld [vmem:[#allocation7 + $0x818] sm:$0xff]  ;;  %4591 = vmatpush.msrb.mxu3 %v3895_v56  ;;  %v4096_v48 = vadd.f32 %v7130_v25, %v4076_v32  ;;  %v4602_v25 = vld [vmem:[#allocation10] sm:$0xff] }
 0x5b8   : > { %v3759_v49 = vld [vmem:[#allocation7 + $0xa18] sm:$0xff]  ;;  %4533 = vmatpush.msrb.mxu0 %v3695_v46 }
 0x5b9   : > { %v3823_v61 = vld [vmem:[#allocation7 + $0xc18] sm:$0xff]  ;;  %4553 = vmatpush.msrb.mxu1 %v3759_v49  ;;  %4534 = vmatmul.f32.vlgmr.msrb.gmra.mxu0 %v7085_v59  ;;  %v4176_v59 = vadd.f32 %v4175_v3, %v4156_v55  ;;  %v4663_v3 = vld [vmem:[#allocation10 + $0x1e8] sm:$0xff] }
 0x5ba   : > { %v3891_v2 = vld [vmem:[#allocation7 + $0xe38] sm:$0xff]  ;;  %4573 = vmatpush.msrb.mxu2 %v3823_v61  ;;  %4554 = vmatmul.f32.vlgmr.msrb.gmra.mxu1 %v7090_v34 }
 0x5bb   : > { %v4617_v60 = vld [vmem:[#allocation10 + $0x78] sm:$0xff]  ;;  %4592 = vmatpush.msrb.mxu3 %v3891_v2  ;;  %4574 = vmatmul.f32.vlgmr.msrb.gmra.mxu2 %v7083_v31  ;;  %v4616_v28 = vld [vmem:[#allocation10 + $0x70] sm:$0xff]  ;;  %v4614_v31 = vld [vmem:[#allocation10 + $0x60] sm:$0xff]  ;;  %v4196_v41 = vadd.f32 %v4195_v27, %v4176_v59  ;;  %v4116_v2 = vadd.f32 %v7134_v11, %v4096_v48 }
 0x5bc   : > { %v4633_v51 = vld [vmem:[#allocation10 + $0xf8] sm:$0xff]  ;;  %4670 = vmatpush.msra.mxu0 %v4617_v60  ;;  %v4632_v20 = vld [vmem:[#allocation10 + $0xf0] sm:$0xff] }
 0x5bd   : > { %v3887_v52 = vld [vmem:[#allocation7 + $0xe18] sm:$0xff]  ;;  %4690 = vmatpush.msra.mxu1 %v4633_v51  ;;  %v4216_v9 = vadd.f32 %v4215_v4, %v4196_v41  ;;  %v4619_v51 = vld [vmem:[#allocation10 + $0x88] sm:$0xff]  ;;  %v4598_v47 = vmax.f32 %v4116_v2, 0.0  ;;  %v4295_v58 = vpop.f32.mrf.mxu0 }
 0x5be   : > { %4593 = vmatpush.msrb.mxu3 %v3887_v52  ;;  %v4649_v12 = vld [vmem:[#allocation10 + $0x178] sm:$0xff]  ;;  %4671 = vmatpush.msra.mxu0 %v4616_v28  ;;  %v4648_v24 = vld [vmem:[#allocation10 + $0x170] sm:$0xff]  ;;  %v4618_v52 = vld [vmem:[#allocation10 + $0x80] sm:$0xff] }
 0x5bf   : > { %4594 = vmatmul.f32.vlgmr.msrb.gmra.mxu3 %v7087_v35  ;;  %4691 = vmatpush.msra.mxu1 %v4632_v20  ;;  %v4613_v53 = vld [vmem:[#allocation10 + $0x58] sm:$0xff]  ;;  %v4612_v26 = vld [vmem:[#allocation10 + $0x50] sm:$0xff]  ;;  %v4236_v33 = vadd.f32 %v4235_v57, %v4216_v9  ;;  %v4638_v20 = vld [vmem:[#allocation10 + $0x120] sm:$0xff] }
 0x5c0   : > { %4710 = vmatpush.msra.mxu2 %v4649_v12  ;;  %4672 = vmatpush.msra.mxu0 %v4615_v0  ;;  %v4629_v35 = vld [vmem:[#allocation10 + $0xd8] sm:$0xff]  ;;  %v4628_v63 = vld [vmem:[#allocation10 + $0xd0] sm:$0xff]  ;;  %v4634_v0 = vld [vmem:[#allocation10 + $0x100] sm:$0xff] }
 0x5c1   : > { %4692 = vmatpush.msra.mxu1 %v4631_v54  ;;  %v4645_v34 = vld [vmem:[#allocation10 + $0x158] sm:$0xff]  ;;  %v4644_v5 = vld [vmem:[#allocation10 + $0x150] sm:$0xff]  ;;  %v4256_v14 = vadd.f32 %v4255_v44, %v4236_v33  ;;  %v4658_v9 = vld [vmem:[#allocation10 + $0x1c0] sm:$0xff] }
 0x5c2   : > { %4711 = vmatpush.msra.mxu2 %v4648_v24  ;;  %4673 = vmatpush.msra.mxu0 %v4614_v31  ;;  %v4609_v15 = vld [vmem:[#allocation10 + $0x38] sm:$0xff]  ;;  %v4608_v21 = vld [vmem:[#allocation10 + $0x30] sm:$0xff]  ;;  %v4662_v24 = vld [vmem:[#allocation10 + $0x1e0] sm:$0xff]  ;;  %v4335_v27 = vpop.f32.mrf.mxu2 }
 0x5c3   : > { %4693 = vmatpush.msra.mxu1 %v4630_v13  ;;  %v4625_v17 = vld [vmem:[#allocation10 + $0xb8] sm:$0xff]  ;;  %v4624_v30 = vld [vmem:[#allocation10 + $0xb0] sm:$0xff]  ;;  %v4276_v60 = vadd.f32 %v4275_v8, %v4256_v14  ;;  %v3952_v13 = vperm.slane %v7122_v39, 2  ;;  %v4655_v57 = vld [vmem:[#allocation10 + $0x1a8] sm:$0xff] }
 0x5c4   : > { %4712 = vmatpush.msra.mxu2 %v4647_v10  ;;  %4674 = vmatpush.msra.mxu0 %v4613_v53  ;;  %v4605_v56 = vld [vmem:[#allocation10 + $0x18] sm:$0xff]  ;;  %v4604_v49 = vld [vmem:[#allocation10 + $0x10] sm:$0xff]  ;;  %v4315_v53 = vpop.f32.mrf.mxu1  ;;  %v4651_v33 = vld [vmem:[#allocation10 + $0x188] sm:$0xff] }
 0x5c5   : > { %4694 = vmatpush.msra.mxu1 %v4629_v35  ;;  %v4621_v29 = vld [vmem:[#allocation10 + $0x98] sm:$0xff]  ;;  %v4620_v7 = vld [vmem:[#allocation10 + $0x90] sm:$0xff]  ;;  %v4599_v28 = vmax.f32 %v4276_v60, 0.0  ;;  %v4296_v59 = vadd.f32 %v4295_v58, %v3952_v13 }
 0x5c6   : > { %4713 = vmatpush.msra.mxu2 %v4646_v62  ;;  %4675 = vmatpush.msra.mxu0 %v4612_v26  ;;  %v4641_v46 = vld [vmem:[#allocation10 + $0x138] sm:$0xff]  ;;  %v4640_v61 = vld [vmem:[#allocation10 + $0x130] sm:$0xff]  ;;  %v4355_v26 = vpop.f32.mrf.mxu3 }
 0x5c7   : > { %4695 = vmatpush.msra.mxu1 %v4628_v63  ;;  %v4637_v11 = vld [vmem:[#allocation10 + $0x118] sm:$0xff]  ;;  %v4636_v12 = vld [vmem:[#allocation10 + $0x110] sm:$0xff]  ;;  %v4316_v35 = vadd.f32 %v4315_v53, %v4296_v59 }
 0x5c8   : > { %4714 = vmatpush.msra.mxu2 %v4645_v34  ;;  %4676 = vmatpush.msra.mxu0 %v4611_v37  ;;  %v4665_v54 = vld [vmem:[#allocation10 + $0x1f8] sm:$0xff]  ;;  %v4664_v55 = vld [vmem:[#allocation10 + $0x1f0] sm:$0xff] }
 0x5c9   : > { %4696 = vmatpush.msra.mxu1 %v4627_v38  ;;  %4730 = vmatpush.msra.mxu3 %v4665_v54  ;;  %v4661_v31 = vld [vmem:[#allocation10 + $0x1d8] sm:$0xff]  ;;  %v4660_v10 = vld [vmem:[#allocation10 + $0x1d0] sm:$0xff]  ;;  %v4336_v62 = vadd.f32 %v4335_v27, %v4316_v35 }
 0x5ca   : > { %4715 = vmatpush.msra.mxu2 %v4644_v5  ;;  %4677 = vmatpush.msra.mxu0 %v4610_v22  ;;  %v4652_v32 = vld [vmem:[#allocation10 + $0x190] sm:$0xff]  ;;  %v4754_v54 = vld [vmem:[#allocation13 + $0x18] sm:$0xff] }
 0x5cb   : > { %4697 = vmatpush.msra.mxu1 %v4626_v6  ;;  %4731 = vmatpush.msra.mxu3 %v4664_v55  ;;  %v4356_v63 = vadd.f32 %v4355_v26, %v4336_v62  ;;  %v4753_v55 = vld [vmem:[#allocation13 + $0x10] sm:$0xff] }
 0x5cc   : > { %4678 = vmatpush.msra.mxu0 %v4609_v15  ;;  %4716 = vmatpush.msra.mxu2 %v4643_v43  ;;  %v4657_v15 = vld [vmem:[#allocation10 + $0x1b8] sm:$0xff] }
 0x5cd   : > { %4698 = vmatpush.msra.mxu1 %v4625_v17  ;;  %4732 = vmatpush.msra.mxu3 %v4663_v3  ;;  %v4656_v17 = vld [vmem:[#allocation10 + $0x1b0] sm:$0xff] }
 0x5ce   : > { %4679 = vmatpush.msra.mxu0 %v4608_v21  ;;  %4717 = vmatpush.msra.mxu2 %v4642_v19  ;;  %v4654_v21 = vld [vmem:[#allocation10 + $0x1a0] sm:$0xff]  ;;  %v4752_v3 = vld [vmem:[#allocation13 + $0x8] sm:$0xff] }
 0x5cf   : > { %4699 = vmatpush.msra.mxu1 %v4624_v30  ;;  %4733 = vmatpush.msra.mxu3 %v4662_v24  ;;  %v4653_v30 = vld [vmem:[#allocation10 + $0x198] sm:$0xff]  ;;  %v4751_v24 = vld [vmem:[#allocation13] sm:$0xff] }
 0x5d0   : > { %4680 = vmatpush.msra.mxu0 %v4607_v36  ;;  %4718 = vmatpush.msra.mxu2 %v4641_v46  ;;  %v4650_v36 = vld [vmem:[#allocation10 + $0x180] sm:$0xff] }
 0x5d1   : > { %4700 = vmatpush.msra.mxu1 %v4623_v42  ;;  %4734 = vmatpush.msra.mxu3 %v4661_v31  ;;  %v3953_v42 = vperm.slane %v7122_v39, 3  ;;  %v4765_v39 = vld [vmem:[#allocation13 + $0x70] sm:$0xff]  ;;  %v5086_v31 = vld [vmem:[#allocation11] ss:$0 sm:$0xff] }
 0x5d2   : > { %4681 = vmatpush.msra.mxu0 %v4606_v18  ;;  %4719 = vmatpush.msra.mxu2 %v4640_v61 }
 0x5d3   : > { %4701 = vmatpush.msra.mxu1 %v4622_v45  ;;  %4735 = vmatpush.msra.mxu3 %v4660_v10 }
 0x5d4   : > { %4682 = vmatpush.msra.mxu0 %v4605_v56  ;;  %4720 = vmatpush.msra.mxu2 %v4639_v16  ;;  %v4762_v16 = vld [vmem:[#allocation13 + $0x58] sm:$0xff] }
 0x5d5   : > { %4702 = vmatpush.msra.mxu1 %v4621_v29  ;;  %4736 = vmatpush.msra.mxu3 %v4659_v23 }
 0x5d6   : > { %4683 = vmatpush.msra.mxu0 %v4604_v49  ;;  %4721 = vmatpush.msra.mxu2 %v4638_v20  ;;  %v4759_v20 = vld [vmem:[#allocation13 + $0x40] sm:$0xff] }
 0x5d7   : > { %4703 = vmatpush.msra.mxu1 %v4620_v7  ;;  %4737 = vmatpush.msra.mxu3 %v4658_v9 }
 0x5d8   : > { %4684 = vmatpush.msra.mxu0 %v4603_v50  ;;  %4722 = vmatpush.msra.mxu2 %v4637_v11  ;;  %v4758_v11 = vld [vmem:[#allocation13 + $0x38] sm:$0xff] }
 0x5d9   : > { %4704 = vmatpush.msra.mxu1 %v4619_v51  ;;  %4738 = vmatpush.msra.mxu3 %v4657_v15  ;;  %v4766_v51 = vld [vmem:[#allocation13 + $0x78] sm:$0xff] }
 0x5da   : > { %4685 = vmatpush.msra.mxu0 %v4602_v25  ;;  %4723 = vmatpush.msra.mxu2 %v4636_v12  ;;  %v4764_v25 = vld [vmem:[#allocation13 + $0x68] sm:$0xff]  ;;  %v4757_v12 = vld [vmem:[#allocation13 + $0x30] sm:$0xff] }
 0x5db   : > { %4705 = vmatpush.msra.mxu1 %v4618_v52  ;;  %4686 = vmatmul.f32.vlgmr.msra.gmra.mxu0 %v4598_v47  ;;  %v4763_v52 = vld [vmem:[#allocation13 + $0x60] sm:$0xff]  ;;  %v4761_v47 = vld [vmem:[#allocation13 + $0x50] sm:$0xff] }
 0x5dc   : > { %4706 = vmatmul.f32.vlgmr.msra.gmra.mxu1 %v4599_v28  ;;  %4724 = vmatpush.msra.mxu2 %v4635_v1  ;;  %v4760_v28 = vld [vmem:[#allocation13 + $0x48] sm:$0xff] }
 0x5dd   : > { %4739 = vmatpush.msra.mxu3 %v4656_v17  ;;  %4771 = vmatpush.msrb.mxu0 %v4766_v51  ;;  %v4756_v1 = vld [vmem:[#allocation13 + $0x28] sm:$0xff] }
 0x5de   : > { %4725 = vmatpush.msra.mxu2 %v4634_v0  ;;  %v4755_v0 = vld [vmem:[#allocation13 + $0x20] sm:$0xff] }
 0x5df   : > { %4740 = vmatpush.msra.mxu3 %v4655_v57  ;;  %4772 = vmatpush.msrb.mxu0 %v4765_v39 }
 0x5e1   : > { %4741 = vmatpush.msra.mxu3 %v4654_v21  ;;  %4773 = vmatpush.msrb.mxu0 %v4764_v25 }
 0x5e3   : > { %4742 = vmatpush.msra.mxu3 %v4653_v30  ;;  %4774 = vmatpush.msrb.mxu0 %v4763_v52 }
 0x5e5   : > { %4743 = vmatpush.msra.mxu3 %v4652_v32  ;;  %4775 = vmatpush.msrb.mxu0 %v4762_v16 }
 0x5e7   : > { %4744 = vmatpush.msra.mxu3 %v4651_v33  ;;  %4776 = vmatpush.msrb.mxu0 %v4761_v47 }
 0x5e9   : > { %4745 = vmatpush.msra.mxu3 %v4650_v36  ;;  %4777 = vmatpush.msrb.mxu0 %v4760_v28 }
 0x5eb   : > { %4778 = vmatpush.msrb.mxu0 %v4759_v20 }
 0x5ec   : > { %v4375_v34 = vpop.f32.mrf.mxu0 }
 0x5ed   : > { %v4376_v40 = vadd.f32 %v4375_v34, %v4356_v63  ;;  %4779 = vmatpush.msrb.mxu0 %v4758_v11  ;;  %v5087_v63 = vld [vmem:[#allocation14] ss:$0 sm:$0xff] }
 0x5ef   : > { %4780 = vmatpush.msrb.mxu0 %v4757_v12 }
 0x5f1   : > { %4781 = vmatpush.msrb.mxu0 %v4756_v1 }
 0x5f3   : > { %v4395_v41 = vpop.f32.mrf.mxu1  ;;  %4782 = vmatpush.msrb.mxu0 %v4755_v0 }
 0x5f4   : > { %v4396_v37 = vadd.f32 %v4395_v41, %v4376_v40  ;;  %v4415_v38 = vpop.f32.mrf.mxu2 }
 0x5f5   : > { %4783 = vmatpush.msrb.mxu0 %v4754_v54 }
 0x5f6   : > { %v4416_v4 = vadd.f32 %v4415_v38, %v4396_v37 }
 0x5f7   : > { %v4435_v5 = vpop.f32.mrf.mxu3  ;;  %4784 = vmatpush.msrb.mxu0 %v4753_v55 }
 0x5f8   : > { %v4436_v22 = vadd.f32 %v4435_v5, %v4416_v4 }
 0x5f9   : > { %4785 = vmatpush.msrb.mxu0 %v4752_v3 }
 0x5fa   : > { %v4600_v6 = vmax.f32 %v4436_v22, 0.0 }
 0x5fb   : > { %4786 = vmatpush.msrb.mxu0 %v4751_v24 }
 0x5fc   : > { %4726 = vmatmul.f32.vlgmr.msra.gmra.mxu2 %v4600_v6 }
 0x627   : > { %v4455_v43 = vpop.f32.mrf.mxu0 }
 0x628   : > { %v4456_v44 = vadd.f32 %v4455_v43, %v3953_v42  ;;  %v4475_v18 = vpop.f32.mrf.mxu1 }
 0x62a   : > { %v4476_v45 = vadd.f32 %v4475_v18, %v4456_v44 }
 0x62c   : > { %v4495_v19 = vpop.f32.mrf.mxu2 }
 0x62d   : > { %v4496_v48 = vadd.f32 %v4495_v19, %v4476_v45 }
 0x62f   : > { %v4515_v14 = vpop.f32.mrf.mxu3 }
 0x630   : > { %v4516_v56 = vadd.f32 %v4515_v14, %v4496_v48 }
 0x636   : > { %v4535_v29 = vpop.f32.mrf.mxu0 }
 0x637   : > { %v4536_v8 = vadd.f32 %v4535_v29, %v4516_v56  ;;  %v4555_v46 = vpop.f32.mrf.mxu1 }
 0x639   : > { %v4556_v49 = vadd.f32 %v4555_v46, %v4536_v8 }
 0x63e   : > { %v4575_v7 = vpop.f32.mrf.mxu2 }
 0x63f   : > { %v4576_v61 = vadd.f32 %v4575_v7, %v4556_v49 }
 0x642   : > { %v4595_v2 = vpop.f32.mrf.mxu3 }
 0x643   : > { %v4596_v60 = vadd.f32 %v4595_v2, %v4576_v61 }
 0x645   : > { %v4601_v50 = vmax.f32 %v4596_v60, 0.0 }
 0x647   : > { %4746 = vmatmul.f32.vlgmr.msra.gmra.mxu3 %v4601_v50 }
 0x658   : > { %v4687_v13 = vpop.f32.mrf.mxu0 }
 0x659   : > { %v4688_v10 = vadd.f32 %v5086_v31, %v4687_v13  ;;  %v4707_v58 = vpop.f32.mrf.mxu1 }
 0x65b   : > { %v4708_v53 = vadd.f32 %v4707_v58, %v4688_v10 }
 0x67f   : > { %v4727_v59 = vpop.f32.mrf.mxu2 }
 0x680   : > { %v4728_v35 = vadd.f32 %v4727_v59, %v4708_v53 }
 0x6ca   : > { %v4747_v27 = vpop.f32.mrf.mxu3 }
 0x6cb   : > { %v4748_v62 = vadd.f32 %v4747_v27, %v4728_v35 }
 0x6cd   : > { %v4750_v26 = vmax.f32 %v4748_v62, 0.0 }
 0x6cf   : > { %4787 = vmatmul.f32.vlgmr.msrb.gmra.mxu0 %v4750_v26 }
 0x74c   : > { %v4788_v34 = vpop.f32.mrf.mxu0 }
 0x74d   : > { %v4789_v40 = vadd.f32 %v5087_v63, %v4788_v34 }
 0x74f   : > { %4791 = vst [vmem:[%s7174_s9] sm:$0xff] %v4789_v40 }
 0x750 PF: > { %p23_p3 = scmp.ge.s32.totalorder %s5518_s25, 6   ;;  %s7181_s30 = smov %s5370_s10 }
 0x751   : > { %s7182_s10 = smov %s5374_s11  ;;  %s7183_s11 = smov %s5529_s18 }
 0x752   : > { %s7184_s12 = smov %s5518_s25  ;;  %25 = sbr.rel (!%p23_p3) target bundleno = 9 (0x9), region = 131 }
 0x757   :  { %4803 = vsyncpa [#allocation4], 1 }
 0x758   :  { %4805 = vsyncpa [#allocation4 + $0x1], 1 }
 0x759   :  { %4806 = vsyncpa [#allocation6], 1 }
 0x75a   :  { %4807 = vsyncpa [#allocation9], 1 }
 0x75b   :  { %4808 = vsyncpa [#allocation12], 1 }
 0x75c   :  { %4809 = vsyncpa [#allocation15], 1 }

</bundles_post_ra>
